<compile_context>
chip_gen: v5e
topology: v5e:2x2
jax: 0.10.0
libtpu: 0.0.40
codegen_flags: <defaults>
</compile_context>

<pallas_src>
import functools

import jax
import jax.numpy as jnp
import numpy as np
from jax.experimental import pallas as pl
from jax.experimental.pallas import tpu as pltpu

EPS = 1e-5


# ----------------------------- Pallas kernel --------------------------------
def shared_block_kernel(x_ref, wm_ref, g_ref, b_ref, o_ref, *, H, W, C,
                        n_blocks):
    NH, WC = x_ref.shape          # (N*H, W*C)  -- lane-dense layout
    M = NH * W                    # N*H*W samples per channel for BN stats
    inv_m = 1.0 / M

    t = x_ref[...].astype(jnp.float32)

    # Row masks for vertical reflection (also correct at batch boundaries,
    # since every image occupies H consecutive rows).  Constants, built once.
    row = jax.lax.broadcasted_iota(jnp.int32, (NH, WC), 0)
    h_in_img = row % H
    top = h_in_img == 0
    bot = h_in_img == (H - 1)

    # Channel-group fold matrix: fold[l, l2] = 1 iff l % C == l2 % C.
    # dot(s, fold) sums the W lane-groups per channel; the result is already
    # tiled across all WC lanes -> no narrow shapes / reshapes in the kernel.
    lane_i = jax.lax.broadcasted_iota(jnp.int32, (WC, WC), 0) % C
    lane_j = jax.lax.broadcasted_iota(jnp.int32, (WC, WC), 1) % C
    fold = (lane_i == lane_j).astype(jnp.float32)

    def conv3x3(v, blk, j):
        # Vertical neighbours via sublane rotation (XLU slot) + reflection fix.
        above = pltpu.roll(v, 1, 0)         # row r-1 (wraps; fixed below)
        below = pltpu.roll(v, NH - 1, 0)    # row r+1 (wraps; fixed below)
        up = jnp.where(top, below, above)   # ReflectionPad: row -1 -> row 1
        dn = jnp.where(bot, above, below)   # ReflectionPad: row H -> row H-2
        # Horizontal taps + column reflection are folded into the (WC, WC)
        # weight matrices -> K=128 MXU matmuls instead of 9 tiny K=C ones.
        acc = jnp.dot(up, wm_ref[blk, j, 0], preferred_element_type=jnp.float32)
        acc = acc + jnp.dot(v, wm_ref[blk, j, 1],
                            preferred_element_type=jnp.float32)
        acc = acc + jnp.dot(dn, wm_ref[blk, j, 2],
                            preferred_element_type=jnp.float32)
        return acc

    def batchnorm(v, blk, j, relu):
        # Train-mode BatchNorm2d (biased variance), one-pass sum / sum-of-sq,
        # fused to a single y = v * scale + bias.
        # Sublane-reduce first (XLU), then fold lane-groups with a tiny
        # (1, WC) x (WC, WC) MXU matmul.
        sum_l = jnp.sum(v, axis=0, keepdims=True)                  # (1, WC)
        sq_l = jnp.sum(v * v, axis=0, keepdims=True)               # (1, WC)
        mean_l = jnp.dot(sum_l, fold,
                         preferred_element_type=jnp.float32) * inv_m
        ex2_l = jnp.dot(sq_l, fold,
                        preferred_element_type=jnp.float32) * inv_m
        var_l = jnp.maximum(ex2_l - mean_l * mean_l, 0.0)
        scale_l = g_ref[blk, j] * jax.lax.rsqrt(var_l + EPS)       # (1, WC)
        bias_l = b_ref[blk, j] - mean_l * scale_l
        y = v * scale_l + bias_l
        if relu:
            y = jnp.maximum(y, 0.0)
        return y

    for blk in range(n_blocks):                 # fully fused residual chain
        hid = batchnorm(conv3x3(t, blk, 0), blk, 0, relu=True)
        hid = batchnorm(conv3x3(hid, blk, 1), blk, 1, relu=False)
        t = t + hid
    o_ref[...] = t.astype(o_ref.dtype)          # lane-dense (NH, WC) store


# ------------------------- wrapper / weight plumbing -------------------------
def _conv_weight_matrices(w_hwio, Wd, C):
    """(3,3,Cin,Cout) HWIO conv weight -> (3, Wd*C, Wd*C) matrices.

    Output mats[dy][ws*C+ci, w*C+co] = sum over dx of w[dy, dx, ci, co] where
    ws == reflect(w + dx - 1); i.e. horizontal taps + ReflectionPad2d(1)
    column handling are baked into a block-structured matrix.
    """
    cols = jnp.arange(Wd)
    sel = []
    for dxi in range(3):
        src = cols + (dxi - 1)
        src = jnp.where(src < 0, 1, src)              # col -1 -> col 1
        src = jnp.where(src > Wd - 1, Wd - 2, src)    # col W  -> col W-2
        sel.append(jax.nn.one_hot(src, Wd, dtype=jnp.float32))  # [d, s]
    S = jnp.stack(sel, axis=0)                        # (3, d, s)
    wm = jnp.einsum('xds,yxio->ysido', S, w_hwio)     # (3, s, ci, d, co)
    return wm.reshape(3, Wd * C, Wd * C)


def _prepare_params(params, Wd, C):
    wms, gs, bs = [], [], []
    for (w1, g1, b1, w2, g2, b2) in params:
        wms.append(jnp.stack([_conv_weight_matrices(w1, Wd, C),
                              _conv_weight_matrices(w2, Wd, C)], axis=0))
        gs.append(jnp.stack([jnp.tile(g1.reshape(1, C), (1, Wd)),
                             jnp.tile(g2.reshape(1, C), (1, Wd))], axis=0))
        bs.append(jnp.stack([jnp.tile(b1.reshape(1, C), (1, Wd)),
                             jnp.tile(b2.reshape(1, C), (1, Wd))], axis=0))
    # (nb, 2, 3, WC, WC), (nb, 2, 1, WC), (nb, 2, 1, WC)
    return jnp.stack(wms), jnp.stack(gs), jnp.stack(bs)


@jax.jit
def shared_block(x, params):
    """x: (N, H, W, C) NHWC; params: list of (w1, g1, b1, w2, g2, b2)."""
    N, H, Wd, C = x.shape
    n_blocks = len(params)
    NH, WC = N * H, Wd * C
    wms, gs, bs = _prepare_params(params, Wd, C)
    x2 = x.reshape(NH, WC)                    # lane-dense slab for the kernel
    kernel = functools.partial(shared_block_kernel, H=H, W=Wd, C=C,
                               n_blocks=n_blocks)
    vmem = pl.BlockSpec(memory_space=pltpu.MemorySpace.VMEM)
    out2 = pl.pallas_call(
        kernel,
        out_shape=jax.ShapeDtypeStruct((NH, WC), x.dtype),
        in_specs=[vmem, vmem, vmem, vmem],
        out_specs=vmem,
    )(x2, wms, gs, bs)
    return out2.reshape(N, H, Wd, C)


# ------------------------------ pure-JAX reference ---------------------------
def _bn_ref(t, gamma, beta):
    mean = jnp.mean(t, axis=(0, 1, 2), keepdims=True)
    var = jnp.mean((t - mean) ** 2, axis=(0, 1, 2), keepdims=True)
    return gamma.reshape(1, 1, 1, -1) * (t - mean) * jax.lax.rsqrt(var + EPS) \
        + beta.reshape(1, 1, 1, -1)


def _conv_ref(t, w):
    tp = jnp.pad(t, ((0, 0), (1, 1), (1, 1), (0, 0)), mode="reflect")
    return jax.lax.conv_general_dilated(
        tp, w, window_strides=(1, 1), padding="VALID",
        dimension_numbers=("NHWC", "HWIO", "NHWC"))


def shared_block_ref(x, all_params):
    for (w1, g1, b1, w2, g2, b2) in all_params:
        h = jnp.maximum(_bn_ref(_conv_ref(x, w1), g1, b1), 0.0)
        h = _bn_ref(_conv_ref(h, w2), g2, b2)
        x = x + h
    return x


# --------------------------- parameter init (weights_init) -------------------
def init_params(key, dim, n_blocks):
    params = []
    for _ in range(n_blocks):
        key, k1, k2, k3, k4 = jax.random.split(key, 5)
        w1 = 0.02 * jax.random.normal(k1, (3, 3, dim, dim), jnp.float32)
        w2 = 0.02 * jax.random.normal(k2, (3, 3, dim, dim), jnp.float32)
        g1 = 1.0 + 0.02 * jax.random.normal(k3, (dim,), jnp.float32)
        g2 = 1.0 + 0.02 * jax.random.normal(k4, (dim,), jnp.float32)
        b1 = jnp.zeros((dim,), jnp.float32)
        b2 = jnp.zeros((dim,), jnp.float32)
        params.append((w1, g1, b1, w2, g2, b2))
    return params


if __name__ == "__main__":
    key = jax.random.PRNGKey(0)
    N, H, W, dim = 2, 16, 16, 8     # N*H = 32 rows, W*dim = 128 lanes
    n_blocks = 6

    key, kx = jax.random.split(key)
    x = jax.random.normal(kx, (N, H, W, dim), jnp.float32)   # NHWC
    params = init_params(key, dim, n_blocks)

    out = jax.block_until_ready(shared_block(x, params))
    ref = jax.block_until_ready(shared_block_ref(x, params))

    np.testing.assert_allclose(np.asarray(out), np.asarray(ref),
                               rtol=5e-4, atol=5e-4)
    print("KERNEL_OK")
</pallas_src>

<mosaic_0001>
module attributes {stable_mosaic.version = 11 : i64} {
  func.func @shared_block_kernel(%arg0: memref<32x128xf32, #tpu.memory_space<vmem>>, %arg1: memref<6x2x3x128x128xf32, #tpu.memory_space<vmem>>, %arg2: memref<6x2x1x128xf32, #tpu.memory_space<vmem>>, %arg3: memref<6x2x1x128xf32, #tpu.memory_space<vmem>>, %arg4: memref<32x128xf32, #tpu.memory_space<vmem>>) attributes {dimension_semantics = [], scalar_prefetch = 0 : i64, scratch_operands = 0 : i64, tpu.core_type = #tpu.core_type<tc>} {
    %c0 = arith.constant 0 : index
    %c0_0 = arith.constant 0 : index
    %0 = vector.load %arg0[%c0, %c0_0] : memref<32x128xf32, #tpu.memory_space<vmem>>, vector<32x128xf32>
    %1 = tpu.iota {dimensions = array<i32: 0>} : vector<32x128xi32>
    %c16_i32 = arith.constant 16 : i32
    %c0_i32 = arith.constant 0 : i32
    %2 = arith.cmpi eq, %c16_i32, %c0_i32 : i32
    %c1_i32 = arith.constant 1 : i32
    %3 = arith.select %2, %c1_i32, %c16_i32 : i32
    %4 = vector.broadcast %3 : i32 to vector<32x128xi32>
    %5 = arith.remsi %1, %4 : vector<32x128xi32>
    %c0_i32_1 = arith.constant 0 : i32
    %6 = vector.broadcast %c0_i32_1 : i32 to vector<32x128xi32>
    %7 = arith.cmpi ne, %5, %6 : vector<32x128xi32>
    %c0_i32_2 = arith.constant 0 : i32
    %8 = vector.broadcast %c0_i32_2 : i32 to vector<32x128xi32>
    %9 = arith.cmpi slt, %5, %8 : vector<32x128xi32>
    %c0_i32_3 = arith.constant 0 : i32
    %10 = arith.cmpi slt, %3, %c0_i32_3 : i32
    %11 = vector.broadcast %10 : i1 to vector<32x128xi1>
    %12 = vector.broadcast %11 : vector<32x128xi1> to vector<32x128xi1>
    %13 = arith.xori %9, %12 : vector<32x128xi1>
    %14 = arith.andi %13, %7 : vector<32x128xi1>
    %15 = vector.broadcast %3 : i32 to vector<32x128xi32>
    %16 = arith.addi %5, %15 : vector<32x128xi32>
    %17 = arith.select %14, %16, %5 : vector<32x128xi1>, vector<32x128xi32>
    %c0_i32_4 = arith.constant 0 : i32
    %18 = vector.broadcast %c0_i32_4 : i32 to vector<32x128xi32>
    %19 = arith.cmpi eq, %17, %18 : vector<32x128xi32>
    %c15_i32 = arith.constant 15 : i32
    %20 = vector.broadcast %c15_i32 : i32 to vector<32x128xi32>
    %21 = arith.cmpi eq, %17, %20 : vector<32x128xi32>
    %22 = tpu.iota {dimensions = array<i32: 0>} : vector<128x128xi32>
    %c8_i32 = arith.constant 8 : i32
    %c0_i32_5 = arith.constant 0 : i32
    %23 = arith.cmpi eq, %c8_i32, %c0_i32_5 : i32
    %c1_i32_6 = arith.constant 1 : i32
    %24 = arith.select %23, %c1_i32_6, %c8_i32 : i32
    %25 = vector.broadcast %24 : i32 to vector<128x128xi32>
    %26 = arith.remsi %22, %25 : vector<128x128xi32>
    %c0_i32_7 = arith.constant 0 : i32
    %27 = vector.broadcast %c0_i32_7 : i32 to vector<128x128xi32>
    %28 = arith.cmpi ne, %26, %27 : vector<128x128xi32>
    %c0_i32_8 = arith.constant 0 : i32
    %29 = vector.broadcast %c0_i32_8 : i32 to vector<128x128xi32>
    %30 = arith.cmpi slt, %26, %29 : vector<128x128xi32>
    %c0_i32_9 = arith.constant 0 : i32
    %31 = arith.cmpi slt, %24, %c0_i32_9 : i32
    %32 = vector.broadcast %31 : i1 to vector<128x128xi1>
    %33 = vector.broadcast %32 : vector<128x128xi1> to vector<128x128xi1>
    %34 = arith.xori %30, %33 : vector<128x128xi1>
    %35 = arith.andi %34, %28 : vector<128x128xi1>
    %36 = vector.broadcast %24 : i32 to vector<128x128xi32>
    %37 = arith.addi %26, %36 : vector<128x128xi32>
    %38 = arith.select %35, %37, %26 : vector<128x128xi1>, vector<128x128xi32>
    %39 = tpu.iota {dimensions = array<i32: 1>} : vector<128x128xi32>
    %c8_i32_10 = arith.constant 8 : i32
    %c0_i32_11 = arith.constant 0 : i32
    %40 = arith.cmpi eq, %c8_i32_10, %c0_i32_11 : i32
    %c1_i32_12 = arith.constant 1 : i32
    %41 = arith.select %40, %c1_i32_12, %c8_i32_10 : i32
    %42 = vector.broadcast %41 : i32 to vector<128x128xi32>
    %43 = arith.remsi %39, %42 : vector<128x128xi32>
    %c0_i32_13 = arith.constant 0 : i32
    %44 = vector.broadcast %c0_i32_13 : i32 to vector<128x128xi32>
    %45 = arith.cmpi ne, %43, %44 : vector<128x128xi32>
    %c0_i32_14 = arith.constant 0 : i32
    %46 = vector.broadcast %c0_i32_14 : i32 to vector<128x128xi32>
    %47 = arith.cmpi slt, %43, %46 : vector<128x128xi32>
    %c0_i32_15 = arith.constant 0 : i32
    %48 = arith.cmpi slt, %41, %c0_i32_15 : i32
    %49 = vector.broadcast %48 : i1 to vector<128x128xi1>
    %50 = vector.broadcast %49 : vector<128x128xi1> to vector<128x128xi1>
    %51 = arith.xori %47, %50 : vector<128x128xi1>
    %52 = arith.andi %51, %45 : vector<128x128xi1>
    %53 = vector.broadcast %41 : i32 to vector<128x128xi32>
    %54 = arith.addi %43, %53 : vector<128x128xi32>
    %55 = arith.select %52, %54, %43 : vector<128x128xi1>, vector<128x128xi32>
    %56 = arith.cmpi eq, %38, %55 : vector<128x128xi32>
    %57 = arith.extui %56 : vector<128x128xi1> to vector<128x128xi32>
    %58 = arith.sitofp %57 : vector<128x128xi32> to vector<128x128xf32>
    %c1_i32_16 = arith.constant 1 : i32
    %59 = tpu.dynamic_rotate %0 by %c1_i32_16 dim 0 : vector<32x128xf32>, i32 -> vector<32x128xf32>
    %c31_i32 = arith.constant 31 : i32
    %60 = tpu.dynamic_rotate %0 by %c31_i32 dim 0 : vector<32x128xf32>, i32 -> vector<32x128xf32>
    %61 = arith.select %19, %60, %59 : vector<32x128xi1>, vector<32x128xf32>
    %62 = arith.select %21, %59, %60 : vector<32x128xi1>, vector<32x128xf32>
    %c0_17 = arith.constant 0 : index
    %c0_18 = arith.constant 0 : index
    %c0_19 = arith.constant 0 : index
    %c0_20 = arith.constant 0 : index
    %c0_21 = arith.constant 0 : index
    %63 = vector.load %arg1[%c0_17, %c0_18, %c0_19, %c0_20, %c0_21] : memref<6x2x3x128x128xf32, #tpu.memory_space<vmem>>, vector<1x1x1x128x128xf32>
    %64 = vector.shape_cast %63 : vector<1x1x1x128x128xf32> to vector<128x128xf32>
    %cst = arith.constant dense<0.000000e+00> : vector<32x128xf32>
    %65 = tpu.matmul %61, %64, %cst {dimension_numbers = #tpu.dot_dimension_numbers<[1], [0], [0], [1], [0, 0, 1, 1], [], []>} : vector<32x128xf32>, vector<128x128xf32>, vector<32x128xf32> -> vector<32x128xf32>
    %c0_22 = arith.constant 0 : index
    %c0_23 = arith.constant 0 : index
    %c1 = arith.constant 1 : index
    %c0_24 = arith.constant 0 : index
    %c0_25 = arith.constant 0 : index
    %66 = vector.load %arg1[%c0_22, %c0_23, %c1, %c0_24, %c0_25] : memref<6x2x3x128x128xf32, #tpu.memory_space<vmem>>, vector<1x1x1x128x128xf32>
    %67 = vector.shape_cast %66 : vector<1x1x1x128x128xf32> to vector<128x128xf32>
    %cst_26 = arith.constant dense<0.000000e+00> : vector<32x128xf32>
    %68 = tpu.matmul %0, %67, %cst_26 {dimension_numbers = #tpu.dot_dimension_numbers<[1], [0], [0], [1], [0, 0, 1, 1], [], []>} : vector<32x128xf32>, vector<128x128xf32>, vector<32x128xf32> -> vector<32x128xf32>
    %69 = arith.addf %65, %68 : vector<32x128xf32>
    %c0_27 = arith.constant 0 : index
    %c0_28 = arith.constant 0 : index
    %c2 = arith.constant 2 : index
    %c0_29 = arith.constant 0 : index
    %c0_30 = arith.constant 0 : index
    %70 = vector.load %arg1[%c0_27, %c0_28, %c2, %c0_29, %c0_30] : memref<6x2x3x128x128xf32, #tpu.memory_space<vmem>>, vector<1x1x1x128x128xf32>
    %71 = vector.shape_cast %70 : vector<1x1x1x128x128xf32> to vector<128x128xf32>
    %cst_31 = arith.constant dense<0.000000e+00> : vector<32x128xf32>
    %72 = tpu.matmul %62, %71, %cst_31 {dimension_numbers = #tpu.dot_dimension_numbers<[1], [0], [0], [1], [0, 0, 1, 1], [], []>} : vector<32x128xf32>, vector<128x128xf32>, vector<32x128xf32> -> vector<32x128xf32>
    %73 = arith.addf %69, %72 : vector<32x128xf32>
    %cst_32 = arith.constant dense<0.000000e+00> : vector<128xf32>
    %74 = vector.multi_reduction <add>, %73, %cst_32 [0] : vector<32x128xf32> to vector<128xf32>
    %75 = vector.shape_cast %74 : vector<128xf32> to vector<1x128xf32>
    %76 = arith.mulf %73, %73 : vector<32x128xf32>
    %cst_33 = arith.constant dense<0.000000e+00> : vector<128xf32>
    %77 = vector.multi_reduction <add>, %76, %cst_33 [0] : vector<32x128xf32> to vector<128xf32>
    %78 = vector.shape_cast %77 : vector<128xf32> to vector<1x128xf32>
    %cst_34 = arith.constant dense<0.000000e+00> : vector<1x128xf32>
    %79 = tpu.matmul %75, %58, %cst_34 {dimension_numbers = #tpu.dot_dimension_numbers<[1], [0], [0], [1], [0, 0, 1, 1], [], []>} : vector<1x128xf32>, vector<128x128xf32>, vector<1x128xf32> -> vector<1x128xf32>
    %cst_35 = arith.constant 0.001953125 : f32
    %80 = vector.broadcast %cst_35 : f32 to vector<1x128xf32>
    %81 = arith.mulf %79, %80 : vector<1x128xf32>
    %cst_36 = arith.constant dense<0.000000e+00> : vector<1x128xf32>
    %82 = tpu.matmul %78, %58, %cst_36 {dimension_numbers = #tpu.dot_dimension_numbers<[1], [0], [0], [1], [0, 0, 1, 1], [], []>} : vector<1x128xf32>, vector<128x128xf32>, vector<1x128xf32> -> vector<1x128xf32>
    %cst_37 = arith.constant 0.001953125 : f32
    %83 = vector.broadcast %cst_37 : f32 to vector<1x128xf32>
    %84 = arith.mulf %82, %83 : vector<1x128xf32>
    %85 = arith.mulf %81, %81 : vector<1x128xf32>
    %86 = arith.subf %84, %85 : vector<1x128xf32>
    %cst_38 = arith.constant 0.000000e+00 : f32
    %87 = vector.broadcast %cst_38 : f32 to vector<1x128xf32>
    %88 = arith.maximumf %86, %87 : vector<1x128xf32>
    %c0_39 = arith.constant 0 : index
    %c0_40 = arith.constant 0 : index
    %c0_41 = arith.constant 0 : index
    %c0_42 = arith.constant 0 : index
    %89 = vector.load %arg2[%c0_39, %c0_40, %c0_41, %c0_42] : memref<6x2x1x128xf32, #tpu.memory_space<vmem>>, vector<1x1x1x128xf32>
    %90 = vector.shape_cast %89 : vector<1x1x1x128xf32> to vector<1x128xf32>
    %cst_43 = arith.constant 9.99999974E-6 : f32
    %91 = vector.broadcast %cst_43 : f32 to vector<1x128xf32>
    %92 = arith.addf %88, %91 : vector<1x128xf32>
    %93 = math.rsqrt %92 : vector<1x128xf32>
    %94 = arith.mulf %90, %93 : vector<1x128xf32>
    %c0_44 = arith.constant 0 : index
    %c0_45 = arith.constant 0 : index
    %c0_46 = arith.constant 0 : index
    %c0_47 = arith.constant 0 : index
    %95 = vector.load %arg3[%c0_44, %c0_45, %c0_46, %c0_47] : memref<6x2x1x128xf32, #tpu.memory_space<vmem>>, vector<1x1x1x128xf32>
    %96 = vector.shape_cast %95 : vector<1x1x1x128xf32> to vector<1x128xf32>
    %97 = arith.mulf %81, %94 : vector<1x128xf32>
    %98 = arith.subf %96, %97 : vector<1x128xf32>
    %99 = vector.broadcast %94 : vector<1x128xf32> to vector<32x128xf32>
    %100 = arith.mulf %73, %99 : vector<32x128xf32>
    %101 = vector.broadcast %98 : vector<1x128xf32> to vector<32x128xf32>
    %102 = arith.addf %100, %101 : vector<32x128xf32>
    %cst_48 = arith.constant 0.000000e+00 : f32
    %103 = vector.broadcast %cst_48 : f32 to vector<32x128xf32>
    %104 = arith.maximumf %102, %103 : vector<32x128xf32>
    %c1_i32_49 = arith.constant 1 : i32
    %105 = tpu.dynamic_rotate %104 by %c1_i32_49 dim 0 : vector<32x128xf32>, i32 -> vector<32x128xf32>
    %c31_i32_50 = arith.constant 31 : i32
    %106 = tpu.dynamic_rotate %104 by %c31_i32_50 dim 0 : vector<32x128xf32>, i32 -> vector<32x128xf32>
    %107 = arith.select %19, %106, %105 : vector<32x128xi1>, vector<32x128xf32>
    %108 = arith.select %21, %105, %106 : vector<32x128xi1>, vector<32x128xf32>
    %c0_51 = arith.constant 0 : index
    %c1_52 = arith.constant 1 : index
    %c0_53 = arith.constant 0 : index
    %c0_54 = arith.constant 0 : index
    %c0_55 = arith.constant 0 : index
    %109 = vector.load %arg1[%c0_51, %c1_52, %c0_53, %c0_54, %c0_55] : memref<6x2x3x128x128xf32, #tpu.memory_space<vmem>>, vector<1x1x1x128x128xf32>
    %110 = vector.shape_cast %109 : vector<1x1x1x128x128xf32> to vector<128x128xf32>
    %cst_56 = arith.constant dense<0.000000e+00> : vector<32x128xf32>
    %111 = tpu.matmul %107, %110, %cst_56 {dimension_numbers = #tpu.dot_dimension_numbers<[1], [0], [0], [1], [0, 0, 1, 1], [], []>} : vector<32x128xf32>, vector<128x128xf32>, vector<32x128xf32> -> vector<32x128xf32>
    %c0_57 = arith.constant 0 : index
    %c1_58 = arith.constant 1 : index
    %c1_59 = arith.constant 1 : index
    %c0_60 = arith.constant 0 : index
    %c0_61 = arith.constant 0 : index
    %112 = vector.load %arg1[%c0_57, %c1_58, %c1_59, %c0_60, %c0_61] : memref<6x2x3x128x128xf32, #tpu.memory_space<vmem>>, vector<1x1x1x128x128xf32>
    %113 = vector.shape_cast %112 : vector<1x1x1x128x128xf32> to vector<128x128xf32>
    %cst_62 = arith.constant dense<0.000000e+00> : vector<32x128xf32>
    %114 = tpu.matmul %104, %113, %cst_62 {dimension_numbers = #tpu.dot_dimension_numbers<[1], [0], [0], [1], [0, 0, 1, 1], [], []>} : vector<32x128xf32>, vector<128x128xf32>, vector<32x128xf32> -> vector<32x128xf32>
    %115 = arith.addf %111, %114 : vector<32x128xf32>
    %c0_63 = arith.constant 0 : index
    %c1_64 = arith.constant 1 : index
    %c2_65 = arith.constant 2 : index
    %c0_66 = arith.constant 0 : index
    %c0_67 = arith.constant 0 : index
    %116 = vector.load %arg1[%c0_63, %c1_64, %c2_65, %c0_66, %c0_67] : memref<6x2x3x128x128xf32, #tpu.memory_space<vmem>>, vector<1x1x1x128x128xf32>
    %117 = vector.shape_cast %116 : vector<1x1x1x128x128xf32> to vector<128x128xf32>
    %cst_68 = arith.constant dense<0.000000e+00> : vector<32x128xf32>
    %118 = tpu.matmul %108, %117, %cst_68 {dimension_numbers = #tpu.dot_dimension_numbers<[1], [0], [0], [1], [0, 0, 1, 1], [], []>} : vector<32x128xf32>, vector<128x128xf32>, vector<32x128xf32> -> vector<32x128xf32>
    %119 = arith.addf %115, %118 : vector<32x128xf32>
    %cst_69 = arith.constant dense<0.000000e+00> : vector<128xf32>
    %120 = vector.multi_reduction <add>, %119, %cst_69 [0] : vector<32x128xf32> to vector<128xf32>
    %121 = vector.shape_cast %120 : vector<128xf32> to vector<1x128xf32>
    %122 = arith.mulf %119, %119 : vector<32x128xf32>
    %cst_70 = arith.constant dense<0.000000e+00> : vector<128xf32>
    %123 = vector.multi_reduction <add>, %122, %cst_70 [0] : vector<32x128xf32> to vector<128xf32>
    %124 = vector.shape_cast %123 : vector<128xf32> to vector<1x128xf32>
    %cst_71 = arith.constant dense<0.000000e+00> : vector<1x128xf32>
    %125 = tpu.matmul %121, %58, %cst_71 {dimension_numbers = #tpu.dot_dimension_numbers<[1], [0], [0], [1], [0, 0, 1, 1], [], []>} : vector<1x128xf32>, vector<128x128xf32>, vector<1x128xf32> -> vector<1x128xf32>
    %cst_72 = arith.constant 0.001953125 : f32
    %126 = vector.broadcast %cst_72 : f32 to vector<1x128xf32>
    %127 = arith.mulf %125, %126 : vector<1x128xf32>
    %cst_73 = arith.constant dense<0.000000e+00> : vector<1x128xf32>
    %128 = tpu.matmul %124, %58, %cst_73 {dimension_numbers = #tpu.dot_dimension_numbers<[1], [0], [0], [1], [0, 0, 1, 1], [], []>} : vector<1x128xf32>, vector<128x128xf32>, vector<1x128xf32> -> vector<1x128xf32>
    %cst_74 = arith.constant 0.001953125 : f32
    %129 = vector.broadcast %cst_74 : f32 to vector<1x128xf32>
    %130 = arith.mulf %128, %129 : vector<1x128xf32>
    %131 = arith.mulf %127, %127 : vector<1x128xf32>
    %132 = arith.subf %130, %131 : vector<1x128xf32>
    %cst_75 = arith.constant 0.000000e+00 : f32
    %133 = vector.broadcast %cst_75 : f32 to vector<1x128xf32>
    %134 = arith.maximumf %132, %133 : vector<1x128xf32>
    %c0_76 = arith.constant 0 : index
    %c1_77 = arith.constant 1 : index
    %c0_78 = arith.constant 0 : index
    %c0_79 = arith.constant 0 : index
    %135 = vector.load %arg2[%c0_76, %c1_77, %c0_78, %c0_79] : memref<6x2x1x128xf32, #tpu.memory_space<vmem>>, vector<1x1x1x128xf32>
    %136 = vector.shape_cast %135 : vector<1x1x1x128xf32> to vector<1x128xf32>
    %cst_80 = arith.constant 9.99999974E-6 : f32
    %137 = vector.broadcast %cst_80 : f32 to vector<1x128xf32>
    %138 = arith.addf %134, %137 : vector<1x128xf32>
    %139 = math.rsqrt %138 : vector<1x128xf32>
    %140 = arith.mulf %136, %139 : vector<1x128xf32>
    %c0_81 = arith.constant 0 : index
    %c1_82 = arith.constant 1 : index
    %c0_83 = arith.constant 0 : index
    %c0_84 = arith.constant 0 : index
    %141 = vector.load %arg3[%c0_81, %c1_82, %c0_83, %c0_84] : memref<6x2x1x128xf32, #tpu.memory_space<vmem>>, vector<1x1x1x128xf32>
    %142 = vector.shape_cast %141 : vector<1x1x1x128xf32> to vector<1x128xf32>
    %143 = arith.mulf %127, %140 : vector<1x128xf32>
    %144 = arith.subf %142, %143 : vector<1x128xf32>
    %145 = vector.broadcast %140 : vector<1x128xf32> to vector<32x128xf32>
    %146 = arith.mulf %119, %145 : vector<32x128xf32>
    %147 = vector.broadcast %144 : vector<1x128xf32> to vector<32x128xf32>
    %148 = arith.addf %146, %147 : vector<32x128xf32>
    %149 = arith.addf %0, %148 : vector<32x128xf32>
    %c1_i32_85 = arith.constant 1 : i32
    %150 = tpu.dynamic_rotate %149 by %c1_i32_85 dim 0 : vector<32x128xf32>, i32 -> vector<32x128xf32>
    %c31_i32_86 = arith.constant 31 : i32
    %151 = tpu.dynamic_rotate %149 by %c31_i32_86 dim 0 : vector<32x128xf32>, i32 -> vector<32x128xf32>
    %152 = arith.select %19, %151, %150 : vector<32x128xi1>, vector<32x128xf32>
    %153 = arith.select %21, %150, %151 : vector<32x128xi1>, vector<32x128xf32>
    %c1_87 = arith.constant 1 : index
    %c0_88 = arith.constant 0 : index
    %c0_89 = arith.constant 0 : index
    %c0_90 = arith.constant 0 : index
    %c0_91 = arith.constant 0 : index
    %154 = vector.load %arg1[%c1_87, %c0_88, %c0_89, %c0_90, %c0_91] : memref<6x2x3x128x128xf32, #tpu.memory_space<vmem>>, vector<1x1x1x128x128xf32>
    %155 = vector.shape_cast %154 : vector<1x1x1x128x128xf32> to vector<128x128xf32>
    %cst_92 = arith.constant dense<0.000000e+00> : vector<32x128xf32>
    %156 = tpu.matmul %152, %155, %cst_92 {dimension_numbers = #tpu.dot_dimension_numbers<[1], [0], [0], [1], [0, 0, 1, 1], [], []>} : vector<32x128xf32>, vector<128x128xf32>, vector<32x128xf32> -> vector<32x128xf32>
    %c1_93 = arith.constant 1 : index
    %c0_94 = arith.constant 0 : index
    %c1_95 = arith.constant 1 : index
    %c0_96 = arith.constant 0 : index
    %c0_97 = arith.constant 0 : index
    %157 = vector.load %arg1[%c1_93, %c0_94, %c1_95, %c0_96, %c0_97] : memref<6x2x3x128x128xf32, #tpu.memory_space<vmem>>, vector<1x1x1x128x128xf32>
    %158 = vector.shape_cast %157 : vector<1x1x1x128x128xf32> to vector<128x128xf32>
    %cst_98 = arith.constant dense<0.000000e+00> : vector<32x128xf32>
    %159 = tpu.matmul %149, %158, %cst_98 {dimension_numbers = #tpu.dot_dimension_numbers<[1], [0], [0], [1], [0, 0, 1, 1], [], []>} : vector<32x128xf32>, vector<128x128xf32>, vector<32x128xf32> -> vector<32x128xf32>
    %160 = arith.addf %156, %159 : vector<32x128xf32>
    %c1_99 = arith.constant 1 : index
    %c0_100 = arith.constant 0 : index
    %c2_101 = arith.constant 2 : index
    %c0_102 = arith.constant 0 : index
    %c0_103 = arith.constant 0 : index
    %161 = vector.load %arg1[%c1_99, %c0_100, %c2_101, %c0_102, %c0_103] : memref<6x2x3x128x128xf32, #tpu.memory_space<vmem>>, vector<1x1x1x128x128xf32>
    %162 = vector.shape_cast %161 : vector<1x1x1x128x128xf32> to vector<128x128xf32>
    %cst_104 = arith.constant dense<0.000000e+00> : vector<32x128xf32>
    %163 = tpu.matmul %153, %162, %cst_104 {dimension_numbers = #tpu.dot_dimension_numbers<[1], [0], [0], [1], [0, 0, 1, 1], [], []>} : vector<32x128xf32>, vector<128x128xf32>, vector<32x128xf32> -> vector<32x128xf32>
    %164 = arith.addf %160, %163 : vector<32x128xf32>
    %cst_105 = arith.constant dense<0.000000e+00> : vector<128xf32>
    %165 = vector.multi_reduction <add>, %164, %cst_105 [0] : vector<32x128xf32> to vector<128xf32>
    %166 = vector.shape_cast %165 : vector<128xf32> to vector<1x128xf32>
    %167 = arith.mulf %164, %164 : vector<32x128xf32>
    %cst_106 = arith.constant dense<0.000000e+00> : vector<128xf32>
    %168 = vector.multi_reduction <add>, %167, %cst_106 [0] : vector<32x128xf32> to vector<128xf32>
    %169 = vector.shape_cast %168 : vector<128xf32> to vector<1x128xf32>
    %cst_107 = arith.constant dense<0.000000e+00> : vector<1x128xf32>
    %170 = tpu.matmul %166, %58, %cst_107 {dimension_numbers = #tpu.dot_dimension_numbers<[1], [0], [0], [1], [0, 0, 1, 1], [], []>} : vector<1x128xf32>, vector<128x128xf32>, vector<1x128xf32> -> vector<1x128xf32>
    %cst_108 = arith.constant 0.001953125 : f32
    %171 = vector.broadcast %cst_108 : f32 to vector<1x128xf32>
    %172 = arith.mulf %170, %171 : vector<1x128xf32>
    %cst_109 = arith.constant dense<0.000000e+00> : vector<1x128xf32>
    %173 = tpu.matmul %169, %58, %cst_109 {dimension_numbers = #tpu.dot_dimension_numbers<[1], [0], [0], [1], [0, 0, 1, 1], [], []>} : vector<1x128xf32>, vector<128x128xf32>, vector<1x128xf32> -> vector<1x128xf32>
    %cst_110 = arith.constant 0.001953125 : f32
    %174 = vector.broadcast %cst_110 : f32 to vector<1x128xf32>
    %175 = arith.mulf %173, %174 : vector<1x128xf32>
    %176 = arith.mulf %172, %172 : vector<1x128xf32>
    %177 = arith.subf %175, %176 : vector<1x128xf32>
    %cst_111 = arith.constant 0.000000e+00 : f32
    %178 = vector.broadcast %cst_111 : f32 to vector<1x128xf32>
    %179 = arith.maximumf %177, %178 : vector<1x128xf32>
    %c1_112 = arith.constant 1 : index
    %c0_113 = arith.constant 0 : index
    %c0_114 = arith.constant 0 : index
    %c0_115 = arith.constant 0 : index
    %180 = vector.load %arg2[%c1_112, %c0_113, %c0_114, %c0_115] : memref<6x2x1x128xf32, #tpu.memory_space<vmem>>, vector<1x1x1x128xf32>
    %181 = vector.shape_cast %180 : vector<1x1x1x128xf32> to vector<1x128xf32>
    %cst_116 = arith.constant 9.99999974E-6 : f32
    %182 = vector.broadcast %cst_116 : f32 to vector<1x128xf32>
    %183 = arith.addf %179, %182 : vector<1x128xf32>
    %184 = math.rsqrt %183 : vector<1x128xf32>
    %185 = arith.mulf %181, %184 : vector<1x128xf32>
    %c1_117 = arith.constant 1 : index
    %c0_118 = arith.constant 0 : index
    %c0_119 = arith.constant 0 : index
    %c0_120 = arith.constant 0 : index
    %186 = vector.load %arg3[%c1_117, %c0_118, %c0_119, %c0_120] : memref<6x2x1x128xf32, #tpu.memory_space<vmem>>, vector<1x1x1x128xf32>
    %187 = vector.shape_cast %186 : vector<1x1x1x128xf32> to vector<1x128xf32>
    %188 = arith.mulf %172, %185 : vector<1x128xf32>
    %189 = arith.subf %187, %188 : vector<1x128xf32>
    %190 = vector.broadcast %185 : vector<1x128xf32> to vector<32x128xf32>
    %191 = arith.mulf %164, %190 : vector<32x128xf32>
    %192 = vector.broadcast %189 : vector<1x128xf32> to vector<32x128xf32>
    %193 = arith.addf %191, %192 : vector<32x128xf32>
    %cst_121 = arith.constant 0.000000e+00 : f32
    %194 = vector.broadcast %cst_121 : f32 to vector<32x128xf32>
    %195 = arith.maximumf %193, %194 : vector<32x128xf32>
    %c1_i32_122 = arith.constant 1 : i32
    %196 = tpu.dynamic_rotate %195 by %c1_i32_122 dim 0 : vector<32x128xf32>, i32 -> vector<32x128xf32>
    %c31_i32_123 = arith.constant 31 : i32
    %197 = tpu.dynamic_rotate %195 by %c31_i32_123 dim 0 : vector<32x128xf32>, i32 -> vector<32x128xf32>
    %198 = arith.select %19, %197, %196 : vector<32x128xi1>, vector<32x128xf32>
    %199 = arith.select %21, %196, %197 : vector<32x128xi1>, vector<32x128xf32>
    %c1_124 = arith.constant 1 : index
    %c1_125 = arith.constant 1 : index
    %c0_126 = arith.constant 0 : index
    %c0_127 = arith.constant 0 : index
    %c0_128 = arith.constant 0 : index
    %200 = vector.load %arg1[%c1_124, %c1_125, %c0_126, %c0_127, %c0_128] : memref<6x2x3x128x128xf32, #tpu.memory_space<vmem>>, vector<1x1x1x128x128xf32>
    %201 = vector.shape_cast %200 : vector<1x1x1x128x128xf32> to vector<128x128xf32>
    %cst_129 = arith.constant dense<0.000000e+00> : vector<32x128xf32>
    %202 = tpu.matmul %198, %201, %cst_129 {dimension_numbers = #tpu.dot_dimension_numbers<[1], [0], [0], [1], [0, 0, 1, 1], [], []>} : vector<32x128xf32>, vector<128x128xf32>, vector<32x128xf32> -> vector<32x128xf32>
    %c1_130 = arith.constant 1 : index
    %c1_131 = arith.constant 1 : index
    %c1_132 = arith.constant 1 : index
    %c0_133 = arith.constant 0 : index
    %c0_134 = arith.constant 0 : index
    %203 = vector.load %arg1[%c1_130, %c1_131, %c1_132, %c0_133, %c0_134] : memref<6x2x3x128x128xf32, #tpu.memory_space<vmem>>, vector<1x1x1x128x128xf32>
    %204 = vector.shape_cast %203 : vector<1x1x1x128x128xf32> to vector<128x128xf32>
    %cst_135 = arith.constant dense<0.000000e+00> : vector<32x128xf32>
    %205 = tpu.matmul %195, %204, %cst_135 {dimension_numbers = #tpu.dot_dimension_numbers<[1], [0], [0], [1], [0, 0, 1, 1], [], []>} : vector<32x128xf32>, vector<128x128xf32>, vector<32x128xf32> -> vector<32x128xf32>
    %206 = arith.addf %202, %205 : vector<32x128xf32>
    %c1_136 = arith.constant 1 : index
    %c1_137 = arith.constant 1 : index
    %c2_138 = arith.constant 2 : index
    %c0_139 = arith.constant 0 : index
    %c0_140 = arith.constant 0 : index
    %207 = vector.load %arg1[%c1_136, %c1_137, %c2_138, %c0_139, %c0_140] : memref<6x2x3x128x128xf32, #tpu.memory_space<vmem>>, vector<1x1x1x128x128xf32>
    %208 = vector.shape_cast %207 : vector<1x1x1x128x128xf32> to vector<128x128xf32>
    %cst_141 = arith.constant dense<0.000000e+00> : vector<32x128xf32>
    %209 = tpu.matmul %199, %208, %cst_141 {dimension_numbers = #tpu.dot_dimension_numbers<[1], [0], [0], [1], [0, 0, 1, 1], [], []>} : vector<32x128xf32>, vector<128x128xf32>, vector<32x128xf32> -> vector<32x128xf32>
    %210 = arith.addf %206, %209 : vector<32x128xf32>
    %cst_142 = arith.constant dense<0.000000e+00> : vector<128xf32>
    %211 = vector.multi_reduction <add>, %210, %cst_142 [0] : vector<32x128xf32> to vector<128xf32>
    %212 = vector.shape_cast %211 : vector<128xf32> to vector<1x128xf32>
    %213 = arith.mulf %210, %210 : vector<32x128xf32>
    %cst_143 = arith.constant dense<0.000000e+00> : vector<128xf32>
    %214 = vector.multi_reduction <add>, %213, %cst_143 [0] : vector<32x128xf32> to vector<128xf32>
    %215 = vector.shape_cast %214 : vector<128xf32> to vector<1x128xf32>
    %cst_144 = arith.constant dense<0.000000e+00> : vector<1x128xf32>
    %216 = tpu.matmul %212, %58, %cst_144 {dimension_numbers = #tpu.dot_dimension_numbers<[1], [0], [0], [1], [0, 0, 1, 1], [], []>} : vector<1x128xf32>, vector<128x128xf32>, vector<1x128xf32> -> vector<1x128xf32>
    %cst_145 = arith.constant 0.001953125 : f32
    %217 = vector.broadcast %cst_145 : f32 to vector<1x128xf32>
    %218 = arith.mulf %216, %217 : vector<1x128xf32>
    %cst_146 = arith.constant dense<0.000000e+00> : vector<1x128xf32>
    %219 = tpu.matmul %215, %58, %cst_146 {dimension_numbers = #tpu.dot_dimension_numbers<[1], [0], [0], [1], [0, 0, 1, 1], [], []>} : vector<1x128xf32>, vector<128x128xf32>, vector<1x128xf32> -> vector<1x128xf32>
    %cst_147 = arith.constant 0.001953125 : f32
    %220 = vector.broadcast %cst_147 : f32 to vector<1x128xf32>
    %221 = arith.mulf %219, %220 : vector<1x128xf32>
    %222 = arith.mulf %218, %218 : vector<1x128xf32>
    %223 = arith.subf %221, %222 : vector<1x128xf32>
    %cst_148 = arith.constant 0.000000e+00 : f32
    %224 = vector.broadcast %cst_148 : f32 to vector<1x128xf32>
    %225 = arith.maximumf %223, %224 : vector<1x128xf32>
    %c1_149 = arith.constant 1 : index
    %c1_150 = arith.constant 1 : index
    %c0_151 = arith.constant 0 : index
    %c0_152 = arith.constant 0 : index
    %226 = vector.load %arg2[%c1_149, %c1_150, %c0_151, %c0_152] : memref<6x2x1x128xf32, #tpu.memory_space<vmem>>, vector<1x1x1x128xf32>
    %227 = vector.shape_cast %226 : vector<1x1x1x128xf32> to vector<1x128xf32>
    %cst_153 = arith.constant 9.99999974E-6 : f32
    %228 = vector.broadcast %cst_153 : f32 to vector<1x128xf32>
    %229 = arith.addf %225, %228 : vector<1x128xf32>
    %230 = math.rsqrt %229 : vector<1x128xf32>
    %231 = arith.mulf %227, %230 : vector<1x128xf32>
    %c1_154 = arith.constant 1 : index
    %c1_155 = arith.constant 1 : index
    %c0_156 = arith.constant 0 : index
    %c0_157 = arith.constant 0 : index
    %232 = vector.load %arg3[%c1_154, %c1_155, %c0_156, %c0_157] : memref<6x2x1x128xf32, #tpu.memory_space<vmem>>, vector<1x1x1x128xf32>
    %233 = vector.shape_cast %232 : vector<1x1x1x128xf32> to vector<1x128xf32>
    %234 = arith.mulf %218, %231 : vector<1x128xf32>
    %235 = arith.subf %233, %234 : vector<1x128xf32>
    %236 = vector.broadcast %231 : vector<1x128xf32> to vector<32x128xf32>
    %237 = arith.mulf %210, %236 : vector<32x128xf32>
    %238 = vector.broadcast %235 : vector<1x128xf32> to vector<32x128xf32>
    %239 = arith.addf %237, %238 : vector<32x128xf32>
    %240 = arith.addf %149, %239 : vector<32x128xf32>
    %c1_i32_158 = arith.constant 1 : i32
    %241 = tpu.dynamic_rotate %240 by %c1_i32_158 dim 0 : vector<32x128xf32>, i32 -> vector<32x128xf32>
    %c31_i32_159 = arith.constant 31 : i32
    %242 = tpu.dynamic_rotate %240 by %c31_i32_159 dim 0 : vector<32x128xf32>, i32 -> vector<32x128xf32>
    %243 = arith.select %19, %242, %241 : vector<32x128xi1>, vector<32x128xf32>
    %244 = arith.select %21, %241, %242 : vector<32x128xi1>, vector<32x128xf32>
    %c2_160 = arith.constant 2 : index
    %c0_161 = arith.constant 0 : index
    %c0_162 = arith.constant 0 : index
    %c0_163 = arith.constant 0 : index
    %c0_164 = arith.constant 0 : index
    %245 = vector.load %arg1[%c2_160, %c0_161, %c0_162, %c0_163, %c0_164] : memref<6x2x3x128x128xf32, #tpu.memory_space<vmem>>, vector<1x1x1x128x128xf32>
    %246 = vector.shape_cast %245 : vector<1x1x1x128x128xf32> to vector<128x128xf32>
    %cst_165 = arith.constant dense<0.000000e+00> : vector<32x128xf32>
    %247 = tpu.matmul %243, %246, %cst_165 {dimension_numbers = #tpu.dot_dimension_numbers<[1], [0], [0], [1], [0, 0, 1, 1], [], []>} : vector<32x128xf32>, vector<128x128xf32>, vector<32x128xf32> -> vector<32x128xf32>
    %c2_166 = arith.constant 2 : index
    %c0_167 = arith.constant 0 : index
    %c1_168 = arith.constant 1 : index
    %c0_169 = arith.constant 0 : index
    %c0_170 = arith.constant 0 : index
    %248 = vector.load %arg1[%c2_166, %c0_167, %c1_168, %c0_169, %c0_170] : memref<6x2x3x128x128xf32, #tpu.memory_space<vmem>>, vector<1x1x1x128x128xf32>
    %249 = vector.shape_cast %248 : vector<1x1x1x128x128xf32> to vector<128x128xf32>
    %cst_171 = arith.constant dense<0.000000e+00> : vector<32x128xf32>
    %250 = tpu.matmul %240, %249, %cst_171 {dimension_numbers = #tpu.dot_dimension_numbers<[1], [0], [0], [1], [0, 0, 1, 1], [], []>} : vector<32x128xf32>, vector<128x128xf32>, vector<32x128xf32> -> vector<32x128xf32>
    %251 = arith.addf %247, %250 : vector<32x128xf32>
    %c2_172 = arith.constant 2 : index
    %c0_173 = arith.constant 0 : index
    %c2_174 = arith.constant 2 : index
    %c0_175 = arith.constant 0 : index
    %c0_176 = arith.constant 0 : index
    %252 = vector.load %arg1[%c2_172, %c0_173, %c2_174, %c0_175, %c0_176] : memref<6x2x3x128x128xf32, #tpu.memory_space<vmem>>, vector<1x1x1x128x128xf32>
    %253 = vector.shape_cast %252 : vector<1x1x1x128x128xf32> to vector<128x128xf32>
    %cst_177 = arith.constant dense<0.000000e+00> : vector<32x128xf32>
    %254 = tpu.matmul %244, %253, %cst_177 {dimension_numbers = #tpu.dot_dimension_numbers<[1], [0], [0], [1], [0, 0, 1, 1], [], []>} : vector<32x128xf32>, vector<128x128xf32>, vector<32x128xf32> -> vector<32x128xf32>
    %255 = arith.addf %251, %254 : vector<32x128xf32>
    %cst_178 = arith.constant dense<0.000000e+00> : vector<128xf32>
    %256 = vector.multi_reduction <add>, %255, %cst_178 [0] : vector<32x128xf32> to vector<128xf32>
    %257 = vector.shape_cast %256 : vector<128xf32> to vector<1x128xf32>
    %258 = arith.mulf %255, %255 : vector<32x128xf32>
    %cst_179 = arith.constant dense<0.000000e+00> : vector<128xf32>
    %259 = vector.multi_reduction <add>, %258, %cst_179 [0] : vector<32x128xf32> to vector<128xf32>
    %260 = vector.shape_cast %259 : vector<128xf32> to vector<1x128xf32>
    %cst_180 = arith.constant dense<0.000000e+00> : vector<1x128xf32>
    %261 = tpu.matmul %257, %58, %cst_180 {dimension_numbers = #tpu.dot_dimension_numbers<[1], [0], [0], [1], [0, 0, 1, 1], [], []>} : vector<1x128xf32>, vector<128x128xf32>, vector<1x128xf32> -> vector<1x128xf32>
    %cst_181 = arith.constant 0.001953125 : f32
    %262 = vector.broadcast %cst_181 : f32 to vector<1x128xf32>
    %263 = arith.mulf %261, %262 : vector<1x128xf32>
    %cst_182 = arith.constant dense<0.000000e+00> : vector<1x128xf32>
    %264 = tpu.matmul %260, %58, %cst_182 {dimension_numbers = #tpu.dot_dimension_numbers<[1], [0], [0], [1], [0, 0, 1, 1], [], []>} : vector<1x128xf32>, vector<128x128xf32>, vector<1x128xf32> -> vector<1x128xf32>
    %cst_183 = arith.constant 0.001953125 : f32
    %265 = vector.broadcast %cst_183 : f32 to vector<1x128xf32>
    %266 = arith.mulf %264, %265 : vector<1x128xf32>
    %267 = arith.mulf %263, %263 : vector<1x128xf32>
    %268 = arith.subf %266, %267 : vector<1x128xf32>
    %cst_184 = arith.constant 0.000000e+00 : f32
    %269 = vector.broadcast %cst_184 : f32 to vector<1x128xf32>
    %270 = arith.maximumf %268, %269 : vector<1x128xf32>
    %c2_185 = arith.constant 2 : index
    %c0_186 = arith.constant 0 : index
    %c0_187 = arith.constant 0 : index
    %c0_188 = arith.constant 0 : index
    %271 = vector.load %arg2[%c2_185, %c0_186, %c0_187, %c0_188] : memref<6x2x1x128xf32, #tpu.memory_space<vmem>>, vector<1x1x1x128xf32>
    %272 = vector.shape_cast %271 : vector<1x1x1x128xf32> to vector<1x128xf32>
    %cst_189 = arith.constant 9.99999974E-6 : f32
    %273 = vector.broadcast %cst_189 : f32 to vector<1x128xf32>
    %274 = arith.addf %270, %273 : vector<1x128xf32>
    %275 = math.rsqrt %274 : vector<1x128xf32>
    %276 = arith.mulf %272, %275 : vector<1x128xf32>
    %c2_190 = arith.constant 2 : index
    %c0_191 = arith.constant 0 : index
    %c0_192 = arith.constant 0 : index
    %c0_193 = arith.constant 0 : index
    %277 = vector.load %arg3[%c2_190, %c0_191, %c0_192, %c0_193] : memref<6x2x1x128xf32, #tpu.memory_space<vmem>>, vector<1x1x1x128xf32>
    %278 = vector.shape_cast %277 : vector<1x1x1x128xf32> to vector<1x128xf32>
    %279 = arith.mulf %263, %276 : vector<1x128xf32>
    %280 = arith.subf %278, %279 : vector<1x128xf32>
    %281 = vector.broadcast %276 : vector<1x128xf32> to vector<32x128xf32>
    %282 = arith.mulf %255, %281 : vector<32x128xf32>
    %283 = vector.broadcast %280 : vector<1x128xf32> to vector<32x128xf32>
    %284 = arith.addf %282, %283 : vector<32x128xf32>
    %cst_194 = arith.constant 0.000000e+00 : f32
    %285 = vector.broadcast %cst_194 : f32 to vector<32x128xf32>
    %286 = arith.maximumf %284, %285 : vector<32x128xf32>
    %c1_i32_195 = arith.constant 1 : i32
    %287 = tpu.dynamic_rotate %286 by %c1_i32_195 dim 0 : vector<32x128xf32>, i32 -> vector<32x128xf32>
    %c31_i32_196 = arith.constant 31 : i32
    %288 = tpu.dynamic_rotate %286 by %c31_i32_196 dim 0 : vector<32x128xf32>, i32 -> vector<32x128xf32>
    %289 = arith.select %19, %288, %287 : vector<32x128xi1>, vector<32x128xf32>
    %290 = arith.select %21, %287, %288 : vector<32x128xi1>, vector<32x128xf32>
    %c2_197 = arith.constant 2 : index
    %c1_198 = arith.constant 1 : index
    %c0_199 = arith.constant 0 : index
    %c0_200 = arith.constant 0 : index
    %c0_201 = arith.constant 0 : index
    %291 = vector.load %arg1[%c2_197, %c1_198, %c0_199, %c0_200, %c0_201] : memref<6x2x3x128x128xf32, #tpu.memory_space<vmem>>, vector<1x1x1x128x128xf32>
    %292 = vector.shape_cast %291 : vector<1x1x1x128x128xf32> to vector<128x128xf32>
    %cst_202 = arith.constant dense<0.000000e+00> : vector<32x128xf32>
    %293 = tpu.matmul %289, %292, %cst_202 {dimension_numbers = #tpu.dot_dimension_numbers<[1], [0], [0], [1], [0, 0, 1, 1], [], []>} : vector<32x128xf32>, vector<128x128xf32>, vector<32x128xf32> -> vector<32x128xf32>
    %c2_203 = arith.constant 2 : index
    %c1_204 = arith.constant 1 : index
    %c1_205 = arith.constant 1 : index
    %c0_206 = arith.constant 0 : index
    %c0_207 = arith.constant 0 : index
    %294 = vector.load %arg1[%c2_203, %c1_204, %c1_205, %c0_206, %c0_207] : memref<6x2x3x128x128xf32, #tpu.memory_space<vmem>>, vector<1x1x1x128x128xf32>
    %295 = vector.shape_cast %294 : vector<1x1x1x128x128xf32> to vector<128x128xf32>
    %cst_208 = arith.constant dense<0.000000e+00> : vector<32x128xf32>
    %296 = tpu.matmul %286, %295, %cst_208 {dimension_numbers = #tpu.dot_dimension_numbers<[1], [0], [0], [1], [0, 0, 1, 1], [], []>} : vector<32x128xf32>, vector<128x128xf32>, vector<32x128xf32> -> vector<32x128xf32>
    %297 = arith.addf %293, %296 : vector<32x128xf32>
    %c2_209 = arith.constant 2 : index
    %c1_210 = arith.constant 1 : index
    %c2_211 = arith.constant 2 : index
    %c0_212 = arith.constant 0 : index
    %c0_213 = arith.constant 0 : index
    %298 = vector.load %arg1[%c2_209, %c1_210, %c2_211, %c0_212, %c0_213] : memref<6x2x3x128x128xf32, #tpu.memory_space<vmem>>, vector<1x1x1x128x128xf32>
    %299 = vector.shape_cast %298 : vector<1x1x1x128x128xf32> to vector<128x128xf32>
    %cst_214 = arith.constant dense<0.000000e+00> : vector<32x128xf32>
    %300 = tpu.matmul %290, %299, %cst_214 {dimension_numbers = #tpu.dot_dimension_numbers<[1], [0], [0], [1], [0, 0, 1, 1], [], []>} : vector<32x128xf32>, vector<128x128xf32>, vector<32x128xf32> -> vector<32x128xf32>
    %301 = arith.addf %297, %300 : vector<32x128xf32>
    %cst_215 = arith.constant dense<0.000000e+00> : vector<128xf32>
    %302 = vector.multi_reduction <add>, %301, %cst_215 [0] : vector<32x128xf32> to vector<128xf32>
    %303 = vector.shape_cast %302 : vector<128xf32> to vector<1x128xf32>
    %304 = arith.mulf %301, %301 : vector<32x128xf32>
    %cst_216 = arith.constant dense<0.000000e+00> : vector<128xf32>
    %305 = vector.multi_reduction <add>, %304, %cst_216 [0] : vector<32x128xf32> to vector<128xf32>
    %306 = vector.shape_cast %305 : vector<128xf32> to vector<1x128xf32>
    %cst_217 = arith.constant dense<0.000000e+00> : vector<1x128xf32>
    %307 = tpu.matmul %303, %58, %cst_217 {dimension_numbers = #tpu.dot_dimension_numbers<[1], [0], [0], [1], [0, 0, 1, 1], [], []>} : vector<1x128xf32>, vector<128x128xf32>, vector<1x128xf32> -> vector<1x128xf32>
    %cst_218 = arith.constant 0.001953125 : f32
    %308 = vector.broadcast %cst_218 : f32 to vector<1x128xf32>
    %309 = arith.mulf %307, %308 : vector<1x128xf32>
    %cst_219 = arith.constant dense<0.000000e+00> : vector<1x128xf32>
    %310 = tpu.matmul %306, %58, %cst_219 {dimension_numbers = #tpu.dot_dimension_numbers<[1], [0], [0], [1], [0, 0, 1, 1], [], []>} : vector<1x128xf32>, vector<128x128xf32>, vector<1x128xf32> -> vector<1x128xf32>
    %cst_220 = arith.constant 0.001953125 : f32
    %311 = vector.broadcast %cst_220 : f32 to vector<1x128xf32>
    %312 = arith.mulf %310, %311 : vector<1x128xf32>
    %313 = arith.mulf %309, %309 : vector<1x128xf32>
    %314 = arith.subf %312, %313 : vector<1x128xf32>
    %cst_221 = arith.constant 0.000000e+00 : f32
    %315 = vector.broadcast %cst_221 : f32 to vector<1x128xf32>
    %316 = arith.maximumf %314, %315 : vector<1x128xf32>
    %c2_222 = arith.constant 2 : index
    %c1_223 = arith.constant 1 : index
    %c0_224 = arith.constant 0 : index
    %c0_225 = arith.constant 0 : index
    %317 = vector.load %arg2[%c2_222, %c1_223, %c0_224, %c0_225] : memref<6x2x1x128xf32, #tpu.memory_space<vmem>>, vector<1x1x1x128xf32>
    %318 = vector.shape_cast %317 : vector<1x1x1x128xf32> to vector<1x128xf32>
    %cst_226 = arith.constant 9.99999974E-6 : f32
    %319 = vector.broadcast %cst_226 : f32 to vector<1x128xf32>
    %320 = arith.addf %316, %319 : vector<1x128xf32>
    %321 = math.rsqrt %320 : vector<1x128xf32>
    %322 = arith.mulf %318, %321 : vector<1x128xf32>
    %c2_227 = arith.constant 2 : index
    %c1_228 = arith.constant 1 : index
    %c0_229 = arith.constant 0 : index
    %c0_230 = arith.constant 0 : index
    %323 = vector.load %arg3[%c2_227, %c1_228, %c0_229, %c0_230] : memref<6x2x1x128xf32, #tpu.memory_space<vmem>>, vector<1x1x1x128xf32>
    %324 = vector.shape_cast %323 : vector<1x1x1x128xf32> to vector<1x128xf32>
    %325 = arith.mulf %309, %322 : vector<1x128xf32>
    %326 = arith.subf %324, %325 : vector<1x128xf32>
    %327 = vector.broadcast %322 : vector<1x128xf32> to vector<32x128xf32>
    %328 = arith.mulf %301, %327 : vector<32x128xf32>
    %329 = vector.broadcast %326 : vector<1x128xf32> to vector<32x128xf32>
    %330 = arith.addf %328, %329 : vector<32x128xf32>
    %331 = arith.addf %240, %330 : vector<32x128xf32>
    %c1_i32_231 = arith.constant 1 : i32
    %332 = tpu.dynamic_rotate %331 by %c1_i32_231 dim 0 : vector<32x128xf32>, i32 -> vector<32x128xf32>
    %c31_i32_232 = arith.constant 31 : i32
    %333 = tpu.dynamic_rotate %331 by %c31_i32_232 dim 0 : vector<32x128xf32>, i32 -> vector<32x128xf32>
    %334 = arith.select %19, %333, %332 : vector<32x128xi1>, vector<32x128xf32>
    %335 = arith.select %21, %332, %333 : vector<32x128xi1>, vector<32x128xf32>
    %c3 = arith.constant 3 : index
    %c0_233 = arith.constant 0 : index
    %c0_234 = arith.constant 0 : index
    %c0_235 = arith.constant 0 : index
    %c0_236 = arith.constant 0 : index
    %336 = vector.load %arg1[%c3, %c0_233, %c0_234, %c0_235, %c0_236] : memref<6x2x3x128x128xf32, #tpu.memory_space<vmem>>, vector<1x1x1x128x128xf32>
    %337 = vector.shape_cast %336 : vector<1x1x1x128x128xf32> to vector<128x128xf32>
    %cst_237 = arith.constant dense<0.000000e+00> : vector<32x128xf32>
    %338 = tpu.matmul %334, %337, %cst_237 {dimension_numbers = #tpu.dot_dimension_numbers<[1], [0], [0], [1], [0, 0, 1, 1], [], []>} : vector<32x128xf32>, vector<128x128xf32>, vector<32x128xf32> -> vector<32x128xf32>
    %c3_238 = arith.constant 3 : index
    %c0_239 = arith.constant 0 : index
    %c1_240 = arith.constant 1 : index
    %c0_241 = arith.constant 0 : index
    %c0_242 = arith.constant 0 : index
    %339 = vector.load %arg1[%c3_238, %c0_239, %c1_240, %c0_241, %c0_242] : memref<6x2x3x128x128xf32, #tpu.memory_space<vmem>>, vector<1x1x1x128x128xf32>
    %340 = vector.shape_cast %339 : vector<1x1x1x128x128xf32> to vector<128x128xf32>
    %cst_243 = arith.constant dense<0.000000e+00> : vector<32x128xf32>
    %341 = tpu.matmul %331, %340, %cst_243 {dimension_numbers = #tpu.dot_dimension_numbers<[1], [0], [0], [1], [0, 0, 1, 1], [], []>} : vector<32x128xf32>, vector<128x128xf32>, vector<32x128xf32> -> vector<32x128xf32>
    %342 = arith.addf %338, %341 : vector<32x128xf32>
    %c3_244 = arith.constant 3 : index
    %c0_245 = arith.constant 0 : index
    %c2_246 = arith.constant 2 : index
    %c0_247 = arith.constant 0 : index
    %c0_248 = arith.constant 0 : index
    %343 = vector.load %arg1[%c3_244, %c0_245, %c2_246, %c0_247, %c0_248] : memref<6x2x3x128x128xf32, #tpu.memory_space<vmem>>, vector<1x1x1x128x128xf32>
    %344 = vector.shape_cast %343 : vector<1x1x1x128x128xf32> to vector<128x128xf32>
    %cst_249 = arith.constant dense<0.000000e+00> : vector<32x128xf32>
    %345 = tpu.matmul %335, %344, %cst_249 {dimension_numbers = #tpu.dot_dimension_numbers<[1], [0], [0], [1], [0, 0, 1, 1], [], []>} : vector<32x128xf32>, vector<128x128xf32>, vector<32x128xf32> -> vector<32x128xf32>
    %346 = arith.addf %342, %345 : vector<32x128xf32>
    %cst_250 = arith.constant dense<0.000000e+00> : vector<128xf32>
    %347 = vector.multi_reduction <add>, %346, %cst_250 [0] : vector<32x128xf32> to vector<128xf32>
    %348 = vector.shape_cast %347 : vector<128xf32> to vector<1x128xf32>
    %349 = arith.mulf %346, %346 : vector<32x128xf32>
    %cst_251 = arith.constant dense<0.000000e+00> : vector<128xf32>
    %350 = vector.multi_reduction <add>, %349, %cst_251 [0] : vector<32x128xf32> to vector<128xf32>
    %351 = vector.shape_cast %350 : vector<128xf32> to vector<1x128xf32>
    %cst_252 = arith.constant dense<0.000000e+00> : vector<1x128xf32>
    %352 = tpu.matmul %348, %58, %cst_252 {dimension_numbers = #tpu.dot_dimension_numbers<[1], [0], [0], [1], [0, 0, 1, 1], [], []>} : vector<1x128xf32>, vector<128x128xf32>, vector<1x128xf32> -> vector<1x128xf32>
    %cst_253 = arith.constant 0.001953125 : f32
    %353 = vector.broadcast %cst_253 : f32 to vector<1x128xf32>
    %354 = arith.mulf %352, %353 : vector<1x128xf32>
    %cst_254 = arith.constant dense<0.000000e+00> : vector<1x128xf32>
    %355 = tpu.matmul %351, %58, %cst_254 {dimension_numbers = #tpu.dot_dimension_numbers<[1], [0], [0], [1], [0, 0, 1, 1], [], []>} : vector<1x128xf32>, vector<128x128xf32>, vector<1x128xf32> -> vector<1x128xf32>
    %cst_255 = arith.constant 0.001953125 : f32
    %356 = vector.broadcast %cst_255 : f32 to vector<1x128xf32>
    %357 = arith.mulf %355, %356 : vector<1x128xf32>
    %358 = arith.mulf %354, %354 : vector<1x128xf32>
    %359 = arith.subf %357, %358 : vector<1x128xf32>
    %cst_256 = arith.constant 0.000000e+00 : f32
    %360 = vector.broadcast %cst_256 : f32 to vector<1x128xf32>
    %361 = arith.maximumf %359, %360 : vector<1x128xf32>
    %c3_257 = arith.constant 3 : index
    %c0_258 = arith.constant 0 : index
    %c0_259 = arith.constant 0 : index
    %c0_260 = arith.constant 0 : index
    %362 = vector.load %arg2[%c3_257, %c0_258, %c0_259, %c0_260] : memref<6x2x1x128xf32, #tpu.memory_space<vmem>>, vector<1x1x1x128xf32>
    %363 = vector.shape_cast %362 : vector<1x1x1x128xf32> to vector<1x128xf32>
    %cst_261 = arith.constant 9.99999974E-6 : f32
    %364 = vector.broadcast %cst_261 : f32 to vector<1x128xf32>
    %365 = arith.addf %361, %364 : vector<1x128xf32>
    %366 = math.rsqrt %365 : vector<1x128xf32>
    %367 = arith.mulf %363, %366 : vector<1x128xf32>
    %c3_262 = arith.constant 3 : index
    %c0_263 = arith.constant 0 : index
    %c0_264 = arith.constant 0 : index
    %c0_265 = arith.constant 0 : index
    %368 = vector.load %arg3[%c3_262, %c0_263, %c0_264, %c0_265] : memref<6x2x1x128xf32, #tpu.memory_space<vmem>>, vector<1x1x1x128xf32>
    %369 = vector.shape_cast %368 : vector<1x1x1x128xf32> to vector<1x128xf32>
    %370 = arith.mulf %354, %367 : vector<1x128xf32>
    %371 = arith.subf %369, %370 : vector<1x128xf32>
    %372 = vector.broadcast %367 : vector<1x128xf32> to vector<32x128xf32>
    %373 = arith.mulf %346, %372 : vector<32x128xf32>
    %374 = vector.broadcast %371 : vector<1x128xf32> to vector<32x128xf32>
    %375 = arith.addf %373, %374 : vector<32x128xf32>
    %cst_266 = arith.constant 0.000000e+00 : f32
    %376 = vector.broadcast %cst_266 : f32 to vector<32x128xf32>
    %377 = arith.maximumf %375, %376 : vector<32x128xf32>
    %c1_i32_267 = arith.constant 1 : i32
    %378 = tpu.dynamic_rotate %377 by %c1_i32_267 dim 0 : vector<32x128xf32>, i32 -> vector<32x128xf32>
    %c31_i32_268 = arith.constant 31 : i32
    %379 = tpu.dynamic_rotate %377 by %c31_i32_268 dim 0 : vector<32x128xf32>, i32 -> vector<32x128xf32>
    %380 = arith.select %19, %379, %378 : vector<32x128xi1>, vector<32x128xf32>
    %381 = arith.select %21, %378, %379 : vector<32x128xi1>, vector<32x128xf32>
    %c3_269 = arith.constant 3 : index
    %c1_270 = arith.constant 1 : index
    %c0_271 = arith.constant 0 : index
    %c0_272 = arith.constant 0 : index
    %c0_273 = arith.constant 0 : index
    %382 = vector.load %arg1[%c3_269, %c1_270, %c0_271, %c0_272, %c0_273] : memref<6x2x3x128x128xf32, #tpu.memory_space<vmem>>, vector<1x1x1x128x128xf32>
    %383 = vector.shape_cast %382 : vector<1x1x1x128x128xf32> to vector<128x128xf32>
    %cst_274 = arith.constant dense<0.000000e+00> : vector<32x128xf32>
    %384 = tpu.matmul %380, %383, %cst_274 {dimension_numbers = #tpu.dot_dimension_numbers<[1], [0], [0], [1], [0, 0, 1, 1], [], []>} : vector<32x128xf32>, vector<128x128xf32>, vector<32x128xf32> -> vector<32x128xf32>
    %c3_275 = arith.constant 3 : index
    %c1_276 = arith.constant 1 : index
    %c1_277 = arith.constant 1 : index
    %c0_278 = arith.constant 0 : index
    %c0_279 = arith.constant 0 : index
    %385 = vector.load %arg1[%c3_275, %c1_276, %c1_277, %c0_278, %c0_279] : memref<6x2x3x128x128xf32, #tpu.memory_space<vmem>>, vector<1x1x1x128x128xf32>
    %386 = vector.shape_cast %385 : vector<1x1x1x128x128xf32> to vector<128x128xf32>
    %cst_280 = arith.constant dense<0.000000e+00> : vector<32x128xf32>
    %387 = tpu.matmul %377, %386, %cst_280 {dimension_numbers = #tpu.dot_dimension_numbers<[1], [0], [0], [1], [0, 0, 1, 1], [], []>} : vector<32x128xf32>, vector<128x128xf32>, vector<32x128xf32> -> vector<32x128xf32>
    %388 = arith.addf %384, %387 : vector<32x128xf32>
    %c3_281 = arith.constant 3 : index
    %c1_282 = arith.constant 1 : index
    %c2_283 = arith.constant 2 : index
    %c0_284 = arith.constant 0 : index
    %c0_285 = arith.constant 0 : index
    %389 = vector.load %arg1[%c3_281, %c1_282, %c2_283, %c0_284, %c0_285] : memref<6x2x3x128x128xf32, #tpu.memory_space<vmem>>, vector<1x1x1x128x128xf32>
    %390 = vector.shape_cast %389 : vector<1x1x1x128x128xf32> to vector<128x128xf32>
    %cst_286 = arith.constant dense<0.000000e+00> : vector<32x128xf32>
    %391 = tpu.matmul %381, %390, %cst_286 {dimension_numbers = #tpu.dot_dimension_numbers<[1], [0], [0], [1], [0, 0, 1, 1], [], []>} : vector<32x128xf32>, vector<128x128xf32>, vector<32x128xf32> -> vector<32x128xf32>
    %392 = arith.addf %388, %391 : vector<32x128xf32>
    %cst_287 = arith.constant dense<0.000000e+00> : vector<128xf32>
    %393 = vector.multi_reduction <add>, %392, %cst_287 [0] : vector<32x128xf32> to vector<128xf32>
    %394 = vector.shape_cast %393 : vector<128xf32> to vector<1x128xf32>
    %395 = arith.mulf %392, %392 : vector<32x128xf32>
    %cst_288 = arith.constant dense<0.000000e+00> : vector<128xf32>
    %396 = vector.multi_reduction <add>, %395, %cst_288 [0] : vector<32x128xf32> to vector<128xf32>
    %397 = vector.shape_cast %396 : vector<128xf32> to vector<1x128xf32>
    %cst_289 = arith.constant dense<0.000000e+00> : vector<1x128xf32>
    %398 = tpu.matmul %394, %58, %cst_289 {dimension_numbers = #tpu.dot_dimension_numbers<[1], [0], [0], [1], [0, 0, 1, 1], [], []>} : vector<1x128xf32>, vector<128x128xf32>, vector<1x128xf32> -> vector<1x128xf32>
    %cst_290 = arith.constant 0.001953125 : f32
    %399 = vector.broadcast %cst_290 : f32 to vector<1x128xf32>
    %400 = arith.mulf %398, %399 : vector<1x128xf32>
    %cst_291 = arith.constant dense<0.000000e+00> : vector<1x128xf32>
    %401 = tpu.matmul %397, %58, %cst_291 {dimension_numbers = #tpu.dot_dimension_numbers<[1], [0], [0], [1], [0, 0, 1, 1], [], []>} : vector<1x128xf32>, vector<128x128xf32>, vector<1x128xf32> -> vector<1x128xf32>
    %cst_292 = arith.constant 0.001953125 : f32
    %402 = vector.broadcast %cst_292 : f32 to vector<1x128xf32>
    %403 = arith.mulf %401, %402 : vector<1x128xf32>
    %404 = arith.mulf %400, %400 : vector<1x128xf32>
    %405 = arith.subf %403, %404 : vector<1x128xf32>
    %cst_293 = arith.constant 0.000000e+00 : f32
    %406 = vector.broadcast %cst_293 : f32 to vector<1x128xf32>
    %407 = arith.maximumf %405, %406 : vector<1x128xf32>
    %c3_294 = arith.constant 3 : index
    %c1_295 = arith.constant 1 : index
    %c0_296 = arith.constant 0 : index
    %c0_297 = arith.constant 0 : index
    %408 = vector.load %arg2[%c3_294, %c1_295, %c0_296, %c0_297] : memref<6x2x1x128xf32, #tpu.memory_space<vmem>>, vector<1x1x1x128xf32>
    %409 = vector.shape_cast %408 : vector<1x1x1x128xf32> to vector<1x128xf32>
    %cst_298 = arith.constant 9.99999974E-6 : f32
    %410 = vector.broadcast %cst_298 : f32 to vector<1x128xf32>
    %411 = arith.addf %407, %410 : vector<1x128xf32>
    %412 = math.rsqrt %411 : vector<1x128xf32>
    %413 = arith.mulf %409, %412 : vector<1x128xf32>
    %c3_299 = arith.constant 3 : index
    %c1_300 = arith.constant 1 : index
    %c0_301 = arith.constant 0 : index
    %c0_302 = arith.constant 0 : index
    %414 = vector.load %arg3[%c3_299, %c1_300, %c0_301, %c0_302] : memref<6x2x1x128xf32, #tpu.memory_space<vmem>>, vector<1x1x1x128xf32>
    %415 = vector.shape_cast %414 : vector<1x1x1x128xf32> to vector<1x128xf32>
    %416 = arith.mulf %400, %413 : vector<1x128xf32>
    %417 = arith.subf %415, %416 : vector<1x128xf32>
    %418 = vector.broadcast %413 : vector<1x128xf32> to vector<32x128xf32>
    %419 = arith.mulf %392, %418 : vector<32x128xf32>
    %420 = vector.broadcast %417 : vector<1x128xf32> to vector<32x128xf32>
    %421 = arith.addf %419, %420 : vector<32x128xf32>
    %422 = arith.addf %331, %421 : vector<32x128xf32>
    %c1_i32_303 = arith.constant 1 : i32
    %423 = tpu.dynamic_rotate %422 by %c1_i32_303 dim 0 : vector<32x128xf32>, i32 -> vector<32x128xf32>
    %c31_i32_304 = arith.constant 31 : i32
    %424 = tpu.dynamic_rotate %422 by %c31_i32_304 dim 0 : vector<32x128xf32>, i32 -> vector<32x128xf32>
    %425 = arith.select %19, %424, %423 : vector<32x128xi1>, vector<32x128xf32>
    %426 = arith.select %21, %423, %424 : vector<32x128xi1>, vector<32x128xf32>
    %c4 = arith.constant 4 : index
    %c0_305 = arith.constant 0 : index
    %c0_306 = arith.constant 0 : index
    %c0_307 = arith.constant 0 : index
    %c0_308 = arith.constant 0 : index
    %427 = vector.load %arg1[%c4, %c0_305, %c0_306, %c0_307, %c0_308] : memref<6x2x3x128x128xf32, #tpu.memory_space<vmem>>, vector<1x1x1x128x128xf32>
    %428 = vector.shape_cast %427 : vector<1x1x1x128x128xf32> to vector<128x128xf32>
    %cst_309 = arith.constant dense<0.000000e+00> : vector<32x128xf32>
    %429 = tpu.matmul %425, %428, %cst_309 {dimension_numbers = #tpu.dot_dimension_numbers<[1], [0], [0], [1], [0, 0, 1, 1], [], []>} : vector<32x128xf32>, vector<128x128xf32>, vector<32x128xf32> -> vector<32x128xf32>
    %c4_310 = arith.constant 4 : index
    %c0_311 = arith.constant 0 : index
    %c1_312 = arith.constant 1 : index
    %c0_313 = arith.constant 0 : index
    %c0_314 = arith.constant 0 : index
    %430 = vector.load %arg1[%c4_310, %c0_311, %c1_312, %c0_313, %c0_314] : memref<6x2x3x128x128xf32, #tpu.memory_space<vmem>>, vector<1x1x1x128x128xf32>
    %431 = vector.shape_cast %430 : vector<1x1x1x128x128xf32> to vector<128x128xf32>
    %cst_315 = arith.constant dense<0.000000e+00> : vector<32x128xf32>
    %432 = tpu.matmul %422, %431, %cst_315 {dimension_numbers = #tpu.dot_dimension_numbers<[1], [0], [0], [1], [0, 0, 1, 1], [], []>} : vector<32x128xf32>, vector<128x128xf32>, vector<32x128xf32> -> vector<32x128xf32>
    %433 = arith.addf %429, %432 : vector<32x128xf32>
    %c4_316 = arith.constant 4 : index
    %c0_317 = arith.constant 0 : index
    %c2_318 = arith.constant 2 : index
    %c0_319 = arith.constant 0 : index
    %c0_320 = arith.constant 0 : index
    %434 = vector.load %arg1[%c4_316, %c0_317, %c2_318, %c0_319, %c0_320] : memref<6x2x3x128x128xf32, #tpu.memory_space<vmem>>, vector<1x1x1x128x128xf32>
    %435 = vector.shape_cast %434 : vector<1x1x1x128x128xf32> to vector<128x128xf32>
    %cst_321 = arith.constant dense<0.000000e+00> : vector<32x128xf32>
    %436 = tpu.matmul %426, %435, %cst_321 {dimension_numbers = #tpu.dot_dimension_numbers<[1], [0], [0], [1], [0, 0, 1, 1], [], []>} : vector<32x128xf32>, vector<128x128xf32>, vector<32x128xf32> -> vector<32x128xf32>
    %437 = arith.addf %433, %436 : vector<32x128xf32>
    %cst_322 = arith.constant dense<0.000000e+00> : vector<128xf32>
    %438 = vector.multi_reduction <add>, %437, %cst_322 [0] : vector<32x128xf32> to vector<128xf32>
    %439 = vector.shape_cast %438 : vector<128xf32> to vector<1x128xf32>
    %440 = arith.mulf %437, %437 : vector<32x128xf32>
    %cst_323 = arith.constant dense<0.000000e+00> : vector<128xf32>
    %441 = vector.multi_reduction <add>, %440, %cst_323 [0] : vector<32x128xf32> to vector<128xf32>
    %442 = vector.shape_cast %441 : vector<128xf32> to vector<1x128xf32>
    %cst_324 = arith.constant dense<0.000000e+00> : vector<1x128xf32>
    %443 = tpu.matmul %439, %58, %cst_324 {dimension_numbers = #tpu.dot_dimension_numbers<[1], [0], [0], [1], [0, 0, 1, 1], [], []>} : vector<1x128xf32>, vector<128x128xf32>, vector<1x128xf32> -> vector<1x128xf32>
    %cst_325 = arith.constant 0.001953125 : f32
    %444 = vector.broadcast %cst_325 : f32 to vector<1x128xf32>
    %445 = arith.mulf %443, %444 : vector<1x128xf32>
    %cst_326 = arith.constant dense<0.000000e+00> : vector<1x128xf32>
    %446 = tpu.matmul %442, %58, %cst_326 {dimension_numbers = #tpu.dot_dimension_numbers<[1], [0], [0], [1], [0, 0, 1, 1], [], []>} : vector<1x128xf32>, vector<128x128xf32>, vector<1x128xf32> -> vector<1x128xf32>
    %cst_327 = arith.constant 0.001953125 : f32
    %447 = vector.broadcast %cst_327 : f32 to vector<1x128xf32>
    %448 = arith.mulf %446, %447 : vector<1x128xf32>
    %449 = arith.mulf %445, %445 : vector<1x128xf32>
    %450 = arith.subf %448, %449 : vector<1x128xf32>
    %cst_328 = arith.constant 0.000000e+00 : f32
    %451 = vector.broadcast %cst_328 : f32 to vector<1x128xf32>
    %452 = arith.maximumf %450, %451 : vector<1x128xf32>
    %c4_329 = arith.constant 4 : index
    %c0_330 = arith.constant 0 : index
    %c0_331 = arith.constant 0 : index
    %c0_332 = arith.constant 0 : index
    %453 = vector.load %arg2[%c4_329, %c0_330, %c0_331, %c0_332] : memref<6x2x1x128xf32, #tpu.memory_space<vmem>>, vector<1x1x1x128xf32>
    %454 = vector.shape_cast %453 : vector<1x1x1x128xf32> to vector<1x128xf32>
    %cst_333 = arith.constant 9.99999974E-6 : f32
    %455 = vector.broadcast %cst_333 : f32 to vector<1x128xf32>
    %456 = arith.addf %452, %455 : vector<1x128xf32>
    %457 = math.rsqrt %456 : vector<1x128xf32>
    %458 = arith.mulf %454, %457 : vector<1x128xf32>
    %c4_334 = arith.constant 4 : index
    %c0_335 = arith.constant 0 : index
    %c0_336 = arith.constant 0 : index
    %c0_337 = arith.constant 0 : index
    %459 = vector.load %arg3[%c4_334, %c0_335, %c0_336, %c0_337] : memref<6x2x1x128xf32, #tpu.memory_space<vmem>>, vector<1x1x1x128xf32>
    %460 = vector.shape_cast %459 : vector<1x1x1x128xf32> to vector<1x128xf32>
    %461 = arith.mulf %445, %458 : vector<1x128xf32>
    %462 = arith.subf %460, %461 : vector<1x128xf32>
    %463 = vector.broadcast %458 : vector<1x128xf32> to vector<32x128xf32>
    %464 = arith.mulf %437, %463 : vector<32x128xf32>
    %465 = vector.broadcast %462 : vector<1x128xf32> to vector<32x128xf32>
    %466 = arith.addf %464, %465 : vector<32x128xf32>
    %cst_338 = arith.constant 0.000000e+00 : f32
    %467 = vector.broadcast %cst_338 : f32 to vector<32x128xf32>
    %468 = arith.maximumf %466, %467 : vector<32x128xf32>
    %c1_i32_339 = arith.constant 1 : i32
    %469 = tpu.dynamic_rotate %468 by %c1_i32_339 dim 0 : vector<32x128xf32>, i32 -> vector<32x128xf32>
    %c31_i32_340 = arith.constant 31 : i32
    %470 = tpu.dynamic_rotate %468 by %c31_i32_340 dim 0 : vector<32x128xf32>, i32 -> vector<32x128xf32>
    %471 = arith.select %19, %470, %469 : vector<32x128xi1>, vector<32x128xf32>
    %472 = arith.select %21, %469, %470 : vector<32x128xi1>, vector<32x128xf32>
    %c4_341 = arith.constant 4 : index
    %c1_342 = arith.constant 1 : index
    %c0_343 = arith.constant 0 : index
    %c0_344 = arith.constant 0 : index
    %c0_345 = arith.constant 0 : index
    %473 = vector.load %arg1[%c4_341, %c1_342, %c0_343, %c0_344, %c0_345] : memref<6x2x3x128x128xf32, #tpu.memory_space<vmem>>, vector<1x1x1x128x128xf32>
    %474 = vector.shape_cast %473 : vector<1x1x1x128x128xf32> to vector<128x128xf32>
    %cst_346 = arith.constant dense<0.000000e+00> : vector<32x128xf32>
    %475 = tpu.matmul %471, %474, %cst_346 {dimension_numbers = #tpu.dot_dimension_numbers<[1], [0], [0], [1], [0, 0, 1, 1], [], []>} : vector<32x128xf32>, vector<128x128xf32>, vector<32x128xf32> -> vector<32x128xf32>
    %c4_347 = arith.constant 4 : index
    %c1_348 = arith.constant 1 : index
    %c1_349 = arith.constant 1 : index
    %c0_350 = arith.constant 0 : index
    %c0_351 = arith.constant 0 : index
    %476 = vector.load %arg1[%c4_347, %c1_348, %c1_349, %c0_350, %c0_351] : memref<6x2x3x128x128xf32, #tpu.memory_space<vmem>>, vector<1x1x1x128x128xf32>
    %477 = vector.shape_cast %476 : vector<1x1x1x128x128xf32> to vector<128x128xf32>
    %cst_352 = arith.constant dense<0.000000e+00> : vector<32x128xf32>
    %478 = tpu.matmul %468, %477, %cst_352 {dimension_numbers = #tpu.dot_dimension_numbers<[1], [0], [0], [1], [0, 0, 1, 1], [], []>} : vector<32x128xf32>, vector<128x128xf32>, vector<32x128xf32> -> vector<32x128xf32>
    %479 = arith.addf %475, %478 : vector<32x128xf32>
    %c4_353 = arith.constant 4 : index
    %c1_354 = arith.constant 1 : index
    %c2_355 = arith.constant 2 : index
    %c0_356 = arith.constant 0 : index
    %c0_357 = arith.constant 0 : index
    %480 = vector.load %arg1[%c4_353, %c1_354, %c2_355, %c0_356, %c0_357] : memref<6x2x3x128x128xf32, #tpu.memory_space<vmem>>, vector<1x1x1x128x128xf32>
    %481 = vector.shape_cast %480 : vector<1x1x1x128x128xf32> to vector<128x128xf32>
    %cst_358 = arith.constant dense<0.000000e+00> : vector<32x128xf32>
    %482 = tpu.matmul %472, %481, %cst_358 {dimension_numbers = #tpu.dot_dimension_numbers<[1], [0], [0], [1], [0, 0, 1, 1], [], []>} : vector<32x128xf32>, vector<128x128xf32>, vector<32x128xf32> -> vector<32x128xf32>
    %483 = arith.addf %479, %482 : vector<32x128xf32>
    %cst_359 = arith.constant dense<0.000000e+00> : vector<128xf32>
    %484 = vector.multi_reduction <add>, %483, %cst_359 [0] : vector<32x128xf32> to vector<128xf32>
    %485 = vector.shape_cast %484 : vector<128xf32> to vector<1x128xf32>
    %486 = arith.mulf %483, %483 : vector<32x128xf32>
    %cst_360 = arith.constant dense<0.000000e+00> : vector<128xf32>
    %487 = vector.multi_reduction <add>, %486, %cst_360 [0] : vector<32x128xf32> to vector<128xf32>
    %488 = vector.shape_cast %487 : vector<128xf32> to vector<1x128xf32>
    %cst_361 = arith.constant dense<0.000000e+00> : vector<1x128xf32>
    %489 = tpu.matmul %485, %58, %cst_361 {dimension_numbers = #tpu.dot_dimension_numbers<[1], [0], [0], [1], [0, 0, 1, 1], [], []>} : vector<1x128xf32>, vector<128x128xf32>, vector<1x128xf32> -> vector<1x128xf32>
    %cst_362 = arith.constant 0.001953125 : f32
    %490 = vector.broadcast %cst_362 : f32 to vector<1x128xf32>
    %491 = arith.mulf %489, %490 : vector<1x128xf32>
    %cst_363 = arith.constant dense<0.000000e+00> : vector<1x128xf32>
    %492 = tpu.matmul %488, %58, %cst_363 {dimension_numbers = #tpu.dot_dimension_numbers<[1], [0], [0], [1], [0, 0, 1, 1], [], []>} : vector<1x128xf32>, vector<128x128xf32>, vector<1x128xf32> -> vector<1x128xf32>
    %cst_364 = arith.constant 0.001953125 : f32
    %493 = vector.broadcast %cst_364 : f32 to vector<1x128xf32>
    %494 = arith.mulf %492, %493 : vector<1x128xf32>
    %495 = arith.mulf %491, %491 : vector<1x128xf32>
    %496 = arith.subf %494, %495 : vector<1x128xf32>
    %cst_365 = arith.constant 0.000000e+00 : f32
    %497 = vector.broadcast %cst_365 : f32 to vector<1x128xf32>
    %498 = arith.maximumf %496, %497 : vector<1x128xf32>
    %c4_366 = arith.constant 4 : index
    %c1_367 = arith.constant 1 : index
    %c0_368 = arith.constant 0 : index
    %c0_369 = arith.constant 0 : index
    %499 = vector.load %arg2[%c4_366, %c1_367, %c0_368, %c0_369] : memref<6x2x1x128xf32, #tpu.memory_space<vmem>>, vector<1x1x1x128xf32>
    %500 = vector.shape_cast %499 : vector<1x1x1x128xf32> to vector<1x128xf32>
    %cst_370 = arith.constant 9.99999974E-6 : f32
    %501 = vector.broadcast %cst_370 : f32 to vector<1x128xf32>
    %502 = arith.addf %498, %501 : vector<1x128xf32>
    %503 = math.rsqrt %502 : vector<1x128xf32>
    %504 = arith.mulf %500, %503 : vector<1x128xf32>
    %c4_371 = arith.constant 4 : index
    %c1_372 = arith.constant 1 : index
    %c0_373 = arith.constant 0 : index
    %c0_374 = arith.constant 0 : index
    %505 = vector.load %arg3[%c4_371, %c1_372, %c0_373, %c0_374] : memref<6x2x1x128xf32, #tpu.memory_space<vmem>>, vector<1x1x1x128xf32>
    %506 = vector.shape_cast %505 : vector<1x1x1x128xf32> to vector<1x128xf32>
    %507 = arith.mulf %491, %504 : vector<1x128xf32>
    %508 = arith.subf %506, %507 : vector<1x128xf32>
    %509 = vector.broadcast %504 : vector<1x128xf32> to vector<32x128xf32>
    %510 = arith.mulf %483, %509 : vector<32x128xf32>
    %511 = vector.broadcast %508 : vector<1x128xf32> to vector<32x128xf32>
    %512 = arith.addf %510, %511 : vector<32x128xf32>
    %513 = arith.addf %422, %512 : vector<32x128xf32>
    %c1_i32_375 = arith.constant 1 : i32
    %514 = tpu.dynamic_rotate %513 by %c1_i32_375 dim 0 : vector<32x128xf32>, i32 -> vector<32x128xf32>
    %c31_i32_376 = arith.constant 31 : i32
    %515 = tpu.dynamic_rotate %513 by %c31_i32_376 dim 0 : vector<32x128xf32>, i32 -> vector<32x128xf32>
    %516 = arith.select %19, %515, %514 : vector<32x128xi1>, vector<32x128xf32>
    %517 = arith.select %21, %514, %515 : vector<32x128xi1>, vector<32x128xf32>
    %c5 = arith.constant 5 : index
    %c0_377 = arith.constant 0 : index
    %c0_378 = arith.constant 0 : index
    %c0_379 = arith.constant 0 : index
    %c0_380 = arith.constant 0 : index
    %518 = vector.load %arg1[%c5, %c0_377, %c0_378, %c0_379, %c0_380] : memref<6x2x3x128x128xf32, #tpu.memory_space<vmem>>, vector<1x1x1x128x128xf32>
    %519 = vector.shape_cast %518 : vector<1x1x1x128x128xf32> to vector<128x128xf32>
    %cst_381 = arith.constant dense<0.000000e+00> : vector<32x128xf32>
    %520 = tpu.matmul %516, %519, %cst_381 {dimension_numbers = #tpu.dot_dimension_numbers<[1], [0], [0], [1], [0, 0, 1, 1], [], []>} : vector<32x128xf32>, vector<128x128xf32>, vector<32x128xf32> -> vector<32x128xf32>
    %c5_382 = arith.constant 5 : index
    %c0_383 = arith.constant 0 : index
    %c1_384 = arith.constant 1 : index
    %c0_385 = arith.constant 0 : index
    %c0_386 = arith.constant 0 : index
    %521 = vector.load %arg1[%c5_382, %c0_383, %c1_384, %c0_385, %c0_386] : memref<6x2x3x128x128xf32, #tpu.memory_space<vmem>>, vector<1x1x1x128x128xf32>
    %522 = vector.shape_cast %521 : vector<1x1x1x128x128xf32> to vector<128x128xf32>
    %cst_387 = arith.constant dense<0.000000e+00> : vector<32x128xf32>
    %523 = tpu.matmul %513, %522, %cst_387 {dimension_numbers = #tpu.dot_dimension_numbers<[1], [0], [0], [1], [0, 0, 1, 1], [], []>} : vector<32x128xf32>, vector<128x128xf32>, vector<32x128xf32> -> vector<32x128xf32>
    %524 = arith.addf %520, %523 : vector<32x128xf32>
    %c5_388 = arith.constant 5 : index
    %c0_389 = arith.constant 0 : index
    %c2_390 = arith.constant 2 : index
    %c0_391 = arith.constant 0 : index
    %c0_392 = arith.constant 0 : index
    %525 = vector.load %arg1[%c5_388, %c0_389, %c2_390, %c0_391, %c0_392] : memref<6x2x3x128x128xf32, #tpu.memory_space<vmem>>, vector<1x1x1x128x128xf32>
    %526 = vector.shape_cast %525 : vector<1x1x1x128x128xf32> to vector<128x128xf32>
    %cst_393 = arith.constant dense<0.000000e+00> : vector<32x128xf32>
    %527 = tpu.matmul %517, %526, %cst_393 {dimension_numbers = #tpu.dot_dimension_numbers<[1], [0], [0], [1], [0, 0, 1, 1], [], []>} : vector<32x128xf32>, vector<128x128xf32>, vector<32x128xf32> -> vector<32x128xf32>
    %528 = arith.addf %524, %527 : vector<32x128xf32>
    %cst_394 = arith.constant dense<0.000000e+00> : vector<128xf32>
    %529 = vector.multi_reduction <add>, %528, %cst_394 [0] : vector<32x128xf32> to vector<128xf32>
    %530 = vector.shape_cast %529 : vector<128xf32> to vector<1x128xf32>
    %531 = arith.mulf %528, %528 : vector<32x128xf32>
    %cst_395 = arith.constant dense<0.000000e+00> : vector<128xf32>
    %532 = vector.multi_reduction <add>, %531, %cst_395 [0] : vector<32x128xf32> to vector<128xf32>
    %533 = vector.shape_cast %532 : vector<128xf32> to vector<1x128xf32>
    %cst_396 = arith.constant dense<0.000000e+00> : vector<1x128xf32>
    %534 = tpu.matmul %530, %58, %cst_396 {dimension_numbers = #tpu.dot_dimension_numbers<[1], [0], [0], [1], [0, 0, 1, 1], [], []>} : vector<1x128xf32>, vector<128x128xf32>, vector<1x128xf32> -> vector<1x128xf32>
    %cst_397 = arith.constant 0.001953125 : f32
    %535 = vector.broadcast %cst_397 : f32 to vector<1x128xf32>
    %536 = arith.mulf %534, %535 : vector<1x128xf32>
    %cst_398 = arith.constant dense<0.000000e+00> : vector<1x128xf32>
    %537 = tpu.matmul %533, %58, %cst_398 {dimension_numbers = #tpu.dot_dimension_numbers<[1], [0], [0], [1], [0, 0, 1, 1], [], []>} : vector<1x128xf32>, vector<128x128xf32>, vector<1x128xf32> -> vector<1x128xf32>
    %cst_399 = arith.constant 0.001953125 : f32
    %538 = vector.broadcast %cst_399 : f32 to vector<1x128xf32>
    %539 = arith.mulf %537, %538 : vector<1x128xf32>
    %540 = arith.mulf %536, %536 : vector<1x128xf32>
    %541 = arith.subf %539, %540 : vector<1x128xf32>
    %cst_400 = arith.constant 0.000000e+00 : f32
    %542 = vector.broadcast %cst_400 : f32 to vector<1x128xf32>
    %543 = arith.maximumf %541, %542 : vector<1x128xf32>
    %c5_401 = arith.constant 5 : index
    %c0_402 = arith.constant 0 : index
    %c0_403 = arith.constant 0 : index
    %c0_404 = arith.constant 0 : index
    %544 = vector.load %arg2[%c5_401, %c0_402, %c0_403, %c0_404] : memref<6x2x1x128xf32, #tpu.memory_space<vmem>>, vector<1x1x1x128xf32>
    %545 = vector.shape_cast %544 : vector<1x1x1x128xf32> to vector<1x128xf32>
    %cst_405 = arith.constant 9.99999974E-6 : f32
    %546 = vector.broadcast %cst_405 : f32 to vector<1x128xf32>
    %547 = arith.addf %543, %546 : vector<1x128xf32>
    %548 = math.rsqrt %547 : vector<1x128xf32>
    %549 = arith.mulf %545, %548 : vector<1x128xf32>
    %c5_406 = arith.constant 5 : index
    %c0_407 = arith.constant 0 : index
    %c0_408 = arith.constant 0 : index
    %c0_409 = arith.constant 0 : index
    %550 = vector.load %arg3[%c5_406, %c0_407, %c0_408, %c0_409] : memref<6x2x1x128xf32, #tpu.memory_space<vmem>>, vector<1x1x1x128xf32>
    %551 = vector.shape_cast %550 : vector<1x1x1x128xf32> to vector<1x128xf32>
    %552 = arith.mulf %536, %549 : vector<1x128xf32>
    %553 = arith.subf %551, %552 : vector<1x128xf32>
    %554 = vector.broadcast %549 : vector<1x128xf32> to vector<32x128xf32>
    %555 = arith.mulf %528, %554 : vector<32x128xf32>
    %556 = vector.broadcast %553 : vector<1x128xf32> to vector<32x128xf32>
    %557 = arith.addf %555, %556 : vector<32x128xf32>
    %cst_410 = arith.constant 0.000000e+00 : f32
    %558 = vector.broadcast %cst_410 : f32 to vector<32x128xf32>
    %559 = arith.maximumf %557, %558 : vector<32x128xf32>
    %c1_i32_411 = arith.constant 1 : i32
    %560 = tpu.dynamic_rotate %559 by %c1_i32_411 dim 0 : vector<32x128xf32>, i32 -> vector<32x128xf32>
    %c31_i32_412 = arith.constant 31 : i32
    %561 = tpu.dynamic_rotate %559 by %c31_i32_412 dim 0 : vector<32x128xf32>, i32 -> vector<32x128xf32>
    %562 = arith.select %19, %561, %560 : vector<32x128xi1>, vector<32x128xf32>
    %563 = arith.select %21, %560, %561 : vector<32x128xi1>, vector<32x128xf32>
    %c5_413 = arith.constant 5 : index
    %c1_414 = arith.constant 1 : index
    %c0_415 = arith.constant 0 : index
    %c0_416 = arith.constant 0 : index
    %c0_417 = arith.constant 0 : index
    %564 = vector.load %arg1[%c5_413, %c1_414, %c0_415, %c0_416, %c0_417] : memref<6x2x3x128x128xf32, #tpu.memory_space<vmem>>, vector<1x1x1x128x128xf32>
    %565 = vector.shape_cast %564 : vector<1x1x1x128x128xf32> to vector<128x128xf32>
    %cst_418 = arith.constant dense<0.000000e+00> : vector<32x128xf32>
    %566 = tpu.matmul %562, %565, %cst_418 {dimension_numbers = #tpu.dot_dimension_numbers<[1], [0], [0], [1], [0, 0, 1, 1], [], []>} : vector<32x128xf32>, vector<128x128xf32>, vector<32x128xf32> -> vector<32x128xf32>
    %c5_419 = arith.constant 5 : index
    %c1_420 = arith.constant 1 : index
    %c1_421 = arith.constant 1 : index
    %c0_422 = arith.constant 0 : index
    %c0_423 = arith.constant 0 : index
    %567 = vector.load %arg1[%c5_419, %c1_420, %c1_421, %c0_422, %c0_423] : memref<6x2x3x128x128xf32, #tpu.memory_space<vmem>>, vector<1x1x1x128x128xf32>
    %568 = vector.shape_cast %567 : vector<1x1x1x128x128xf32> to vector<128x128xf32>
    %cst_424 = arith.constant dense<0.000000e+00> : vector<32x128xf32>
    %569 = tpu.matmul %559, %568, %cst_424 {dimension_numbers = #tpu.dot_dimension_numbers<[1], [0], [0], [1], [0, 0, 1, 1], [], []>} : vector<32x128xf32>, vector<128x128xf32>, vector<32x128xf32> -> vector<32x128xf32>
    %570 = arith.addf %566, %569 : vector<32x128xf32>
    %c5_425 = arith.constant 5 : index
    %c1_426 = arith.constant 1 : index
    %c2_427 = arith.constant 2 : index
    %c0_428 = arith.constant 0 : index
    %c0_429 = arith.constant 0 : index
    %571 = vector.load %arg1[%c5_425, %c1_426, %c2_427, %c0_428, %c0_429] : memref<6x2x3x128x128xf32, #tpu.memory_space<vmem>>, vector<1x1x1x128x128xf32>
    %572 = vector.shape_cast %571 : vector<1x1x1x128x128xf32> to vector<128x128xf32>
    %cst_430 = arith.constant dense<0.000000e+00> : vector<32x128xf32>
    %573 = tpu.matmul %563, %572, %cst_430 {dimension_numbers = #tpu.dot_dimension_numbers<[1], [0], [0], [1], [0, 0, 1, 1], [], []>} : vector<32x128xf32>, vector<128x128xf32>, vector<32x128xf32> -> vector<32x128xf32>
    %574 = arith.addf %570, %573 : vector<32x128xf32>
    %cst_431 = arith.constant dense<0.000000e+00> : vector<128xf32>
    %575 = vector.multi_reduction <add>, %574, %cst_431 [0] : vector<32x128xf32> to vector<128xf32>
    %576 = vector.shape_cast %575 : vector<128xf32> to vector<1x128xf32>
    %577 = arith.mulf %574, %574 : vector<32x128xf32>
    %cst_432 = arith.constant dense<0.000000e+00> : vector<128xf32>
    %578 = vector.multi_reduction <add>, %577, %cst_432 [0] : vector<32x128xf32> to vector<128xf32>
    %579 = vector.shape_cast %578 : vector<128xf32> to vector<1x128xf32>
    %cst_433 = arith.constant dense<0.000000e+00> : vector<1x128xf32>
    %580 = tpu.matmul %576, %58, %cst_433 {dimension_numbers = #tpu.dot_dimension_numbers<[1], [0], [0], [1], [0, 0, 1, 1], [], []>} : vector<1x128xf32>, vector<128x128xf32>, vector<1x128xf32> -> vector<1x128xf32>
    %cst_434 = arith.constant 0.001953125 : f32
    %581 = vector.broadcast %cst_434 : f32 to vector<1x128xf32>
    %582 = arith.mulf %580, %581 : vector<1x128xf32>
    %cst_435 = arith.constant dense<0.000000e+00> : vector<1x128xf32>
    %583 = tpu.matmul %579, %58, %cst_435 {dimension_numbers = #tpu.dot_dimension_numbers<[1], [0], [0], [1], [0, 0, 1, 1], [], []>} : vector<1x128xf32>, vector<128x128xf32>, vector<1x128xf32> -> vector<1x128xf32>
    %cst_436 = arith.constant 0.001953125 : f32
    %584 = vector.broadcast %cst_436 : f32 to vector<1x128xf32>
    %585 = arith.mulf %583, %584 : vector<1x128xf32>
    %586 = arith.mulf %582, %582 : vector<1x128xf32>
    %587 = arith.subf %585, %586 : vector<1x128xf32>
    %cst_437 = arith.constant 0.000000e+00 : f32
    %588 = vector.broadcast %cst_437 : f32 to vector<1x128xf32>
    %589 = arith.maximumf %587, %588 : vector<1x128xf32>
    %c5_438 = arith.constant 5 : index
    %c1_439 = arith.constant 1 : index
    %c0_440 = arith.constant 0 : index
    %c0_441 = arith.constant 0 : index
    %590 = vector.load %arg2[%c5_438, %c1_439, %c0_440, %c0_441] : memref<6x2x1x128xf32, #tpu.memory_space<vmem>>, vector<1x1x1x128xf32>
    %591 = vector.shape_cast %590 : vector<1x1x1x128xf32> to vector<1x128xf32>
    %cst_442 = arith.constant 9.99999974E-6 : f32
    %592 = vector.broadcast %cst_442 : f32 to vector<1x128xf32>
    %593 = arith.addf %589, %592 : vector<1x128xf32>
    %594 = math.rsqrt %593 : vector<1x128xf32>
    %595 = arith.mulf %591, %594 : vector<1x128xf32>
    %c5_443 = arith.constant 5 : index
    %c1_444 = arith.constant 1 : index
    %c0_445 = arith.constant 0 : index
    %c0_446 = arith.constant 0 : index
    %596 = vector.load %arg3[%c5_443, %c1_444, %c0_445, %c0_446] : memref<6x2x1x128xf32, #tpu.memory_space<vmem>>, vector<1x1x1x128xf32>
    %597 = vector.shape_cast %596 : vector<1x1x1x128xf32> to vector<1x128xf32>
    %598 = arith.mulf %582, %595 : vector<1x128xf32>
    %599 = arith.subf %597, %598 : vector<1x128xf32>
    %600 = vector.broadcast %595 : vector<1x128xf32> to vector<32x128xf32>
    %601 = arith.mulf %574, %600 : vector<32x128xf32>
    %602 = vector.broadcast %599 : vector<1x128xf32> to vector<32x128xf32>
    %603 = arith.addf %601, %602 : vector<32x128xf32>
    %604 = arith.addf %513, %603 : vector<32x128xf32>
    %c0_447 = arith.constant 0 : index
    %c0_448 = arith.constant 0 : index
    %605 = vector.load %arg4[%c0_447, %c0_448] : memref<32x128xf32, #tpu.memory_space<vmem>>, vector<32x128xf32>
    tpu.vector_store %arg4[%c0_447, %c0_448], %604 {strides = array<i32>} : memref<32x128xf32, #tpu.memory_space<vmem>>, vector<32x128xf32>,
    return
  }
}

</mosaic_0001>

<bundles_post_ra>
// kernel: shared_block.1
= control target key start
LH: loop header
LB: loop body
LE: loop exit
PB: predicated region body
PF: predicated region fallthrough
CT: control target
= control target key end

     0   :  { %v21_v0 = vlaneseq  ;;  %s8476_s1 = inlined_call_operand.vmem [shape: f32[6,2,3,128,128], index: 1, kind: input, shape index: {}]   ;;  %s8477_s0 = inlined_call_operand.vmem [shape: f32[32,128], index: 0, kind: input, shape index: {}]   ;;  %s8478_s2 = inlined_call_operand.vmem [shape: f32[6,2,1,128], index: 2, kind: input, shape index: {}]   ;;  %s8479_s3 = inlined_call_operand.vmem [shape: f32[6,2,1,128], index: 3, kind: input, shape index: {}]   ;;  %s8480_s4 = inlined_call_operand.vmem [shape: f32[32,128], index: 4, kind: output, shape index: {}]  }
   0x1   :  { %v3630_v1 = vld [vmem:[%s8476_s1 + $0x178] sm:$0xff]  ;;  %v3629_v2 = vld [vmem:[%s8476_s1 + $0x170] sm:$0xff]  ;;  %v3628_v6 = vld [vmem:[%s8476_s1 + $0x168] sm:$0xff] }
   0x2   :  { %v3614_v3 = vld [vmem:[%s8476_s1 + $0xf8] sm:$0xff]  ;;  %482 = vmatpush.msra.mxu2 %v3630_v1  ;;  %v3613_v5 = vld [vmem:[%s8476_s1 + $0xf0] sm:$0xff]  ;;  %v3612_v8 = vld [vmem:[%s8476_s1 + $0xe8] sm:$0xff]  ;;  %v4644_v9 = vshrl.u32 %v21_v0, 7  ;;  %v287_v10 = vand.u32 127, %v21_v0 }
   0x3   :  { %407 = vmatpush.msra.mxu0 %v3614_v3  ;;  %v389_v4 = vld [vmem:[%s8476_s1 + $0x78] sm:$0xff]  ;;  %v388_v7 = vld [vmem:[%s8476_s1 + $0x70] sm:$0xff]  ;;  %v387_v11 = vld [vmem:[%s8476_s1 + $0x68] sm:$0xff] }
   0x4   :  { %436 = vmatpush.msra.mxu1 %v389_v4  ;;  %483 = vmatpush.msra.mxu2 %v3629_v2  ;;  %v3627_v12 = vld [vmem:[%s8476_s1 + $0x160] sm:$0xff]  ;;  %v4656_v14 = vadd.s32 8, %v4644_v9  ;;  %v3626_v16 = vld [vmem:[%s8476_s1 + $0x158] sm:$0xff]  ;;  %v4668_v19 = vand.u32 7, %v287_v10  ;;  %v3625_v21 = vld [vmem:[%s8476_s1 + $0x150] sm:$0xff]  ;;  %v4715_v34 = vadd.s32 16, %v4644_v9 }
   0x5   :  { %408 = vmatpush.msra.mxu0 %v3613_v5  ;;  %v3611_v13 = vld [vmem:[%s8476_s1 + $0xe0] sm:$0xff]  ;;  %v3610_v17 = vld [vmem:[%s8476_s1 + $0xd8] sm:$0xff]  ;;  %v3609_v22 = vld [vmem:[%s8476_s1 + $0xd0] sm:$0xff]  ;;  %v4734_v41 = vadd.s32 24, %v4644_v9  ;;  %v30_v55 = vand.u32 15, %v4644_v9  ;;  %vm8481_vm3 = vcmp.lt.s32.totalorder %v4644_v9, 1 }
   0x6   :  { %437 = vmatpush.msra.mxu1 %v388_v7  ;;  %484 = vmatpush.msra.mxu2 %v3628_v6  ;;  %v386_v15 = vld [vmem:[%s8476_s1 + $0x60] sm:$0xff]  ;;  %v105_v18 = vand.u32 7, %v4656_v14  ;;  %v385_v20 = vld [vmem:[%s8476_s1 + $0x58] sm:$0xff]  ;;  %v384_v24 = vld [vmem:[%s8476_s1 + $0x50] sm:$0xff]  ;;  %v112_v38 = vand.u32 7, %v4715_v34  ;;  %vm8482_vm4 = vcmp.lt.s32.totalorder %v4644_v9, 7 }
   0x7   :  { %409 = vmatpush.msra.mxu0 %v3612_v8  ;;  %v3624_v25 = vld [vmem:[%s8476_s1 + $0x148] sm:$0xff]  ;;  %v3623_v28 = vld [vmem:[%s8476_s1 + $0x140] sm:$0xff]  ;;  %v3622_v31 = vld [vmem:[%s8476_s1 + $0x138] sm:$0xff]  ;;  %v119_v47 = vand.u32 7, %v4734_v41  ;;  %vm4805_vm5 = vcmp.eq.s32.totalorder %v30_v55, 0  ;;  %v8553_v2 = vmov 0 }
   0x8   :  { %438 = vmatpush.msra.mxu1 %v387_v11  ;;  %485 = vmatpush.msra.mxu2 %v3627_v12  ;;  %vm4680_vm0 = vcmp.eq.s32.totalorder %v105_v18, %v4668_v19  ;;  %v3608_v26 = vld [vmem:[%s8476_s1 + $0xc8] sm:$0xff]  ;;  %v3607_v29 = vld [vmem:[%s8476_s1 + $0xc0] sm:$0xff]  ;;  %v3606_v32 = vld [vmem:[%s8476_s1 + $0xb8] sm:$0xff]  ;;  %vm4740_vm1 = vcmp.eq.s32.totalorder %v112_v38, %v4668_v19  ;;  %v8554_v2 = vsel %vm4805_vm5, 4294967295, %v8553_v2  ;;  %v37_v11 = vand.u32 15, %v4656_v14 }
   0x9   :  { %410 = vmatpush.msra.mxu0 %v3611_v13  ;;  %v383_v27 = vld [vmem:[%s8476_s1 + $0x48] sm:$0xff]  ;;  %v382_v30 = vld [vmem:[%s8476_s1 + $0x40] sm:$0xff]  ;;  %v381_v33 = vld [vmem:[%s8476_s1 + $0x38] sm:$0xff]  ;;  %vm4774_vm2 = vcmp.eq.s32.totalorder %v119_v47, %v4668_v19  ;;  %v44_v18 = vand.u32 15, %v4715_v34  ;;  %v92_v34 = vadd.s32 112, %v4644_v9  ;;  %v4594_v38 = vmov 1.0  }
   0xa   :  { %439 = vmatpush.msra.mxu1 %v386_v15  ;;  %486 = vmatpush.msra.mxu2 %v3626_v16  ;;  %v3621_v35 = vld [vmem:[%s8476_s1 + $0x130] sm:$0xff]  ;;  %v3620_v39 = vld [vmem:[%s8476_s1 + $0x128] sm:$0xff]  ;;  %v3619_v44 = vld [vmem:[%s8476_s1 + $0x120] sm:$0xff]  ;;  %vm4829_vm6 = vcmp.eq.s32.totalorder %v37_v11, 15  ;;  %v8555_v15 = vmov 0  ;;  %v86_v55 = vadd.s32 64, %v4644_v9 }
   0xb   :  { %411 = vmatpush.msra.mxu0 %v3610_v17  ;;  %v3605_v36 = vld [vmem:[%s8476_s1 + $0xb0] sm:$0xff]  ;;  %v3604_v40 = vld [vmem:[%s8476_s1 + $0xa8] sm:$0xff]  ;;  %v3603_v45 = vld [vmem:[%s8476_s1 + $0xa0] sm:$0xff]  ;;  %v8556_v15 = vsel %vm4829_vm6, 4294967295, %v8555_v15  ;;  %vm4841_vm7 = vcmp.eq.s32.totalorder %v44_v18, 0 }
   0xc   :  { %440 = vmatpush.msra.mxu1 %v385_v20  ;;  %487 = vmatpush.msra.mxu2 %v3625_v21  ;;  %v380_v37 = vld [vmem:[%s8476_s1 + $0x30] sm:$0xff]  ;;  %v379_v42 = vld [vmem:[%s8476_s1 + $0x28] sm:$0xff]  ;;  %v4753_v46 = vld [vmem:[%s8477_s0 + $0x18] sm:$0xff] }
   0xd   :  { %412 = vmatpush.msra.mxu0 %v3609_v22  ;;  %v3618_v48 = vld [vmem:[%s8476_s1 + $0x118] sm:$0xff]  ;;  %v378_v49 = vld [vmem:[%s8476_s1 + $0x20] sm:$0xff]  ;;  %v18_v52 = vld [vmem:[%s8477_s0 + $0x8] sm:$0xff]  ;;  %v351_v57 = vrot.slane %v4753_v46, 7  ;;  %v360_v21 = vrot.slane %v4753_v46, 1  ;;  %v8557_v22 = vmov 0 }
   0xe   :  { %441 = vmatpush.msra.mxu1 %v384_v24  ;;  %488 = vmatpush.msra.mxu2 %v3624_v25  ;;  %v3602_v50 = vld [vmem:[%s8476_s1 + $0x98] sm:$0xff]  ;;  %v4768_v51 = vld [vmem:[%s8477_s0] sm:$0xff]  ;;  %v3617_v58 = vld [vmem:[%s8476_s1 + $0x110] sm:$0xff]  ;;  %v358_v62 = vrot.slane %v18_v52, 1  ;;  %v349_v12 = vrot.slane %v18_v52, 7  ;;  %v8558_v22 = vsel %vm4841_vm7, 4294967295, %v8557_v22 }
   0xf   :  { %413 = vmatpush.msra.mxu0 %v3608_v26  ;;  %v377_v54 = vld [vmem:[%s8476_s1 + $0x18] sm:$0xff]  ;;  %v348_v56 = vrot.slane %v4768_v51, 7  ;;  %v3601_v59 = vld [vmem:[%s8476_s1 + $0x90] sm:$0xff]  ;;  %v357_v61 = vrot.slane %v4768_v51, 1  ;;  %v3616_v63 = vld [vmem:[%s8476_s1 + $0x108] sm:$0xff] }
  0x10   :  { %442 = vmatpush.msra.mxu1 %v383_v27  ;;  %489 = vmatpush.msra.mxu2 %v3623_v28  ;;  %v376_v60 = vld [vmem:[%s8476_s1 + $0x10] sm:$0xff]  ;;  %v3600_v0 = vld [vmem:[%s8476_s1 + $0x88] sm:$0xff]  ;;  %v3615_v5 = vld [vmem:[%s8476_s1 + $0x100] sm:$0xff]  ;;  %v51_v27 = vand.u32 15, %v4734_v41  ;;  %v8559_v28 = vmov 0  ;;  %v90_v41 = vadd.s32 96, %v4644_v9 }
  0x11   :  { %414 = vmatpush.msra.mxu0 %v3607_v29  ;;  %v375_v1 = vld [vmem:[%s8476_s1 + $0x8] sm:$0xff]  ;;  %v356_v3 = vsel %vm8481_vm3, %v351_v57, %v348_v56  ;;  %v19_v4 = vld [vmem:[%s8477_s0 + $0x10] sm:$0xff]  ;;  %v3599_v6 = vld [vmem:[%s8476_s1 + $0x80] sm:$0xff]  ;;  %v364_v7 = vsel %vm8482_vm4, %v357_v61, %v358_v62  ;;  %v355_v16 = vsel %vm8481_vm3, %v348_v56, %v349_v12 }
  0x12   :  { %443 = vmatpush.msra.mxu1 %v382_v30  ;;  %490 = vmatpush.msra.mxu2 %v3622_v31  ;;  %v374_v8 = vld [vmem:[%s8476_s1] sm:$0xff]  ;;  %v366_v10 = vsel %vm4805_vm5, %v364_v7, %v356_v3  ;;  %v359_v13 = vrot.slane %v19_v4, 1  ;;  %v350_v20 = vrot.slane %v19_v4, 7  ;;  %vm4852_vm8 = vcmp.eq.s32.totalorder %v51_v27, 15 }
  0x13   :  { %415 = vmatpush.msra.mxu0 %v3606_v32  ;;  %v8560_v28 = vsel %vm4852_vm8, 4294967295, %v8559_v28  ;;  %v365_v30 = vsel %vm8482_vm4, %v360_v21, %v357_v61  ;;  %v93_v32 = vadd.s32 120, %v4644_v9  ;;  %v84_v61 = vadd.s32 48, %v4644_v9 }
  0x14   :  { %444 = vmatpush.msra.mxu1 %v381_v33  ;;  %491 = vmatpush.msra.mxu2 %v3621_v35  ;;  %v363_v17 = vsel %vm8482_vm4, %v358_v62, %v359_v13  ;;  %v354_v24 = vsel %vm8481_vm3, %v349_v12, %v350_v20  ;;  %v362_v25 = vsel %vm8482_vm4, %v359_v13, %v360_v21  ;;  %v8561_v35 = vmov 0 }
  0x15   :  { %416 = vmatpush.msra.mxu0 %v3605_v36  ;;  %v371_v14 = vsel %vm4829_vm6, %v355_v16, %v363_v17  ;;  %v368_v26 = vsel %vm4841_vm7, %v362_v25, %v354_v24  ;;  %v353_v29 = vsel %vm8481_vm3, %v350_v20, %v351_v57  ;;  %v203_v33 = vand.u32 7, %v93_v32 }
  0x16   :  { %445 = vmatpush.msra.mxu1 %v380_v37  ;;  %492 = vmatpush.msra.mxu2 %v3620_v39  ;;  %v373_v31 = vsel %vm4852_vm8, %v353_v29, %v365_v30  ;;  %v196_v36 = vand.u32 7, %v92_v34  ;;  %v91_v37 = vadd.s32 104, %v4644_v9  ;;  %v8563_v39 = vmov 0 }
  0x17   :  { %417 = vmatpush.msra.mxu0 %v3604_v40  ;;  %vm4866_vm9 = vcmp.eq.s32.totalorder %v203_v33, %v4668_v19  ;;  %v154_v57 = vand.u32 7, %v86_v55  ;;  %v98_v12 = vand.u32 7, %v4644_v9  ;;  %v8585_v17 = vmov 0 }
  0x18   :  { %446 = vmatpush.msra.mxu1 %v379_v42  ;;  %493 = vmatpush.msra.mxu2 %v3619_v44  ;;  %v8562_v35 = vsel %vm4866_vm9, 4294967295, %v8561_v35  ;;  %vm4878_vm10 = vcmp.eq.s32.totalorder %v196_v36, %v4668_v19  ;;  %v189_v40 = vand.u32 7, %v91_v37  ;;  %v8565_v42 = vmov 0 }
  0x19   :  { %418 = vmatpush.msra.mxu0 %v3603_v45  ;;  %3631 = vmatpush.msk.msra.mxu3 %vm4866_vm9, %v4594_v38  ;;  %v8564_v39 = vsel %vm4878_vm10, 4294967295, %v8563_v39  ;;  %v182_v44 = vand.u32 7, %v90_v41  ;;  %v89_v45 = vadd.s32 88, %v4644_v9  ;;  %vm4950_vm3 = vcmp.eq.s32.totalorder %v154_v57, %v4668_v19 }
  0x1a   :  { %447 = vmatpush.msra.mxu1 %v378_v49  ;;  %494 = vmatpush.msra.mxu2 %v3618_v48  ;;  %vm4890_vm11 = vcmp.eq.s32.totalorder %v189_v40, %v4668_v19  ;;  %v88_v48 = vadd.s32 80, %v4644_v9  ;;  %v8569_v49 = vmov 0  ;;  %vm5021_vm5 = vcmp.eq.s32.totalorder %v98_v12, %v4668_v19  ;;  %v3710_v12 = vld [vmem:[%s8476_s1 + $0x2f8] sm:$0xff] }
  0x1b   :  { %419 = vmatpush.msra.mxu0 %v3602_v50  ;;  %3632 = vmatpush.msk.msra.mxu3 %vm4878_vm10, %v4594_v38  ;;  %v8566_v42 = vsel %vm4890_vm11, 4294967295, %v8565_v42  ;;  %vm4902_vm12 = vcmp.eq.s32.totalorder %v182_v44, %v4668_v19  ;;  %v175_v47 = vand.u32 7, %v89_v45  ;;  %v8586_v17 = vsel %vm5021_vm5, 4294967295, %v8585_v17 }
  0x1c   :  { %448 = vmatpush.msra.mxu1 %v377_v54  ;;  %495 = vmatpush.msra.mxu2 %v3617_v58  ;;  %v168_v50 = vand.u32 7, %v88_v48  ;;  %v85_v58 = vadd.s32 56, %v4644_v9 }
  0x1d   :  { %420 = vmatpush.msra.mxu0 %v3601_v59  ;;  %3633 = vmatpush.msk.msra.mxu3 %vm4890_vm11, %v4594_v38  ;;  %vm4914_vm13 = vcmp.eq.s32.totalorder %v175_v47, %v4668_v19  ;;  %v4482_v59 = vld [vmem:[%s8479_s3 + $0xa] sm:$0x1] }
  0x1e   :  { %449 = vmatpush.msra.mxu1 %v376_v60  ;;  %496 = vmatpush.msra.mxu2 %v3616_v63  ;;  %v8570_v49 = vsel %vm4914_vm13, 4294967295, %v8569_v49  ;;  %vm4926_vm14 = vcmp.eq.s32.totalorder %v168_v50, %v4668_v19  ;;  %v147_v60 = vand.u32 7, %v85_v58  ;;  %v140_v63 = vand.u32 7, %v84_v61 }
  0x1f   :  { %421 = vmatpush.msra.mxu0 %v3600_v0  ;;  %3634 = vmatpush.msk.msra.mxu3 %vm4902_vm12, %v4594_v38  ;;  %v83_v0 = vadd.s32 40, %v4644_v9 }
  0x20   :  { %450 = vmatpush.msra.mxu1 %v375_v1  ;;  %497 = vmatpush.msra.mxu2 %v3615_v5  ;;  %vm4962_vm4 = vcmp.eq.s32.totalorder %v147_v60, %v4668_v19  ;;  %vm4974_vm8 = vcmp.eq.s32.totalorder %v140_v63, %v4668_v19 }
  0x21   :  { %422 = vmatpush.msra.mxu0 %v3599_v6  ;;  %498 = vmatmul.f32.vlgmr.msra.gmra.mxu2 %v364_v7  ;;  %v133_v5 = vand.u32 7, %v83_v0  ;;  %v82_v6 = vadd.s32 32, %v4644_v9 }
  0x22   :  { %451 = vmatpush.msra.mxu1 %v374_v8  ;;  %423 = vmatmul.f32.vlgmr.msra.gmra.mxu0 %v4768_v51  ;;  %v87_v51 = vadd.s32 72, %v4644_v9 }
  0x23   :  { %452 = vmatmul.f32.vlgmr.msra.gmra.mxu1 %v366_v10  ;;  %3647 = vmatpush.msk.msrb.mxu0 %vm4866_vm9, %v4594_v38  ;;  %vm4986_vm7 = vcmp.eq.s32.totalorder %v133_v5, %v4668_v19  ;;  %v126_v8 = vand.u32 7, %v82_v6 }
  0x24   :  { %3635 = vmatpush.msk.msra.mxu3 %vm4914_vm13, %v4594_v38  ;;  %v161_v54 = vand.u32 7, %v87_v51 }
  0x25   :  { %3648 = vmatpush.msk.msrb.mxu0 %vm4878_vm10, %v4594_v38  ;;  %vm4997_vm6 = vcmp.eq.s32.totalorder %v126_v8, %v4668_v19  ;;  %v3694_v8 = vld [vmem:[%s8476_s1 + $0x278] sm:$0xff] }
  0x26   :  { %3636 = vmatpush.msk.msra.mxu3 %vm4926_vm14, %v4594_v38  ;;  %vm4938_vm15 = vcmp.eq.s32.totalorder %v161_v54, %v4668_v19  ;;  %674 = vmatpush.msrb.mxu1 %v3694_v8  ;;  %v3699_v8 = vld [vmem:[%s8476_s1 + $0x2a0] sm:$0xff] }
  0x27   :  { %3649 = vmatpush.msk.msrb.mxu0 %vm4890_vm11, %v4594_v38 }
  0x28   :  { %3637 = vmatpush.msk.msra.mxu3 %vm4938_vm15, %v4594_v38 }
  0x29   :  { %501 = vmatmul.f32.gmra.mxu2 %v371_v14  ;;  %3650 = vmatpush.msk.msrb.mxu0 %vm4902_vm12, %v4594_v38 }
  0x2a   :  { %426 = vmatmul.f32.gmra.mxu0 %v18_v52  ;;  %v8571_v52 = vmov 0  ;;  %3638 = vmatpush.msk.msra.mxu3 %vm4950_vm3, %v4594_v38 }
  0x2b   :  { %455 = vmatmul.f32.gmra.mxu1 %v355_v16  ;;  %3651 = vmatpush.msk.msrb.mxu0 %vm4914_vm13, %v4594_v38  ;;  %v8572_v52 = vsel %vm4926_vm14, 4294967295, %v8571_v52 }
  0x2c   :  { %3639 = vmatpush.msk.msra.mxu3 %vm4962_vm4, %v4594_v38 }
  0x2d   :  { %3652 = vmatpush.msk.msrb.mxu0 %vm4926_vm14, %v4594_v38 }
  0x2e   :  { %3640 = vmatpush.msk.msra.mxu3 %vm4974_vm8, %v4594_v38 }
  0x2f   :  { %3653 = vmatpush.msk.msrb.mxu0 %vm4938_vm15, %v4594_v38 }
  0x30   :  { %3641 = vmatpush.msk.msra.mxu3 %vm4986_vm7, %v4594_v38 }
  0x31   :  { %504 = vmatmul.f32.gmra.mxu2 %v362_v25  ;;  %3654 = vmatpush.msk.msrb.mxu0 %vm4950_vm3, %v4594_v38 }
  0x32   :  { %429 = vmatmul.f32.gmra.mxu0 %v19_v4  ;;  %3642 = vmatpush.msk.msra.mxu3 %vm4997_vm6, %v4594_v38 }
  0x33   :  { %458 = vmatmul.f32.gmra.mxu1 %v368_v26  ;;  %3655 = vmatpush.msk.msrb.mxu0 %vm4962_vm4, %v4594_v38 }
  0x34   :  { %3643 = vmatpush.msk.msra.mxu3 %vm4774_vm2, %v4594_v38 }
  0x35   :  { %3656 = vmatpush.msk.msrb.mxu0 %vm4974_vm8, %v4594_v38 }
  0x36   :  { %3644 = vmatpush.msk.msra.mxu3 %vm4740_vm1, %v4594_v38 }
  0x37   :  { %3657 = vmatpush.msk.msrb.mxu0 %vm4986_vm7, %v4594_v38 }
  0x38   :  { %3645 = vmatpush.msk.msra.mxu3 %vm4680_vm0, %v4594_v38 }
  0x39   :  { %507 = vmatmul.f32.gmra.mxu2 %v373_v31  ;;  %3658 = vmatpush.msk.msrb.mxu0 %vm4997_vm6, %v4594_v38 }
  0x3a   :  { %432 = vmatmul.f32.gmra.mxu0 %v4753_v46  ;;  %v8567_v46 = vmov 0  ;;  %3646 = vmatpush.msk.msra.mxu3 %vm5021_vm5, %v4594_v38 }
  0x3b   :  { %461 = vmatmul.f32.gmra.mxu1 %v353_v29  ;;  %v8568_v46 = vsel %vm4902_vm12, 4294967295, %v8567_v46  ;;  %3659 = vmatpush.msk.msrb.mxu0 %vm4774_vm2, %v4594_v38 }
  0x3c   :  { %749 = vmatpush.msrb.mxu3 %v3710_v12 }
  0x3d   :  { %3660 = vmatpush.msk.msrb.mxu0 %vm4740_vm1, %v4594_v38 }
  0x3f   :  { %3661 = vmatpush.msk.msrb.mxu0 %vm4680_vm0, %v4594_v38 }
  0x41   :  { %3662 = vmatpush.msk.msrb.mxu0 %vm5021_vm5, %v4594_v38 }
  0x43   :  { %3711 = vmatpush.msk.msra.mxu0 %vm4866_vm9, %v4594_v38 }
  0x45   :  { %3712 = vmatpush.msk.msra.mxu0 %vm4878_vm10, %v4594_v38 }
  0x47   :  { %3713 = vmatpush.msk.msra.mxu0 %vm4890_vm11, %v4594_v38 }
  0x49   :  { %3714 = vmatpush.msk.msra.mxu0 %vm4902_vm12, %v4594_v38 }
  0x4b   :  { %3715 = vmatpush.msk.msra.mxu0 %vm4914_vm13, %v4594_v38 }
  0x4d   :  { %3716 = vmatpush.msk.msra.mxu0 %vm4926_vm14, %v4594_v38 }
  0x4f   :  { %3717 = vmatpush.msk.msra.mxu0 %vm4938_vm15, %v4594_v38 }
  0x51   :  { %3718 = vmatpush.msk.msra.mxu0 %vm4950_vm3, %v4594_v38 }
  0x53   :  { %3719 = vmatpush.msk.msra.mxu0 %vm4962_vm4, %v4594_v38 }
  0x55   :  { %3720 = vmatpush.msk.msra.mxu0 %vm4974_vm8, %v4594_v38 }
  0x57   :  { %3721 = vmatpush.msk.msra.mxu0 %vm4986_vm7, %v4594_v38 }
  0x59   :  { %3722 = vmatpush.msk.msra.mxu0 %vm4997_vm6, %v4594_v38 }
  0x5b   :  { %3723 = vmatpush.msk.msra.mxu0 %vm4774_vm2, %v4594_v38 }
  0x5d   :  { %3724 = vmatpush.msk.msra.mxu0 %vm4740_vm1, %v4594_v38 }
  0x5f   :  { %3725 = vmatpush.msk.msra.mxu0 %vm4680_vm0, %v4594_v38 }
  0x61   :  { %3726 = vmatpush.msk.msra.mxu0 %vm5021_vm5, %v4594_v38 }
  0x9f   :  { %v424_v1 = vpop.f32.mrf.mxu0 }
  0xa0   :  { %v453_v3 = vpop.f32.mrf.mxu1 }
  0xa1   :  { %v454_v21 = vadd.f32 %v453_v3, %v424_v1 }
  0xa4   :  { %v499_v11 = vpop.f32.mrf.mxu2 }
  0xa5   :  { %v5054_v27 = vadd.f32 %v499_v11, %v454_v21  ;;  %v3693_v11 = vld [vmem:[%s8476_s1 + $0x270] sm:$0xff]  ;;  %v3676_v21 = vld [vmem:[%s8476_s1 + $0x1e8] sm:$0xff] }
  0xa6   :  { %675 = vmatpush.msrb.mxu1 %v3693_v11 }
  0xa7   :  { %v427_v13 = vpop.f32.mrf.mxu0  ;;  %v524_v34 = vmul.f32 %v5054_v27, %v5054_v27 }
  0xa8   :  { %v456_v16 = vpop.f32.mrf.mxu1 }
  0xa9   :  { %v457_v20 = vadd.f32 %v456_v16, %v427_v13  ;;  %v3678_v13 = vld [vmem:[%s8476_s1 + $0x1f8] sm:$0xff]  ;;  %v3692_v16 = vld [vmem:[%s8476_s1 + $0x268] sm:$0xff] }
  0xaa   :  { %703 = vmatpush.msrb.mxu2 %v3678_v13  ;;  %676 = vmatpush.msrb.mxu1 %v3692_v16  ;;  %v3667_v13 = vld [vmem:[%s8476_s1 + $0x1a0] sm:$0xff]  ;;  %v3681_v16 = vld [vmem:[%s8476_s1 + $0x210] sm:$0xff] }
  0xac   :  { %v502_v14 = vpop.f32.mrf.mxu2 }
  0xad   :  { %v5049_v26 = vadd.f32 %v502_v14, %v457_v20  ;;  %v3709_v14 = vld [vmem:[%s8476_s1 + $0x2f0] sm:$0xff]  ;;  %v3708_v20 = vld [vmem:[%s8476_s1 + $0x2e8] sm:$0xff] }
  0xae   :  { %750 = vmatpush.msrb.mxu3 %v3709_v14  ;;  %v3666_v14 = vld [vmem:[%s8476_s1 + $0x198] sm:$0xff] }
  0xaf   :  { %v430_v19 = vpop.f32.mrf.mxu0  ;;  %v525_v32 = vmul.f32 %v5049_v26, %v5049_v26  ;;  %v515_v36 = vadd.f32 %v5049_v26, %v5054_v27 }
  0xb0   :  { %v459_v18 = vpop.f32.mrf.mxu1  ;;  %751 = vmatpush.msrb.mxu3 %v3708_v20 }
  0xb1   :  { %v460_v24 = vadd.f32 %v459_v18, %v430_v19  ;;  %v528_v41 = vadd.f32 %v525_v32, %v524_v34  ;;  %v3677_v19 = vld [vmem:[%s8476_s1 + $0x1f0] sm:$0xff]  ;;  %v3691_v18 = vld [vmem:[%s8476_s1 + $0x260] sm:$0xff]  ;;  %v3706_v32 = vld [vmem:[%s8476_s1 + $0x2d8] sm:$0xff] }
  0xb2   :  { %704 = vmatpush.msrb.mxu2 %v3677_v19  ;;  %677 = vmatpush.msrb.mxu1 %v3691_v18  ;;  %v3688_v34 = vld [vmem:[%s8476_s1 + $0x248] sm:$0xff]  ;;  %v3698_v19 = vld [vmem:[%s8476_s1 + $0x298] sm:$0xff] }
  0xb3   :  { %v3680_v18 = vld [vmem:[%s8476_s1 + $0x208] sm:$0xff] }
  0xb4   :  { %v505_v25 = vpop.f32.mrf.mxu2  ;;  %705 = vmatpush.msrb.mxu2 %v3676_v21  ;;  %v3665_v21 = vld [vmem:[%s8476_s1 + $0x190] sm:$0xff] }
  0xb5   :  { %v5056_v29 = vadd.f32 %v505_v25, %v460_v24  ;;  %v3690_v24 = vld [vmem:[%s8476_s1 + $0x258] sm:$0xff]  ;;  %v3707_v25 = vld [vmem:[%s8476_s1 + $0x2e0] sm:$0xff] }
  0xb6   :  { %678 = vmatpush.msrb.mxu1 %v3690_v24  ;;  %752 = vmatpush.msrb.mxu3 %v3707_v25  ;;  %v3697_v24 = vld [vmem:[%s8476_s1 + $0x290] sm:$0xff]  ;;  %v3679_v25 = vld [vmem:[%s8476_s1 + $0x200] sm:$0xff] }
  0xb7   :  { %v433_v30 = vpop.f32.mrf.mxu0  ;;  %v526_v37 = vmul.f32 %v5056_v29, %v5056_v29  ;;  %v516_v44 = vadd.f32 %v515_v36, %v5056_v29  ;;  %v3705_v36 = vld [vmem:[%s8476_s1 + $0x2d0] sm:$0xff] }
  0xb8   :  { %v462_v31 = vpop.f32.mrf.mxu1  ;;  %753 = vmatpush.msrb.mxu3 %v3706_v32 }
  0xb9   :  { %v463_v33 = vadd.f32 %v462_v31, %v433_v30  ;;  %v529_v47 = vadd.f32 %v528_v41, %v526_v37  ;;  %v3675_v30 = vld [vmem:[%s8476_s1 + $0x1e0] sm:$0xff]  ;;  %v3689_v31 = vld [vmem:[%s8476_s1 + $0x250] sm:$0xff]  ;;  %v3704_v41 = vld [vmem:[%s8476_s1 + $0x2c8] sm:$0xff] }
  0xba   :  { %706 = vmatpush.msrb.mxu2 %v3675_v30  ;;  %679 = vmatpush.msrb.mxu1 %v3689_v31  ;;  %v3673_v37 = vld [vmem:[%s8476_s1 + $0x1d0] sm:$0xff]  ;;  %v3696_v31 = vld [vmem:[%s8476_s1 + $0x288] sm:$0xff] }
  0xbb   :  { %754 = vmatpush.msrb.mxu3 %v3705_v36  ;;  %v3695_v36 = vld [vmem:[%s8476_s1 + $0x280] sm:$0xff] }
  0xbc   :  { %v508_v40 = vpop.f32.mrf.mxu2  ;;  %680 = vmatpush.msrb.mxu1 %v3688_v34  ;;  %v3663_v34 = vld [vmem:[%s8476_s1 + $0x180] sm:$0xff] }
  0xbd   :  { %v5076_v45 = vadd.f32 %v508_v40, %v463_v33  ;;  %v3674_v33 = vld [vmem:[%s8476_s1 + $0x1d8] sm:$0xff]  ;;  %v3687_v40 = vld [vmem:[%s8476_s1 + $0x240] sm:$0xff]  ;;  %755 = vmatpush.msrb.mxu3 %v3704_v41 }
  0xbe   :  { %707 = vmatpush.msrb.mxu2 %v3674_v33  ;;  %681 = vmatpush.msrb.mxu1 %v3687_v40  ;;  %v3664_v33 = vld [vmem:[%s8476_s1 + $0x188] sm:$0xff] }
  0xbf   :  { %v517_v48 = vadd.f32 %v516_v44, %v5076_v45  ;;  %v527_v50 = vmul.f32 %v5076_v45, %v5076_v45  ;;  %v3672_v44 = vld [vmem:[%s8476_s1 + $0x1c8] sm:$0xff] }
  0xc0   :  { %708 = vmatpush.msrb.mxu2 %v3673_v37 }
  0xc1   :  { %v530_v51 = vadd.f32 %v529_v47, %v527_v50  ;;  %v518_v54 = vrot.slane %v517_v48, 4  ;;  %v3686_v47 = vld [vmem:[%s8476_s1 + $0x238] sm:$0xff]  ;;  %v3671_v50 = vld [vmem:[%s8476_s1 + $0x1c0] sm:$0xff] }
  0xc2   :  { %709 = vmatpush.msrb.mxu2 %v3672_v44  ;;  %682 = vmatpush.msrb.mxu1 %v3686_v47 }
  0xc3   :  { %v519_v55 = vadd.f32 %v518_v54, %v517_v48  ;;  %v531_v57 = vrot.slane %v530_v51, 4  ;;  %v3703_v48 = vld [vmem:[%s8476_s1 + $0x2c0] sm:$0xff]  ;;  %v3702_v54 = vld [vmem:[%s8476_s1 + $0x2b8] sm:$0xff] }
  0xc4   :  { %756 = vmatpush.msrb.mxu3 %v3703_v48  ;;  %710 = vmatpush.msrb.mxu2 %v3671_v50  ;;  %v582_v48 = vld [vmem:[%s8478_s2] sm:$0x1] }
  0xc5   :  { %v520_v58 = vrot.slane %v519_v55, 2  ;;  %v532_v60 = vadd.f32 %v531_v57, %v530_v51  ;;  %v3685_v51 = vld [vmem:[%s8476_s1 + $0x230] sm:$0xff]  ;;  %v3684_v57 = vld [vmem:[%s8476_s1 + $0x228] sm:$0xff] }
  0xc6   :  { %683 = vmatpush.msrb.mxu1 %v3685_v51  ;;  %757 = vmatpush.msrb.mxu3 %v3702_v54 }
  0xc7   :  { %v521_v61 = vadd.f32 %v520_v58, %v519_v55  ;;  %v533_v63 = vrot.slane %v532_v60, 2  ;;  %v3670_v55 = vld [vmem:[%s8476_s1 + $0x1b8] sm:$0xff]  ;;  %v3701_v58 = vld [vmem:[%s8476_s1 + $0x2b0] sm:$0xff] }
  0xc8   :  { %711 = vmatpush.msrb.mxu2 %v3670_v55  ;;  %684 = vmatpush.msrb.mxu1 %v3684_v57  ;;  %v595_v55 = vld [vmem:[%s8479_s3] sm:$0x1] }
  0xc9   :  { %v522_v0 = vrot.slane %v521_v61, 1  ;;  %v534_v1 = vadd.f32 %v533_v63, %v532_v60  ;;  %v3669_v60 = vld [vmem:[%s8476_s1 + $0x1b0] sm:$0xff]  ;;  %758 = vmatpush.msrb.mxu3 %v3701_v58 }
  0xca   :  { %712 = vmatpush.msrb.mxu2 %v3669_v60 }
  0xcb   :  { %v523_v3 = vadd.f32 %v522_v0, %v521_v61  ;;  %v535_v5 = vrot.slane %v534_v1, 1  ;;  %v3683_v61 = vld [vmem:[%s8476_s1 + $0x220] sm:$0xff] }
  0xcc   :  { %685 = vmatpush.msrb.mxu1 %v3683_v61 }
  0xcd   :  { %553 = vmatmul.f32.vlgmr.msra.gmra.mxu3 %v523_v3  ;;  %v536_v6 = vadd.f32 %v535_v5, %v534_v1  ;;  %v3700_v1 = vld [vmem:[%s8476_s1 + $0x2a8] sm:$0xff] }
  0xce   :  { %v3668_v5 = vld [vmem:[%s8476_s1 + $0x1a8] sm:$0xff]  ;;  %759 = vmatpush.msrb.mxu3 %v3700_v1 }
  0xcf   :  { %574 = vmatmul.f32.vlgmr.msrb.gmra.mxu0 %v536_v6  ;;  %v3682_v6 = vld [vmem:[%s8476_s1 + $0x218] sm:$0xff]  ;;  %713 = vmatpush.msrb.mxu2 %v3668_v5 }
  0xd0   :  { %686 = vmatpush.msrb.mxu1 %v3682_v6  ;;  %760 = vmatpush.msrb.mxu3 %v3699_v8 }
  0xd1   :  { %714 = vmatpush.msrb.mxu2 %v3667_v13 }
  0xd2   :  { %687 = vmatpush.msrb.mxu1 %v3681_v16  ;;  %761 = vmatpush.msrb.mxu3 %v3698_v19 }
  0xd3   :  { %715 = vmatpush.msrb.mxu2 %v3666_v14 }
  0xd4   :  { %688 = vmatpush.msrb.mxu1 %v3680_v18  ;;  %762 = vmatpush.msrb.mxu3 %v3697_v24 }
  0xd5   :  { %716 = vmatpush.msrb.mxu2 %v3665_v21 }
  0xd6   :  { %689 = vmatpush.msrb.mxu1 %v3679_v25  ;;  %763 = vmatpush.msrb.mxu3 %v3696_v31 }
  0xd7   :  { %717 = vmatpush.msrb.mxu2 %v3664_v33 }
  0xd8   :  { %3727 = vmatpush.msk.msra.mxu1 %vm4866_vm9, %v4594_v38  ;;  %764 = vmatpush.msrb.mxu3 %v3695_v36 }
  0xd9   :  { %718 = vmatpush.msrb.mxu2 %v3663_v34 }
  0xda   :  { %3728 = vmatpush.msk.msra.mxu1 %vm4878_vm10, %v4594_v38 }
  0xdc   :  { %3729 = vmatpush.msk.msra.mxu1 %vm4890_vm11, %v4594_v38 }
  0xde   :  { %3730 = vmatpush.msk.msra.mxu1 %vm4902_vm12, %v4594_v38 }
  0xe0   :  { %3731 = vmatpush.msk.msra.mxu1 %vm4914_vm13, %v4594_v38 }
  0xe2   :  { %3732 = vmatpush.msk.msra.mxu1 %vm4926_vm14, %v4594_v38 }
  0xe4   :  { %3733 = vmatpush.msk.msra.mxu1 %vm4938_vm15, %v4594_v38 }
  0xe6   :  { %3734 = vmatpush.msk.msra.mxu1 %vm4950_vm3, %v4594_v38 }
  0xe8   :  { %3735 = vmatpush.msk.msra.mxu1 %vm4962_vm4, %v4594_v38 }
  0xea   :  { %3736 = vmatpush.msk.msra.mxu1 %vm4974_vm8, %v4594_v38 }
  0xec   :  { %3737 = vmatpush.msk.msra.mxu1 %vm4986_vm7, %v4594_v38 }
  0xee   :  { %3738 = vmatpush.msk.msra.mxu1 %vm4997_vm6, %v4594_v38 }
  0xf0   :  { %3739 = vmatpush.msk.msra.mxu1 %vm4774_vm2, %v4594_v38 }
  0xf2   :  { %3740 = vmatpush.msk.msra.mxu1 %vm4740_vm1, %v4594_v38 }
  0xf4   :  { %3741 = vmatpush.msk.msra.mxu1 %vm4680_vm0, %v4594_v38 }
  0xf6   :  { %3742 = vmatpush.msk.msra.mxu1 %vm5021_vm5, %v4594_v38 }
 0x14c   :  { %v575_v63 = vpop.f32.mrf.mxu0 }
 0x14d   :  { %v578_v11 = vmul.f32 0.001953125, %v575_v63 }
 0x150   :  { %v554_v0 = vpop.f32.mrf.mxu3 }
 0x151   :  { %v5204_v3 = vmul.f32 0.001953125, %v554_v0 }
 0x153   :  { %v579_v12 = vmul.f32 %v5204_v3, %v5204_v3 }
 0x155   :  { %v580_v20 = vsub.f32 %v578_v11, %v579_v12 }
 0x157   :  { %v581_v30 = vmax.f32 %v580_v20, 0.0 }
 0x159   :  { %v583_v32 = vadd.f32 1e-05, %v581_v30 }
 0x15b   :  { %4566 = vrsqrt.f32 %v583_v32  ;;  %vm590_vm14 = vweird.f32 %v583_v32 }
 0x161   :  { %v4567_v37 = vpop.eup %4566 }
 0x162   :  { %v585_v40 = vmul.f32 %v4567_v37, %v583_v32  ;;  %vm591_vm12 = vweird.f32 %v4567_v37 }
 0x163   :  { %vm592_vm13 = vmor %vm590_vm14, %vm591_vm12  ;;  %vm8587_vm12 = vcmp.lt.s32.totalorder %v4644_v9, 7  ;;  %vm8589_vm14 = vnez %v8554_v2 }
 0x164   :  { %v586_v41 = vmul.f32 %v4567_v37, %v585_v40 }
 0x166   :  { %v587_v44 = vmul.f32 0.5, %v586_v41 }
 0x168   :  { %v588_v47 = vsub.f32 1.5, %v587_v44 }
 0x16a   :  { %v589_v50 = vmul.f32 %v4567_v37, %v588_v47 }
 0x16c   :  { %v593_v51 = vsel %vm592_vm13, %v4567_v37, %v589_v50  ;;  %vm8588_vm13 = vcmp.lt.s32.totalorder %v4644_v9, 1 }
 0x16d   :  { %v594_v54 = vmul.f32 %v593_v51, %v582_v48  ;;  %vm8590_vm5 = vmmov %vm8588_vm13 }
 0x16f   :  { %v596_v57 = vmul.f32 %v594_v54, %v5204_v3  ;;  %v599_v58 = vperm.slane %v594_v54, 0 }
 0x171   :  { %v597_v60 = vsub.f32 %v595_v55, %v596_v57  ;;  %v601_v61 = vmul.f32 %v599_v58, %v5054_v27  ;;  %v602_v0 = vmul.f32 %v599_v58, %v5049_v26  ;;  %v604_v1 = vmul.f32 %v599_v58, %v5076_v45 }
 0x172   :  { %v603_v5 = vmul.f32 %v599_v58, %v5056_v29 }
 0x173   :  { %v606_v63 = vperm.slane %v597_v60, 0 }
 0x175   :  { %v608_v3 = vadd.f32 %v606_v63, %v601_v61  ;;  %v609_v6 = vadd.f32 %v606_v63, %v602_v0  ;;  %v611_v8 = vadd.f32 %v606_v63, %v604_v1  ;;  %v610_v11 = vadd.f32 %v606_v63, %v603_v5 }
 0x177   :  { %v612_v27 = vmax.f32 %v608_v3, 0.0  ;;  %v613_v12 = vmax.f32 %v609_v6, 0.0  ;;  %v615_v13 = vmax.f32 %v611_v8, 0.0  ;;  %v614_v26 = vmax.f32 %v610_v11, 0.0 }
 0x179   :  { %690 = vmatmul.f32.vlgmr.msrb.gmra.mxu1 %v612_v27  ;;  %v624_v29 = vrot.slane %v612_v27, 1  ;;  %v625_v45 = vrot.slane %v613_v12, 1  ;;  %v616_v16 = vrot.slane %v612_v27, 7  ;;  %v619_v14 = vrot.slane %v615_v13, 7 }
 0x17a   :  { %3793 = vmatpush.msk.msrb.mxu1 %vm4866_vm9, %v4594_v38  ;;  %v617_v21 = vrot.slane %v613_v12, 7  ;;  %v626_v24 = vrot.slane %v614_v26, 1  ;;  %vm8591_vm9 = vmmov %vm8587_vm12  ;;  %v627_v32 = vrot.slane %v615_v13, 1  ;;  %v618_v33 = vrot.slane %v614_v26, 7 }
 0x17b   :  { %v630_v19 = vsel %vm8587_vm12, %v624_v29, %v625_v45  ;;  %v623_v18 = vsel %vm8588_vm13, %v619_v14, %v616_v16  ;;  %vm8592_vm12 = vnez %v8568_v46  ;;  %vm8593_vm13 = vnez %v8556_v15 }
 0x17c   :  { %765 = vmatmul.f32.vlgmr.msrb.gmra.mxu3 %v630_v19  ;;  %v632_v20 = vsel %vm8589_vm14, %v630_v19, %v623_v18  ;;  %3794 = vmatpush.msk.msrb.mxu1 %vm4878_vm10, %v4594_v38  ;;  %v622_v25 = vsel %vm8590_vm5, %v616_v16, %v617_v21  ;;  %v629_v30 = vsel %vm8591_vm9, %v625_v45, %v626_v24 }
 0x17d   :  { %719 = vmatmul.f32.vlgmr.msrb.gmra.mxu2 %v632_v20  ;;  %v637_v31 = vsel %vm8593_vm13, %v622_v25, %v629_v30  ;;  %vm8594_vm14 = vnez %v8570_v49  ;;  %vm8595_vm5 = vnez %v8572_v52  ;;  %v628_v34 = vsel %vm8591_vm9, %v626_v24, %v627_v32 }
 0x17e   :  { %3795 = vmatpush.msk.msrb.mxu1 %vm4890_vm11, %v4594_v38  ;;  %vm8596_vm13 = vcmp.lt.s32.totalorder %v4644_v9, 1 }
 0x17f   :  { %v621_v36 = vsel %vm8596_vm13, %v617_v21, %v618_v33  ;;  %vm8598_vm9 = vmmov %vm8596_vm13  ;;  %vm8599_vm13 = vcmp.lt.s32.totalorder %v4644_v9, 7 }
 0x180   :  { %3796 = vmatpush.msk.msrb.mxu1 %vm8592_vm12, %v4594_v38  ;;  %v620_v40 = vsel %vm8598_vm9, %v618_v33, %v619_v14  ;;  %v631_v41 = vsel %vm8599_vm13, %v627_v32, %v624_v29  ;;  %vm8601_vm9 = vnez %v8586_v17  ;;  %vm8602_vm13 = vnez %v8562_v35 }
 0x181   :  { %693 = vmatmul.f32.gmra.mxu1 %v613_v12 }
 0x182   :  { %3797 = vmatpush.msk.msrb.mxu1 %vm8594_vm14, %v4594_v38  ;;  %vm8597_vm14 = vnez %v8558_v22 }
 0x183   :  { %v634_v37 = vsel %vm8597_vm14, %v628_v34, %v621_v36  ;;  %vm8600_vm14 = vnez %v8560_v28 }
 0x184   :  { %768 = vmatmul.f32.gmra.mxu3 %v637_v31  ;;  %3798 = vmatpush.msk.msrb.mxu1 %vm8595_vm5, %v4594_v38  ;;  %v639_v44 = vsel %vm8600_vm14, %v620_v40, %v631_v41  ;;  %vm8603_vm14 = vnez %v8570_v49 }
 0x185   :  { %722 = vmatmul.f32.gmra.mxu2 %v622_v25 }
 0x186   :  { %3799 = vmatpush.msk.msrb.mxu1 %vm4938_vm15, %v4594_v38 }
 0x188   :  { %3800 = vmatpush.msk.msrb.mxu1 %vm4950_vm3, %v4594_v38 }
 0x189   :  { %696 = vmatmul.f32.gmra.mxu1 %v614_v26 }
 0x18a   :  { %3801 = vmatpush.msk.msrb.mxu1 %vm4962_vm4, %v4594_v38 }
 0x18c   :  { %771 = vmatmul.f32.gmra.mxu3 %v628_v34  ;;  %3802 = vmatpush.msk.msrb.mxu1 %vm4974_vm8, %v4594_v38 }
 0x18d   :  { %725 = vmatmul.f32.gmra.mxu2 %v634_v37 }
 0x18e   :  { %3803 = vmatpush.msk.msrb.mxu1 %vm4986_vm7, %v4594_v38 }
 0x190   :  { %3804 = vmatpush.msk.msrb.mxu1 %vm4997_vm6, %v4594_v38 }
 0x191   :  { %699 = vmatmul.f32.gmra.mxu1 %v615_v13 }
 0x192   :  { %3805 = vmatpush.msk.msrb.mxu1 %vm4774_vm2, %v4594_v38 }
 0x194   :  { %774 = vmatmul.f32.gmra.mxu3 %v639_v44  ;;  %3806 = vmatpush.msk.msrb.mxu1 %vm4740_vm1, %v4594_v38 }
 0x195   :  { %728 = vmatmul.f32.gmra.mxu2 %v620_v40 }
 0x196   :  { %3807 = vmatpush.msk.msrb.mxu1 %vm4680_vm0, %v4594_v38 }
 0x198   :  { %3808 = vmatpush.msk.msrb.mxu1 %vm8601_vm9, %v4594_v38 }
 0x1f6   :  { %v691_v47 = vpop.f32.mrf.mxu1 }
 0x1fe   :  { %v694_v51 = vpop.f32.mrf.mxu1 }
 0x1ff   :  { %v766_v48 = vpop.f32.mrf.mxu3 }
 0x200   :  { %v720_v50 = vpop.f32.mrf.mxu2 }
 0x201   :  { %v721_v63 = vadd.f32 %v720_v50, %v691_v47  ;;  %v3776_v47 = vld [vmem:[%s8476_s1 + $0x3f8] sm:$0xff] }
 0x202   :  { %943 = vmatpush.msra.mxu2 %v3776_v47  ;;  %v3792_v50 = vld [vmem:[%s8476_s1 + $0x478] sm:$0xff] }
 0x203   :  { %v5386_v5 = vadd.f32 %v766_v48, %v721_v63  ;;  %v3775_v48 = vld [vmem:[%s8476_s1 + $0x3f0] sm:$0xff]  ;;  %1018 = vmatpush.msrb.mxu0 %v3792_v50  ;;  %v3772_v63 = vld [vmem:[%s8476_s1 + $0x3d8] sm:$0xff]  ;;  %v3749_v50 = vld [vmem:[%s8476_s1 + $0x320] sm:$0xff] }
 0x204   :  { %944 = vmatpush.msra.mxu2 %v3775_v48 }
 0x205   :  { %v791_v27 = vmul.f32 %v5386_v5, %v5386_v5 }
 0x206   :  { %v697_v57 = vpop.f32.mrf.mxu1 }
 0x207   :  { %v769_v54 = vpop.f32.mrf.mxu3 }
 0x208   :  { %v723_v55 = vpop.f32.mrf.mxu2 }
 0x209   :  { %v724_v58 = vadd.f32 %v723_v55, %v694_v51  ;;  %v3760_v51 = vld [vmem:[%s8476_s1 + $0x378] sm:$0xff]  ;;  %v3791_v55 = vld [vmem:[%s8476_s1 + $0x470] sm:$0xff] }
 0x20a   :  { %972 = vmatpush.msra.mxu3 %v3760_v51  ;;  %1019 = vmatpush.msrb.mxu0 %v3791_v55  ;;  %v3781_v51 = vld [vmem:[%s8476_s1 + $0x420] sm:$0xff]  ;;  %v3780_v55 = vld [vmem:[%s8476_s1 + $0x418] sm:$0xff] }
 0x20b   :  { %v5384_v1 = vadd.f32 %v769_v54, %v724_v58  ;;  %v3774_v54 = vld [vmem:[%s8476_s1 + $0x3e8] sm:$0xff]  ;;  %v3773_v58 = vld [vmem:[%s8476_s1 + $0x3e0] sm:$0xff] }
 0x20c   :  { %945 = vmatpush.msra.mxu2 %v3774_v54  ;;  %v3763_v54 = vld [vmem:[%s8476_s1 + $0x390] sm:$0xff] }
 0x20d   :  { %v792_v6 = vmul.f32 %v5384_v1, %v5384_v1  ;;  %v782_v12 = vadd.f32 %v5384_v1, %v5386_v5 }
 0x20e   :  { %v700_v8 = vpop.f32.mrf.mxu1  ;;  %946 = vmatpush.msra.mxu2 %v3773_v58  ;;  %v3748_v58 = vld [vmem:[%s8476_s1 + $0x318] sm:$0xff] }
 0x20f   :  { %v772_v60 = vpop.f32.mrf.mxu3  ;;  %v795_v45 = vadd.f32 %v792_v6, %v791_v27  ;;  %v3757_v6 = vld [vmem:[%s8476_s1 + $0x360] sm:$0xff]  ;;  %v3756_v27 = vld [vmem:[%s8476_s1 + $0x358] sm:$0xff] }
 0x210   :  { %v726_v61 = vpop.f32.mrf.mxu2  ;;  %947 = vmatpush.msra.mxu2 %v3772_v63 }
 0x211   :  { %v727_v0 = vadd.f32 %v726_v61, %v697_v57  ;;  %v3759_v57 = vld [vmem:[%s8476_s1 + $0x370] sm:$0xff]  ;;  %v3758_v61 = vld [vmem:[%s8476_s1 + $0x368] sm:$0xff] }
 0x212   :  { %973 = vmatpush.msra.mxu3 %v3759_v57 }
 0x213   :  { %v5388_v3 = vadd.f32 %v772_v60, %v727_v0  ;;  %v3790_v60 = vld [vmem:[%s8476_s1 + $0x468] sm:$0xff]  ;;  %v3789_v0 = vld [vmem:[%s8476_s1 + $0x460] sm:$0xff] }
 0x214   :  { %1020 = vmatpush.msrb.mxu0 %v3790_v60  ;;  %974 = vmatpush.msra.mxu3 %v3758_v61  ;;  %v3762_v60 = vld [vmem:[%s8476_s1 + $0x388] sm:$0xff]  ;;  %v3779_v61 = vld [vmem:[%s8476_s1 + $0x410] sm:$0xff] }
 0x215   :  { %v793_v13 = vmul.f32 %v5388_v3, %v5388_v3  ;;  %v783_v16 = vadd.f32 %v782_v12, %v5388_v3  ;;  %v3770_v12 = vld [vmem:[%s8476_s1 + $0x3c8] sm:$0xff] }
 0x216   :  { %1021 = vmatpush.msrb.mxu0 %v3789_v0  ;;  %975 = vmatpush.msra.mxu3 %v3757_v6  ;;  %v3747_v0 = vld [vmem:[%s8476_s1 + $0x310] sm:$0xff]  ;;  %v3761_v6 = vld [vmem:[%s8476_s1 + $0x380] sm:$0xff] }
 0x217   :  { %v775_v29 = vpop.f32.mrf.mxu3  ;;  %v796_v19 = vadd.f32 %v795_v45, %v793_v13  ;;  %v3787_v13 = vld [vmem:[%s8476_s1 + $0x450] sm:$0xff]  ;;  %v3786_v45 = vld [vmem:[%s8476_s1 + $0x448] sm:$0xff] }
 0x218   :  { %v729_v11 = vpop.f32.mrf.mxu2  ;;  %976 = vmatpush.msra.mxu3 %v3756_v27  ;;  %v3778_v27 = vld [vmem:[%s8476_s1 + $0x408] sm:$0xff] }
 0x219   :  { %v730_v26 = vadd.f32 %v729_v11, %v700_v8  ;;  %v3771_v8 = vld [vmem:[%s8476_s1 + $0x3d0] sm:$0xff]  ;;  %v3788_v11 = vld [vmem:[%s8476_s1 + $0x458] sm:$0xff] }
 0x21a   :  { %948 = vmatpush.msra.mxu2 %v3771_v8  ;;  %1022 = vmatpush.msrb.mxu0 %v3788_v11  ;;  %v3746_v11 = vld [vmem:[%s8476_s1 + $0x308] sm:$0xff] }
 0x21b   :  { %v5399_v14 = vadd.f32 %v775_v29, %v730_v26  ;;  %v3755_v26 = vld [vmem:[%s8476_s1 + $0x350] sm:$0xff]  ;;  %v3769_v29 = vld [vmem:[%s8476_s1 + $0x3c0] sm:$0xff] }
 0x21c   :  { %949 = vmatpush.msra.mxu2 %v3770_v12  ;;  %1023 = vmatpush.msrb.mxu0 %v3787_v13  ;;  %v3777_v12 = vld [vmem:[%s8476_s1 + $0x400] sm:$0xff] }
 0x21d   :  { %v784_v18 = vadd.f32 %v783_v16, %v5399_v14  ;;  %v794_v20 = vmul.f32 %v5399_v14, %v5399_v14  ;;  %977 = vmatpush.msra.mxu3 %v3755_v26  ;;  %v3754_v16 = vld [vmem:[%s8476_s1 + $0x348] sm:$0xff]  ;;  %v3745_v13 = vld [vmem:[%s8476_s1 + $0x300] sm:$0xff] }
 0x21e   :  { %950 = vmatpush.msra.mxu2 %v3769_v29  ;;  %1024 = vmatpush.msrb.mxu0 %v3786_v45 }
 0x21f   :  { %v785_v21 = vrot.slane %v784_v18, 4  ;;  %v797_v24 = vadd.f32 %v796_v19, %v794_v20  ;;  %v3768_v19 = vld [vmem:[%s8476_s1 + $0x3b8] sm:$0xff]  ;;  %978 = vmatpush.msra.mxu3 %v3754_v16  ;;  %v3753_v20 = vld [vmem:[%s8476_s1 + $0x340] sm:$0xff] }
 0x220   :  { %951 = vmatpush.msra.mxu2 %v3768_v19 }
 0x221   :  { %v786_v25 = vadd.f32 %v785_v21, %v784_v18  ;;  %v798_v30 = vrot.slane %v797_v24, 4  ;;  %v3785_v18 = vld [vmem:[%s8476_s1 + $0x440] sm:$0xff]  ;;  %v3767_v21 = vld [vmem:[%s8476_s1 + $0x3b0] sm:$0xff]  ;;  %979 = vmatpush.msra.mxu3 %v3753_v20 }
 0x222   :  { %1025 = vmatpush.msrb.mxu0 %v3785_v18  ;;  %952 = vmatpush.msra.mxu2 %v3767_v21  ;;  %v3743_v18 = vld [vmem:[%s8478_s2 + $0x1] sm:$0x1] }
 0x223   :  { %v787_v31 = vrot.slane %v786_v25, 2  ;;  %v799_v32 = vadd.f32 %v798_v30, %v797_v24  ;;  %v3784_v24 = vld [vmem:[%s8476_s1 + $0x438] sm:$0xff]  ;;  %v3766_v30 = vld [vmem:[%s8476_s1 + $0x3a8] sm:$0xff] }
 0x224   :  { %1026 = vmatpush.msrb.mxu0 %v3784_v24  ;;  %953 = vmatpush.msra.mxu2 %v3766_v30 }
 0x225   :  { %v788_v33 = vadd.f32 %v787_v31, %v786_v25  ;;  %v800_v34 = vrot.slane %v799_v32, 2  ;;  %v3752_v25 = vld [vmem:[%s8476_s1 + $0x338] sm:$0xff] }
 0x226   :  { %980 = vmatpush.msra.mxu3 %v3752_v25  ;;  %v3744_v25 = vld [vmem:[%s8479_s3 + $0x1] sm:$0x1] }
 0x227   :  { %v789_v36 = vrot.slane %v788_v33, 1  ;;  %v801_v37 = vadd.f32 %v800_v34, %v799_v32  ;;  %v3783_v32 = vld [vmem:[%s8476_s1 + $0x430] sm:$0xff] }
 0x228   :  { %v3751_v34 = vld [vmem:[%s8476_s1 + $0x330] sm:$0xff]  ;;  %1027 = vmatpush.msrb.mxu0 %v3783_v32 }
 0x229   :  { %v790_v40 = vadd.f32 %v789_v36, %v788_v33  ;;  %v802_v41 = vrot.slane %v801_v37, 1  ;;  %v3765_v36 = vld [vmem:[%s8476_s1 + $0x3a0] sm:$0xff]  ;;  %981 = vmatpush.msra.mxu3 %v3751_v34 }
 0x22a   :  { %954 = vmatpush.msra.mxu2 %v3765_v36 }
 0x22b   :  { %820 = vmatmul.f32.vlgmr.msra.gmra.mxu0 %v790_v40  ;;  %v803_v44 = vadd.f32 %v802_v41, %v801_v37  ;;  %v3750_v37 = vld [vmem:[%s8476_s1 + $0x328] sm:$0xff] }
 0x22c   :  { %v3782_v41 = vld [vmem:[%s8476_s1 + $0x428] sm:$0xff]  ;;  %982 = vmatpush.msra.mxu3 %v3750_v37 }
 0x22d   :  { %841 = vmatmul.f32.vlgmr.msra.gmra.mxu1 %v803_v44  ;;  %v3764_v44 = vld [vmem:[%s8476_s1 + $0x398] sm:$0xff]  ;;  %1028 = vmatpush.msrb.mxu0 %v3782_v41 }
 0x22e   :  { %955 = vmatpush.msra.mxu2 %v3764_v44  ;;  %983 = vmatpush.msra.mxu3 %v3749_v50  ;;  %v4592_v50 = vld [vmem:[%s8477_s0 + $0x18] sm:$0xff] }
 0x22f   :  { %1029 = vmatpush.msrb.mxu0 %v3781_v51 }
 0x230   :  { %956 = vmatpush.msra.mxu2 %v3763_v54  ;;  %984 = vmatpush.msra.mxu3 %v3748_v58  ;;  %v4593_v54 = vld [vmem:[%s8477_s0 + $0x10] sm:$0xff] }
 0x231   :  { %1030 = vmatpush.msrb.mxu0 %v3780_v55 }
 0x232   :  { %957 = vmatpush.msra.mxu2 %v3762_v60  ;;  %985 = vmatpush.msra.mxu3 %v3747_v0 }
 0x233   :  { %1031 = vmatpush.msrb.mxu0 %v3779_v61 }
 0x234   :  { %958 = vmatpush.msra.mxu2 %v3761_v6  ;;  %986 = vmatpush.msra.mxu3 %v3746_v11 }
 0x235   :  { %1032 = vmatpush.msrb.mxu0 %v3778_v27 }
 0x236   :  { %3809 = vmatpush.msk.msrb.mxu2 %vm8602_vm13, %v4594_v38  ;;  %987 = vmatpush.msra.mxu3 %v3745_v13 }
 0x237   :  { %1033 = vmatpush.msrb.mxu0 %v3777_v12 }
 0x238   :  { %3810 = vmatpush.msk.msrb.mxu2 %vm4878_vm10, %v4594_v38 }
 0x23a   :  { %3811 = vmatpush.msk.msrb.mxu2 %vm4890_vm11, %v4594_v38 }
 0x23c   :  { %3812 = vmatpush.msk.msrb.mxu2 %vm8592_vm12, %v4594_v38 }
 0x23e   :  { %3813 = vmatpush.msk.msrb.mxu2 %vm8603_vm14, %v4594_v38 }
 0x240   :  { %3814 = vmatpush.msk.msrb.mxu2 %vm8595_vm5, %v4594_v38 }
 0x242   :  { %3815 = vmatpush.msk.msrb.mxu2 %vm4938_vm15, %v4594_v38 }
 0x244   :  { %3816 = vmatpush.msk.msrb.mxu2 %vm4950_vm3, %v4594_v38 }
 0x246   :  { %3817 = vmatpush.msk.msrb.mxu2 %vm4962_vm4, %v4594_v38 }
 0x248   :  { %3818 = vmatpush.msk.msrb.mxu2 %vm4974_vm8, %v4594_v38 }
 0x24a   :  { %3819 = vmatpush.msk.msrb.mxu2 %vm4986_vm7, %v4594_v38 }
 0x24c   :  { %3820 = vmatpush.msk.msrb.mxu2 %vm4997_vm6, %v4594_v38 }
 0x24e   :  { %3821 = vmatpush.msk.msrb.mxu2 %vm4774_vm2, %v4594_v38 }
 0x250   :  { %3822 = vmatpush.msk.msrb.mxu2 %vm4740_vm1, %v4594_v38 }
 0x252   :  { %3823 = vmatpush.msk.msrb.mxu2 %vm4680_vm0, %v4594_v38 }
 0x254   :  { %3824 = vmatpush.msk.msrb.mxu2 %vm8601_vm9, %v4594_v38  ;;  %vm8611_vm9 = vnez %v8556_v15 }
 0x2a8   :  { %v821_v31 = vpop.f32.mrf.mxu0 }
 0x2a9   :  { %v5494_v33 = vmul.f32 0.001953125, %v821_v31 }
 0x2aa   :  { %v842_v40 = vpop.f32.mrf.mxu1 }
 0x2ab   :  { %v846_v47 = vmul.f32 %v5494_v33, %v5494_v33  ;;  %v845_v48 = vmul.f32 0.001953125, %v842_v40 }
 0x2ad   :  { %v847_v57 = vsub.f32 %v845_v48, %v846_v47 }
 0x2af   :  { %v848_v63 = vmax.f32 %v847_v57, 0.0 }
 0x2b1   :  { %v851_v8 = vadd.f32 1e-05, %v848_v63 }
 0x2b3   :  { %4568 = vrsqrt.f32 %v851_v8  ;;  %vm858_vm14 = vweird.f32 %v851_v8 }
 0x2b9   :  { %v4569_v26 = vpop.eup %4568 }
 0x2ba   :  { %v853_v29 = vmul.f32 %v4569_v26, %v851_v8  ;;  %vm859_vm11 = vweird.f32 %v4569_v26 }
 0x2bb   :  { %vm860_vm12 = vmor %vm858_vm14, %vm859_vm11  ;;  %vm8604_vm11 = vcmp.lt.s32.totalorder %v4644_v9, 7  ;;  %vm8605_vm14 = vcmp.lt.s32.totalorder %v4644_v9, 1 }
 0x2bc   :  { %v854_v45 = vmul.f32 %v4569_v26, %v853_v29 }
 0x2be   :  { %v855_v16 = vmul.f32 0.5, %v854_v45 }
 0x2c0   :  { %v856_v19 = vsub.f32 1.5, %v855_v16 }
 0x2c2   :  { %v857_v20 = vmul.f32 %v4569_v26, %v856_v19 }
 0x2c4   :  { %v861_v21 = vsel %vm860_vm12, %v4569_v26, %v857_v20  ;;  %vm8606_vm12 = vnez %v8554_v2 }
 0x2c5   :  { %v862_v24 = vmul.f32 %v3743_v18, %v861_v21 }
 0x2c7   :  { %v865_v30 = vmul.f32 %v862_v24, %v5494_v33  ;;  %v868_v31 = vperm.slane %v862_v24, 0 }
 0x2c9   :  { %v866_v32 = vsub.f32 %v3744_v25, %v865_v30  ;;  %v870_v34 = vmul.f32 %v868_v31, %v5386_v5  ;;  %v871_v37 = vmul.f32 %v868_v31, %v5384_v1  ;;  %v873_v40 = vmul.f32 %v868_v31, %v5399_v14  ;;  %v4590_v1 = vld [vmem:[%s8477_s0] sm:$0xff] }
 0x2ca   :  { %v872_v41 = vmul.f32 %v868_v31, %v5388_v3  ;;  %v4591_v3 = vld [vmem:[%s8477_s0 + $0x8] sm:$0xff] }
 0x2cb   :  { %v875_v36 = vperm.slane %v866_v32, 0 }
 0x2cd   :  { %v877_v33 = vadd.f32 %v875_v36, %v870_v34  ;;  %v878_v44 = vadd.f32 %v875_v36, %v871_v37  ;;  %v880_v47 = vadd.f32 %v875_v36, %v873_v40  ;;  %v879_v48 = vadd.f32 %v875_v36, %v872_v41 }
 0x2cf   :  { %v5608_v5 = vadd.f32 %v4590_v1, %v877_v33  ;;  %v5613_v14 = vadd.f32 %v4591_v3, %v878_v44  ;;  %v5618_v51 = vadd.f32 %v4592_v50, %v880_v47  ;;  %v5626_v55 = vadd.f32 %v4593_v54, %v879_v48 }
 0x2d1   :  { %959 = vmatmul.f32.vlgmr.msra.gmra.mxu2 %v5608_v5  ;;  %v893_v57 = vrot.slane %v5608_v5, 1  ;;  %v894_v58 = vrot.slane %v5613_v14, 1  ;;  %v885_v60 = vrot.slane %v5608_v5, 7  ;;  %v888_v61 = vrot.slane %v5618_v51, 7 }
 0x2d2   :  { %3875 = vmatpush.msk.msra.mxu2 %vm8602_vm13, %v4594_v38  ;;  %v886_v8 = vrot.slane %v5613_v14, 7  ;;  %v895_v11 = vrot.slane %v5626_v55, 1  ;;  %vm8609_vm13 = vnez %v8566_v42  ;;  %v896_v26 = vrot.slane %v5618_v51, 1 }
 0x2d3   :  { %v899_v63 = vsel %vm8604_vm11, %v893_v57, %v894_v58  ;;  %v892_v0 = vsel %vm8605_vm14, %v888_v61, %v885_v60  ;;  %vm8607_vm11 = vmmov %vm8605_vm14  ;;  %vm8608_vm14 = vcmp.lt.s32.totalorder %v4644_v9, 7  ;;  %v887_v29 = vrot.slane %v5626_v55, 7 }
 0x2d4   :  { %1034 = vmatmul.f32.vlgmr.msrb.gmra.mxu0 %v899_v63  ;;  %v901_v6 = vsel %vm8606_vm12, %v899_v63, %v892_v0  ;;  %3876 = vmatpush.msk.msra.mxu2 %vm4878_vm10, %v4594_v38  ;;  %v891_v27 = vsel %vm8607_vm11, %v885_v60, %v886_v8  ;;  %v898_v12 = vsel %vm8608_vm14, %v894_v58, %v895_v11 }
 0x2d5   :  { %988 = vmatmul.f32.vlgmr.msra.gmra.mxu3 %v901_v6  ;;  %vm8610_vm12 = vnez %v8568_v46  ;;  %v906_v13 = vsel %vm8611_vm9, %v891_v27, %v898_v12  ;;  %vm8612_vm11 = vnez %v8570_v49  ;;  %v897_v45 = vsel %vm8608_vm14, %v895_v11, %v896_v26 }
 0x2d6   :  { %3877 = vmatpush.msk.msra.mxu2 %vm8609_vm13, %v4594_v38  ;;  %vm8613_vm9 = vcmp.lt.s32.totalorder %v4644_v9, 1 }
 0x2d7   :  { %v890_v16 = vsel %vm8613_vm9, %v886_v8, %v887_v29  ;;  %vm8615_vm14 = vmmov %vm8613_vm9  ;;  %vm8616_vm9 = vcmp.lt.s32.totalorder %v4644_v9, 7 }
 0x2d8   :  { %3878 = vmatpush.msk.msra.mxu2 %vm8610_vm12, %v4594_v38  ;;  %v889_v18 = vsel %vm8615_vm14, %v887_v29, %v888_v61  ;;  %v900_v20 = vsel %vm8616_vm9, %v896_v26, %v893_v57  ;;  %vm8618_vm14 = vnez %v8586_v17  ;;  %vm8619_vm9 = vnez %v8562_v35 }
 0x2d9   :  { %962 = vmatmul.f32.gmra.mxu2 %v5613_v14 }
 0x2da   :  { %3879 = vmatpush.msk.msra.mxu2 %vm8612_vm11, %v4594_v38  ;;  %vm8614_vm11 = vnez %v8558_v22 }
 0x2db   :  { %v903_v19 = vsel %vm8614_vm11, %v897_v45, %v890_v16  ;;  %vm8617_vm11 = vnez %v8560_v28 }
 0x2dc   :  { %1037 = vmatmul.f32.gmra.mxu0 %v906_v13  ;;  %3880 = vmatpush.msk.msra.mxu2 %vm8595_vm5, %v4594_v38  ;;  %v908_v21 = vsel %vm8617_vm11, %v889_v18, %v900_v20  ;;  %vm8620_vm11 = vnez %v8570_v49 }
 0x2dd   :  { %991 = vmatmul.f32.gmra.mxu3 %v891_v27 }
 0x2de   :  { %3881 = vmatpush.msk.msra.mxu2 %vm4938_vm15, %v4594_v38 }
 0x2e0   :  { %3882 = vmatpush.msk.msra.mxu2 %vm4950_vm3, %v4594_v38 }
 0x2e1   :  { %965 = vmatmul.f32.gmra.mxu2 %v5626_v55 }
 0x2e2   :  { %3883 = vmatpush.msk.msra.mxu2 %vm4962_vm4, %v4594_v38 }
 0x2e4   :  { %1040 = vmatmul.f32.gmra.mxu0 %v897_v45  ;;  %3884 = vmatpush.msk.msra.mxu2 %vm4974_vm8, %v4594_v38 }
 0x2e5   :  { %994 = vmatmul.f32.gmra.mxu3 %v903_v19 }
 0x2e6   :  { %3885 = vmatpush.msk.msra.mxu2 %vm4986_vm7, %v4594_v38 }
 0x2e8   :  { %3886 = vmatpush.msk.msra.mxu2 %vm4997_vm6, %v4594_v38 }
 0x2e9   :  { %968 = vmatmul.f32.gmra.mxu2 %v5618_v51 }
 0x2ea   :  { %3887 = vmatpush.msk.msra.mxu2 %vm4774_vm2, %v4594_v38 }
 0x2ec   :  { %1043 = vmatmul.f32.gmra.mxu0 %v908_v21  ;;  %3888 = vmatpush.msk.msra.mxu2 %vm4740_vm1, %v4594_v38 }
 0x2ed   :  { %997 = vmatmul.f32.gmra.mxu3 %v889_v18 }
 0x2ee   :  { %3889 = vmatpush.msk.msra.mxu2 %vm4680_vm0, %v4594_v38 }
 0x2f0   :  { %3890 = vmatpush.msk.msra.mxu2 %vm8618_vm14, %v4594_v38 }
 0x351   :  { %v1035_v24 = vpop.f32.mrf.mxu0 }
 0x354   :  { %v960_v25 = vpop.f32.mrf.mxu2 }
 0x358   :  { %v989_v30 = vpop.f32.mrf.mxu3 }
 0x359   :  { %v1038_v32 = vpop.f32.mrf.mxu0  ;;  %v990_v33 = vadd.f32 %v989_v30, %v960_v25 }
 0x35b   :  { %v5717_v48 = vadd.f32 %v1035_v24, %v990_v33  ;;  %v3855_v33 = vld [vmem:[%s8476_s1 + $0x560] sm:$0xff] }
 0x35c   :  { %v963_v31 = vpop.f32.mrf.mxu2 }
 0x35d   :  { %v1060_v57 = vmul.f32 %v5717_v48, %v5717_v48 }
 0x360   :  { %v992_v34 = vpop.f32.mrf.mxu3 }
 0x361   :  { %v993_v37 = vadd.f32 %v992_v34, %v963_v31  ;;  %v1041_v40 = vpop.f32.mrf.mxu0  ;;  %v3857_v34 = vld [vmem:[%s8476_s1 + $0x570] sm:$0xff] }
 0x363   :  { %v5715_v47 = vadd.f32 %v1038_v32, %v993_v37  ;;  %v3858_v32 = vld [vmem:[%s8476_s1 + $0x578] sm:$0xff]  ;;  %v3856_v37 = vld [vmem:[%s8476_s1 + $0x568] sm:$0xff] }
 0x364   :  { %v966_v36 = vpop.f32.mrf.mxu2  ;;  %1212 = vmatpush.msrb.mxu3 %v3858_v32  ;;  %v3846_v32 = vld [vmem:[%s8476_s1 + $0x518] sm:$0xff] }
 0x365   :  { %v1061_v3 = vmul.f32 %v5715_v47, %v5715_v47  ;;  %v1051_v58 = vadd.f32 %v5715_v47, %v5717_v48 }
 0x366   :  { %1213 = vmatpush.msrb.mxu3 %v3857_v34  ;;  %v3864_v34 = vld [vmem:[%s8476_s1 + $0x5a8] sm:$0xff] }
 0x367   :  { %v1064_v0 = vadd.f32 %v1061_v3, %v1060_v57  ;;  %v3872_v3 = vld [vmem:[%s8476_s1 + $0x5e8] sm:$0xff]  ;;  %v3871_v57 = vld [vmem:[%s8476_s1 + $0x5e0] sm:$0xff] }
 0x368   :  { %v995_v41 = vpop.f32.mrf.mxu3  ;;  %1214 = vmatpush.msrb.mxu3 %v3856_v37 }
 0x369   :  { %v996_v44 = vadd.f32 %v995_v41, %v966_v36  ;;  %v1044_v63 = vpop.f32.mrf.mxu0  ;;  %v3874_v36 = vld [vmem:[%s8476_s1 + $0x5f8] sm:$0xff]  ;;  %v3873_v41 = vld [vmem:[%s8476_s1 + $0x5f0] sm:$0xff] }
 0x36a   :  { %1287 = vmatpush.msra.mxu1 %v3874_v36  ;;  %1215 = vmatpush.msrb.mxu3 %v3855_v33  ;;  %v3832_v36 = vld [vmem:[%s8476_s1 + $0x4a8] sm:$0xff] }
 0x36b   :  { %v5719_v1 = vadd.f32 %v1041_v40, %v996_v44  ;;  %v3842_v40 = vld [vmem:[%s8476_s1 + $0x4f8] sm:$0xff]  ;;  %v3841_v44 = vld [vmem:[%s8476_s1 + $0x4f0] sm:$0xff] }
 0x36c   :  { %v969_v50 = vpop.f32.mrf.mxu2  ;;  %1241 = vmatpush.msra.mxu0 %v3842_v40  ;;  %1288 = vmatpush.msra.mxu1 %v3873_v41  ;;  %v3863_v40 = vld [vmem:[%s8476_s1 + $0x5a0] sm:$0xff] }
 0x36d   :  { %v1062_v60 = vmul.f32 %v5719_v1, %v5719_v1  ;;  %v1052_v6 = vadd.f32 %v1051_v58, %v5719_v1  ;;  %v3853_v58 = vld [vmem:[%s8476_s1 + $0x550] sm:$0xff] }
 0x36e   :  { %1242 = vmatpush.msra.mxu0 %v3841_v44  ;;  %1289 = vmatpush.msra.mxu1 %v3872_v3  ;;  %v3845_v44 = vld [vmem:[%s8476_s1 + $0x510] sm:$0xff]  ;;  %v3831_v3 = vld [vmem:[%s8476_s1 + $0x4a0] sm:$0xff] }
 0x36f   :  { %v1065_v11 = vadd.f32 %v1064_v0, %v1062_v60  ;;  %v3839_v60 = vld [vmem:[%s8476_s1 + $0x4e0] sm:$0xff]  ;;  %v3838_v0 = vld [vmem:[%s8476_s1 + $0x4d8] sm:$0xff] }
 0x370   :  { %v998_v54 = vpop.f32.mrf.mxu3  ;;  %1290 = vmatpush.msra.mxu1 %v3871_v57  ;;  %v3844_v57 = vld [vmem:[%s8476_s1 + $0x508] sm:$0xff] }
 0x371   :  { %v999_v61 = vadd.f32 %v998_v54, %v969_v50  ;;  %v3854_v50 = vld [vmem:[%s8476_s1 + $0x558] sm:$0xff]  ;;  %v3840_v54 = vld [vmem:[%s8476_s1 + $0x4e8] sm:$0xff] }
 0x372   :  { %1216 = vmatpush.msrb.mxu3 %v3854_v50  ;;  %1243 = vmatpush.msra.mxu0 %v3840_v54  ;;  %v3862_v50 = vld [vmem:[%s8476_s1 + $0x598] sm:$0xff] }
 0x373   :  { %v5730_v8 = vadd.f32 %v1044_v63, %v999_v61  ;;  %v3870_v61 = vld [vmem:[%s8476_s1 + $0x5d8] sm:$0xff]  ;;  %v3852_v63 = vld [vmem:[%s8476_s1 + $0x548] sm:$0xff] }
 0x374   :  { %1217 = vmatpush.msrb.mxu3 %v3853_v58  ;;  %1244 = vmatpush.msra.mxu0 %v3839_v60  ;;  %v3830_v58 = vld [vmem:[%s8476_s1 + $0x498] sm:$0xff]  ;;  %v3861_v60 = vld [vmem:[%s8476_s1 + $0x590] sm:$0xff] }
 0x375   :  { %v1053_v27 = vadd.f32 %v1052_v6, %v5730_v8  ;;  %v1063_v12 = vmul.f32 %v5730_v8, %v5730_v8  ;;  %1291 = vmatpush.msra.mxu1 %v3870_v61  ;;  %v3869_v6 = vld [vmem:[%s8476_s1 + $0x5d0] sm:$0xff] }
 0x376   :  { %1218 = vmatpush.msrb.mxu3 %v3852_v63  ;;  %1245 = vmatpush.msra.mxu0 %v3838_v0  ;;  %v3843_v63 = vld [vmem:[%s8476_s1 + $0x500] sm:$0xff]  ;;  %v3829_v0 = vld [vmem:[%s8476_s1 + $0x490] sm:$0xff] }
 0x377   :  { %v1054_v13 = vrot.slane %v1053_v27, 4  ;;  %v1066_v26 = vadd.f32 %v1065_v11, %v1063_v12  ;;  %v3851_v11 = vld [vmem:[%s8476_s1 + $0x540] sm:$0xff]  ;;  %1292 = vmatpush.msra.mxu1 %v3869_v6  ;;  %v3868_v12 = vld [vmem:[%s8476_s1 + $0x5c8] sm:$0xff] }
 0x378   :  { %1219 = vmatpush.msrb.mxu3 %v3851_v11  ;;  %v3860_v11 = vld [vmem:[%s8476_s1 + $0x588] sm:$0xff] }
 0x379   :  { %v1055_v29 = vadd.f32 %v1054_v13, %v1053_v27  ;;  %v1067_v45 = vrot.slane %v1066_v26, 4  ;;  %v3837_v27 = vld [vmem:[%s8476_s1 + $0x4d0] sm:$0xff]  ;;  %v3850_v13 = vld [vmem:[%s8476_s1 + $0x538] sm:$0xff]  ;;  %1293 = vmatpush.msra.mxu1 %v3868_v12  ;;  %v3859_v12 = vld [vmem:[%s8476_s1 + $0x580] sm:$0xff] }
 0x37a   :  { %1246 = vmatpush.msra.mxu0 %v3837_v27  ;;  %1220 = vmatpush.msrb.mxu3 %v3850_v13  ;;  %v3828_v27 = vld [vmem:[%s8476_s1 + $0x488] sm:$0xff]  ;;  %v3827_v13 = vld [vmem:[%s8476_s1 + $0x480] sm:$0xff] }
 0x37b   :  { %v1056_v16 = vrot.slane %v1055_v29, 2  ;;  %v1068_v19 = vadd.f32 %v1067_v45, %v1066_v26  ;;  %v3836_v26 = vld [vmem:[%s8476_s1 + $0x4c8] sm:$0xff]  ;;  %v3867_v45 = vld [vmem:[%s8476_s1 + $0x5c0] sm:$0xff] }
 0x37c   :  { %1247 = vmatpush.msra.mxu0 %v3836_v26  ;;  %1294 = vmatpush.msra.mxu1 %v3867_v45 }
 0x37d   :  { %v1057_v18 = vadd.f32 %v1056_v16, %v1055_v29  ;;  %v1069_v20 = vrot.slane %v1068_v19, 2  ;;  %v3849_v16 = vld [vmem:[%s8476_s1 + $0x530] sm:$0xff] }
 0x37e   :  { %1221 = vmatpush.msrb.mxu3 %v3849_v16 }
 0x37f   :  { %v1058_v21 = vrot.slane %v1057_v18, 1  ;;  %v1070_v24 = vadd.f32 %v1069_v20, %v1068_v19  ;;  %v3835_v19 = vld [vmem:[%s8476_s1 + $0x4c0] sm:$0xff] }
 0x380   :  { %1248 = vmatpush.msra.mxu0 %v3835_v19 }
 0x381   :  { %v1059_v25 = vadd.f32 %v1058_v21, %v1057_v18  ;;  %v1071_v30 = vrot.slane %v1070_v24, 1  ;;  %v3866_v18 = vld [vmem:[%s8476_s1 + $0x5b8] sm:$0xff]  ;;  %v3848_v21 = vld [vmem:[%s8476_s1 + $0x528] sm:$0xff] }
 0x382   :  { %1295 = vmatpush.msra.mxu1 %v3866_v18  ;;  %1222 = vmatpush.msrb.mxu3 %v3848_v21  ;;  %v3825_v18 = vld [vmem:[%s8478_s2 + $0x2] sm:$0x1] }
 0x383   :  { %1089 = vmatmul.f32.vlgmr.msrb.gmra.mxu1 %v1059_v25  ;;  %v1072_v31 = vadd.f32 %v1071_v30, %v1070_v24  ;;  %v3834_v24 = vld [vmem:[%s8476_s1 + $0x4b8] sm:$0xff]  ;;  %v3847_v25 = vld [vmem:[%s8476_s1 + $0x520] sm:$0xff]  ;;  %v3865_v30 = vld [vmem:[%s8476_s1 + $0x5b0] sm:$0xff] }
 0x384   :  { %1249 = vmatpush.msra.mxu0 %v3834_v24  ;;  %1296 = vmatpush.msra.mxu1 %v3865_v30  ;;  %v3826_v30 = vld [vmem:[%s8479_s3 + $0x2] sm:$0x1] }
 0x385   :  { %1110 = vmatmul.f32.vlgmr.msrb.gmra.mxu2 %v1072_v31  ;;  %v3833_v31 = vld [vmem:[%s8476_s1 + $0x4b0] sm:$0xff]  ;;  %1223 = vmatpush.msrb.mxu3 %v3847_v25 }
 0x386   :  { %1250 = vmatpush.msra.mxu0 %v3833_v31  ;;  %1297 = vmatpush.msra.mxu1 %v3864_v34 }
 0x387   :  { %1224 = vmatpush.msrb.mxu3 %v3846_v32 }
 0x388   :  { %1251 = vmatpush.msra.mxu0 %v3832_v36  ;;  %1298 = vmatpush.msra.mxu1 %v3863_v40 }
 0x389   :  { %1225 = vmatpush.msrb.mxu3 %v3845_v44 }
 0x38a   :  { %1252 = vmatpush.msra.mxu0 %v3831_v3  ;;  %1299 = vmatpush.msra.mxu1 %v3862_v50 }
 0x38b   :  { %1226 = vmatpush.msrb.mxu3 %v3844_v57 }
 0x38c   :  { %1253 = vmatpush.msra.mxu0 %v3830_v58  ;;  %1300 = vmatpush.msra.mxu1 %v3861_v60 }
 0x38d   :  { %1227 = vmatpush.msrb.mxu3 %v3843_v63 }
 0x38e   :  { %1254 = vmatpush.msra.mxu0 %v3829_v0  ;;  %1301 = vmatpush.msra.mxu1 %v3860_v11 }
 0x38f   :  { %3891 = vmatpush.msk.msra.mxu3 %vm8619_vm9, %v4594_v38 }
 0x390   :  { %1255 = vmatpush.msra.mxu0 %v3828_v27  ;;  %1302 = vmatpush.msra.mxu1 %v3859_v12 }
 0x391   :  { %3892 = vmatpush.msk.msra.mxu3 %vm4878_vm10, %v4594_v38 }
 0x392   :  { %1256 = vmatpush.msra.mxu0 %v3827_v13 }
 0x393   :  { %3893 = vmatpush.msk.msra.mxu3 %vm8609_vm13, %v4594_v38 }
 0x395   :  { %3894 = vmatpush.msk.msra.mxu3 %vm8610_vm12, %v4594_v38 }
 0x397   :  { %3895 = vmatpush.msk.msra.mxu3 %vm8620_vm11, %v4594_v38 }
 0x399   :  { %3896 = vmatpush.msk.msra.mxu3 %vm8595_vm5, %v4594_v38 }
 0x39b   :  { %3897 = vmatpush.msk.msra.mxu3 %vm4938_vm15, %v4594_v38 }
 0x39d   :  { %3898 = vmatpush.msk.msra.mxu3 %vm4950_vm3, %v4594_v38 }
 0x39f   :  { %3899 = vmatpush.msk.msra.mxu3 %vm4962_vm4, %v4594_v38 }
 0x3a1   :  { %3900 = vmatpush.msk.msra.mxu3 %vm4974_vm8, %v4594_v38 }
 0x3a3   :  { %3901 = vmatpush.msk.msra.mxu3 %vm4986_vm7, %v4594_v38 }
 0x3a5   :  { %3902 = vmatpush.msk.msra.mxu3 %vm4997_vm6, %v4594_v38 }
 0x3a7   :  { %3903 = vmatpush.msk.msra.mxu3 %vm4774_vm2, %v4594_v38 }
 0x3a9   :  { %3904 = vmatpush.msk.msra.mxu3 %vm4740_vm1, %v4594_v38 }
 0x3ab   :  { %3905 = vmatpush.msk.msra.mxu3 %vm4680_vm0, %v4594_v38 }
 0x3ad   :  { %3906 = vmatpush.msk.msra.mxu3 %vm8618_vm14, %v4594_v38  ;;  %vm8628_vm14 = vnez %v8556_v15 }
 0x400   :  { %v1090_v29 = vpop.f32.mrf.mxu1 }
 0x401   :  { %v5816_v20 = vmul.f32 0.001953125, %v1090_v29 }
 0x403   :  { %v1115_v41 = vmul.f32 %v5816_v20, %v5816_v20 }
 0x408   :  { %v1111_v37 = vpop.f32.mrf.mxu2 }
 0x409   :  { %v1114_v33 = vmul.f32 0.001953125, %v1111_v37 }
 0x40b   :  { %v1116_v54 = vsub.f32 %v1114_v33, %v1115_v41 }
 0x40d   :  { %v1117_v61 = vmax.f32 %v1116_v54, 0.0 }
 0x40f   :  { %v1120_v6 = vadd.f32 1e-05, %v1117_v61 }
 0x411   :  { %4570 = vrsqrt.f32 %v1120_v6  ;;  %vm1127_vm11 = vweird.f32 %v1120_v6 }
 0x417   :  { %v4571_v26 = vpop.eup %4570 }
 0x418   :  { %v1122_v29 = vmul.f32 %v4571_v26, %v1120_v6  ;;  %vm1128_vm13 = vweird.f32 %v4571_v26 }
 0x419   :  { %vm1129_vm12 = vmor %vm1127_vm11, %vm1128_vm13  ;;  %vm8621_vm13 = vcmp.lt.s32.totalorder %v4644_v9, 7  ;;  %vm8623_vm11 = vnez %v8554_v2 }
 0x41a   :  { %v1123_v45 = vmul.f32 %v4571_v26, %v1122_v29 }
 0x41c   :  { %v1124_v16 = vmul.f32 0.5, %v1123_v45 }
 0x41e   :  { %v1125_v19 = vsub.f32 1.5, %v1124_v16 }
 0x420   :  { %v1126_v21 = vmul.f32 %v4571_v26, %v1125_v19 }
 0x422   :  { %v1130_v24 = vsel %vm1129_vm12, %v4571_v26, %v1126_v21  ;;  %vm8622_vm12 = vcmp.lt.s32.totalorder %v4644_v9, 1 }
 0x423   :  { %v1131_v25 = vmul.f32 %v3825_v18, %v1130_v24 }
 0x425   :  { %v1134_v31 = vmul.f32 %v1131_v25, %v5816_v20  ;;  %v1137_v32 = vperm.slane %v1131_v25, 0 }
 0x427   :  { %v1135_v34 = vsub.f32 %v3826_v30, %v1134_v31  ;;  %v1139_v36 = vmul.f32 %v1137_v32, %v5717_v48  ;;  %v1140_v40 = vmul.f32 %v1137_v32, %v5715_v47  ;;  %v1142_v41 = vmul.f32 %v1137_v32, %v5730_v8 }
 0x428   :  { %v1141_v33 = vmul.f32 %v1137_v32, %v5719_v1 }
 0x429   :  { %v1144_v37 = vperm.slane %v1135_v34, 0 }
 0x42b   :  { %v1146_v20 = vadd.f32 %v1144_v37, %v1139_v36  ;;  %v1147_v44 = vadd.f32 %v1144_v37, %v1140_v40  ;;  %v1149_v3 = vadd.f32 %v1144_v37, %v1142_v41  ;;  %v1148_v50 = vadd.f32 %v1144_v37, %v1141_v33 }
 0x42d   :  { %v1150_v48 = vmax.f32 %v1146_v20, 0.0  ;;  %v1151_v54 = vmax.f32 %v1147_v44, 0.0  ;;  %v1153_v57 = vmax.f32 %v1149_v3, 0.0  ;;  %v1152_v47 = vmax.f32 %v1148_v50, 0.0 }
 0x42f   :  { %1228 = vmatmul.f32.vlgmr.msrb.gmra.mxu3 %v1150_v48  ;;  %v1162_v1 = vrot.slane %v1150_v48, 1  ;;  %v1163_v8 = vrot.slane %v1151_v54, 1  ;;  %v1154_v58 = vrot.slane %v1150_v48, 7  ;;  %v1157_v60 = vrot.slane %v1153_v57, 7 }
 0x430   :  { %3957 = vmatpush.msk.msrb.mxu3 %vm8619_vm9, %v4594_v38  ;;  %v1155_v6 = vrot.slane %v1151_v54, 7  ;;  %v1164_v11 = vrot.slane %v1152_v47, 1  ;;  %vm8626_vm9 = vnez %v8566_v42  ;;  %v1165_v26 = vrot.slane %v1153_v57, 1 }
 0x431   :  { %v1168_v61 = vsel %vm8621_vm13, %v1162_v1, %v1163_v8  ;;  %v1161_v63 = vsel %vm8622_vm12, %v1157_v60, %v1154_v58  ;;  %vm8624_vm13 = vmmov %vm8622_vm12  ;;  %vm8625_vm12 = vcmp.lt.s32.totalorder %v4644_v9, 7  ;;  %v1156_v29 = vrot.slane %v1152_v47, 7 }
 0x432   :  { %1303 = vmatmul.f32.vlgmr.msra.gmra.mxu1 %v1168_v61  ;;  %v1170_v0 = vsel %vm8623_vm11, %v1168_v61, %v1161_v63  ;;  %3958 = vmatpush.msk.msrb.mxu3 %vm4878_vm10, %v4594_v38  ;;  %v1160_v27 = vsel %vm8624_vm13, %v1154_v58, %v1155_v6  ;;  %v1167_v12 = vsel %vm8625_vm12, %v1163_v8, %v1164_v11  ;;  %vm8630_vm13 = vmmov %vm8625_vm12  ;;  %vm8631_vm12 = vcmp.lt.s32.totalorder %v4644_v9, 1 }
 0x433   :  { %1257 = vmatmul.f32.vlgmr.msra.gmra.mxu0 %v1170_v0  ;;  %vm8627_vm11 = vnez %v8568_v46  ;;  %v1175_v13 = vsel %vm8628_vm14, %v1160_v27, %v1167_v12  ;;  %vm8629_vm10 = vnez %v8570_v49  ;;  %v1166_v45 = vsel %vm8630_vm13, %v1164_v11, %v1165_v26  ;;  %vm8633_vm13 = vmmov %vm8631_vm12 }
 0x434   :  { %3959 = vmatpush.msk.msrb.mxu3 %vm8626_vm9, %v4594_v38  ;;  %v1159_v16 = vsel %vm8631_vm12, %v1155_v6, %v1156_v29  ;;  %vm8632_vm14 = vnez %v8558_v22  ;;  %v1158_v18 = vsel %vm8633_vm13, %v1156_v29, %v1157_v60  ;;  %vm8634_vm12 = vcmp.lt.s32.totalorder %v4644_v9, 7 }
 0x435   :  { %v1172_v19 = vsel %vm8632_vm14, %v1166_v45, %v1159_v16  ;;  %v1169_v21 = vsel %vm8634_vm12, %v1165_v26, %v1162_v1  ;;  %vm8635_vm14 = vnez %v8560_v28  ;;  %vm8636_vm13 = vnez %v8586_v17 }
 0x436   :  { %3960 = vmatpush.msk.msrb.mxu3 %vm8627_vm11, %v4594_v38  ;;  %v1177_v24 = vsel %vm8635_vm14, %v1158_v18, %v1169_v21  ;;  %vm8637_vm12 = vnez %v8562_v35  ;;  %vm8638_vm14 = vnez %v8564_v39 }
 0x437   :  { %1231 = vmatmul.f32.gmra.mxu3 %v1151_v54 }
 0x438   :  { %3961 = vmatpush.msk.msrb.mxu3 %vm8629_vm10, %v4594_v38 }
 0x43a   :  { %1306 = vmatmul.f32.gmra.mxu1 %v1175_v13  ;;  %3962 = vmatpush.msk.msrb.mxu3 %vm8595_vm5, %v4594_v38 }
 0x43b   :  { %1260 = vmatmul.f32.gmra.mxu0 %v1160_v27 }
 0x43c   :  { %3963 = vmatpush.msk.msrb.mxu3 %vm4938_vm15, %v4594_v38 }
 0x43e   :  { %3964 = vmatpush.msk.msrb.mxu3 %vm4950_vm3, %v4594_v38 }
 0x43f   :  { %1234 = vmatmul.f32.gmra.mxu3 %v1152_v47 }
 0x440   :  { %3965 = vmatpush.msk.msrb.mxu3 %vm4962_vm4, %v4594_v38 }
 0x442   :  { %1309 = vmatmul.f32.gmra.mxu1 %v1166_v45  ;;  %3966 = vmatpush.msk.msrb.mxu3 %vm4974_vm8, %v4594_v38 }
 0x443   :  { %1263 = vmatmul.f32.gmra.mxu0 %v1172_v19 }
 0x444   :  { %3967 = vmatpush.msk.msrb.mxu3 %vm4986_vm7, %v4594_v38 }
 0x446   :  { %3968 = vmatpush.msk.msrb.mxu3 %vm4997_vm6, %v4594_v38 }
 0x447   :  { %1237 = vmatmul.f32.gmra.mxu3 %v1153_v57 }
 0x448   :  { %3969 = vmatpush.msk.msrb.mxu3 %vm4774_vm2, %v4594_v38 }
 0x44a   :  { %1312 = vmatmul.f32.gmra.mxu1 %v1177_v24  ;;  %3970 = vmatpush.msk.msrb.mxu3 %vm4740_vm1, %v4594_v38 }
 0x44b   :  { %1266 = vmatmul.f32.gmra.mxu0 %v1158_v18 }
 0x44c   :  { %3971 = vmatpush.msk.msrb.mxu3 %vm4680_vm0, %v4594_v38 }
 0x44e   :  { %3972 = vmatpush.msk.msrb.mxu3 %vm8636_vm13, %v4594_v38 }
 0x4af   :  { %v1304_v25 = vpop.f32.mrf.mxu1 }
 0x4b0   :  { %v1258_v30 = vpop.f32.mrf.mxu0 }
 0x4b2   :  { %v1229_v31 = vpop.f32.mrf.mxu3 }
 0x4b3   :  { %v1259_v20 = vadd.f32 %v1258_v30, %v1229_v31 }
 0x4b5   :  { %v6016_v50 = vadd.f32 %v1304_v25, %v1259_v20  ;;  %v3937_v20 = vld [vmem:[%s8476_s1 + $0x6e0] sm:$0xff] }
 0x4b7   :  { %v1307_v32 = vpop.f32.mrf.mxu1  ;;  %v1329_v1 = vmul.f32 %v6016_v50, %v6016_v50 }
 0x4b8   :  { %v1261_v34 = vpop.f32.mrf.mxu0 }
 0x4ba   :  { %v1232_v36 = vpop.f32.mrf.mxu3 }
 0x4bb   :  { %v1262_v40 = vadd.f32 %v1261_v34, %v1232_v36  ;;  %v3940_v34 = vld [vmem:[%s8476_s1 + $0x6f8] sm:$0xff]  ;;  %v3939_v36 = vld [vmem:[%s8476_s1 + $0x6f0] sm:$0xff] }
 0x4bc   :  { %1481 = vmatpush.msrb.mxu0 %v3940_v34  ;;  %v3946_v34 = vld [vmem:[%s8476_s1 + $0x728] sm:$0xff] }
 0x4bd   :  { %v6014_v3 = vadd.f32 %v1307_v32, %v1262_v40  ;;  %v3938_v40 = vld [vmem:[%s8476_s1 + $0x6e8] sm:$0xff] }
 0x4be   :  { %1482 = vmatpush.msrb.mxu0 %v3939_v36 }
 0x4bf   :  { %v1310_v41 = vpop.f32.mrf.mxu1  ;;  %v1330_v54 = vmul.f32 %v6014_v3, %v6014_v3  ;;  %v1320_v8 = vadd.f32 %v6014_v3, %v6016_v50 }
 0x4c0   :  { %v1264_v37 = vpop.f32.mrf.mxu0  ;;  %1483 = vmatpush.msrb.mxu0 %v3938_v40  ;;  %v3914_v40 = vld [vmem:[%s8476_s1 + $0x628] sm:$0xff] }
 0x4c1   :  { %v1333_v63 = vadd.f32 %v1330_v54, %v1329_v1  ;;  %v3954_v54 = vld [vmem:[%s8476_s1 + $0x768] sm:$0xff]  ;;  %v3953_v1 = vld [vmem:[%s8476_s1 + $0x760] sm:$0xff] }
 0x4c2   :  { %v1235_v33 = vpop.f32.mrf.mxu3  ;;  %1484 = vmatpush.msrb.mxu0 %v3937_v20 }
 0x4c3   :  { %v1265_v44 = vadd.f32 %v1264_v37, %v1235_v33  ;;  %v3956_v37 = vld [vmem:[%s8476_s1 + $0x778] sm:$0xff]  ;;  %v3955_v33 = vld [vmem:[%s8476_s1 + $0x770] sm:$0xff] }
 0x4c4   :  { %1556 = vmatpush.msrb.mxu2 %v3956_v37  ;;  %v3928_v37 = vld [vmem:[%s8476_s1 + $0x698] sm:$0xff] }
 0x4c5   :  { %v6018_v48 = vadd.f32 %v1310_v41, %v1265_v44  ;;  %v3924_v41 = vld [vmem:[%s8476_s1 + $0x678] sm:$0xff]  ;;  %v3923_v44 = vld [vmem:[%s8476_s1 + $0x670] sm:$0xff] }
 0x4c6   :  { %1510 = vmatpush.msrb.mxu1 %v3924_v41  ;;  %1557 = vmatpush.msrb.mxu2 %v3955_v33  ;;  %v3945_v41 = vld [vmem:[%s8476_s1 + $0x720] sm:$0xff] }
 0x4c7   :  { %v1331_v58 = vmul.f32 %v6018_v48, %v6018_v48  ;;  %v1313_v61 = vpop.f32.mrf.mxu1  ;;  %v1321_v0 = vadd.f32 %v1320_v8, %v6018_v48  ;;  %v3935_v8 = vld [vmem:[%s8476_s1 + $0x6d0] sm:$0xff] }
 0x4c8   :  { %v1267_v57 = vpop.f32.mrf.mxu0  ;;  %1511 = vmatpush.msrb.mxu1 %v3923_v44  ;;  %1558 = vmatpush.msrb.mxu2 %v3954_v54  ;;  %v3927_v44 = vld [vmem:[%s8476_s1 + $0x690] sm:$0xff]  ;;  %v3913_v54 = vld [vmem:[%s8476_s1 + $0x620] sm:$0xff] }
 0x4c9   :  { %v1334_v11 = vadd.f32 %v1333_v63, %v1331_v58  ;;  %v3921_v58 = vld [vmem:[%s8476_s1 + $0x660] sm:$0xff]  ;;  %v3920_v63 = vld [vmem:[%s8476_s1 + $0x658] sm:$0xff] }
 0x4ca   :  { %v1238_v47 = vpop.f32.mrf.mxu3  ;;  %1559 = vmatpush.msrb.mxu2 %v3953_v1  ;;  %v3926_v1 = vld [vmem:[%s8476_s1 + $0x688] sm:$0xff] }
 0x4cb   :  { %v1268_v60 = vadd.f32 %v1267_v57, %v1238_v47  ;;  %v3936_v57 = vld [vmem:[%s8476_s1 + $0x6d8] sm:$0xff]  ;;  %v3922_v47 = vld [vmem:[%s8476_s1 + $0x668] sm:$0xff] }
 0x4cc   :  { %1485 = vmatpush.msrb.mxu0 %v3936_v57  ;;  %1512 = vmatpush.msrb.mxu1 %v3922_v47  ;;  %v3944_v57 = vld [vmem:[%s8476_s1 + $0x718] sm:$0xff] }
 0x4cd   :  { %v6029_v6 = vadd.f32 %v1313_v61, %v1268_v60  ;;  %v3952_v60 = vld [vmem:[%s8476_s1 + $0x758] sm:$0xff]  ;;  %v3934_v61 = vld [vmem:[%s8476_s1 + $0x6c8] sm:$0xff] }
 0x4ce   :  { %1486 = vmatpush.msrb.mxu0 %v3935_v8  ;;  %1513 = vmatpush.msrb.mxu1 %v3921_v58  ;;  %v3912_v8 = vld [vmem:[%s8476_s1 + $0x618] sm:$0xff]  ;;  %v3943_v58 = vld [vmem:[%s8476_s1 + $0x710] sm:$0xff] }
 0x4cf   :  { %v1322_v27 = vadd.f32 %v1321_v0, %v6029_v6  ;;  %v1332_v12 = vmul.f32 %v6029_v6, %v6029_v6  ;;  %1560 = vmatpush.msrb.mxu2 %v3952_v60  ;;  %v3951_v0 = vld [vmem:[%s8476_s1 + $0x750] sm:$0xff] }
 0x4d0   :  { %1487 = vmatpush.msrb.mxu0 %v3934_v61  ;;  %1514 = vmatpush.msrb.mxu1 %v3920_v63  ;;  %v3925_v61 = vld [vmem:[%s8476_s1 + $0x680] sm:$0xff]  ;;  %v3911_v63 = vld [vmem:[%s8476_s1 + $0x610] sm:$0xff] }
 0x4d1   :  { %v1323_v13 = vrot.slane %v1322_v27, 4  ;;  %v1335_v26 = vadd.f32 %v1334_v11, %v1332_v12  ;;  %1561 = vmatpush.msrb.mxu2 %v3951_v0  ;;  %v3933_v11 = vld [vmem:[%s8476_s1 + $0x6c0] sm:$0xff]  ;;  %v3950_v12 = vld [vmem:[%s8476_s1 + $0x748] sm:$0xff] }
 0x4d2   :  { %1488 = vmatpush.msrb.mxu0 %v3933_v11  ;;  %v3942_v11 = vld [vmem:[%s8476_s1 + $0x708] sm:$0xff] }
 0x4d3   :  { %v1324_v29 = vadd.f32 %v1323_v13, %v1322_v27  ;;  %v1336_v45 = vrot.slane %v1335_v26, 4  ;;  %v3919_v27 = vld [vmem:[%s8476_s1 + $0x650] sm:$0xff]  ;;  %1562 = vmatpush.msrb.mxu2 %v3950_v12  ;;  %v3932_v13 = vld [vmem:[%s8476_s1 + $0x6b8] sm:$0xff]  ;;  %v3941_v12 = vld [vmem:[%s8476_s1 + $0x700] sm:$0xff] }
 0x4d4   :  { %1515 = vmatpush.msrb.mxu1 %v3919_v27  ;;  %1489 = vmatpush.msrb.mxu0 %v3932_v13  ;;  %v3910_v27 = vld [vmem:[%s8476_s1 + $0x608] sm:$0xff]  ;;  %v3909_v13 = vld [vmem:[%s8476_s1 + $0x600] sm:$0xff] }
 0x4d5   :  { %v1325_v16 = vrot.slane %v1324_v29, 2  ;;  %v1337_v19 = vadd.f32 %v1336_v45, %v1335_v26  ;;  %v3918_v26 = vld [vmem:[%s8476_s1 + $0x648] sm:$0xff]  ;;  %v3931_v45 = vld [vmem:[%s8476_s1 + $0x6b0] sm:$0xff] }
 0x4d6   :  { %1516 = vmatpush.msrb.mxu1 %v3918_v26  ;;  %1490 = vmatpush.msrb.mxu0 %v3931_v45 }
 0x4d7   :  { %v1326_v18 = vadd.f32 %v1325_v16, %v1324_v29  ;;  %v1338_v21 = vrot.slane %v1337_v19, 2  ;;  %v3949_v29 = vld [vmem:[%s8476_s1 + $0x740] sm:$0xff] }
 0x4d8   :  { %1563 = vmatpush.msrb.mxu2 %v3949_v29  ;;  %v3917_v16 = vld [vmem:[%s8476_s1 + $0x640] sm:$0xff] }
 0x4d9   :  { %v1327_v24 = vrot.slane %v1326_v18, 1  ;;  %v1339_v25 = vadd.f32 %v1338_v21, %v1337_v19  ;;  %1517 = vmatpush.msrb.mxu1 %v3917_v16  ;;  %v3948_v19 = vld [vmem:[%s8476_s1 + $0x738] sm:$0xff] }
 0x4da   :  { %1564 = vmatpush.msrb.mxu2 %v3948_v19  ;;  %v3916_v21 = vld [vmem:[%s8476_s1 + $0x638] sm:$0xff] }
 0x4db   :  { %v1328_v30 = vadd.f32 %v1327_v24, %v1326_v18  ;;  %v1340_v31 = vrot.slane %v1339_v25, 1  ;;  %v3930_v18 = vld [vmem:[%s8476_s1 + $0x6a8] sm:$0xff]  ;;  %1518 = vmatpush.msrb.mxu1 %v3916_v21 }
 0x4dc   :  { %1491 = vmatpush.msrb.mxu0 %v3930_v18  ;;  %v3907_v18 = vld [vmem:[%s8478_s2 + $0x3] sm:$0x1] }
 0x4dd   :  { %1358 = vmatmul.f32.vlgmr.msra.gmra.mxu2 %v1328_v30  ;;  %v1341_v32 = vadd.f32 %v1340_v31, %v1339_v25  ;;  %v3947_v25 = vld [vmem:[%s8476_s1 + $0x730] sm:$0xff]  ;;  %v3929_v31 = vld [vmem:[%s8476_s1 + $0x6a0] sm:$0xff] }
 0x4de   :  { %1565 = vmatpush.msrb.mxu2 %v3947_v25  ;;  %1492 = vmatpush.msrb.mxu0 %v3929_v31  ;;  %v3908_v31 = vld [vmem:[%s8479_s3 + $0x3] sm:$0x1] }
 0x4df   :  { %1379 = vmatmul.f32.vlgmr.msra.gmra.mxu3 %v1341_v32  ;;  %v3915_v32 = vld [vmem:[%s8476_s1 + $0x630] sm:$0xff] }
 0x4e0   :  { %1519 = vmatpush.msrb.mxu1 %v3915_v32  ;;  %1566 = vmatpush.msrb.mxu2 %v3946_v34 }
 0x4e1   :  { %1493 = vmatpush.msrb.mxu0 %v3928_v37 }
 0x4e2   :  { %1520 = vmatpush.msrb.mxu1 %v3914_v40  ;;  %1567 = vmatpush.msrb.mxu2 %v3945_v41 }
 0x4e3   :  { %1494 = vmatpush.msrb.mxu0 %v3927_v44 }
 0x4e4   :  { %1521 = vmatpush.msrb.mxu1 %v3913_v54  ;;  %1568 = vmatpush.msrb.mxu2 %v3944_v57 }
 0x4e5   :  { %1495 = vmatpush.msrb.mxu0 %v3926_v1 }
 0x4e6   :  { %1522 = vmatpush.msrb.mxu1 %v3912_v8  ;;  %1569 = vmatpush.msrb.mxu2 %v3943_v58 }
 0x4e7   :  { %1496 = vmatpush.msrb.mxu0 %v3925_v61 }
 0x4e8   :  { %1523 = vmatpush.msrb.mxu1 %v3911_v63  ;;  %1570 = vmatpush.msrb.mxu2 %v3942_v11 }
 0x4e9   :  { %3973 = vmatpush.msk.msra.mxu0 %vm8637_vm12, %v4594_v38 }
 0x4ea   :  { %1524 = vmatpush.msrb.mxu1 %v3910_v27  ;;  %1571 = vmatpush.msrb.mxu2 %v3941_v12 }
 0x4eb   :  { %3974 = vmatpush.msk.msra.mxu0 %vm8638_vm14, %v4594_v38 }
 0x4ec   :  { %1525 = vmatpush.msrb.mxu1 %v3909_v13 }
 0x4ed   :  { %3975 = vmatpush.msk.msra.mxu0 %vm8626_vm9, %v4594_v38 }
 0x4ef   :  { %3976 = vmatpush.msk.msra.mxu0 %vm8627_vm11, %v4594_v38 }
 0x4f1   :  { %3977 = vmatpush.msk.msra.mxu0 %vm8629_vm10, %v4594_v38 }
 0x4f3   :  { %3978 = vmatpush.msk.msra.mxu0 %vm8595_vm5, %v4594_v38 }
 0x4f5   :  { %3979 = vmatpush.msk.msra.mxu0 %vm4938_vm15, %v4594_v38 }
 0x4f7   :  { %3980 = vmatpush.msk.msra.mxu0 %vm4950_vm3, %v4594_v38 }
 0x4f9   :  { %3981 = vmatpush.msk.msra.mxu0 %vm4962_vm4, %v4594_v38 }
 0x4fb   :  { %3982 = vmatpush.msk.msra.mxu0 %vm4974_vm8, %v4594_v38 }
 0x4fd   :  { %3983 = vmatpush.msk.msra.mxu0 %vm4986_vm7, %v4594_v38 }
 0x4ff   :  { %3984 = vmatpush.msk.msra.mxu0 %vm4997_vm6, %v4594_v38 }
 0x501   :  { %3985 = vmatpush.msk.msra.mxu0 %vm4774_vm2, %v4594_v38 }
 0x503   :  { %3986 = vmatpush.msk.msra.mxu0 %vm4740_vm1, %v4594_v38 }
 0x505   :  { %3987 = vmatpush.msk.msra.mxu0 %vm4680_vm0, %v4594_v38 }
 0x507   :  { %3988 = vmatpush.msk.msra.mxu0 %vm8636_vm13, %v4594_v38  ;;  %vm8646_vm13 = vnez %v8556_v15 }
 0x560   :  { %v1359_v24 = vpop.f32.mrf.mxu2 }
 0x561   :  { %v6124_v30 = vmul.f32 0.001953125, %v1359_v24 }
 0x562   :  { %v1380_v36 = vpop.f32.mrf.mxu3 }
 0x563   :  { %v1384_v33 = vmul.f32 %v6124_v30, %v6124_v30  ;;  %v1383_v20 = vmul.f32 0.001953125, %v1380_v36 }
 0x565   :  { %v1385_v47 = vsub.f32 %v1383_v20, %v1384_v33 }
 0x567   :  { %v1386_v60 = vmax.f32 %v1385_v47, 0.0 }
 0x569   :  { %v1389_v0 = vadd.f32 1e-05, %v1386_v60 }
 0x56b   :  { %4572 = vrsqrt.f32 %v1389_v0  ;;  %vm1396_vm10 = vweird.f32 %v1389_v0 }
 0x571   :  { %v4573_v26 = vpop.eup %4572 }
 0x572   :  { %v1391_v29 = vmul.f32 %v4573_v26, %v1389_v0  ;;  %vm1397_vm9 = vweird.f32 %v4573_v26 }
 0x573   :  { %vm1398_vm11 = vmor %vm1396_vm10, %vm1397_vm9  ;;  %vm8639_vm10 = vcmp.lt.s32.totalorder %v4644_v9, 7  ;;  %vm8640_vm9 = vcmp.lt.s32.totalorder %v4644_v9, 1 }
 0x574   :  { %v1392_v45 = vmul.f32 %v4573_v26, %v1391_v29 }
 0x576   :  { %v1393_v16 = vmul.f32 0.5, %v1392_v45 }
 0x578   :  { %v1394_v19 = vsub.f32 1.5, %v1393_v16 }
 0x57a   :  { %v1395_v21 = vmul.f32 %v4573_v26, %v1394_v19 }
 0x57c   :  { %v1399_v24 = vsel %vm1398_vm11, %v4573_v26, %v1395_v21  ;;  %vm8641_vm11 = vnez %v8554_v2 }
 0x57d   :  { %v1400_v25 = vmul.f32 %v3907_v18, %v1399_v24 }
 0x57f   :  { %v1403_v32 = vmul.f32 %v1400_v25, %v6124_v30  ;;  %v1406_v34 = vperm.slane %v1400_v25, 0 }
 0x581   :  { %v1404_v36 = vsub.f32 %v3908_v31, %v1403_v32  ;;  %v1408_v37 = vmul.f32 %v1406_v34, %v6016_v50  ;;  %v1409_v41 = vmul.f32 %v1406_v34, %v6014_v3  ;;  %v1411_v33 = vmul.f32 %v1406_v34, %v6029_v6 }
 0x582   :  { %v1410_v20 = vmul.f32 %v1406_v34, %v6018_v48 }
 0x583   :  { %v1413_v40 = vperm.slane %v1404_v36, 0 }
 0x585   :  { %v1415_v30 = vadd.f32 %v1413_v40, %v1408_v37  ;;  %v1416_v44 = vadd.f32 %v1413_v40, %v1409_v41  ;;  %v1418_v54 = vadd.f32 %v1413_v40, %v1411_v33  ;;  %v1417_v57 = vadd.f32 %v1413_v40, %v1410_v20 }
 0x587   :  { %v6236_v50 = vadd.f32 %v1415_v30, %v5608_v5  ;;  %v6239_v3 = vadd.f32 %v1416_v44, %v5613_v14  ;;  %v6242_v48 = vadd.f32 %v1418_v54, %v5618_v51  ;;  %v6248_v6 = vadd.f32 %v1417_v57, %v5626_v55 }
 0x589   :  { %1497 = vmatmul.f32.vlgmr.msrb.gmra.mxu0 %v6236_v50  ;;  %v1431_v47 = vrot.slane %v6236_v50, 1  ;;  %v1432_v5 = vrot.slane %v6239_v3, 1  ;;  %v1423_v1 = vrot.slane %v6236_v50, 7  ;;  %v1426_v14 = vrot.slane %v6242_v48, 7 }
 0x58a   :  { %4039 = vmatpush.msk.msrb.mxu0 %vm8637_vm12, %v4594_v38  ;;  %v1424_v58 = vrot.slane %v6239_v3, 7  ;;  %v1433_v60 = vrot.slane %v6248_v6, 1  ;;  %vm8644_vm12 = vnez %v8566_v42  ;;  %v1434_v11 = vrot.slane %v6242_v48, 1 }
 0x58b   :  { %v1437_v51 = vsel %vm8639_vm10, %v1431_v47, %v1432_v5  ;;  %v1430_v55 = vsel %vm8640_vm9, %v1426_v14, %v1423_v1  ;;  %vm8642_vm10 = vmmov %vm8640_vm9  ;;  %vm8643_vm9 = vcmp.lt.s32.totalorder %v4644_v9, 7  ;;  %v1425_v27 = vrot.slane %v6248_v6, 7 }
 0x58c   :  { %1572 = vmatmul.f32.vlgmr.msrb.gmra.mxu2 %v1437_v51  ;;  %v1439_v8 = vsel %vm8641_vm11, %v1437_v51, %v1430_v55  ;;  %4040 = vmatpush.msk.msrb.mxu0 %vm8638_vm14, %v4594_v38  ;;  %v1429_v61 = vsel %vm8642_vm10, %v1423_v1, %v1424_v58  ;;  %v1436_v63 = vsel %vm8643_vm9, %v1432_v5, %v1433_v60 }
 0x58d   :  { %1526 = vmatmul.f32.vlgmr.msrb.gmra.mxu1 %v1439_v8  ;;  %vm8645_vm11 = vnez %v8568_v46  ;;  %v1444_v0 = vsel %vm8646_vm13, %v1429_v61, %v1436_v63  ;;  %vm8647_vm10 = vnez %v8570_v49  ;;  %v1435_v12 = vsel %vm8643_vm9, %v1433_v60, %v1434_v11 }
 0x58e   :  { %4041 = vmatpush.msk.msrb.mxu0 %vm8644_vm12, %v4594_v38  ;;  %vm8648_vm13 = vcmp.lt.s32.totalorder %v4644_v9, 1 }
 0x58f   :  { %v1428_v13 = vsel %vm8648_vm13, %v1424_v58, %v1425_v27  ;;  %vm8650_vm9 = vmmov %vm8648_vm13  ;;  %vm8651_vm13 = vcmp.lt.s32.totalorder %v4644_v9, 7 }
 0x590   :  { %4042 = vmatpush.msk.msrb.mxu0 %vm8645_vm11, %v4594_v38  ;;  %v1427_v29 = vsel %vm8650_vm9, %v1425_v27, %v1426_v14  ;;  %v1438_v45 = vsel %vm8651_vm13, %v1434_v11, %v1431_v47  ;;  %vm8653_vm9 = vnez %v8586_v17  ;;  %vm8654_vm13 = vnez %v8562_v35 }
 0x591   :  { %1500 = vmatmul.f32.gmra.mxu0 %v6239_v3 }
 0x592   :  { %4043 = vmatpush.msk.msrb.mxu0 %vm8647_vm10, %v4594_v38  ;;  %vm8649_vm10 = vnez %v8558_v22 }
 0x593   :  { %v1441_v26 = vsel %vm8649_vm10, %v1435_v12, %v1428_v13  ;;  %vm8652_vm10 = vnez %v8560_v28 }
 0x594   :  { %1575 = vmatmul.f32.gmra.mxu2 %v1444_v0  ;;  %4044 = vmatpush.msk.msrb.mxu0 %vm8595_vm5, %v4594_v38  ;;  %v1446_v16 = vsel %vm8652_vm10, %v1427_v29, %v1438_v45  ;;  %vm8655_vm10 = vnez %v8570_v49 }
 0x595   :  { %1529 = vmatmul.f32.gmra.mxu1 %v1429_v61 }
 0x596   :  { %4045 = vmatpush.msk.msrb.mxu0 %vm4938_vm15, %v4594_v38 }
 0x598   :  { %4046 = vmatpush.msk.msrb.mxu0 %vm4950_vm3, %v4594_v38 }
 0x599   :  { %1503 = vmatmul.f32.gmra.mxu0 %v6248_v6 }
 0x59a   :  { %4047 = vmatpush.msk.msrb.mxu0 %vm4962_vm4, %v4594_v38 }
 0x59c   :  { %1578 = vmatmul.f32.gmra.mxu2 %v1435_v12  ;;  %4048 = vmatpush.msk.msrb.mxu0 %vm4974_vm8, %v4594_v38 }
 0x59d   :  { %1532 = vmatmul.f32.gmra.mxu1 %v1441_v26 }
 0x59e   :  { %4049 = vmatpush.msk.msrb.mxu0 %vm4986_vm7, %v4594_v38 }
 0x5a0   :  { %4050 = vmatpush.msk.msrb.mxu0 %vm4997_vm6, %v4594_v38 }
 0x5a1   :  { %1506 = vmatmul.f32.gmra.mxu0 %v6242_v48 }
 0x5a2   :  { %4051 = vmatpush.msk.msrb.mxu0 %vm4774_vm2, %v4594_v38 }
 0x5a4   :  { %1581 = vmatmul.f32.gmra.mxu2 %v1446_v16  ;;  %4052 = vmatpush.msk.msrb.mxu0 %vm4740_vm1, %v4594_v38 }
 0x5a5   :  { %1535 = vmatmul.f32.gmra.mxu1 %v1427_v29 }
 0x5a6   :  { %4053 = vmatpush.msk.msrb.mxu0 %vm4680_vm0, %v4594_v38 }
 0x5a8   :  { %4054 = vmatpush.msk.msrb.mxu0 %vm8653_vm9, %v4594_v38 }
 0x606   :  { %v1498_v19 = vpop.f32.mrf.mxu0 }
 0x60a   :  { %v1527_v18 = vpop.f32.mrf.mxu1 }
 0x60b   :  { %v1528_v40 = vadd.f32 %v1527_v18, %v1498_v19 }
 0x60e   :  { %v1501_v24 = vpop.f32.mrf.mxu0 }
 0x60f   :  { %v1573_v21 = vpop.f32.mrf.mxu2 }
 0x610   :  { %v6339_v20 = vadd.f32 %v1573_v21, %v1528_v40  ;;  %v4005_v40 = vld [vmem:[%s8476_s1 + $0x7f0] sm:$0xff] }
 0x612   :  { %v1530_v25 = vpop.f32.mrf.mxu1  ;;  %v1598_v47 = vmul.f32 %v6339_v20, %v6339_v20 }
 0x613   :  { %v1531_v36 = vadd.f32 %v1530_v25, %v1501_v24  ;;  %v4022_v25 = vld [vmem:[%s8476_s1 + $0x878] sm:$0xff] }
 0x614   :  { %1750 = vmatpush.msra.mxu1 %v4022_v25  ;;  %v4011_v25 = vld [vmem:[%s8476_s1 + $0x820] sm:$0xff] }
 0x616   :  { %v1504_v34 = vpop.f32.mrf.mxu0 }
 0x617   :  { %v1576_v31 = vpop.f32.mrf.mxu2 }
 0x618   :  { %v6337_v41 = vadd.f32 %v1576_v31, %v1531_v36  ;;  %v4021_v31 = vld [vmem:[%s8476_s1 + $0x870] sm:$0xff]  ;;  %v4020_v36 = vld [vmem:[%s8476_s1 + $0x868] sm:$0xff] }
 0x619   :  { %1751 = vmatpush.msra.mxu1 %v4021_v31  ;;  %v4028_v31 = vld [vmem:[%s8476_s1 + $0x8a8] sm:$0xff] }
 0x61a   :  { %v1533_v32 = vpop.f32.mrf.mxu1  ;;  %v1599_v54 = vmul.f32 %v6337_v41, %v6337_v41  ;;  %v1589_v5 = vadd.f32 %v6337_v41, %v6339_v20 }
 0x61b   :  { %v1534_v33 = vadd.f32 %v1533_v32, %v1504_v34  ;;  %v4038_v32 = vld [vmem:[%s8476_s1 + $0x8f8] sm:$0xff]  ;;  %1752 = vmatpush.msra.mxu1 %v4020_v36  ;;  %v3996_v36 = vld [vmem:[%s8476_s1 + $0x7a8] sm:$0xff] }
 0x61c   :  { %v1602_v55 = vadd.f32 %v1599_v54, %v1598_v47  ;;  %v4006_v34 = vld [vmem:[%s8476_s1 + $0x7f8] sm:$0xff]  ;;  %1825 = vmatpush.msra.mxu3 %v4038_v32  ;;  %v4004_v54 = vld [vmem:[%s8476_s1 + $0x7e8] sm:$0xff]  ;;  %v4035_v47 = vld [vmem:[%s8476_s1 + $0x8e0] sm:$0xff] }
 0x61d   :  { %1779 = vmatpush.msra.mxu2 %v4006_v34 }
 0x61e   :  { %v1507_v57 = vpop.f32.mrf.mxu0 }
 0x61f   :  { %v1579_v37 = vpop.f32.mrf.mxu2  ;;  %1780 = vmatpush.msra.mxu2 %v4005_v40  ;;  %v4027_v40 = vld [vmem:[%s8476_s1 + $0x8a0] sm:$0xff] }
 0x620   :  { %v6341_v30 = vadd.f32 %v1579_v37, %v1534_v33  ;;  %v4037_v37 = vld [vmem:[%s8476_s1 + $0x8f0] sm:$0xff]  ;;  %v4019_v33 = vld [vmem:[%s8476_s1 + $0x860] sm:$0xff] }
 0x621   :  { %1826 = vmatpush.msra.mxu3 %v4037_v37  ;;  %1753 = vmatpush.msra.mxu1 %v4019_v33  ;;  %v4010_v37 = vld [vmem:[%s8476_s1 + $0x818] sm:$0xff] }
 0x622   :  { %v1536_v44 = vpop.f32.mrf.mxu1  ;;  %v1600_v1 = vmul.f32 %v6341_v30, %v6341_v30  ;;  %v1590_v8 = vadd.f32 %v1589_v5, %v6341_v30  ;;  %1781 = vmatpush.msra.mxu2 %v4004_v54  ;;  %v4003_v5 = vld [vmem:[%s8476_s1 + $0x7e0] sm:$0xff]  ;;  %v4009_v54 = vld [vmem:[%s8476_s1 + $0x810] sm:$0xff] }
 0x623   :  { %v1537_v14 = vadd.f32 %v1536_v44, %v1507_v57  ;;  %v4036_v44 = vld [vmem:[%s8476_s1 + $0x8e8] sm:$0xff]  ;;  %v4018_v57 = vld [vmem:[%s8476_s1 + $0x858] sm:$0xff] }
 0x624   :  { %v1603_v60 = vadd.f32 %v1602_v55, %v1600_v1  ;;  %1827 = vmatpush.msra.mxu3 %v4036_v44  ;;  %1754 = vmatpush.msra.mxu1 %v4018_v57  ;;  %v4017_v1 = vld [vmem:[%s8476_s1 + $0x850] sm:$0xff]  ;;  %v4016_v55 = vld [vmem:[%s8476_s1 + $0x848] sm:$0xff]  ;;  %v3995_v44 = vld [vmem:[%s8476_s1 + $0x7a0] sm:$0xff] }
 0x625   :  { %1782 = vmatpush.msra.mxu2 %v4003_v5  ;;  %v3994_v57 = vld [vmem:[%s8476_s1 + $0x798] sm:$0xff]  ;;  %v4008_v5 = vld [vmem:[%s8476_s1 + $0x808] sm:$0xff] }
 0x626   :  { %1828 = vmatpush.msra.mxu3 %v4035_v47  ;;  %1755 = vmatpush.msra.mxu1 %v4017_v1  ;;  %v4026_v47 = vld [vmem:[%s8476_s1 + $0x898] sm:$0xff] }
 0x627   :  { %v1582_v51 = vpop.f32.mrf.mxu2 }
 0x628   :  { %v6352_v58 = vadd.f32 %v1582_v51, %v1537_v14  ;;  %v4034_v14 = vld [vmem:[%s8476_s1 + $0x8d8] sm:$0xff]  ;;  %1756 = vmatpush.msra.mxu1 %v4016_v55  ;;  %v4007_v55 = vld [vmem:[%s8476_s1 + $0x800] sm:$0xff] }
 0x629   :  { %v4002_v51 = vld [vmem:[%s8476_s1 + $0x7d8] sm:$0xff]  ;;  %1829 = vmatpush.msra.mxu3 %v4034_v14  ;;  %v3993_v14 = vld [vmem:[%s8476_s1 + $0x790] sm:$0xff] }
 0x62a   :  { %v1591_v61 = vadd.f32 %v1590_v8, %v6352_v58  ;;  %v1601_v63 = vmul.f32 %v6352_v58, %v6352_v58  ;;  %1783 = vmatpush.msra.mxu2 %v4002_v51  ;;  %v4033_v8 = vld [vmem:[%s8476_s1 + $0x8d0] sm:$0xff] }
 0x62b   :  { %1830 = vmatpush.msra.mxu3 %v4033_v8  ;;  %v4025_v51 = vld [vmem:[%s8476_s1 + $0x890] sm:$0xff] }
 0x62c   :  { %v1592_v0 = vrot.slane %v1591_v61, 4  ;;  %v1604_v11 = vadd.f32 %v1603_v60, %v1601_v63  ;;  %v4001_v60 = vld [vmem:[%s8476_s1 + $0x7d0] sm:$0xff]  ;;  %v4032_v63 = vld [vmem:[%s8476_s1 + $0x8c8] sm:$0xff] }
 0x62d   :  { %1784 = vmatpush.msra.mxu2 %v4001_v60  ;;  %1831 = vmatpush.msra.mxu3 %v4032_v63  ;;  %v3992_v60 = vld [vmem:[%s8476_s1 + $0x788] sm:$0xff]  ;;  %v4023_v63 = vld [vmem:[%s8476_s1 + $0x880] sm:$0xff] }
 0x62e   :  { %v1593_v27 = vadd.f32 %v1592_v0, %v1591_v61  ;;  %v1605_v12 = vrot.slane %v1604_v11, 4  ;;  %v4015_v61 = vld [vmem:[%s8476_s1 + $0x840] sm:$0xff]  ;;  %v4000_v0 = vld [vmem:[%s8476_s1 + $0x7c8] sm:$0xff] }
 0x62f   :  { %1757 = vmatpush.msra.mxu1 %v4015_v61  ;;  %1785 = vmatpush.msra.mxu2 %v4000_v0  ;;  %v4024_v61 = vld [vmem:[%s8476_s1 + $0x888] sm:$0xff]  ;;  %v3991_v0 = vld [vmem:[%s8476_s1 + $0x780] sm:$0xff] }
 0x630   :  { %v1594_v13 = vrot.slane %v1593_v27, 2  ;;  %v1606_v26 = vadd.f32 %v1605_v12, %v1604_v11  ;;  %v4014_v11 = vld [vmem:[%s8476_s1 + $0x838] sm:$0xff]  ;;  %v3999_v12 = vld [vmem:[%s8476_s1 + $0x7c0] sm:$0xff] }
 0x631   :  { %1758 = vmatpush.msra.mxu1 %v4014_v11  ;;  %1786 = vmatpush.msra.mxu2 %v3999_v12 }
 0x632   :  { %v1595_v29 = vadd.f32 %v1594_v13, %v1593_v27  ;;  %v1607_v45 = vrot.slane %v1606_v26, 2  ;;  %v4031_v27 = vld [vmem:[%s8476_s1 + $0x8c0] sm:$0xff]  ;;  %v4013_v13 = vld [vmem:[%s8476_s1 + $0x830] sm:$0xff] }
 0x633   :  { %1832 = vmatpush.msra.mxu3 %v4031_v27  ;;  %1759 = vmatpush.msra.mxu1 %v4013_v13 }
 0x634   :  { %v1596_v16 = vrot.slane %v1595_v29, 1  ;;  %v1608_v19 = vadd.f32 %v1607_v45, %v1606_v26  ;;  %v4030_v26 = vld [vmem:[%s8476_s1 + $0x8b8] sm:$0xff]  ;;  %v4012_v45 = vld [vmem:[%s8476_s1 + $0x828] sm:$0xff] }
 0x635   :  { %1833 = vmatpush.msra.mxu3 %v4030_v26  ;;  %1760 = vmatpush.msra.mxu1 %v4012_v45 }
 0x636   :  { %v1597_v18 = vadd.f32 %v1596_v16, %v1595_v29  ;;  %v1609_v21 = vrot.slane %v1608_v19, 1  ;;  %v3998_v29 = vld [vmem:[%s8476_s1 + $0x7b8] sm:$0xff] }
 0x637   :  { %1787 = vmatpush.msra.mxu2 %v3998_v29  ;;  %1761 = vmatpush.msra.mxu1 %v4011_v25  ;;  %v3989_v29 = vld [vmem:[%s8478_s2 + $0x4] sm:$0x1] }
 0x638   :  { %1627 = vmatmul.f32.vlgmr.msrb.gmra.mxu3 %v1597_v18  ;;  %v1610_v24 = vadd.f32 %v1609_v21, %v1608_v19  ;;  %v4029_v18 = vld [vmem:[%s8476_s1 + $0x8b0] sm:$0xff] }
 0x639   :  { %1834 = vmatpush.msra.mxu3 %v4029_v18  ;;  %1762 = vmatpush.msra.mxu1 %v4010_v37  ;;  %v3990_v18 = vld [vmem:[%s8479_s3 + $0x4] sm:$0x1] }
 0x63a   :  { %1648 = vmatmul.f32.vlgmr.msra.gmra.mxu0 %v1610_v24  ;;  %v3997_v24 = vld [vmem:[%s8476_s1 + $0x7b0] sm:$0xff] }
 0x63b   :  { %1788 = vmatpush.msra.mxu2 %v3997_v24  ;;  %1835 = vmatpush.msra.mxu3 %v4028_v31 }
 0x63c   :  { %1763 = vmatpush.msra.mxu1 %v4009_v54 }
 0x63d   :  { %1789 = vmatpush.msra.mxu2 %v3996_v36  ;;  %1836 = vmatpush.msra.mxu3 %v4027_v40 }
 0x63e   :  { %1764 = vmatpush.msra.mxu1 %v4008_v5 }
 0x63f   :  { %1790 = vmatpush.msra.mxu2 %v3995_v44  ;;  %1837 = vmatpush.msra.mxu3 %v4026_v47 }
 0x640   :  { %1765 = vmatpush.msra.mxu1 %v4007_v55 }
 0x641   :  { %1791 = vmatpush.msra.mxu2 %v3994_v57  ;;  %1838 = vmatpush.msra.mxu3 %v4025_v51 }
 0x642   :  { %4055 = vmatpush.msk.msrb.mxu1 %vm8654_vm13, %v4594_v38 }
 0x643   :  { %1792 = vmatpush.msra.mxu2 %v3993_v14  ;;  %1839 = vmatpush.msra.mxu3 %v4024_v61 }
 0x644   :  { %4056 = vmatpush.msk.msrb.mxu1 %vm8638_vm14, %v4594_v38 }
 0x645   :  { %1793 = vmatpush.msra.mxu2 %v3992_v60  ;;  %1840 = vmatpush.msra.mxu3 %v4023_v63 }
 0x646   :  { %4057 = vmatpush.msk.msrb.mxu1 %vm8644_vm12, %v4594_v38 }
 0x647   :  { %1794 = vmatpush.msra.mxu2 %v3991_v0 }
 0x648   :  { %4058 = vmatpush.msk.msrb.mxu1 %vm8645_vm11, %v4594_v38 }
 0x64a   :  { %4059 = vmatpush.msk.msrb.mxu1 %vm8655_vm10, %v4594_v38 }
 0x64c   :  { %4060 = vmatpush.msk.msrb.mxu1 %vm8595_vm5, %v4594_v38 }
 0x64e   :  { %4061 = vmatpush.msk.msrb.mxu1 %vm4938_vm15, %v4594_v38 }
 0x650   :  { %4062 = vmatpush.msk.msrb.mxu1 %vm4950_vm3, %v4594_v38 }
 0x652   :  { %4063 = vmatpush.msk.msrb.mxu1 %vm4962_vm4, %v4594_v38 }
 0x654   :  { %4064 = vmatpush.msk.msrb.mxu1 %vm4974_vm8, %v4594_v38 }
 0x656   :  { %4065 = vmatpush.msk.msrb.mxu1 %vm4986_vm7, %v4594_v38 }
 0x658   :  { %4066 = vmatpush.msk.msrb.mxu1 %vm4997_vm6, %v4594_v38 }
 0x65a   :  { %4067 = vmatpush.msk.msrb.mxu1 %vm4774_vm2, %v4594_v38 }
 0x65c   :  { %4068 = vmatpush.msk.msrb.mxu1 %vm4740_vm1, %v4594_v38 }
 0x65e   :  { %4069 = vmatpush.msk.msrb.mxu1 %vm4680_vm0, %v4594_v38 }
 0x660   :  { %4070 = vmatpush.msk.msrb.mxu1 %vm8653_vm9, %v4594_v38  ;;  %vm8663_vm9 = vnez %v8556_v15 }
 0x6b7   :  { %v1649_v16 = vpop.f32.mrf.mxu0 }
 0x6b8   :  { %v1652_v32 = vmul.f32 0.001953125, %v1649_v16 }
 0x6bb   :  { %v1628_v19 = vpop.f32.mrf.mxu3 }
 0x6bc   :  { %v6447_v21 = vmul.f32 0.001953125, %v1628_v19 }
 0x6be   :  { %v1653_v34 = vmul.f32 %v6447_v21, %v6447_v21 }
 0x6c0   :  { %v1654_v33 = vsub.f32 %v1652_v32, %v1653_v34 }
 0x6c2   :  { %v1655_v1 = vmax.f32 %v1654_v33, 0.0 }
 0x6c4   :  { %v1658_v8 = vadd.f32 1e-05, %v1655_v1 }
 0x6c6   :  { %4574 = vrsqrt.f32 %v1658_v8  ;;  %vm1665_vm10 = vweird.f32 %v1658_v8 }
 0x6cc   :  { %v4575_v11 = vpop.eup %4574 }
 0x6cd   :  { %v1660_v27 = vmul.f32 %v4575_v11, %v1658_v8  ;;  %vm1666_vm12 = vweird.f32 %v4575_v11 }
 0x6ce   :  { %vm1667_vm11 = vmor %vm1665_vm10, %vm1666_vm12  ;;  %vm8656_vm12 = vcmp.lt.s32.totalorder %v4644_v9, 7  ;;  %vm8658_vm10 = vnez %v8554_v2 }
 0x6cf   :  { %v1661_v12 = vmul.f32 %v4575_v11, %v1660_v27 }
 0x6d1   :  { %v1662_v13 = vmul.f32 0.5, %v1661_v12 }
 0x6d3   :  { %v1663_v26 = vsub.f32 1.5, %v1662_v13 }
 0x6d5   :  { %v1664_v45 = vmul.f32 %v4575_v11, %v1663_v26 }
 0x6d7   :  { %v1668_v16 = vsel %vm1667_vm11, %v4575_v11, %v1664_v45  ;;  %vm8657_vm11 = vcmp.lt.s32.totalorder %v4644_v9, 1 }
 0x6d8   :  { %v1669_v19 = vmul.f32 %v3989_v29, %v1668_v16 }
 0x6da   :  { %v1672_v24 = vmul.f32 %v1669_v19, %v6447_v21  ;;  %v1675_v25 = vperm.slane %v1669_v19, 0 }
 0x6dc   :  { %v1673_v31 = vsub.f32 %v3990_v18, %v1672_v24  ;;  %v1680_v32 = vmul.f32 %v1675_v25, %v6352_v58  ;;  %v1677_v36 = vmul.f32 %v1675_v25, %v6339_v20  ;;  %v1678_v37 = vmul.f32 %v1675_v25, %v6337_v41 }
 0x6dd   :  { %v1679_v40 = vmul.f32 %v1675_v25, %v6341_v30 }
 0x6de   :  { %v1682_v34 = vperm.slane %v1673_v31, 0 }
 0x6e0   :  { %v1687_v21 = vadd.f32 %v1682_v34, %v1680_v32  ;;  %v1684_v33 = vadd.f32 %v1682_v34, %v1677_v36  ;;  %v1685_v44 = vadd.f32 %v1682_v34, %v1678_v37  ;;  %v1686_v54 = vadd.f32 %v1682_v34, %v1679_v40 }
 0x6e2   :  { %v1688_v58 = vmax.f32 %v1684_v33, 0.0  ;;  %v1689_v57 = vmax.f32 %v1685_v44, 0.0  ;;  %v1691_v47 = vmax.f32 %v1687_v21, 0.0  ;;  %v1690_v41 = vmax.f32 %v1686_v54, 0.0 }
 0x6e4   :  { %1766 = vmatmul.f32.vlgmr.msra.gmra.mxu1 %v1688_v58  ;;  %v1700_v20 = vrot.slane %v1688_v58, 1  ;;  %v1701_v30 = vrot.slane %v1689_v57, 1  ;;  %v1692_v5 = vrot.slane %v1688_v58, 7  ;;  %v1695_v1 = vrot.slane %v1691_v47, 7 }
 0x6e5   :  { %4121 = vmatpush.msk.msra.mxu1 %vm8654_vm13, %v4594_v38  ;;  %v1693_v8 = vrot.slane %v1689_v57, 7  ;;  %v1702_v60 = vrot.slane %v1690_v41, 1  ;;  %vm8661_vm13 = vnez %v8566_v42  ;;  %v1703_v11 = vrot.slane %v1691_v47, 1 }
 0x6e6   :  { %v1706_v14 = vsel %vm8656_vm12, %v1700_v20, %v1701_v30  ;;  %v1699_v51 = vsel %vm8657_vm11, %v1695_v1, %v1692_v5  ;;  %vm8659_vm12 = vmmov %vm8657_vm11  ;;  %vm8660_vm11 = vcmp.lt.s32.totalorder %v4644_v9, 7  ;;  %v1694_v27 = vrot.slane %v1690_v41, 7 }
 0x6e7   :  { %1841 = vmatmul.f32.vlgmr.msra.gmra.mxu3 %v1706_v14  ;;  %v1708_v55 = vsel %vm8658_vm10, %v1706_v14, %v1699_v51  ;;  %4122 = vmatpush.msk.msra.mxu1 %vm8638_vm14, %v4594_v38  ;;  %v1698_v61 = vsel %vm8659_vm12, %v1692_v5, %v1693_v8  ;;  %v1705_v63 = vsel %vm8660_vm11, %v1701_v30, %v1702_v60  ;;  %vm8665_vm12 = vmmov %vm8660_vm11  ;;  %vm8666_vm11 = vcmp.lt.s32.totalorder %v4644_v9, 1 }
 0x6e8   :  { %1795 = vmatmul.f32.vlgmr.msra.gmra.mxu2 %v1708_v55  ;;  %vm8662_vm10 = vnez %v8568_v46  ;;  %v1713_v0 = vsel %vm8663_vm9, %v1698_v61, %v1705_v63  ;;  %vm8664_vm14 = vnez %v8570_v49  ;;  %v1704_v12 = vsel %vm8665_vm12, %v1702_v60, %v1703_v11  ;;  %vm8668_vm12 = vmmov %vm8666_vm11 }
 0x6e9   :  { %4123 = vmatpush.msk.msra.mxu1 %vm8661_vm13, %v4594_v38  ;;  %v1697_v13 = vsel %vm8666_vm11, %v1693_v8, %v1694_v27  ;;  %vm8667_vm9 = vnez %v8558_v22  ;;  %v1696_v29 = vsel %vm8668_vm12, %v1694_v27, %v1695_v1  ;;  %vm8669_vm11 = vcmp.lt.s32.totalorder %v4644_v9, 7 }
 0x6ea   :  { %v1710_v26 = vsel %vm8667_vm9, %v1704_v12, %v1697_v13  ;;  %v1707_v45 = vsel %vm8669_vm11, %v1703_v11, %v1700_v20  ;;  %vm8670_vm9 = vnez %v8560_v28  ;;  %vm8671_vm12 = vnez %v8586_v17 }
 0x6eb   :  { %4124 = vmatpush.msk.msra.mxu1 %vm8662_vm10, %v4594_v38  ;;  %v1715_v16 = vsel %vm8670_vm9, %v1696_v29, %v1707_v45  ;;  %vm8672_vm11 = vnez %v8562_v35  ;;  %vm8673_vm9 = vnez %v8564_v39 }
 0x6ec   :  { %1769 = vmatmul.f32.gmra.mxu1 %v1689_v57 }
 0x6ed   :  { %4125 = vmatpush.msk.msra.mxu1 %vm8664_vm14, %v4594_v38 }
 0x6ef   :  { %1844 = vmatmul.f32.gmra.mxu3 %v1713_v0  ;;  %4126 = vmatpush.msk.msra.mxu1 %vm8595_vm5, %v4594_v38 }
 0x6f0   :  { %1798 = vmatmul.f32.gmra.mxu2 %v1698_v61 }
 0x6f1   :  { %4127 = vmatpush.msk.msra.mxu1 %vm4938_vm15, %v4594_v38 }
 0x6f3   :  { %4128 = vmatpush.msk.msra.mxu1 %vm4950_vm3, %v4594_v38 }
 0x6f4   :  { %1772 = vmatmul.f32.gmra.mxu1 %v1690_v41 }
 0x6f5   :  { %4129 = vmatpush.msk.msra.mxu1 %vm4962_vm4, %v4594_v38 }
 0x6f7   :  { %1847 = vmatmul.f32.gmra.mxu3 %v1704_v12  ;;  %4130 = vmatpush.msk.msra.mxu1 %vm4974_vm8, %v4594_v38 }
 0x6f8   :  { %1801 = vmatmul.f32.gmra.mxu2 %v1710_v26 }
 0x6f9   :  { %4131 = vmatpush.msk.msra.mxu1 %vm4986_vm7, %v4594_v38 }
 0x6fb   :  { %4132 = vmatpush.msk.msra.mxu1 %vm4997_vm6, %v4594_v38 }
 0x6fc   :  { %1775 = vmatmul.f32.gmra.mxu1 %v1691_v47 }
 0x6fd   :  { %4133 = vmatpush.msk.msra.mxu1 %vm4774_vm2, %v4594_v38 }
 0x6ff   :  { %1850 = vmatmul.f32.gmra.mxu3 %v1715_v16  ;;  %4134 = vmatpush.msk.msra.mxu1 %vm4740_vm1, %v4594_v38 }
 0x700   :  { %1804 = vmatmul.f32.gmra.mxu2 %v1696_v29 }
 0x701   :  { %4135 = vmatpush.msk.msra.mxu1 %vm4680_vm0, %v4594_v38 }
 0x703   :  { %4136 = vmatpush.msk.msra.mxu1 %vm8671_vm12, %v4594_v38 }
 0x761   :  { %v1767_v19 = vpop.f32.mrf.mxu1 }
 0x769   :  { %v1770_v25 = vpop.f32.mrf.mxu1 }
 0x76a   :  { %v1842_v18 = vpop.f32.mrf.mxu3 }
 0x76b   :  { %v1796_v24 = vpop.f32.mrf.mxu2 }
 0x76c   :  { %v1797_v21 = vadd.f32 %v1796_v24, %v1767_v19 }
 0x76e   :  { %v6638_v54 = vadd.f32 %v1842_v18, %v1797_v21  ;;  %v4087_v21 = vld [vmem:[%s8476_s1 + $0x970] sm:$0xff] }
 0x770   :  { %v1867_v20 = vmul.f32 %v6638_v54, %v6638_v54 }
 0x771   :  { %v1773_v34 = vpop.f32.mrf.mxu1 }
 0x772   :  { %v1845_v31 = vpop.f32.mrf.mxu3 }
 0x773   :  { %v1799_v32 = vpop.f32.mrf.mxu2 }
 0x774   :  { %v1800_v36 = vadd.f32 %v1799_v32, %v1770_v25  ;;  %v4103_v32 = vld [vmem:[%s8476_s1 + $0x9f0] sm:$0xff] }
 0x776   :  { %v6636_v44 = vadd.f32 %v1845_v31, %v1800_v36  ;;  %v4104_v31 = vld [vmem:[%s8476_s1 + $0x9f8] sm:$0xff] }
 0x777   :  { %2019 = vmatpush.msrb.mxu2 %v4104_v31  ;;  %v4088_v36 = vld [vmem:[%s8476_s1 + $0x978] sm:$0xff] }
 0x778   :  { %v1868_v57 = vmul.f32 %v6636_v44, %v6636_v44  ;;  %v1858_v30 = vadd.f32 %v6636_v44, %v6638_v54  ;;  %2048 = vmatpush.msrb.mxu3 %v4088_v36 }
 0x779   :  { %v1776_v47 = vpop.f32.mrf.mxu1  ;;  %2020 = vmatpush.msrb.mxu2 %v4103_v32  ;;  %v4110_v32 = vld [vmem:[%s8476_s1 + $0xa28] sm:$0xff] }
 0x77a   :  { %v1848_v37 = vpop.f32.mrf.mxu3  ;;  %v1871_v51 = vadd.f32 %v1868_v57, %v1867_v20  ;;  %2049 = vmatpush.msrb.mxu3 %v4087_v21  ;;  %v4118_v57 = vld [vmem:[%s8476_s1 + $0xa68] sm:$0xff]  ;;  %v4117_v20 = vld [vmem:[%s8476_s1 + $0xa60] sm:$0xff] }
 0x77b   :  { %v1802_v40 = vpop.f32.mrf.mxu2  ;;  %v4077_v21 = vld [vmem:[%s8476_s1 + $0x920] sm:$0xff] }
 0x77c   :  { %v1803_v33 = vadd.f32 %v1802_v40, %v1773_v34  ;;  %v4120_v34 = vld [vmem:[%s8476_s1 + $0xa78] sm:$0xff]  ;;  %v4119_v40 = vld [vmem:[%s8476_s1 + $0xa70] sm:$0xff] }
 0x77d   :  { %2094 = vmatpush.msra.mxu0 %v4120_v34 }
 0x77e   :  { %v6640_v58 = vadd.f32 %v1848_v37, %v1803_v33  ;;  %v4102_v37 = vld [vmem:[%s8476_s1 + $0x9e8] sm:$0xff]  ;;  %v4101_v33 = vld [vmem:[%s8476_s1 + $0x9e0] sm:$0xff] }
 0x77f   :  { %2021 = vmatpush.msrb.mxu2 %v4102_v37  ;;  %2095 = vmatpush.msra.mxu0 %v4119_v40  ;;  %v4078_v37 = vld [vmem:[%s8476_s1 + $0x928] sm:$0xff]  ;;  %v4092_v40 = vld [vmem:[%s8476_s1 + $0x998] sm:$0xff] }
 0x780   :  { %v1869_v5 = vmul.f32 %v6640_v58, %v6640_v58  ;;  %v1859_v55 = vadd.f32 %v1858_v30, %v6640_v58  ;;  %v4085_v30 = vld [vmem:[%s8476_s1 + $0x960] sm:$0xff] }
 0x781   :  { %2022 = vmatpush.msrb.mxu2 %v4101_v33  ;;  %2096 = vmatpush.msra.mxu0 %v4118_v57  ;;  %v4109_v33 = vld [vmem:[%s8476_s1 + $0xa20] sm:$0xff]  ;;  %v4091_v57 = vld [vmem:[%s8476_s1 + $0x990] sm:$0xff] }
 0x782   :  { %v1851_v14 = vpop.f32.mrf.mxu3  ;;  %v1872_v60 = vadd.f32 %v1871_v51, %v1869_v5  ;;  %v4099_v5 = vld [vmem:[%s8476_s1 + $0x9d0] sm:$0xff]  ;;  %v4098_v51 = vld [vmem:[%s8476_s1 + $0x9c8] sm:$0xff] }
 0x783   :  { %v1805_v41 = vpop.f32.mrf.mxu2  ;;  %2097 = vmatpush.msra.mxu0 %v4117_v20  ;;  %v4108_v20 = vld [vmem:[%s8476_s1 + $0xa18] sm:$0xff] }
 0x784   :  { %v1806_v1 = vadd.f32 %v1805_v41, %v1776_v47  ;;  %v4086_v47 = vld [vmem:[%s8476_s1 + $0x968] sm:$0xff]  ;;  %v4100_v41 = vld [vmem:[%s8476_s1 + $0x9d8] sm:$0xff] }
 0x785   :  { %2050 = vmatpush.msrb.mxu3 %v4086_v47  ;;  %2023 = vmatpush.msrb.mxu2 %v4100_v41  ;;  %v4076_v41 = vld [vmem:[%s8476_s1 + $0x918] sm:$0xff] }
 0x786   :  { %v6651_v8 = vadd.f32 %v1851_v14, %v1806_v1  ;;  %v4116_v1 = vld [vmem:[%s8476_s1 + $0xa58] sm:$0xff] }
 0x787   :  { %2051 = vmatpush.msrb.mxu3 %v4085_v30  ;;  %2024 = vmatpush.msrb.mxu2 %v4099_v5  ;;  %v4084_v14 = vld [vmem:[%s8476_s1 + $0x958] sm:$0xff]  ;;  %v4090_v30 = vld [vmem:[%s8476_s1 + $0x988] sm:$0xff]  ;;  %v4107_v5 = vld [vmem:[%s8476_s1 + $0xa10] sm:$0xff] }
 0x788   :  { %v1860_v61 = vadd.f32 %v1859_v55, %v6651_v8  ;;  %v1870_v63 = vmul.f32 %v6651_v8, %v6651_v8  ;;  %2098 = vmatpush.msra.mxu0 %v4116_v1  ;;  %v4115_v55 = vld [vmem:[%s8476_s1 + $0xa50] sm:$0xff] }
 0x789   :  { %2052 = vmatpush.msrb.mxu3 %v4084_v14  ;;  %2025 = vmatpush.msrb.mxu2 %v4098_v51  ;;  %v4075_v14 = vld [vmem:[%s8476_s1 + $0x910] sm:$0xff]  ;;  %v4089_v51 = vld [vmem:[%s8476_s1 + $0x980] sm:$0xff] }
 0x78a   :  { %v1861_v0 = vrot.slane %v1860_v61, 4  ;;  %v1873_v11 = vadd.f32 %v1872_v60, %v1870_v63  ;;  %v4083_v60 = vld [vmem:[%s8476_s1 + $0x950] sm:$0xff]  ;;  %2099 = vmatpush.msra.mxu0 %v4115_v55  ;;  %v4114_v63 = vld [vmem:[%s8476_s1 + $0xa48] sm:$0xff] }
 0x78b   :  { %2053 = vmatpush.msrb.mxu3 %v4083_v60  ;;  %v4074_v60 = vld [vmem:[%s8476_s1 + $0x908] sm:$0xff] }
 0x78c   :  { %v1862_v27 = vadd.f32 %v1861_v0, %v1860_v61  ;;  %v1874_v12 = vrot.slane %v1873_v11, 4  ;;  %v4097_v61 = vld [vmem:[%s8476_s1 + $0x9c0] sm:$0xff]  ;;  %v4082_v0 = vld [vmem:[%s8476_s1 + $0x948] sm:$0xff]  ;;  %2100 = vmatpush.msra.mxu0 %v4114_v63 }
 0x78d   :  { %2026 = vmatpush.msrb.mxu2 %v4097_v61  ;;  %2054 = vmatpush.msrb.mxu3 %v4082_v0  ;;  %v4106_v61 = vld [vmem:[%s8476_s1 + $0xa08] sm:$0xff]  ;;  %v4105_v63 = vld [vmem:[%s8476_s1 + $0xa00] sm:$0xff] }
 0x78e   :  { %v1863_v13 = vrot.slane %v1862_v27, 2  ;;  %v1875_v26 = vadd.f32 %v1874_v12, %v1873_v11  ;;  %v4096_v11 = vld [vmem:[%s8476_s1 + $0x9b8] sm:$0xff]  ;;  %v4081_v12 = vld [vmem:[%s8476_s1 + $0x940] sm:$0xff] }
 0x78f   :  { %2027 = vmatpush.msrb.mxu2 %v4096_v11  ;;  %2055 = vmatpush.msrb.mxu3 %v4081_v12  ;;  %v4073_v0 = vld [vmem:[%s8476_s1 + $0x900] sm:$0xff] }
 0x790   :  { %v1864_v29 = vadd.f32 %v1863_v13, %v1862_v27  ;;  %v1876_v45 = vrot.slane %v1875_v26, 2  ;;  %v4113_v27 = vld [vmem:[%s8476_s1 + $0xa40] sm:$0xff]  ;;  %v4095_v13 = vld [vmem:[%s8476_s1 + $0x9b0] sm:$0xff] }
 0x791   :  { %2101 = vmatpush.msra.mxu0 %v4113_v27  ;;  %2028 = vmatpush.msrb.mxu2 %v4095_v13 }
 0x792   :  { %v1865_v16 = vrot.slane %v1864_v29, 1  ;;  %v1877_v19 = vadd.f32 %v1876_v45, %v1875_v26  ;;  %v4112_v26 = vld [vmem:[%s8476_s1 + $0xa38] sm:$0xff]  ;;  %v4094_v45 = vld [vmem:[%s8476_s1 + $0x9a8] sm:$0xff] }
 0x793   :  { %2102 = vmatpush.msra.mxu0 %v4112_v26  ;;  %2029 = vmatpush.msrb.mxu2 %v4094_v45 }
 0x794   :  { %v1866_v18 = vadd.f32 %v1865_v16, %v1864_v29  ;;  %v1878_v24 = vrot.slane %v1877_v19, 1  ;;  %v4080_v29 = vld [vmem:[%s8476_s1 + $0x938] sm:$0xff] }
 0x795   :  { %2056 = vmatpush.msrb.mxu3 %v4080_v29  ;;  %v4071_v29 = vld [vmem:[%s8478_s2 + $0x5] sm:$0x1] }
 0x796   :  { %1896 = vmatmul.f32.vlgmr.msrb.gmra.mxu0 %v1866_v18  ;;  %v1879_v25 = vadd.f32 %v1878_v24, %v1877_v19  ;;  %v4111_v19 = vld [vmem:[%s8476_s1 + $0xa30] sm:$0xff] }
 0x797   :  { %v4079_v24 = vld [vmem:[%s8476_s1 + $0x930] sm:$0xff]  ;;  %2103 = vmatpush.msra.mxu0 %v4111_v19 }
 0x798   :  { %1917 = vmatmul.f32.vlgmr.msrb.gmra.mxu1 %v1879_v25  ;;  %v4093_v25 = vld [vmem:[%s8476_s1 + $0x9a0] sm:$0xff]  ;;  %2057 = vmatpush.msrb.mxu3 %v4079_v24 }
 0x799   :  { %2030 = vmatpush.msrb.mxu2 %v4093_v25  ;;  %2104 = vmatpush.msra.mxu0 %v4110_v32  ;;  %v4072_v24 = vld [vmem:[%s8479_s3 + $0x5] sm:$0x1] }
 0x79a   :  { %2058 = vmatpush.msrb.mxu3 %v4078_v37 }
 0x79b   :  { %2031 = vmatpush.msrb.mxu2 %v4092_v40  ;;  %2105 = vmatpush.msra.mxu0 %v4109_v33 }
 0x79c   :  { %2059 = vmatpush.msrb.mxu3 %v4077_v21 }
 0x79d   :  { %2032 = vmatpush.msrb.mxu2 %v4091_v57  ;;  %2106 = vmatpush.msra.mxu0 %v4108_v20 }
 0x79e   :  { %2060 = vmatpush.msrb.mxu3 %v4076_v41 }
 0x79f   :  { %2033 = vmatpush.msrb.mxu2 %v4090_v30  ;;  %2107 = vmatpush.msra.mxu0 %v4107_v5 }
 0x7a0   :  { %2061 = vmatpush.msrb.mxu3 %v4075_v14 }
 0x7a1   :  { %2034 = vmatpush.msrb.mxu2 %v4089_v51  ;;  %2108 = vmatpush.msra.mxu0 %v4106_v61 }
 0x7a2   :  { %2062 = vmatpush.msrb.mxu3 %v4074_v60 }
 0x7a3   :  { %4137 = vmatpush.msk.msra.mxu2 %vm8672_vm11, %v4594_v38  ;;  %2109 = vmatpush.msra.mxu0 %v4105_v63 }
 0x7a4   :  { %2063 = vmatpush.msrb.mxu3 %v4073_v0 }
 0x7a5   :  { %4138 = vmatpush.msk.msra.mxu2 %vm8673_vm9, %v4594_v38 }
 0x7a7   :  { %4139 = vmatpush.msk.msra.mxu2 %vm8661_vm13, %v4594_v38 }
 0x7a9   :  { %4140 = vmatpush.msk.msra.mxu2 %vm8662_vm10, %v4594_v38 }
 0x7ab   :  { %4141 = vmatpush.msk.msra.mxu2 %vm8664_vm14, %v4594_v38 }
 0x7ad   :  { %4142 = vmatpush.msk.msra.mxu2 %vm8595_vm5, %v4594_v38 }
 0x7af   :  { %4143 = vmatpush.msk.msra.mxu2 %vm4938_vm15, %v4594_v38 }
 0x7b1   :  { %4144 = vmatpush.msk.msra.mxu2 %vm4950_vm3, %v4594_v38 }
 0x7b3   :  { %4145 = vmatpush.msk.msra.mxu2 %vm4962_vm4, %v4594_v38 }
 0x7b5   :  { %4146 = vmatpush.msk.msra.mxu2 %vm4974_vm8, %v4594_v38 }
 0x7b7   :  { %4147 = vmatpush.msk.msra.mxu2 %vm4986_vm7, %v4594_v38 }
 0x7b9   :  { %4148 = vmatpush.msk.msra.mxu2 %vm4997_vm6, %v4594_v38 }
 0x7bb   :  { %4149 = vmatpush.msk.msra.mxu2 %vm4774_vm2, %v4594_v38 }
 0x7bd   :  { %4150 = vmatpush.msk.msra.mxu2 %vm4740_vm1, %v4594_v38 }
 0x7bf   :  { %4151 = vmatpush.msk.msra.mxu2 %vm4680_vm0, %v4594_v38 }
 0x7c1   :  { %4152 = vmatpush.msk.msra.mxu2 %vm8671_vm12, %v4594_v38  ;;  %vm8681_vm12 = vnez %v8556_v15 }
 0x813   :  { %v1897_v16 = vpop.f32.mrf.mxu0 }
 0x814   :  { %v6746_v18 = vmul.f32 0.001953125, %v1897_v16 }
 0x815   :  { %v1918_v31 = vpop.f32.mrf.mxu1 }
 0x816   :  { %v1922_v34 = vmul.f32 %v6746_v18, %v6746_v18  ;;  %v1921_v36 = vmul.f32 0.001953125, %v1918_v31 }
 0x818   :  { %v1923_v47 = vsub.f32 %v1921_v36, %v1922_v34 }
 0x81a   :  { %v1924_v1 = vmax.f32 %v1923_v47, 0.0 }
 0x81c   :  { %v1927_v55 = vadd.f32 1e-05, %v1924_v1 }
 0x81e   :  { %4576 = vrsqrt.f32 %v1927_v55  ;;  %vm1934_vm14 = vweird.f32 %v1927_v55 }
 0x824   :  { %v4577_v11 = vpop.eup %4576 }
 0x825   :  { %v1929_v27 = vmul.f32 %v4577_v11, %v1927_v55  ;;  %vm1935_vm13 = vweird.f32 %v4577_v11 }
 0x826   :  { %vm1936_vm10 = vmor %vm1934_vm14, %vm1935_vm13  ;;  %vm8674_vm14 = vcmp.lt.s32.totalorder %v4644_v9, 7  ;;  %vm8675_vm13 = vcmp.lt.s32.totalorder %v4644_v9, 1 }
 0x827   :  { %v1930_v12 = vmul.f32 %v4577_v11, %v1929_v27 }
 0x829   :  { %v1931_v13 = vmul.f32 0.5, %v1930_v12 }
 0x82b   :  { %v1932_v26 = vsub.f32 1.5, %v1931_v13 }
 0x82d   :  { %v1933_v45 = vmul.f32 %v4577_v11, %v1932_v26 }
 0x82f   :  { %v1937_v16 = vsel %vm1936_vm10, %v4577_v11, %v1933_v45  ;;  %vm8676_vm10 = vnez %v8554_v2 }
 0x830   :  { %v1938_v19 = vmul.f32 %v4071_v29, %v1937_v16 }
 0x832   :  { %v1941_v25 = vmul.f32 %v1938_v19, %v6746_v18  ;;  %v1944_v31 = vperm.slane %v1938_v19, 0 }
 0x834   :  { %v1942_v32 = vsub.f32 %v4072_v24, %v1941_v25  ;;  %v1946_v34 = vmul.f32 %v1944_v31, %v6638_v54  ;;  %v1947_v37 = vmul.f32 %v1944_v31, %v6636_v44  ;;  %v1949_v40 = vmul.f32 %v1944_v31, %v6651_v8 }
 0x835   :  { %v1948_v21 = vmul.f32 %v1944_v31, %v6640_v58 }
 0x836   :  { %v1951_v36 = vperm.slane %v1942_v32, 0 }
 0x838   :  { %v1953_v18 = vadd.f32 %v1951_v36, %v1946_v34  ;;  %v1954_v33 = vadd.f32 %v1951_v36, %v1947_v37  ;;  %v1956_v57 = vadd.f32 %v1951_v36, %v1949_v40  ;;  %v1955_v47 = vadd.f32 %v1951_v36, %v1948_v21 }
 0x83a   :  { %v6858_v54 = vadd.f32 %v1953_v18, %v6236_v50  ;;  %v6861_v44 = vadd.f32 %v1954_v33, %v6239_v3  ;;  %v6864_v58 = vadd.f32 %v1956_v57, %v6242_v48  ;;  %v6870_v8 = vadd.f32 %v1955_v47, %v6248_v6 }
 0x83c   :  { %2035 = vmatmul.f32.vlgmr.msrb.gmra.mxu2 %v6858_v54  ;;  %v1969_v41 = vrot.slane %v6858_v54, 1  ;;  %v1970_v50 = vrot.slane %v6861_v44, 1  ;;  %v1961_v20 = vrot.slane %v6858_v54, 7  ;;  %v1964_v3 = vrot.slane %v6864_v58, 7 }
 0x83d   :  { %4203 = vmatpush.msk.msrb.mxu2 %vm8672_vm11, %v4594_v38  ;;  %v1962_v5 = vrot.slane %v6861_v44, 7  ;;  %v1971_v1 = vrot.slane %v6870_v8, 1  ;;  %vm8679_vm11 = vnez %v8566_v42  ;;  %v1972_v60 = vrot.slane %v6864_v58, 1 }
 0x83e   :  { %v1975_v48 = vsel %vm8674_vm14, %v1969_v41, %v1970_v50  ;;  %v1968_v6 = vsel %vm8675_vm13, %v1964_v3, %v1961_v20  ;;  %vm8677_vm14 = vmmov %vm8675_vm13  ;;  %vm8678_vm13 = vcmp.lt.s32.totalorder %v4644_v9, 7  ;;  %v1963_v61 = vrot.slane %v6870_v8, 7 }
 0x83f   :  { %2110 = vmatmul.f32.vlgmr.msra.gmra.mxu0 %v1975_v48  ;;  %v1977_v30 = vsel %vm8676_vm10, %v1975_v48, %v1968_v6  ;;  %4204 = vmatpush.msk.msrb.mxu2 %vm8673_vm9, %v4594_v38  ;;  %v1967_v14 = vsel %vm8677_vm14, %v1961_v20, %v1962_v5  ;;  %v1974_v51 = vsel %vm8678_vm13, %v1970_v50, %v1971_v1 }
 0x840   :  { %2064 = vmatmul.f32.vlgmr.msrb.gmra.mxu3 %v1977_v30  ;;  %vm8680_vm10 = vnez %v8568_v46  ;;  %v1982_v55 = vsel %vm8681_vm12, %v1967_v14, %v1974_v51  ;;  %vm8682_vm14 = vnez %v8570_v49  ;;  %v1973_v63 = vsel %vm8678_vm13, %v1971_v1, %v1972_v60 }
 0x841   :  { %4205 = vmatpush.msk.msrb.mxu2 %vm8679_vm11, %v4594_v38  ;;  %vm8683_vm12 = vcmp.lt.s32.totalorder %v4644_v9, 1 }
 0x842   :  { %v1966_v0 = vsel %vm8683_vm12, %v1962_v5, %v1963_v61  ;;  %vm8685_vm13 = vmmov %vm8683_vm12  ;;  %vm8686_vm12 = vcmp.lt.s32.totalorder %v4644_v9, 7 }
 0x843   :  { %4206 = vmatpush.msk.msrb.mxu2 %vm8680_vm10, %v4594_v38  ;;  %v1965_v27 = vsel %vm8685_vm13, %v1963_v61, %v1964_v3  ;;  %v1976_v12 = vsel %vm8686_vm12, %v1972_v60, %v1969_v41  ;;  %vm8688_vm13 = vnez %v8586_v17  ;;  %vm8689_vm12 = vnez %v8562_v35 }
 0x844   :  { %2038 = vmatmul.f32.gmra.mxu2 %v6861_v44 }
 0x845   :  { %4207 = vmatpush.msk.msrb.mxu2 %vm8682_vm14, %v4594_v38  ;;  %vm8684_vm14 = vnez %v8558_v22 }
 0x846   :  { %v1979_v11 = vsel %vm8684_vm14, %v1973_v63, %v1966_v0  ;;  %vm8687_vm14 = vnez %v8560_v28 }
 0x847   :  { %2113 = vmatmul.f32.gmra.mxu0 %v1982_v55  ;;  %4208 = vmatpush.msk.msrb.mxu2 %vm8595_vm5, %v4594_v38  ;;  %v1984_v13 = vsel %vm8687_vm14, %v1965_v27, %v1976_v12  ;;  %vm8690_vm14 = vnez %v8570_v49 }
 0x848   :  { %2067 = vmatmul.f32.gmra.mxu3 %v1967_v14 }
 0x849   :  { %4209 = vmatpush.msk.msrb.mxu2 %vm4938_vm15, %v4594_v38 }
 0x84b   :  { %4210 = vmatpush.msk.msrb.mxu2 %vm4950_vm3, %v4594_v38 }
 0x84c   :  { %2041 = vmatmul.f32.gmra.mxu2 %v6870_v8 }
 0x84d   :  { %4211 = vmatpush.msk.msrb.mxu2 %vm4962_vm4, %v4594_v38 }
 0x84f   :  { %2116 = vmatmul.f32.gmra.mxu0 %v1973_v63  ;;  %4212 = vmatpush.msk.msrb.mxu2 %vm4974_vm8, %v4594_v38 }
 0x850   :  { %2070 = vmatmul.f32.gmra.mxu3 %v1979_v11 }
 0x851   :  { %4213 = vmatpush.msk.msrb.mxu2 %vm4986_vm7, %v4594_v38 }
 0x853   :  { %4214 = vmatpush.msk.msrb.mxu2 %vm4997_vm6, %v4594_v38 }
 0x854   :  { %2044 = vmatmul.f32.gmra.mxu2 %v6864_v58 }
 0x855   :  { %4215 = vmatpush.msk.msrb.mxu2 %vm4774_vm2, %v4594_v38 }
 0x857   :  { %2119 = vmatmul.f32.gmra.mxu0 %v1984_v13  ;;  %4216 = vmatpush.msk.msrb.mxu2 %vm4740_vm1, %v4594_v38 }
 0x858   :  { %2073 = vmatmul.f32.gmra.mxu3 %v1965_v27 }
 0x859   :  { %4217 = vmatpush.msk.msrb.mxu2 %vm4680_vm0, %v4594_v38 }
 0x85b   :  { %4218 = vmatpush.msk.msrb.mxu2 %vm8688_vm13, %v4594_v38 }
 0x8bc   :  { %v2111_v26 = vpop.f32.mrf.mxu0 }
 0x8bf   :  { %v2036_v29 = vpop.f32.mrf.mxu2 }
 0x8c3   :  { %v2065_v45 = vpop.f32.mrf.mxu3 }
 0x8c4   :  { %v2114_v19 = vpop.f32.mrf.mxu0  ;;  %v2066_v36 = vadd.f32 %v2065_v45, %v2036_v29 }
 0x8c6   :  { %v6961_v21 = vadd.f32 %v2111_v26, %v2066_v36  ;;  %v4183_v36 = vld [vmem:[%s8476_s1 + $0xb60] sm:$0xff] }
 0x8c7   :  { %v2039_v16 = vpop.f32.mrf.mxu2 }
 0x8c8   :  { %v2136_v41 = vmul.f32 %v6961_v21, %v6961_v21 }
 0x8cb   :  { %v2068_v24 = vpop.f32.mrf.mxu3 }
 0x8cc   :  { %v2069_v31 = vadd.f32 %v2068_v24, %v2039_v16  ;;  %v2117_v32 = vpop.f32.mrf.mxu0  ;;  %v4185_v24 = vld [vmem:[%s8476_s1 + $0xb70] sm:$0xff] }
 0x8ce   :  { %v6959_v40 = vadd.f32 %v2114_v19, %v2069_v31  ;;  %v4186_v19 = vld [vmem:[%s8476_s1 + $0xb78] sm:$0xff]  ;;  %v4184_v31 = vld [vmem:[%s8476_s1 + $0xb68] sm:$0xff] }
 0x8cf   :  { %v2042_v25 = vpop.f32.mrf.mxu2  ;;  %2288 = vmatpush.msra.mxu3 %v4186_v19  ;;  %v4174_v19 = vld [vmem:[%s8476_s1 + $0xb18] sm:$0xff] }
 0x8d0   :  { %v2137_v33 = vmul.f32 %v6959_v40, %v6959_v40  ;;  %v2127_v50 = vadd.f32 %v6959_v40, %v6961_v21 }
 0x8d1   :  { %2289 = vmatpush.msra.mxu3 %v4185_v24 }
 0x8d2   :  { %v2140_v6 = vadd.f32 %v2137_v33, %v2136_v41  ;;  %v4200_v33 = vld [vmem:[%s8476_s1 + $0xbe8] sm:$0xff]  ;;  %v4199_v41 = vld [vmem:[%s8476_s1 + $0xbe0] sm:$0xff] }
 0x8d3   :  { %v2071_v34 = vpop.f32.mrf.mxu3  ;;  %2290 = vmatpush.msra.mxu3 %v4184_v31  ;;  %v4160_v31 = vld [vmem:[%s8476_s1 + $0xaa8] sm:$0xff] }
 0x8d4   :  { %v2072_v37 = vadd.f32 %v2071_v34, %v2042_v25  ;;  %v2120_v48 = vpop.f32.mrf.mxu0  ;;  %v4202_v25 = vld [vmem:[%s8476_s1 + $0xbf8] sm:$0xff]  ;;  %v4201_v34 = vld [vmem:[%s8476_s1 + $0xbf0] sm:$0xff] }
 0x8d5   :  { %2363 = vmatpush.msrb.mxu1 %v4202_v25  ;;  %2291 = vmatpush.msra.mxu3 %v4183_v36  ;;  %v4192_v25 = vld [vmem:[%s8476_s1 + $0xba8] sm:$0xff]  ;;  %v4173_v36 = vld [vmem:[%s8476_s1 + $0xb10] sm:$0xff] }
 0x8d6   :  { %v6963_v18 = vadd.f32 %v2117_v32, %v2072_v37  ;;  %v4170_v32 = vld [vmem:[%s8476_s1 + $0xaf8] sm:$0xff]  ;;  %v4169_v37 = vld [vmem:[%s8476_s1 + $0xaf0] sm:$0xff] }
 0x8d7   :  { %v2045_v57 = vpop.f32.mrf.mxu2  ;;  %2317 = vmatpush.msrb.mxu0 %v4170_v32  ;;  %2364 = vmatpush.msrb.mxu1 %v4201_v34 }
 0x8d8   :  { %v2138_v20 = vmul.f32 %v6963_v18, %v6963_v18  ;;  %v2128_v30 = vadd.f32 %v2127_v50, %v6963_v18  ;;  %v4181_v50 = vld [vmem:[%s8476_s1 + $0xb50] sm:$0xff] }
 0x8d9   :  { %2318 = vmatpush.msrb.mxu0 %v4169_v37  ;;  %2365 = vmatpush.msrb.mxu1 %v4200_v33  ;;  %v4191_v37 = vld [vmem:[%s8476_s1 + $0xba0] sm:$0xff] }
 0x8da   :  { %v2141_v1 = vadd.f32 %v2140_v6, %v2138_v20  ;;  %v4167_v20 = vld [vmem:[%s8476_s1 + $0xae0] sm:$0xff]  ;;  %v4166_v6 = vld [vmem:[%s8476_s1 + $0xad8] sm:$0xff] }
 0x8db   :  { %v2074_v47 = vpop.f32.mrf.mxu3  ;;  %2366 = vmatpush.msrb.mxu1 %v4199_v41  ;;  %v4159_v33 = vld [vmem:[%s8476_s1 + $0xaa0] sm:$0xff]  ;;  %v4172_v41 = vld [vmem:[%s8476_s1 + $0xb08] sm:$0xff] }
 0x8dc   :  { %v2075_v3 = vadd.f32 %v2074_v47, %v2045_v57  ;;  %v4182_v57 = vld [vmem:[%s8476_s1 + $0xb58] sm:$0xff]  ;;  %v4168_v47 = vld [vmem:[%s8476_s1 + $0xae8] sm:$0xff] }
 0x8dd   :  { %2292 = vmatpush.msra.mxu3 %v4182_v57  ;;  %2319 = vmatpush.msrb.mxu0 %v4168_v47  ;;  %v4190_v57 = vld [vmem:[%s8476_s1 + $0xb98] sm:$0xff] }
 0x8de   :  { %v6974_v5 = vadd.f32 %v2120_v48, %v2075_v3  ;;  %v4198_v3 = vld [vmem:[%s8476_s1 + $0xbd8] sm:$0xff]  ;;  %v4180_v48 = vld [vmem:[%s8476_s1 + $0xb48] sm:$0xff] }
 0x8df   :  { %2293 = vmatpush.msra.mxu3 %v4181_v50  ;;  %2320 = vmatpush.msrb.mxu0 %v4167_v20  ;;  %v4158_v50 = vld [vmem:[%s8476_s1 + $0xa98] sm:$0xff]  ;;  %v4189_v20 = vld [vmem:[%s8476_s1 + $0xb90] sm:$0xff] }
 0x8e0   :  { %v2129_v14 = vadd.f32 %v2128_v30, %v6974_v5  ;;  %v2139_v51 = vmul.f32 %v6974_v5, %v6974_v5  ;;  %2367 = vmatpush.msrb.mxu1 %v4198_v3  ;;  %v4197_v30 = vld [vmem:[%s8476_s1 + $0xbd0] sm:$0xff] }
 0x8e1   :  { %2294 = vmatpush.msra.mxu3 %v4180_v48  ;;  %2321 = vmatpush.msrb.mxu0 %v4166_v6  ;;  %v4171_v48 = vld [vmem:[%s8476_s1 + $0xb00] sm:$0xff]  ;;  %v4157_v6 = vld [vmem:[%s8476_s1 + $0xa90] sm:$0xff] }
 0x8e2   :  { %v2130_v55 = vrot.slane %v2129_v14, 4  ;;  %v2142_v60 = vadd.f32 %v2141_v1, %v2139_v51  ;;  %v4179_v1 = vld [vmem:[%s8476_s1 + $0xb40] sm:$0xff]  ;;  %2368 = vmatpush.msrb.mxu1 %v4197_v30  ;;  %v4196_v51 = vld [vmem:[%s8476_s1 + $0xbc8] sm:$0xff] }
 0x8e3   :  { %2295 = vmatpush.msra.mxu3 %v4179_v1  ;;  %v4188_v1 = vld [vmem:[%s8476_s1 + $0xb88] sm:$0xff] }
 0x8e4   :  { %v2131_v61 = vadd.f32 %v2130_v55, %v2129_v14  ;;  %v2143_v63 = vrot.slane %v2142_v60, 4  ;;  %v4165_v14 = vld [vmem:[%s8476_s1 + $0xad0] sm:$0xff]  ;;  %v4178_v55 = vld [vmem:[%s8476_s1 + $0xb38] sm:$0xff]  ;;  %2369 = vmatpush.msrb.mxu1 %v4196_v51  ;;  %v4187_v51 = vld [vmem:[%s8476_s1 + $0xb80] sm:$0xff] }
 0x8e5   :  { %2322 = vmatpush.msrb.mxu0 %v4165_v14  ;;  %2296 = vmatpush.msra.mxu3 %v4178_v55  ;;  %v4156_v14 = vld [vmem:[%s8476_s1 + $0xa88] sm:$0xff]  ;;  %v4155_v55 = vld [vmem:[%s8476_s1 + $0xa80] sm:$0xff] }
 0x8e6   :  { %v2132_v0 = vrot.slane %v2131_v61, 2  ;;  %v2144_v11 = vadd.f32 %v2143_v63, %v2142_v60  ;;  %v4164_v60 = vld [vmem:[%s8476_s1 + $0xac8] sm:$0xff]  ;;  %v4195_v63 = vld [vmem:[%s8476_s1 + $0xbc0] sm:$0xff] }
 0x8e7   :  { %2323 = vmatpush.msrb.mxu0 %v4164_v60  ;;  %2370 = vmatpush.msrb.mxu1 %v4195_v63 }
 0x8e8   :  { %v2145_v27 = vrot.slane %v2144_v11, 2  ;;  %v2133_v12 = vadd.f32 %v2132_v0, %v2131_v61  ;;  %v4177_v0 = vld [vmem:[%s8476_s1 + $0xb30] sm:$0xff] }
 0x8e9   :  { %2297 = vmatpush.msra.mxu3 %v4177_v0 }
 0x8ea   :  { %v2146_v13 = vadd.f32 %v2145_v27, %v2144_v11  ;;  %v2134_v26 = vrot.slane %v2133_v12, 1  ;;  %v4163_v11 = vld [vmem:[%s8476_s1 + $0xac0] sm:$0xff]  ;;  %v4194_v27 = vld [vmem:[%s8476_s1 + $0xbb8] sm:$0xff] }
 0x8eb   :  { %2324 = vmatpush.msrb.mxu0 %v4163_v11  ;;  %2371 = vmatpush.msrb.mxu1 %v4194_v27  ;;  %v4153_v27 = vld [vmem:[%s8478_s2 + $0x6] sm:$0x1] }
 0x8ec   :  { %v2135_v29 = vadd.f32 %v2134_v26, %v2133_v12  ;;  %v2147_v45 = vrot.slane %v2146_v13, 1  ;;  %v4162_v26 = vld [vmem:[%s8476_s1 + $0xab8] sm:$0xff] }
 0x8ed   :  { %2325 = vmatpush.msrb.mxu0 %v4162_v26 }
 0x8ee   :  { %2165 = vmatmul.f32.vlgmr.msra.gmra.mxu1 %v2135_v29  ;;  %v2148_v16 = vadd.f32 %v2147_v45, %v2146_v13  ;;  %v4176_v13 = vld [vmem:[%s8476_s1 + $0xb28] sm:$0xff]  ;;  %v4193_v29 = vld [vmem:[%s8476_s1 + $0xbb0] sm:$0xff]  ;;  %v4175_v45 = vld [vmem:[%s8476_s1 + $0xb20] sm:$0xff] }
 0x8ef   :  { %2298 = vmatpush.msra.mxu3 %v4176_v13  ;;  %2372 = vmatpush.msrb.mxu1 %v4193_v29 }
 0x8f0   :  { %2186 = vmatmul.f32.vlgmr.msra.gmra.mxu2 %v2148_v16  ;;  %v4161_v16 = vld [vmem:[%s8476_s1 + $0xab0] sm:$0xff] }
 0x8f1   :  { %2299 = vmatpush.msra.mxu3 %v4175_v45  ;;  %2326 = vmatpush.msrb.mxu0 %v4161_v16  ;;  %v4154_v45 = vld [vmem:[%s8479_s3 + $0x6] sm:$0x1] }
 0x8f2   :  { %2373 = vmatpush.msrb.mxu1 %v4192_v25 }
 0x8f3   :  { %2300 = vmatpush.msra.mxu3 %v4174_v19  ;;  %2327 = vmatpush.msrb.mxu0 %v4160_v31 }
 0x8f4   :  { %2374 = vmatpush.msrb.mxu1 %v4191_v37 }
 0x8f5   :  { %2301 = vmatpush.msra.mxu3 %v4173_v36  ;;  %2328 = vmatpush.msrb.mxu0 %v4159_v33 }
 0x8f6   :  { %2375 = vmatpush.msrb.mxu1 %v4190_v57 }
 0x8f7   :  { %2302 = vmatpush.msra.mxu3 %v4172_v41  ;;  %2329 = vmatpush.msrb.mxu0 %v4158_v50 }
 0x8f8   :  { %2376 = vmatpush.msrb.mxu1 %v4189_v20 }
 0x8f9   :  { %2303 = vmatpush.msra.mxu3 %v4171_v48  ;;  %2330 = vmatpush.msrb.mxu0 %v4157_v6 }
 0x8fa   :  { %2377 = vmatpush.msrb.mxu1 %v4188_v1 }
 0x8fb   :  { %4219 = vmatpush.msk.msrb.mxu3 %vm8689_vm12, %v4594_v38  ;;  %2331 = vmatpush.msrb.mxu0 %v4156_v14 }
 0x8fc   :  { %2378 = vmatpush.msrb.mxu1 %v4187_v51 }
 0x8fd   :  { %4220 = vmatpush.msk.msrb.mxu3 %vm8673_vm9, %v4594_v38  ;;  %2332 = vmatpush.msrb.mxu0 %v4155_v55 }
 0x8ff   :  { %4221 = vmatpush.msk.msrb.mxu3 %vm8679_vm11, %v4594_v38 }
 0x901   :  { %4222 = vmatpush.msk.msrb.mxu3 %vm8680_vm10, %v4594_v38 }
 0x903   :  { %4223 = vmatpush.msk.msrb.mxu3 %vm8690_vm14, %v4594_v38 }
 0x905   :  { %4224 = vmatpush.msk.msrb.mxu3 %vm8595_vm5, %v4594_v38 }
 0x907   :  { %4225 = vmatpush.msk.msrb.mxu3 %vm4938_vm15, %v4594_v38 }
 0x909   :  { %4226 = vmatpush.msk.msrb.mxu3 %vm4950_vm3, %v4594_v38 }
 0x90b   :  { %4227 = vmatpush.msk.msrb.mxu3 %vm4962_vm4, %v4594_v38 }
 0x90d   :  { %4228 = vmatpush.msk.msrb.mxu3 %vm4974_vm8, %v4594_v38 }
 0x90f   :  { %4229 = vmatpush.msk.msrb.mxu3 %vm4986_vm7, %v4594_v38 }
 0x911   :  { %4230 = vmatpush.msk.msrb.mxu3 %vm4997_vm6, %v4594_v38 }
 0x913   :  { %4231 = vmatpush.msk.msrb.mxu3 %vm4774_vm2, %v4594_v38 }
 0x915   :  { %4232 = vmatpush.msk.msrb.mxu3 %vm4740_vm1, %v4594_v38 }
 0x917   :  { %4233 = vmatpush.msk.msrb.mxu3 %vm4680_vm0, %v4594_v38 }
 0x919   :  { %4234 = vmatpush.msk.msrb.mxu3 %vm8688_vm13, %v4594_v38  ;;  %vm8698_vm13 = vnez %v8556_v15 }
 0x96b   :  { %v2166_v61 = vpop.f32.mrf.mxu1 }
 0x96c   :  { %v7060_v12 = vmul.f32 0.001953125, %v2166_v61 }
 0x96e   :  { %v2191_v32 = vmul.f32 %v7060_v12, %v7060_v12 }
 0x973   :  { %v2187_v24 = vpop.f32.mrf.mxu2 }
 0x974   :  { %v2190_v34 = vmul.f32 0.001953125, %v2187_v24 }
 0x976   :  { %v2192_v47 = vsub.f32 %v2190_v34, %v2191_v32 }
 0x978   :  { %v2193_v3 = vmax.f32 %v2192_v47, 0.0 }
 0x97a   :  { %v2196_v30 = vadd.f32 1e-05, %v2193_v3 }
 0x97c   :  { %4578 = vrsqrt.f32 %v2196_v30  ;;  %vm2203_vm14 = vweird.f32 %v2196_v30 }
 0x982   :  { %v4579_v60 = vpop.eup %4578 }
 0x983   :  { %v2198_v61 = vmul.f32 %v4579_v60, %v2196_v30  ;;  %vm2204_vm11 = vweird.f32 %v4579_v60 }
 0x984   :  { %vm2205_vm10 = vmor %vm2203_vm14, %vm2204_vm11  ;;  %vm8691_vm11 = vcmp.lt.s32.totalorder %v4644_v9, 7  ;;  %vm8693_vm14 = vnez %v8554_v2 }
 0x985   :  { %v2199_v63 = vmul.f32 %v4579_v60, %v2198_v61 }
 0x987   :  { %v2200_v0 = vmul.f32 0.5, %v2199_v63 }
 0x989   :  { %v2201_v11 = vsub.f32 1.5, %v2200_v0 }
 0x98b   :  { %v2202_v13 = vmul.f32 %v4579_v60, %v2201_v11 }
 0x98d   :  { %v2206_v26 = vsel %vm2205_vm10, %v4579_v60, %v2202_v13  ;;  %vm8692_vm10 = vcmp.lt.s32.totalorder %v4644_v9, 1 }
 0x98e   :  { %v2207_v29 = vmul.f32 %v4153_v27, %v2206_v26 }
 0x990   :  { %v2210_v16 = vmul.f32 %v2207_v29, %v7060_v12  ;;  %v2213_v19 = vperm.slane %v2207_v29, 0 }
 0x992   :  { %v2211_v24 = vsub.f32 %v4154_v45, %v2210_v16  ;;  %v2215_v25 = vmul.f32 %v2213_v19, %v6961_v21  ;;  %v2216_v32 = vmul.f32 %v2213_v19, %v6959_v40  ;;  %v2218_v34 = vmul.f32 %v2213_v19, %v6974_v5 }
 0x993   :  { %v2217_v36 = vmul.f32 %v2213_v19, %v6963_v18 }
 0x994   :  { %v2220_v31 = vperm.slane %v2211_v24, 0 }
 0x996   :  { %v2222_v12 = vadd.f32 %v2220_v31, %v2215_v25  ;;  %v2223_v37 = vadd.f32 %v2220_v31, %v2216_v32  ;;  %v2225_v33 = vadd.f32 %v2220_v31, %v2218_v34  ;;  %v2224_v57 = vadd.f32 %v2220_v31, %v2217_v36 }
 0x998   :  { %v2226_v21 = vmax.f32 %v2222_v12, 0.0  ;;  %v2227_v47 = vmax.f32 %v2223_v37, 0.0  ;;  %v2229_v41 = vmax.f32 %v2225_v33, 0.0  ;;  %v2228_v40 = vmax.f32 %v2224_v57, 0.0 }
 0x99a   :  { %v2230_v18 = vrot.slane %v2226_v21, 7  ;;  %2304 = vmatmul.f32.vlgmr.msra.gmra.mxu3 %v2226_v21  ;;  %v2238_v5 = vrot.slane %v2226_v21, 1  ;;  %v2239_v50 = vrot.slane %v2227_v47, 1  ;;  %v2233_v20 = vrot.slane %v2229_v41, 7 }
 0x99b   :  { %4285 = vmatpush.msk.msra.mxu3 %vm8689_vm12, %v4594_v38  ;;  %v2231_v30 = vrot.slane %v2227_v47, 7  ;;  %v2240_v1 = vrot.slane %v2228_v40, 1  ;;  %vm8696_vm12 = vnez %v8566_v42  ;;  %v2241_v60 = vrot.slane %v2229_v41, 1 }
 0x99c   :  { %v2244_v3 = vsel %vm8691_vm11, %v2238_v5, %v2239_v50  ;;  %v2237_v48 = vsel %vm8692_vm10, %v2233_v20, %v2230_v18  ;;  %vm8694_vm11 = vmmov %vm8692_vm10  ;;  %vm8695_vm10 = vcmp.lt.s32.totalorder %v4644_v9, 7  ;;  %v2232_v61 = vrot.slane %v2228_v40, 7 }
 0x99d   :  { %2379 = vmatmul.f32.vlgmr.msrb.gmra.mxu1 %v2244_v3  ;;  %v2246_v6 = vsel %vm8693_vm14, %v2244_v3, %v2237_v48  ;;  %4286 = vmatpush.msk.msra.mxu3 %vm8673_vm9, %v4594_v38  ;;  %v2236_v14 = vsel %vm8694_vm11, %v2230_v18, %v2231_v30  ;;  %v2243_v51 = vsel %vm8695_vm10, %v2239_v50, %v2240_v1  ;;  %vm8700_vm11 = vmmov %vm8695_vm10  ;;  %vm8701_vm10 = vcmp.lt.s32.totalorder %v4644_v9, 1 }
 0x99e   :  { %2333 = vmatmul.f32.vlgmr.msrb.gmra.mxu0 %v2246_v6  ;;  %vm8697_vm14 = vnez %v8568_v46  ;;  %v2251_v55 = vsel %vm8698_vm13, %v2236_v14, %v2243_v51  ;;  %vm8699_vm9 = vnez %v8570_v49  ;;  %v2242_v63 = vsel %vm8700_vm11, %v2240_v1, %v2241_v60  ;;  %vm8703_vm11 = vmmov %vm8701_vm10 }
 0x99f   :  { %4287 = vmatpush.msk.msra.mxu3 %vm8696_vm12, %v4594_v38  ;;  %v2235_v0 = vsel %vm8701_vm10, %v2231_v30, %v2232_v61  ;;  %vm8702_vm13 = vnez %v8558_v22  ;;  %v2234_v27 = vsel %vm8703_vm11, %v2232_v61, %v2233_v20  ;;  %vm8704_vm10 = vcmp.lt.s32.totalorder %v4644_v9, 7 }
 0x9a0   :  { %v2248_v11 = vsel %vm8702_vm13, %v2242_v63, %v2235_v0  ;;  %v2245_v13 = vsel %vm8704_vm10, %v2241_v60, %v2238_v5  ;;  %vm8705_vm13 = vnez %v8560_v28  ;;  %vm8706_vm11 = vnez %v8586_v17 }
 0x9a1   :  { %4288 = vmatpush.msk.msra.mxu3 %vm8697_vm14, %v4594_v38  ;;  %v2253_v26 = vsel %vm8705_vm13, %v2234_v27, %v2245_v13  ;;  %vm8707_vm10 = vnez %v8562_v35  ;;  %vm8708_vm13 = vnez %v8564_v39 }
 0x9a2   :  { %2307 = vmatmul.f32.gmra.mxu3 %v2227_v47 }
 0x9a3   :  { %4289 = vmatpush.msk.msra.mxu3 %vm8699_vm9, %v4594_v38 }
 0x9a5   :  { %2382 = vmatmul.f32.gmra.mxu1 %v2251_v55  ;;  %4290 = vmatpush.msk.msra.mxu3 %vm8595_vm5, %v4594_v38 }
 0x9a6   :  { %2336 = vmatmul.f32.gmra.mxu0 %v2236_v14 }
 0x9a7   :  { %4291 = vmatpush.msk.msra.mxu3 %vm4938_vm15, %v4594_v38 }
 0x9a9   :  { %4292 = vmatpush.msk.msra.mxu3 %vm4950_vm3, %v4594_v38 }
 0x9aa   :  { %2310 = vmatmul.f32.gmra.mxu3 %v2228_v40 }
 0x9ab   :  { %4293 = vmatpush.msk.msra.mxu3 %vm4962_vm4, %v4594_v38 }
 0x9ad   :  { %2385 = vmatmul.f32.gmra.mxu1 %v2242_v63  ;;  %4294 = vmatpush.msk.msra.mxu3 %vm4974_vm8, %v4594_v38 }
 0x9ae   :  { %2339 = vmatmul.f32.gmra.mxu0 %v2248_v11 }
 0x9af   :  { %4295 = vmatpush.msk.msra.mxu3 %vm4986_vm7, %v4594_v38 }
 0x9b1   :  { %4296 = vmatpush.msk.msra.mxu3 %vm4997_vm6, %v4594_v38 }
 0x9b2   :  { %2313 = vmatmul.f32.gmra.mxu3 %v2229_v41 }
 0x9b3   :  { %4297 = vmatpush.msk.msra.mxu3 %vm4774_vm2, %v4594_v38 }
 0x9b5   :  { %2388 = vmatmul.f32.gmra.mxu1 %v2253_v26  ;;  %4298 = vmatpush.msk.msra.mxu3 %vm4740_vm1, %v4594_v38 }
 0x9b6   :  { %2342 = vmatmul.f32.gmra.mxu0 %v2234_v27 }
 0x9b7   :  { %4299 = vmatpush.msk.msra.mxu3 %vm4680_vm0, %v4594_v38 }
 0x9b9   :  { %4300 = vmatpush.msk.msra.mxu3 %vm8706_vm11, %v4594_v38 }
 0xa1a   :  { %v2380_v29 = vpop.f32.mrf.mxu1 }
 0xa1b   :  { %v2334_v45 = vpop.f32.mrf.mxu0 }
 0xa1d   :  { %v2305_v16 = vpop.f32.mrf.mxu3 }
 0xa1e   :  { %v2335_v12 = vadd.f32 %v2334_v45, %v2305_v16 }
 0xa20   :  { %v7260_v57 = vadd.f32 %v2380_v29, %v2335_v12  ;;  %v4265_v12 = vld [vmem:[%s8476_s1 + $0xce0] sm:$0xff] }
 0xa22   :  { %v2383_v19 = vpop.f32.mrf.mxu1  ;;  %v2405_v18 = vmul.f32 %v7260_v57, %v7260_v57 }
 0xa23   :  { %v2337_v24 = vpop.f32.mrf.mxu0 }
 0xa25   :  { %v2308_v25 = vpop.f32.mrf.mxu3 }
 0xa26   :  { %v2338_v32 = vadd.f32 %v2337_v24, %v2308_v25  ;;  %v4268_v24 = vld [vmem:[%s8476_s1 + $0xcf8] sm:$0xff]  ;;  %v4267_v25 = vld [vmem:[%s8476_s1 + $0xcf0] sm:$0xff] }
 0xa27   :  { %2557 = vmatpush.msra.mxu0 %v4268_v24 }
 0xa28   :  { %v7258_v33 = vadd.f32 %v2383_v19, %v2338_v32  ;;  %v4266_v32 = vld [vmem:[%s8476_s1 + $0xce8] sm:$0xff] }
 0xa29   :  { %2558 = vmatpush.msra.mxu0 %v4267_v25  ;;  %v4274_v25 = vld [vmem:[%s8476_s1 + $0xd28] sm:$0xff] }
 0xa2a   :  { %v2386_v34 = vpop.f32.mrf.mxu1  ;;  %v2406_v47 = vmul.f32 %v7258_v33, %v7258_v33  ;;  %v2396_v5 = vadd.f32 %v7258_v33, %v7260_v57 }
 0xa2b   :  { %v2340_v31 = vpop.f32.mrf.mxu0  ;;  %2559 = vmatpush.msra.mxu0 %v4266_v32 }
 0xa2c   :  { %v2409_v48 = vadd.f32 %v2406_v47, %v2405_v18  ;;  %v4282_v47 = vld [vmem:[%s8476_s1 + $0xd68] sm:$0xff]  ;;  %v4281_v18 = vld [vmem:[%s8476_s1 + $0xd60] sm:$0xff] }
 0xa2d   :  { %v2311_v36 = vpop.f32.mrf.mxu3  ;;  %2560 = vmatpush.msra.mxu0 %v4265_v12  ;;  %v4273_v12 = vld [vmem:[%s8476_s1 + $0xd20] sm:$0xff] }
 0xa2e   :  { %v2341_v37 = vadd.f32 %v2340_v31, %v2311_v36  ;;  %v4284_v31 = vld [vmem:[%s8476_s1 + $0xd78] sm:$0xff]  ;;  %v4283_v36 = vld [vmem:[%s8476_s1 + $0xd70] sm:$0xff] }
 0xa2f   :  { %2632 = vmatpush.msra.mxu2 %v4284_v31 }
 0xa30   :  { %v7262_v21 = vadd.f32 %v2386_v34, %v2341_v37  ;;  %v4252_v34 = vld [vmem:[%s8476_s1 + $0xc78] sm:$0xff]  ;;  %v4251_v37 = vld [vmem:[%s8476_s1 + $0xc70] sm:$0xff] }
 0xa31   :  { %2586 = vmatpush.msra.mxu1 %v4252_v34  ;;  %2633 = vmatpush.msra.mxu2 %v4283_v36  ;;  %v4256_v34 = vld [vmem:[%s8476_s1 + $0xc98] sm:$0xff]  ;;  %v4242_v36 = vld [vmem:[%s8476_s1 + $0xc28] sm:$0xff] }
 0xa32   :  { %v2407_v50 = vmul.f32 %v7262_v21, %v7262_v21  ;;  %v2389_v3 = vpop.f32.mrf.mxu1  ;;  %v2397_v6 = vadd.f32 %v2396_v5, %v7262_v21  ;;  %v4263_v5 = vld [vmem:[%s8476_s1 + $0xcd0] sm:$0xff] }
 0xa33   :  { %v2343_v41 = vpop.f32.mrf.mxu0  ;;  %2587 = vmatpush.msra.mxu1 %v4251_v37  ;;  %2634 = vmatpush.msra.mxu2 %v4282_v47  ;;  %v4255_v37 = vld [vmem:[%s8476_s1 + $0xc90] sm:$0xff]  ;;  %v4241_v47 = vld [vmem:[%s8476_s1 + $0xc20] sm:$0xff] }
 0xa34   :  { %v2410_v1 = vadd.f32 %v2409_v48, %v2407_v50  ;;  %v4249_v50 = vld [vmem:[%s8476_s1 + $0xc60] sm:$0xff]  ;;  %v4248_v48 = vld [vmem:[%s8476_s1 + $0xc58] sm:$0xff] }
 0xa35   :  { %v2314_v40 = vpop.f32.mrf.mxu3  ;;  %2635 = vmatpush.msra.mxu2 %v4281_v18  ;;  %v4254_v18 = vld [vmem:[%s8476_s1 + $0xc88] sm:$0xff] }
 0xa36   :  { %v2344_v20 = vadd.f32 %v2343_v41, %v2314_v40  ;;  %v4264_v41 = vld [vmem:[%s8476_s1 + $0xcd8] sm:$0xff]  ;;  %v4250_v40 = vld [vmem:[%s8476_s1 + $0xc68] sm:$0xff] }
 0xa37   :  { %2561 = vmatpush.msra.mxu0 %v4264_v41  ;;  %2588 = vmatpush.msra.mxu1 %v4250_v40  ;;  %v4272_v41 = vld [vmem:[%s8476_s1 + $0xd18] sm:$0xff] }
 0xa38   :  { %v7273_v30 = vadd.f32 %v2389_v3, %v2344_v20  ;;  %v4280_v20 = vld [vmem:[%s8476_s1 + $0xd58] sm:$0xff]  ;;  %v4262_v3 = vld [vmem:[%s8476_s1 + $0xcc8] sm:$0xff] }
 0xa39   :  { %2562 = vmatpush.msra.mxu0 %v4263_v5  ;;  %2589 = vmatpush.msra.mxu1 %v4249_v50  ;;  %v4240_v5 = vld [vmem:[%s8476_s1 + $0xc18] sm:$0xff]  ;;  %v4271_v50 = vld [vmem:[%s8476_s1 + $0xd10] sm:$0xff] }
 0xa3a   :  { %v2398_v14 = vadd.f32 %v2397_v6, %v7273_v30  ;;  %v2408_v51 = vmul.f32 %v7273_v30, %v7273_v30  ;;  %2636 = vmatpush.msra.mxu2 %v4280_v20  ;;  %v4279_v6 = vld [vmem:[%s8476_s1 + $0xd50] sm:$0xff] }
 0xa3b   :  { %2563 = vmatpush.msra.mxu0 %v4262_v3  ;;  %2590 = vmatpush.msra.mxu1 %v4248_v48  ;;  %v4253_v3 = vld [vmem:[%s8476_s1 + $0xc80] sm:$0xff]  ;;  %v4239_v48 = vld [vmem:[%s8476_s1 + $0xc10] sm:$0xff] }
 0xa3c   :  { %v2399_v55 = vrot.slane %v2398_v14, 4  ;;  %v2411_v60 = vadd.f32 %v2410_v1, %v2408_v51  ;;  %2637 = vmatpush.msra.mxu2 %v4279_v6  ;;  %v4261_v1 = vld [vmem:[%s8476_s1 + $0xcc0] sm:$0xff]  ;;  %v4278_v51 = vld [vmem:[%s8476_s1 + $0xd48] sm:$0xff] }
 0xa3d   :  { %2564 = vmatpush.msra.mxu0 %v4261_v1  ;;  %v4270_v1 = vld [vmem:[%s8476_s1 + $0xd08] sm:$0xff] }
 0xa3e   :  { %v2400_v61 = vadd.f32 %v2399_v55, %v2398_v14  ;;  %v2412_v63 = vrot.slane %v2411_v60, 4  ;;  %v4247_v14 = vld [vmem:[%s8476_s1 + $0xc50] sm:$0xff]  ;;  %2638 = vmatpush.msra.mxu2 %v4278_v51  ;;  %v4260_v55 = vld [vmem:[%s8476_s1 + $0xcb8] sm:$0xff]  ;;  %v4269_v51 = vld [vmem:[%s8476_s1 + $0xd00] sm:$0xff] }
 0xa3f   :  { %2591 = vmatpush.msra.mxu1 %v4247_v14  ;;  %2565 = vmatpush.msra.mxu0 %v4260_v55  ;;  %v4238_v14 = vld [vmem:[%s8476_s1 + $0xc08] sm:$0xff]  ;;  %v4237_v55 = vld [vmem:[%s8476_s1 + $0xc00] sm:$0xff] }
 0xa40   :  { %v2401_v0 = vrot.slane %v2400_v61, 2  ;;  %v2413_v11 = vadd.f32 %v2412_v63, %v2411_v60  ;;  %v4246_v60 = vld [vmem:[%s8476_s1 + $0xc48] sm:$0xff]  ;;  %v4259_v63 = vld [vmem:[%s8476_s1 + $0xcb0] sm:$0xff] }
 0xa41   :  { %2592 = vmatpush.msra.mxu1 %v4246_v60  ;;  %2566 = vmatpush.msra.mxu0 %v4259_v63 }
 0xa42   :  { %v2402_v27 = vadd.f32 %v2401_v0, %v2400_v61  ;;  %v2414_v13 = vrot.slane %v2413_v11, 2  ;;  %v4277_v61 = vld [vmem:[%s8476_s1 + $0xd40] sm:$0xff] }
 0xa43   :  { %2639 = vmatpush.msra.mxu2 %v4277_v61  ;;  %v4245_v0 = vld [vmem:[%s8476_s1 + $0xc40] sm:$0xff] }
 0xa44   :  { %v2403_v26 = vrot.slane %v2402_v27, 1  ;;  %v2415_v29 = vadd.f32 %v2414_v13, %v2413_v11  ;;  %2593 = vmatpush.msra.mxu1 %v4245_v0  ;;  %v4276_v11 = vld [vmem:[%s8476_s1 + $0xd38] sm:$0xff] }
 0xa45   :  { %2640 = vmatpush.msra.mxu2 %v4276_v11  ;;  %v4244_v13 = vld [vmem:[%s8476_s1 + $0xc38] sm:$0xff] }
 0xa46   :  { %v2404_v45 = vadd.f32 %v2403_v26, %v2402_v27  ;;  %v2416_v16 = vrot.slane %v2415_v29, 1  ;;  %v4258_v27 = vld [vmem:[%s8476_s1 + $0xca8] sm:$0xff]  ;;  %2594 = vmatpush.msra.mxu1 %v4244_v13 }
 0xa47   :  { %2567 = vmatpush.msra.mxu0 %v4258_v27  ;;  %v4235_v27 = vld [vmem:[%s8478_s2 + $0x7] sm:$0x1] }
 0xa48   :  { %2434 = vmatmul.f32.vlgmr.msrb.gmra.mxu2 %v2404_v45  ;;  %v2417_v19 = vadd.f32 %v2416_v16, %v2415_v29  ;;  %v4275_v29 = vld [vmem:[%s8476_s1 + $0xd30] sm:$0xff]  ;;  %v4257_v16 = vld [vmem:[%s8476_s1 + $0xca0] sm:$0xff] }
 0xa49   :  { %2641 = vmatpush.msra.mxu2 %v4275_v29  ;;  %2568 = vmatpush.msra.mxu0 %v4257_v16  ;;  %v4236_v16 = vld [vmem:[%s8479_s3 + $0x7] sm:$0x1] }
 0xa4a   :  { %2455 = vmatmul.f32.vlgmr.msrb.gmra.mxu3 %v2417_v19  ;;  %v4243_v19 = vld [vmem:[%s8476_s1 + $0xc30] sm:$0xff] }
 0xa4b   :  { %2595 = vmatpush.msra.mxu1 %v4243_v19  ;;  %2642 = vmatpush.msra.mxu2 %v4274_v25 }
 0xa4c   :  { %2569 = vmatpush.msra.mxu0 %v4256_v34 }
 0xa4d   :  { %2596 = vmatpush.msra.mxu1 %v4242_v36  ;;  %2643 = vmatpush.msra.mxu2 %v4273_v12 }
 0xa4e   :  { %2570 = vmatpush.msra.mxu0 %v4255_v37 }
 0xa4f   :  { %2597 = vmatpush.msra.mxu1 %v4241_v47  ;;  %2644 = vmatpush.msra.mxu2 %v4272_v41 }
 0xa50   :  { %2571 = vmatpush.msra.mxu0 %v4254_v18 }
 0xa51   :  { %2598 = vmatpush.msra.mxu1 %v4240_v5  ;;  %2645 = vmatpush.msra.mxu2 %v4271_v50 }
 0xa52   :  { %2572 = vmatpush.msra.mxu0 %v4253_v3 }
 0xa53   :  { %2599 = vmatpush.msra.mxu1 %v4239_v48  ;;  %2646 = vmatpush.msra.mxu2 %v4270_v1 }
 0xa54   :  { %4301 = vmatpush.msk.msrb.mxu0 %vm8707_vm10, %v4594_v38 }
 0xa55   :  { %2600 = vmatpush.msra.mxu1 %v4238_v14  ;;  %2647 = vmatpush.msra.mxu2 %v4269_v51 }
 0xa56   :  { %4302 = vmatpush.msk.msrb.mxu0 %vm8708_vm13, %v4594_v38 }
 0xa57   :  { %2601 = vmatpush.msra.mxu1 %v4237_v55 }
 0xa58   :  { %4303 = vmatpush.msk.msrb.mxu0 %vm8696_vm12, %v4594_v38 }
 0xa5a   :  { %4304 = vmatpush.msk.msrb.mxu0 %vm8697_vm14, %v4594_v38 }
 0xa5c   :  { %4305 = vmatpush.msk.msrb.mxu0 %vm8699_vm9, %v4594_v38 }
 0xa5e   :  { %4306 = vmatpush.msk.msrb.mxu0 %vm8595_vm5, %v4594_v38 }
 0xa60   :  { %4307 = vmatpush.msk.msrb.mxu0 %vm4938_vm15, %v4594_v38 }
 0xa62   :  { %4308 = vmatpush.msk.msrb.mxu0 %vm4950_vm3, %v4594_v38 }
 0xa64   :  { %4309 = vmatpush.msk.msrb.mxu0 %vm4962_vm4, %v4594_v38 }
 0xa66   :  { %4310 = vmatpush.msk.msrb.mxu0 %vm4974_vm8, %v4594_v38 }
 0xa68   :  { %4311 = vmatpush.msk.msrb.mxu0 %vm4986_vm7, %v4594_v38 }
 0xa6a   :  { %4312 = vmatpush.msk.msrb.mxu0 %vm4997_vm6, %v4594_v38 }
 0xa6c   :  { %4313 = vmatpush.msk.msrb.mxu0 %vm4774_vm2, %v4594_v38 }
 0xa6e   :  { %4314 = vmatpush.msk.msrb.mxu0 %vm4740_vm1, %v4594_v38 }
 0xa70   :  { %4315 = vmatpush.msk.msrb.mxu0 %vm4680_vm0, %v4594_v38 }
 0xa72   :  { %4316 = vmatpush.msk.msrb.mxu0 %vm8706_vm11, %v4594_v38  ;;  %vm8716_vm11 = vnez %v8556_v15 }
 0xacb   :  { %v2435_v26 = vpop.f32.mrf.mxu2 }
 0xacc   :  { %v7368_v45 = vmul.f32 0.001953125, %v2435_v26 }
 0xacd   :  { %v2456_v24 = vpop.f32.mrf.mxu3 }
 0xace   :  { %v2460_v31 = vmul.f32 %v7368_v45, %v7368_v45  ;;  %v2459_v32 = vmul.f32 0.001953125, %v2456_v24 }
 0xad0   :  { %v2461_v40 = vsub.f32 %v2459_v32, %v2460_v31 }
 0xad2   :  { %v2462_v20 = vmax.f32 %v2461_v40, 0.0 }
 0xad4   :  { %v2465_v6 = vadd.f32 1e-05, %v2462_v20 }
 0xad6   :  { %4580 = vrsqrt.f32 %v2465_v6  ;;  %vm2472_vm9 = vweird.f32 %v2465_v6 }
 0xadc   :  { %v4581_v60 = vpop.eup %4580 }
 0xadd   :  { %v2467_v61 = vmul.f32 %v4581_v60, %v2465_v6  ;;  %vm2473_vm12 = vweird.f32 %v4581_v60 }
 0xade   :  { %vm2474_vm14 = vmor %vm2472_vm9, %vm2473_vm12  ;;  %vm8709_vm9 = vcmp.lt.s32.totalorder %v4644_v9, 7  ;;  %vm8710_vm12 = vcmp.lt.s32.totalorder %v4644_v9, 1 }
 0xadf   :  { %v2468_v63 = vmul.f32 %v4581_v60, %v2467_v61 }
 0xae1   :  { %v2469_v0 = vmul.f32 0.5, %v2468_v63 }
 0xae3   :  { %v2470_v11 = vsub.f32 1.5, %v2469_v0 }
 0xae5   :  { %v2471_v13 = vmul.f32 %v4581_v60, %v2470_v11 }
 0xae7   :  { %v2475_v26 = vsel %vm2474_vm14, %v4581_v60, %v2471_v13  ;;  %vm8711_vm14 = vnez %v8554_v2 }
 0xae8   :  { %v2476_v29 = vmul.f32 %v4235_v27, %v2475_v26 }
 0xaea   :  { %v2479_v19 = vmul.f32 %v2476_v29, %v7368_v45  ;;  %v2482_v24 = vperm.slane %v2476_v29, 0 }
 0xaec   :  { %v2480_v25 = vsub.f32 %v4236_v16, %v2479_v19  ;;  %v2487_v31 = vmul.f32 %v2482_v24, %v7273_v30  ;;  %v2484_v34 = vmul.f32 %v2482_v24, %v7260_v57  ;;  %v2485_v36 = vmul.f32 %v2482_v24, %v7258_v33 }
 0xaed   :  { %v2486_v12 = vmul.f32 %v2482_v24, %v7262_v21 }
 0xaee   :  { %v2489_v32 = vperm.slane %v2480_v25, 0 }
 0xaf0   :  { %v2491_v45 = vadd.f32 %v2489_v32, %v2484_v34  ;;  %v2492_v37 = vadd.f32 %v2489_v32, %v2485_v36  ;;  %v2494_v47 = vadd.f32 %v2489_v32, %v2487_v31  ;;  %v2493_v41 = vadd.f32 %v2489_v32, %v2486_v12 }
 0xaf2   :  { %v7480_v30 = vadd.f32 %v2491_v45, %v6858_v54  ;;  %v7483_v57 = vadd.f32 %v2492_v37, %v6861_v44  ;;  %v7486_v33 = vadd.f32 %v2494_v47, %v6864_v58  ;;  %v7492_v21 = vadd.f32 %v2493_v41, %v6870_v8 }
 0xaf4   :  { %2573 = vmatmul.f32.vlgmr.msra.gmra.mxu0 %v7480_v30  ;;  %v2507_v40 = vrot.slane %v7480_v30, 1  ;;  %v2508_v54 = vrot.slane %v7483_v57, 1  ;;  %v2499_v18 = vrot.slane %v7480_v30, 7  ;;  %v2502_v44 = vrot.slane %v7486_v33, 7 }
 0xaf5   :  { %4367 = vmatpush.msk.msra.mxu0 %vm8707_vm10, %v4594_v38  ;;  %v2500_v50 = vrot.slane %v7483_v57, 7  ;;  %v2509_v20 = vrot.slane %v7492_v21, 1  ;;  %vm8714_vm10 = vnez %v8566_v42  ;;  %v2510_v1 = vrot.slane %v7486_v33, 1 }
 0xaf6   :  { %v2513_v58 = vsel %vm8709_vm9, %v2507_v40, %v2508_v54  ;;  %v2506_v8 = vsel %vm8710_vm12, %v2502_v44, %v2499_v18  ;;  %vm8712_vm9 = vmmov %vm8710_vm12  ;;  %vm8713_vm12 = vcmp.lt.s32.totalorder %v4644_v9, 7  ;;  %v2501_v14 = vrot.slane %v7492_v21, 7 }
 0xaf7   :  { %2648 = vmatmul.f32.vlgmr.msra.gmra.mxu2 %v2513_v58  ;;  %v2515_v5 = vsel %vm8711_vm14, %v2513_v58, %v2506_v8  ;;  %4368 = vmatpush.msk.msra.mxu0 %vm8708_vm13, %v4594_v38  ;;  %v2505_v3 = vsel %vm8712_vm9, %v2499_v18, %v2500_v50  ;;  %v2512_v48 = vsel %vm8713_vm12, %v2508_v54, %v2509_v20 }
 0xaf8   :  { %2602 = vmatmul.f32.vlgmr.msra.gmra.mxu1 %v2515_v5  ;;  %vm8715_vm14 = vnez %v8568_v46  ;;  %v2520_v6 = vsel %vm8716_vm11, %v2505_v3, %v2512_v48  ;;  %vm8717_vm9 = vnez %v8570_v49  ;;  %v2511_v51 = vsel %vm8713_vm12, %v2509_v20, %v2510_v1 }
 0xaf9   :  { %4369 = vmatpush.msk.msra.mxu0 %vm8714_vm10, %v4594_v38  ;;  %vm8718_vm11 = vcmp.lt.s32.totalorder %v4644_v9, 1 }
 0xafa   :  { %v2504_v55 = vsel %vm8718_vm11, %v2500_v50, %v2501_v14  ;;  %vm8720_vm12 = vmmov %vm8718_vm11  ;;  %vm8721_vm11 = vcmp.lt.s32.totalorder %v4644_v9, 7 }
 0xafb   :  { %4370 = vmatpush.msk.msra.mxu0 %vm8715_vm14, %v4594_v38  ;;  %v2503_v61 = vsel %vm8720_vm12, %v2501_v14, %v2502_v44  ;;  %v2514_v63 = vsel %vm8721_vm11, %v2510_v1, %v2507_v40  ;;  %vm8723_vm12 = vnez %v8586_v17  ;;  %vm8724_vm11 = vnez %v8562_v35 }
 0xafc   :  { %2576 = vmatmul.f32.gmra.mxu0 %v7483_v57 }
 0xafd   :  { %4371 = vmatpush.msk.msra.mxu0 %vm8717_vm9, %v4594_v38  ;;  %vm8719_vm9 = vnez %v8558_v22 }
 0xafe   :  { %v2517_v60 = vsel %vm8719_vm9, %v2511_v51, %v2504_v55  ;;  %vm8722_vm9 = vnez %v8560_v28 }
 0xaff   :  { %2651 = vmatmul.f32.gmra.mxu2 %v2520_v6  ;;  %4372 = vmatpush.msk.msra.mxu0 %vm8595_vm5, %v4594_v38  ;;  %v2522_v0 = vsel %vm8722_vm9, %v2503_v61, %v2514_v63  ;;  %vm8725_vm9 = vnez %v8570_v49 }
 0xb00   :  { %2605 = vmatmul.f32.gmra.mxu1 %v2505_v3 }
 0xb01   :  { %4373 = vmatpush.msk.msra.mxu0 %vm4938_vm15, %v4594_v38 }
 0xb03   :  { %4374 = vmatpush.msk.msra.mxu0 %vm4950_vm3, %v4594_v38 }
 0xb04   :  { %2579 = vmatmul.f32.gmra.mxu0 %v7492_v21 }
 0xb05   :  { %4375 = vmatpush.msk.msra.mxu0 %vm4962_vm4, %v4594_v38 }
 0xb07   :  { %2654 = vmatmul.f32.gmra.mxu2 %v2511_v51  ;;  %4376 = vmatpush.msk.msra.mxu0 %vm4974_vm8, %v4594_v38 }
 0xb08   :  { %2608 = vmatmul.f32.gmra.mxu1 %v2517_v60 }
 0xb09   :  { %4377 = vmatpush.msk.msra.mxu0 %vm4986_vm7, %v4594_v38 }
 0xb0b   :  { %4378 = vmatpush.msk.msra.mxu0 %vm4997_vm6, %v4594_v38 }
 0xb0c   :  { %2582 = vmatmul.f32.gmra.mxu0 %v7486_v33 }
 0xb0d   :  { %4379 = vmatpush.msk.msra.mxu0 %vm4774_vm2, %v4594_v38 }
 0xb0f   :  { %2657 = vmatmul.f32.gmra.mxu2 %v2522_v0  ;;  %4380 = vmatpush.msk.msra.mxu0 %vm4740_vm1, %v4594_v38 }
 0xb10   :  { %2611 = vmatmul.f32.gmra.mxu1 %v2503_v61 }
 0xb11   :  { %4381 = vmatpush.msk.msra.mxu0 %vm4680_vm0, %v4594_v38 }
 0xb13   :  { %4382 = vmatpush.msk.msra.mxu0 %vm8723_vm12, %v4594_v38 }
 0xb71   :  { %v2574_v11 = vpop.f32.mrf.mxu0 }
 0xb75   :  { %v2603_v27 = vpop.f32.mrf.mxu1 }
 0xb76   :  { %v2604_v32 = vadd.f32 %v2603_v27, %v2574_v11 }
 0xb79   :  { %v2577_v26 = vpop.f32.mrf.mxu0 }
 0xb7a   :  { %v2649_v13 = vpop.f32.mrf.mxu2 }
 0xb7b   :  { %v7583_v12 = vadd.f32 %v2649_v13, %v2604_v32  ;;  %v4333_v32 = vld [vmem:[%s8476_s1 + $0xdf0] sm:$0xff] }
 0xb7d   :  { %v2606_v29 = vpop.f32.mrf.mxu1  ;;  %v2674_v40 = vmul.f32 %v7583_v12, %v7583_v12 }
 0xb7e   :  { %v2607_v25 = vadd.f32 %v2606_v29, %v2577_v26  ;;  %v4350_v29 = vld [vmem:[%s8476_s1 + $0xe78] sm:$0xff] }
 0xb7f   :  { %2826 = vmatpush.msrb.mxu1 %v4350_v29  ;;  %v4339_v29 = vld [vmem:[%s8476_s1 + $0xe20] sm:$0xff] }
 0xb81   :  { %v2580_v24 = vpop.f32.mrf.mxu0 }
 0xb82   :  { %v2652_v16 = vpop.f32.mrf.mxu2 }
 0xb83   :  { %v7581_v34 = vadd.f32 %v2652_v16, %v2607_v25  ;;  %v4349_v16 = vld [vmem:[%s8476_s1 + $0xe70] sm:$0xff]  ;;  %v4348_v25 = vld [vmem:[%s8476_s1 + $0xe68] sm:$0xff] }
 0xb84   :  { %2827 = vmatpush.msrb.mxu1 %v4349_v16  ;;  %v4356_v16 = vld [vmem:[%s8476_s1 + $0xea8] sm:$0xff] }
 0xb85   :  { %v2609_v19 = vpop.f32.mrf.mxu1  ;;  %v2675_v47 = vmul.f32 %v7581_v34, %v7581_v34  ;;  %v2665_v54 = vadd.f32 %v7581_v34, %v7583_v12 }
 0xb86   :  { %v2610_v36 = vadd.f32 %v2609_v19, %v2580_v24  ;;  %v4366_v19 = vld [vmem:[%s8476_s1 + $0xef8] sm:$0xff]  ;;  %2828 = vmatpush.msrb.mxu1 %v4348_v25  ;;  %v4324_v25 = vld [vmem:[%s8476_s1 + $0xda8] sm:$0xff] }
 0xb87   :  { %v2678_v8 = vadd.f32 %v2675_v47, %v2674_v40  ;;  %v4334_v24 = vld [vmem:[%s8476_s1 + $0xdf8] sm:$0xff]  ;;  %2901 = vmatpush.msrb.mxu3 %v4366_v19  ;;  %v4332_v47 = vld [vmem:[%s8476_s1 + $0xde8] sm:$0xff]  ;;  %v4363_v40 = vld [vmem:[%s8476_s1 + $0xee0] sm:$0xff] }
 0xb88   :  { %2855 = vmatpush.msrb.mxu2 %v4334_v24 }
 0xb89   :  { %v2583_v41 = vpop.f32.mrf.mxu0 }
 0xb8a   :  { %v2655_v31 = vpop.f32.mrf.mxu2  ;;  %2856 = vmatpush.msrb.mxu2 %v4333_v32  ;;  %v4355_v32 = vld [vmem:[%s8476_s1 + $0xea0] sm:$0xff] }
 0xb8b   :  { %v7585_v45 = vadd.f32 %v2655_v31, %v2610_v36  ;;  %v4365_v31 = vld [vmem:[%s8476_s1 + $0xef0] sm:$0xff]  ;;  %v4347_v36 = vld [vmem:[%s8476_s1 + $0xe60] sm:$0xff] }
 0xb8c   :  { %2902 = vmatpush.msrb.mxu3 %v4365_v31  ;;  %2829 = vmatpush.msrb.mxu1 %v4347_v36  ;;  %v4338_v31 = vld [vmem:[%s8476_s1 + $0xe18] sm:$0xff] }
 0xb8d   :  { %v2612_v37 = vpop.f32.mrf.mxu1  ;;  %v2676_v18 = vmul.f32 %v7585_v45, %v7585_v45  ;;  %v2666_v5 = vadd.f32 %v2665_v54, %v7585_v45  ;;  %2857 = vmatpush.msrb.mxu2 %v4332_v47  ;;  %v4331_v54 = vld [vmem:[%s8476_s1 + $0xde0] sm:$0xff]  ;;  %v4337_v47 = vld [vmem:[%s8476_s1 + $0xe10] sm:$0xff] }
 0xb8e   :  { %v2613_v44 = vadd.f32 %v2612_v37, %v2583_v41  ;;  %v4364_v37 = vld [vmem:[%s8476_s1 + $0xee8] sm:$0xff]  ;;  %v4346_v41 = vld [vmem:[%s8476_s1 + $0xe58] sm:$0xff] }
 0xb8f   :  { %v2679_v20 = vadd.f32 %v2678_v8, %v2676_v18  ;;  %2903 = vmatpush.msrb.mxu3 %v4364_v37  ;;  %2830 = vmatpush.msrb.mxu1 %v4346_v41  ;;  %v4345_v18 = vld [vmem:[%s8476_s1 + $0xe50] sm:$0xff]  ;;  %v4344_v8 = vld [vmem:[%s8476_s1 + $0xe48] sm:$0xff]  ;;  %v4323_v37 = vld [vmem:[%s8476_s1 + $0xda0] sm:$0xff] }
 0xb90   :  { %2858 = vmatpush.msrb.mxu2 %v4331_v54  ;;  %v4354_v41 = vld [vmem:[%s8476_s1 + $0xe98] sm:$0xff] }
 0xb91   :  { %2904 = vmatpush.msrb.mxu3 %v4363_v40  ;;  %2831 = vmatpush.msrb.mxu1 %v4345_v18  ;;  %v4322_v54 = vld [vmem:[%s8476_s1 + $0xd98] sm:$0xff]  ;;  %v4336_v18 = vld [vmem:[%s8476_s1 + $0xe08] sm:$0xff] }
 0xb92   :  { %v2658_v58 = vpop.f32.mrf.mxu2 }
 0xb93   :  { %v7596_v50 = vadd.f32 %v2658_v58, %v2613_v44  ;;  %v4362_v44 = vld [vmem:[%s8476_s1 + $0xed8] sm:$0xff]  ;;  %2832 = vmatpush.msrb.mxu1 %v4344_v8  ;;  %v4335_v8 = vld [vmem:[%s8476_s1 + $0xe00] sm:$0xff] }
 0xb94   :  { %v4330_v58 = vld [vmem:[%s8476_s1 + $0xdd8] sm:$0xff]  ;;  %2905 = vmatpush.msrb.mxu3 %v4362_v44  ;;  %v4321_v44 = vld [vmem:[%s8476_s1 + $0xd90] sm:$0xff] }
 0xb95   :  { %v2667_v3 = vadd.f32 %v2666_v5, %v7596_v50  ;;  %v2677_v48 = vmul.f32 %v7596_v50, %v7596_v50  ;;  %2859 = vmatpush.msrb.mxu2 %v4330_v58  ;;  %v4361_v5 = vld [vmem:[%s8476_s1 + $0xed0] sm:$0xff] }
 0xb96   :  { %2906 = vmatpush.msrb.mxu3 %v4361_v5  ;;  %v4353_v58 = vld [vmem:[%s8476_s1 + $0xe90] sm:$0xff] }
 0xb97   :  { %v2668_v6 = vrot.slane %v2667_v3, 4  ;;  %v2680_v1 = vadd.f32 %v2679_v20, %v2677_v48  ;;  %v4329_v20 = vld [vmem:[%s8476_s1 + $0xdd0] sm:$0xff]  ;;  %v4360_v48 = vld [vmem:[%s8476_s1 + $0xec8] sm:$0xff] }
 0xb98   :  { %2860 = vmatpush.msrb.mxu2 %v4329_v20  ;;  %2907 = vmatpush.msrb.mxu3 %v4360_v48  ;;  %v4320_v20 = vld [vmem:[%s8476_s1 + $0xd88] sm:$0xff]  ;;  %v4351_v48 = vld [vmem:[%s8476_s1 + $0xe80] sm:$0xff] }
 0xb99   :  { %v2669_v14 = vadd.f32 %v2668_v6, %v2667_v3  ;;  %v2681_v51 = vrot.slane %v2680_v1, 4  ;;  %v4343_v3 = vld [vmem:[%s8476_s1 + $0xe40] sm:$0xff]  ;;  %v4328_v6 = vld [vmem:[%s8476_s1 + $0xdc8] sm:$0xff] }
 0xb9a   :  { %2833 = vmatpush.msrb.mxu1 %v4343_v3  ;;  %2861 = vmatpush.msrb.mxu2 %v4328_v6  ;;  %v4352_v3 = vld [vmem:[%s8476_s1 + $0xe88] sm:$0xff]  ;;  %v4319_v6 = vld [vmem:[%s8476_s1 + $0xd80] sm:$0xff] }
 0xb9b   :  { %v2670_v55 = vrot.slane %v2669_v14, 2  ;;  %v2682_v60 = vadd.f32 %v2681_v51, %v2680_v1  ;;  %v4342_v1 = vld [vmem:[%s8476_s1 + $0xe38] sm:$0xff]  ;;  %v4327_v51 = vld [vmem:[%s8476_s1 + $0xdc0] sm:$0xff] }
 0xb9c   :  { %2834 = vmatpush.msrb.mxu1 %v4342_v1  ;;  %2862 = vmatpush.msrb.mxu2 %v4327_v51 }
 0xb9d   :  { %v2671_v61 = vadd.f32 %v2670_v55, %v2669_v14  ;;  %v2683_v63 = vrot.slane %v2682_v60, 2  ;;  %v4359_v14 = vld [vmem:[%s8476_s1 + $0xec0] sm:$0xff]  ;;  %v4341_v55 = vld [vmem:[%s8476_s1 + $0xe30] sm:$0xff] }
 0xb9e   :  { %2908 = vmatpush.msrb.mxu3 %v4359_v14  ;;  %2835 = vmatpush.msrb.mxu1 %v4341_v55 }
 0xb9f   :  { %v2672_v0 = vrot.slane %v2671_v61, 1  ;;  %v2684_v11 = vadd.f32 %v2683_v63, %v2682_v60  ;;  %v4358_v60 = vld [vmem:[%s8476_s1 + $0xeb8] sm:$0xff]  ;;  %v4340_v63 = vld [vmem:[%s8476_s1 + $0xe28] sm:$0xff] }
 0xba0   :  { %2909 = vmatpush.msrb.mxu3 %v4358_v60  ;;  %2836 = vmatpush.msrb.mxu1 %v4340_v63 }
 0xba1   :  { %v2673_v27 = vadd.f32 %v2672_v0, %v2671_v61  ;;  %v2685_v13 = vrot.slane %v2684_v11, 1  ;;  %v4326_v61 = vld [vmem:[%s8476_s1 + $0xdb8] sm:$0xff] }
 0xba2   :  { %2863 = vmatpush.msrb.mxu2 %v4326_v61  ;;  %2837 = vmatpush.msrb.mxu1 %v4339_v29  ;;  %v4317_v61 = vld [vmem:[%s8478_s2 + $0x8] sm:$0x1] }
 0xba3   :  { %2703 = vmatmul.f32.vlgmr.msra.gmra.mxu3 %v2673_v27  ;;  %v2686_v26 = vadd.f32 %v2685_v13, %v2684_v11  ;;  %v4357_v27 = vld [vmem:[%s8476_s1 + $0xeb0] sm:$0xff] }
 0xba4   :  { %2910 = vmatpush.msrb.mxu3 %v4357_v27  ;;  %2838 = vmatpush.msrb.mxu1 %v4338_v31  ;;  %v4318_v27 = vld [vmem:[%s8479_s3 + $0x8] sm:$0x1] }
 0xba5   :  { %2724 = vmatmul.f32.vlgmr.msrb.gmra.mxu0 %v2686_v26  ;;  %v4325_v26 = vld [vmem:[%s8476_s1 + $0xdb0] sm:$0xff] }
 0xba6   :  { %2864 = vmatpush.msrb.mxu2 %v4325_v26  ;;  %2911 = vmatpush.msrb.mxu3 %v4356_v16 }
 0xba7   :  { %2839 = vmatpush.msrb.mxu1 %v4337_v47 }
 0xba8   :  { %2865 = vmatpush.msrb.mxu2 %v4324_v25  ;;  %2912 = vmatpush.msrb.mxu3 %v4355_v32 }
 0xba9   :  { %2840 = vmatpush.msrb.mxu1 %v4336_v18 }
 0xbaa   :  { %2866 = vmatpush.msrb.mxu2 %v4323_v37  ;;  %2913 = vmatpush.msrb.mxu3 %v4354_v41 }
 0xbab   :  { %2841 = vmatpush.msrb.mxu1 %v4335_v8 }
 0xbac   :  { %2867 = vmatpush.msrb.mxu2 %v4322_v54  ;;  %2914 = vmatpush.msrb.mxu3 %v4353_v58 }
 0xbad   :  { %4383 = vmatpush.msk.msra.mxu1 %vm8724_vm11, %v4594_v38 }
 0xbae   :  { %2868 = vmatpush.msrb.mxu2 %v4321_v44  ;;  %2915 = vmatpush.msrb.mxu3 %v4352_v3 }
 0xbaf   :  { %4384 = vmatpush.msk.msra.mxu1 %vm8708_vm13, %v4594_v38 }
 0xbb0   :  { %2869 = vmatpush.msrb.mxu2 %v4320_v20  ;;  %2916 = vmatpush.msrb.mxu3 %v4351_v48 }
 0xbb1   :  { %4385 = vmatpush.msk.msra.mxu1 %vm8714_vm10, %v4594_v38 }
 0xbb2   :  { %2870 = vmatpush.msrb.mxu2 %v4319_v6 }
 0xbb3   :  { %4386 = vmatpush.msk.msra.mxu1 %vm8715_vm14, %v4594_v38 }
 0xbb5   :  { %4387 = vmatpush.msk.msra.mxu1 %vm8725_vm9, %v4594_v38 }
 0xbb7   :  { %4388 = vmatpush.msk.msra.mxu1 %vm8595_vm5, %v4594_v38 }
 0xbb9   :  { %4389 = vmatpush.msk.msra.mxu1 %vm4938_vm15, %v4594_v38 }
 0xbbb   :  { %4390 = vmatpush.msk.msra.mxu1 %vm4950_vm3, %v4594_v38 }
 0xbbd   :  { %4391 = vmatpush.msk.msra.mxu1 %vm4962_vm4, %v4594_v38 }
 0xbbf   :  { %4392 = vmatpush.msk.msra.mxu1 %vm4974_vm8, %v4594_v38 }
 0xbc1   :  { %4393 = vmatpush.msk.msra.mxu1 %vm4986_vm7, %v4594_v38 }
 0xbc3   :  { %4394 = vmatpush.msk.msra.mxu1 %vm4997_vm6, %v4594_v38 }
 0xbc5   :  { %4395 = vmatpush.msk.msra.mxu1 %vm4774_vm2, %v4594_v38 }
 0xbc7   :  { %4396 = vmatpush.msk.msra.mxu1 %vm4740_vm1, %v4594_v38 }
 0xbc9   :  { %4397 = vmatpush.msk.msra.mxu1 %vm4680_vm0, %v4594_v38 }
 0xbcb   :  { %4398 = vmatpush.msk.msra.mxu1 %vm8723_vm12, %v4594_v38  ;;  %vm8733_vm12 = vnez %v8556_v15 }
 0xc22   :  { %v2725_v0 = vpop.f32.mrf.mxu0 }
 0xc23   :  { %v2728_v19 = vmul.f32 0.001953125, %v2725_v0 }
 0xc26   :  { %v2704_v11 = vpop.f32.mrf.mxu3 }
 0xc27   :  { %v7691_v13 = vmul.f32 0.001953125, %v2704_v11 }
 0xc29   :  { %v2729_v24 = vmul.f32 %v7691_v13, %v7691_v13 }
 0xc2b   :  { %v2730_v36 = vsub.f32 %v2728_v19, %v2729_v24 }
 0xc2d   :  { %v2731_v40 = vmax.f32 %v2730_v36, 0.0 }
 0xc2f   :  { %v2734_v5 = vadd.f32 1e-05, %v2731_v40 }
 0xc31   :  { %4582 = vrsqrt.f32 %v2734_v5  ;;  %vm2741_vm9 = vweird.f32 %v2734_v5 }
 0xc37   :  { %v4583_v1 = vpop.eup %4582 }
 0xc38   :  { %v2736_v14 = vmul.f32 %v4583_v1, %v2734_v5  ;;  %vm2742_vm10 = vweird.f32 %v4583_v1 }
 0xc39   :  { %vm2743_vm14 = vmor %vm2741_vm9, %vm2742_vm10  ;;  %vm8726_vm10 = vcmp.lt.s32.totalorder %v4644_v9, 7  ;;  %vm8728_vm9 = vnez %v8554_v2 }
 0xc3a   :  { %v2737_v51 = vmul.f32 %v4583_v1, %v2736_v14 }
 0xc3c   :  { %v2738_v55 = vmul.f32 0.5, %v2737_v51 }
 0xc3e   :  { %v2739_v60 = vsub.f32 1.5, %v2738_v55 }
 0xc40   :  { %v2740_v63 = vmul.f32 %v4583_v1, %v2739_v60 }
 0xc42   :  { %v2744_v0 = vsel %vm2743_vm14, %v4583_v1, %v2740_v63  ;;  %vm8727_vm14 = vcmp.lt.s32.totalorder %v4644_v9, 1 }
 0xc43   :  { %v2745_v11 = vmul.f32 %v4317_v61, %v2744_v0 }
 0xc45   :  { %v2748_v26 = vmul.f32 %v2745_v11, %v7691_v13  ;;  %v2751_v29 = vperm.slane %v2745_v11, 0 }
 0xc47   :  { %v2749_v16 = vsub.f32 %v4318_v27, %v2748_v26  ;;  %v2754_v19 = vmul.f32 %v2751_v29, %v7581_v34  ;;  %v2755_v24 = vmul.f32 %v2751_v29, %v7585_v45  ;;  %v2756_v25 = vmul.f32 %v2751_v29, %v7596_v50 }
 0xc48   :  { %v2753_v32 = vmul.f32 %v2751_v29, %v7583_v12 }
 0xc49   :  { %v2758_v31 = vperm.slane %v2749_v16, 0 }
 0xc4b   :  { %v2761_v13 = vadd.f32 %v2758_v31, %v2754_v19  ;;  %v2762_v36 = vadd.f32 %v2758_v31, %v2755_v24  ;;  %v2763_v37 = vadd.f32 %v2758_v31, %v2756_v25  ;;  %v2760_v47 = vadd.f32 %v2758_v31, %v2753_v32 }
 0xc4d   :  { %v2765_v34 = vmax.f32 %v2761_v13, 0.0  ;;  %v2767_v41 = vmax.f32 %v2763_v37, 0.0  ;;  %v2764_v45 = vmax.f32 %v2760_v47, 0.0  ;;  %v2766_v12 = vmax.f32 %v2762_v36, 0.0 }
 0xc4f   :  { %2842 = vmatmul.f32.vlgmr.msrb.gmra.mxu1 %v2764_v45  ;;  %v2776_v50 = vrot.slane %v2764_v45, 1  ;;  %v2777_v40 = vrot.slane %v2765_v34, 1  ;;  %v2768_v54 = vrot.slane %v2764_v45, 7  ;;  %v2771_v18 = vrot.slane %v2767_v41, 7 }
 0xc50   :  { %4449 = vmatpush.msk.msrb.mxu1 %vm8724_vm11, %v4594_v38  ;;  %v2769_v5 = vrot.slane %v2765_v34, 7  ;;  %v2778_v20 = vrot.slane %v2766_v12, 1  ;;  %vm8731_vm11 = vnez %v8566_v42  ;;  %v2779_v1 = vrot.slane %v2767_v41, 1 }
 0xc51   :  { %v2782_v44 = vsel %vm8726_vm10, %v2776_v50, %v2777_v40  ;;  %v2775_v58 = vsel %vm8727_vm14, %v2771_v18, %v2768_v54  ;;  %vm8729_vm10 = vmmov %vm8727_vm14  ;;  %vm8730_vm14 = vcmp.lt.s32.totalorder %v4644_v9, 7  ;;  %v2770_v14 = vrot.slane %v2766_v12, 7 }
 0xc52   :  { %2917 = vmatmul.f32.vlgmr.msrb.gmra.mxu3 %v2782_v44  ;;  %v2784_v8 = vsel %vm8728_vm9, %v2782_v44, %v2775_v58  ;;  %4450 = vmatpush.msk.msrb.mxu1 %vm8708_vm13, %v4594_v38  ;;  %v2774_v3 = vsel %vm8729_vm10, %v2768_v54, %v2769_v5  ;;  %v2781_v48 = vsel %vm8730_vm14, %v2777_v40, %v2778_v20  ;;  %vm8735_vm10 = vmmov %vm8730_vm14  ;;  %vm8736_vm14 = vcmp.lt.s32.totalorder %v4644_v9, 1 }
 0xc53   :  { %2871 = vmatmul.f32.vlgmr.msrb.gmra.mxu2 %v2784_v8  ;;  %vm8732_vm9 = vnez %v8568_v46  ;;  %v2789_v6 = vsel %vm8733_vm12, %v2774_v3, %v2781_v48  ;;  %vm8734_vm13 = vnez %v8570_v49  ;;  %v2780_v51 = vsel %vm8735_vm10, %v2778_v20, %v2779_v1  ;;  %vm8738_vm10 = vmmov %vm8736_vm14 }
 0xc54   :  { %4451 = vmatpush.msk.msrb.mxu1 %vm8731_vm11, %v4594_v38  ;;  %v2773_v55 = vsel %vm8736_vm14, %v2769_v5, %v2770_v14  ;;  %vm8737_vm12 = vnez %v8558_v22  ;;  %v2772_v61 = vsel %vm8738_vm10, %v2770_v14, %v2771_v18  ;;  %vm8739_vm14 = vcmp.lt.s32.totalorder %v4644_v9, 7 }
 0xc55   :  { %v2786_v60 = vsel %vm8737_vm12, %v2780_v51, %v2773_v55  ;;  %v2783_v63 = vsel %vm8739_vm14, %v2779_v1, %v2776_v50  ;;  %vm8740_vm12 = vnez %v8560_v28  ;;  %vm8741_vm10 = vnez %v8586_v17 }
 0xc56   :  { %4452 = vmatpush.msk.msrb.mxu1 %vm8732_vm9, %v4594_v38  ;;  %v2791_v0 = vsel %vm8740_vm12, %v2772_v61, %v2783_v63  ;;  %vm8742_vm14 = vnez %v8562_v35  ;;  %vm8743_vm12 = vnez %v8564_v39 }
 0xc57   :  { %2845 = vmatmul.f32.gmra.mxu1 %v2765_v34 }
 0xc58   :  { %4453 = vmatpush.msk.msrb.mxu1 %vm8734_vm13, %v4594_v38 }
 0xc5a   :  { %2920 = vmatmul.f32.gmra.mxu3 %v2789_v6  ;;  %4454 = vmatpush.msk.msrb.mxu1 %vm8595_vm5, %v4594_v38 }
 0xc5b   :  { %2874 = vmatmul.f32.gmra.mxu2 %v2774_v3 }
 0xc5c   :  { %4455 = vmatpush.msk.msrb.mxu1 %vm4938_vm15, %v4594_v38 }
 0xc5e   :  { %4456 = vmatpush.msk.msrb.mxu1 %vm4950_vm3, %v4594_v38 }
 0xc5f   :  { %2848 = vmatmul.f32.gmra.mxu1 %v2766_v12 }
 0xc60   :  { %4457 = vmatpush.msk.msrb.mxu1 %vm4962_vm4, %v4594_v38 }
 0xc62   :  { %2923 = vmatmul.f32.gmra.mxu3 %v2780_v51  ;;  %4458 = vmatpush.msk.msrb.mxu1 %vm4974_vm8, %v4594_v38 }
 0xc63   :  { %2877 = vmatmul.f32.gmra.mxu2 %v2786_v60 }
 0xc64   :  { %4459 = vmatpush.msk.msrb.mxu1 %vm4986_vm7, %v4594_v38 }
 0xc66   :  { %4460 = vmatpush.msk.msrb.mxu1 %vm4997_vm6, %v4594_v38 }
 0xc67   :  { %2851 = vmatmul.f32.gmra.mxu1 %v2767_v41 }
 0xc68   :  { %4461 = vmatpush.msk.msrb.mxu1 %vm4774_vm2, %v4594_v38 }
 0xc6a   :  { %2926 = vmatmul.f32.gmra.mxu3 %v2791_v0  ;;  %4462 = vmatpush.msk.msrb.mxu1 %vm4740_vm1, %v4594_v38 }
 0xc6b   :  { %2880 = vmatmul.f32.gmra.mxu2 %v2772_v61 }
 0xc6c   :  { %4463 = vmatpush.msk.msrb.mxu1 %vm4680_vm0, %v4594_v38 }
 0xc6e   :  { %4464 = vmatpush.msk.msrb.mxu1 %vm8741_vm10, %v4594_v38 }
 0xccc   :  { %v2843_v11 = vpop.f32.mrf.mxu1 }
 0xcd4   :  { %v2846_v29 = vpop.f32.mrf.mxu1 }
 0xcd5   :  { %v2918_v27 = vpop.f32.mrf.mxu3 }
 0xcd6   :  { %v2872_v26 = vpop.f32.mrf.mxu2 }
 0xcd7   :  { %v2873_v13 = vadd.f32 %v2872_v26, %v2843_v11 }
 0xcd9   :  { %v7882_v47 = vadd.f32 %v2918_v27, %v2873_v13  ;;  %v4415_v13 = vld [vmem:[%s8476_s1 + $0xf70] sm:$0xff] }
 0xcdb   :  { %v2943_v50 = vmul.f32 %v7882_v47, %v7882_v47 }
 0xcdc   :  { %v2849_v24 = vpop.f32.mrf.mxu1 }
 0xcdd   :  { %v2921_v16 = vpop.f32.mrf.mxu3 }
 0xcde   :  { %v2875_v19 = vpop.f32.mrf.mxu2 }
 0xcdf   :  { %v2876_v25 = vadd.f32 %v2875_v19, %v2846_v29  ;;  %v4431_v19 = vld [vmem:[%s8476_s1 + $0xff0] sm:$0xff] }
 0xce1   :  { %v7880_v37 = vadd.f32 %v2921_v16, %v2876_v25  ;;  %v4432_v16 = vld [vmem:[%s8476_s1 + $0xff8] sm:$0xff] }
 0xce2   :  { %3095 = vmatpush.msra.mxu2 %v4432_v16  ;;  %v4416_v25 = vld [vmem:[%s8476_s1 + $0xf78] sm:$0xff] }
 0xce3   :  { %v2944_v41 = vmul.f32 %v7880_v37, %v7880_v37  ;;  %v2934_v40 = vadd.f32 %v7880_v37, %v7882_v47  ;;  %3124 = vmatpush.msra.mxu3 %v4416_v25 }
 0xce4   :  { %v2852_v45 = vpop.f32.mrf.mxu1  ;;  %3096 = vmatpush.msra.mxu2 %v4431_v19  ;;  %v4438_v19 = vld [vmem:[%s8476_s1 + $0x1028] sm:$0xff] }
 0xce5   :  { %v2924_v31 = vpop.f32.mrf.mxu3  ;;  %v2947_v58 = vadd.f32 %v2944_v41, %v2943_v50  ;;  %3125 = vmatpush.msra.mxu3 %v4415_v13  ;;  %v4446_v41 = vld [vmem:[%s8476_s1 + $0x1068] sm:$0xff]  ;;  %v4445_v50 = vld [vmem:[%s8476_s1 + $0x1060] sm:$0xff] }
 0xce6   :  { %v2878_v32 = vpop.f32.mrf.mxu2  ;;  %v4405_v13 = vld [vmem:[%s8476_s1 + $0xf20] sm:$0xff] }
 0xce7   :  { %v2879_v36 = vadd.f32 %v2878_v32, %v2849_v24  ;;  %v4448_v24 = vld [vmem:[%s8476_s1 + $0x1078] sm:$0xff]  ;;  %v4447_v32 = vld [vmem:[%s8476_s1 + $0x1070] sm:$0xff] }
 0xce8   :  { %3170 = vmatpush.msrb.mxu0 %v4448_v24 }
 0xce9   :  { %v7884_v34 = vadd.f32 %v2924_v31, %v2879_v36  ;;  %v4430_v31 = vld [vmem:[%s8476_s1 + $0xfe8] sm:$0xff]  ;;  %v4429_v36 = vld [vmem:[%s8476_s1 + $0xfe0] sm:$0xff] }
 0xcea   :  { %3097 = vmatpush.msra.mxu2 %v4430_v31  ;;  %3171 = vmatpush.msrb.mxu0 %v4447_v32  ;;  %v4406_v31 = vld [vmem:[%s8476_s1 + $0xf28] sm:$0xff]  ;;  %v4420_v32 = vld [vmem:[%s8476_s1 + $0xf98] sm:$0xff] }
 0xceb   :  { %v2945_v54 = vmul.f32 %v7884_v34, %v7884_v34  ;;  %v2935_v8 = vadd.f32 %v2934_v40, %v7884_v34  ;;  %v4413_v40 = vld [vmem:[%s8476_s1 + $0xf60] sm:$0xff] }
 0xcec   :  { %3098 = vmatpush.msra.mxu2 %v4429_v36  ;;  %3172 = vmatpush.msrb.mxu0 %v4446_v41  ;;  %v4437_v36 = vld [vmem:[%s8476_s1 + $0x1020] sm:$0xff]  ;;  %v4419_v41 = vld [vmem:[%s8476_s1 + $0xf90] sm:$0xff] }
 0xced   :  { %v2927_v44 = vpop.f32.mrf.mxu3  ;;  %v2948_v20 = vadd.f32 %v2947_v58, %v2945_v54  ;;  %v4427_v54 = vld [vmem:[%s8476_s1 + $0xfd0] sm:$0xff]  ;;  %v4426_v58 = vld [vmem:[%s8476_s1 + $0xfc8] sm:$0xff] }
 0xcee   :  { %v2881_v12 = vpop.f32.mrf.mxu2  ;;  %3173 = vmatpush.msrb.mxu0 %v4445_v50  ;;  %v4436_v50 = vld [vmem:[%s8476_s1 + $0x1018] sm:$0xff] }
 0xcef   :  { %v2882_v18 = vadd.f32 %v2881_v12, %v2852_v45  ;;  %v4414_v45 = vld [vmem:[%s8476_s1 + $0xf68] sm:$0xff]  ;;  %v4428_v12 = vld [vmem:[%s8476_s1 + $0xfd8] sm:$0xff] }
 0xcf0   :  { %3126 = vmatpush.msra.mxu3 %v4414_v45  ;;  %3099 = vmatpush.msra.mxu2 %v4428_v12  ;;  %v4404_v12 = vld [vmem:[%s8476_s1 + $0xf18] sm:$0xff] }
 0xcf1   :  { %v7895_v5 = vadd.f32 %v2927_v44, %v2882_v18  ;;  %v4444_v18 = vld [vmem:[%s8476_s1 + $0x1058] sm:$0xff] }
 0xcf2   :  { %3127 = vmatpush.msra.mxu3 %v4413_v40  ;;  %3100 = vmatpush.msra.mxu2 %v4427_v54  ;;  %v4412_v44 = vld [vmem:[%s8476_s1 + $0xf58] sm:$0xff]  ;;  %v4418_v40 = vld [vmem:[%s8476_s1 + $0xf88] sm:$0xff]  ;;  %v4435_v54 = vld [vmem:[%s8476_s1 + $0x1010] sm:$0xff] }
 0xcf3   :  { %v2936_v3 = vadd.f32 %v2935_v8, %v7895_v5  ;;  %v2946_v48 = vmul.f32 %v7895_v5, %v7895_v5  ;;  %3174 = vmatpush.msrb.mxu0 %v4444_v18  ;;  %v4443_v8 = vld [vmem:[%s8476_s1 + $0x1050] sm:$0xff] }
 0xcf4   :  { %3128 = vmatpush.msra.mxu3 %v4412_v44  ;;  %3101 = vmatpush.msra.mxu2 %v4426_v58  ;;  %v4403_v44 = vld [vmem:[%s8476_s1 + $0xf10] sm:$0xff]  ;;  %v4417_v58 = vld [vmem:[%s8476_s1 + $0xf80] sm:$0xff] }
 0xcf5   :  { %v2937_v6 = vrot.slane %v2936_v3, 4  ;;  %v2949_v1 = vadd.f32 %v2948_v20, %v2946_v48  ;;  %v4411_v20 = vld [vmem:[%s8476_s1 + $0xf50] sm:$0xff]  ;;  %3175 = vmatpush.msrb.mxu0 %v4443_v8  ;;  %v4442_v48 = vld [vmem:[%s8476_s1 + $0x1048] sm:$0xff] }
 0xcf6   :  { %3129 = vmatpush.msra.mxu3 %v4411_v20  ;;  %v4402_v20 = vld [vmem:[%s8476_s1 + $0xf08] sm:$0xff] }
 0xcf7   :  { %v2938_v14 = vadd.f32 %v2937_v6, %v2936_v3  ;;  %v2950_v51 = vrot.slane %v2949_v1, 4  ;;  %v4425_v3 = vld [vmem:[%s8476_s1 + $0xfc0] sm:$0xff]  ;;  %v4410_v6 = vld [vmem:[%s8476_s1 + $0xf48] sm:$0xff]  ;;  %3176 = vmatpush.msrb.mxu0 %v4442_v48 }
 0xcf8   :  { %3102 = vmatpush.msra.mxu2 %v4425_v3  ;;  %3130 = vmatpush.msra.mxu3 %v4410_v6  ;;  %v4434_v3 = vld [vmem:[%s8476_s1 + $0x1008] sm:$0xff]  ;;  %v4433_v48 = vld [vmem:[%s8476_s1 + $0x1000] sm:$0xff] }
 0xcf9   :  { %v2939_v55 = vrot.slane %v2938_v14, 2  ;;  %v2951_v60 = vadd.f32 %v2950_v51, %v2949_v1  ;;  %v4424_v1 = vld [vmem:[%s8476_s1 + $0xfb8] sm:$0xff]  ;;  %v4409_v51 = vld [vmem:[%s8476_s1 + $0xf40] sm:$0xff] }
 0xcfa   :  { %3103 = vmatpush.msra.mxu2 %v4424_v1  ;;  %3131 = vmatpush.msra.mxu3 %v4409_v51  ;;  %v4401_v6 = vld [vmem:[%s8476_s1 + $0xf00] sm:$0xff] }
 0xcfb   :  { %v2940_v61 = vadd.f32 %v2939_v55, %v2938_v14  ;;  %v2952_v63 = vrot.slane %v2951_v60, 2  ;;  %v4441_v14 = vld [vmem:[%s8476_s1 + $0x1040] sm:$0xff]  ;;  %v4423_v55 = vld [vmem:[%s8476_s1 + $0xfb0] sm:$0xff] }
 0xcfc   :  { %3177 = vmatpush.msrb.mxu0 %v4441_v14  ;;  %3104 = vmatpush.msra.mxu2 %v4423_v55 }
 0xcfd   :  { %v2941_v0 = vrot.slane %v2940_v61, 1  ;;  %v2953_v11 = vadd.f32 %v2952_v63, %v2951_v60  ;;  %v4440_v60 = vld [vmem:[%s8476_s1 + $0x1038] sm:$0xff]  ;;  %v4422_v63 = vld [vmem:[%s8476_s1 + $0xfa8] sm:$0xff] }
 0xcfe   :  { %3178 = vmatpush.msrb.mxu0 %v4440_v60  ;;  %3105 = vmatpush.msra.mxu2 %v4422_v63 }
 0xcff   :  { %v2942_v27 = vadd.f32 %v2941_v0, %v2940_v61  ;;  %v2954_v26 = vrot.slane %v2953_v11, 1  ;;  %v4408_v61 = vld [vmem:[%s8476_s1 + $0xf38] sm:$0xff] }
 0xd00   :  { %3132 = vmatpush.msra.mxu3 %v4408_v61  ;;  %v4399_v61 = vld [vmem:[%s8478_s2 + $0x9] sm:$0x1] }
 0xd01   :  { %2972 = vmatmul.f32.vlgmr.msra.gmra.mxu0 %v2942_v27  ;;  %v2955_v29 = vadd.f32 %v2954_v26, %v2953_v11  ;;  %v4439_v11 = vld [vmem:[%s8476_s1 + $0x1030] sm:$0xff] }
 0xd02   :  { %v4407_v26 = vld [vmem:[%s8476_s1 + $0xf30] sm:$0xff]  ;;  %3179 = vmatpush.msrb.mxu0 %v4439_v11 }
 0xd03   :  { %2993 = vmatmul.f32.vlgmr.msra.gmra.mxu1 %v2955_v29  ;;  %v4421_v29 = vld [vmem:[%s8476_s1 + $0xfa0] sm:$0xff]  ;;  %3133 = vmatpush.msra.mxu3 %v4407_v26  ;;  %v4400_v26 = vld [vmem:[%s8479_s3 + $0x9] sm:$0x1] }
 0xd04   :  { %3106 = vmatpush.msra.mxu2 %v4421_v29  ;;  %3180 = vmatpush.msrb.mxu0 %v4438_v19 }
 0xd05   :  { %3134 = vmatpush.msra.mxu3 %v4406_v31 }
 0xd06   :  { %3107 = vmatpush.msra.mxu2 %v4420_v32  ;;  %3181 = vmatpush.msrb.mxu0 %v4437_v36 }
 0xd07   :  { %3135 = vmatpush.msra.mxu3 %v4405_v13 }
 0xd08   :  { %3108 = vmatpush.msra.mxu2 %v4419_v41  ;;  %3182 = vmatpush.msrb.mxu0 %v4436_v50 }
 0xd09   :  { %3136 = vmatpush.msra.mxu3 %v4404_v12 }
 0xd0a   :  { %3109 = vmatpush.msra.mxu2 %v4418_v40  ;;  %3183 = vmatpush.msrb.mxu0 %v4435_v54 }
 0xd0b   :  { %3137 = vmatpush.msra.mxu3 %v4403_v44 }
 0xd0c   :  { %3110 = vmatpush.msra.mxu2 %v4417_v58  ;;  %3184 = vmatpush.msrb.mxu0 %v4434_v3 }
 0xd0d   :  { %3138 = vmatpush.msra.mxu3 %v4402_v20 }
 0xd0e   :  { %4465 = vmatpush.msk.msrb.mxu2 %vm8742_vm14, %v4594_v38  ;;  %3185 = vmatpush.msrb.mxu0 %v4433_v48 }
 0xd0f   :  { %3139 = vmatpush.msra.mxu3 %v4401_v6 }
 0xd10   :  { %4466 = vmatpush.msk.msrb.mxu2 %vm8743_vm12, %v4594_v38 }
 0xd12   :  { %4467 = vmatpush.msk.msrb.mxu2 %vm8731_vm11, %v4594_v38 }
 0xd14   :  { %4468 = vmatpush.msk.msrb.mxu2 %vm8732_vm9, %v4594_v38 }
 0xd16   :  { %4469 = vmatpush.msk.msrb.mxu2 %vm8734_vm13, %v4594_v38 }
 0xd18   :  { %4470 = vmatpush.msk.msrb.mxu2 %vm8595_vm5, %v4594_v38 }
 0xd1a   :  { %4471 = vmatpush.msk.msrb.mxu2 %vm4938_vm15, %v4594_v38 }
 0xd1c   :  { %4472 = vmatpush.msk.msrb.mxu2 %vm4950_vm3, %v4594_v38 }
 0xd1e   :  { %4473 = vmatpush.msk.msrb.mxu2 %vm4962_vm4, %v4594_v38 }
 0xd20   :  { %4474 = vmatpush.msk.msrb.mxu2 %vm4974_vm8, %v4594_v38 }
 0xd22   :  { %4475 = vmatpush.msk.msrb.mxu2 %vm4986_vm7, %v4594_v38 }
 0xd24   :  { %4476 = vmatpush.msk.msrb.mxu2 %vm4997_vm6, %v4594_v38 }
 0xd26   :  { %4477 = vmatpush.msk.msrb.mxu2 %vm4774_vm2, %v4594_v38 }
 0xd28   :  { %4478 = vmatpush.msk.msrb.mxu2 %vm4740_vm1, %v4594_v38 }
 0xd2a   :  { %4479 = vmatpush.msk.msrb.mxu2 %vm4680_vm0, %v4594_v38 }
 0xd2c   :  { %4480 = vmatpush.msk.msrb.mxu2 %vm8741_vm10, %v4594_v38  ;;  %vm8751_vm10 = vnez %v8556_v15 }
 0xd7e   :  { %v2973_v0 = vpop.f32.mrf.mxu0 }
 0xd7f   :  { %v7990_v27 = vmul.f32 0.001953125, %v2973_v0 }
 0xd80   :  { %v2994_v16 = vpop.f32.mrf.mxu1 }
 0xd81   :  { %v2998_v24 = vmul.f32 %v7990_v27, %v7990_v27  ;;  %v2997_v25 = vmul.f32 0.001953125, %v2994_v16 }
 0xd83   :  { %v2999_v45 = vsub.f32 %v2997_v25, %v2998_v24 }
 0xd85   :  { %v3000_v18 = vmax.f32 %v2999_v45, 0.0 }
 0xd87   :  { %v3003_v8 = vadd.f32 1e-05, %v3000_v18 }
 0xd89   :  { %4584 = vrsqrt.f32 %v3003_v8  ;;  %vm3010_vm13 = vweird.f32 %v3003_v8 }
 0xd8f   :  { %v4585_v1 = vpop.eup %4584 }
 0xd90   :  { %v3005_v14 = vmul.f32 %v4585_v1, %v3003_v8  ;;  %vm3011_vm11 = vweird.f32 %v4585_v1 }
 0xd91   :  { %vm3012_vm9 = vmor %vm3010_vm13, %vm3011_vm11  ;;  %vm8744_vm13 = vcmp.lt.s32.totalorder %v4644_v9, 7  ;;  %vm8745_vm11 = vcmp.lt.s32.totalorder %v4644_v9, 1 }
 0xd92   :  { %v3006_v51 = vmul.f32 %v4585_v1, %v3005_v14 }
 0xd94   :  { %v3007_v55 = vmul.f32 0.5, %v3006_v51 }
 0xd96   :  { %v3008_v60 = vsub.f32 1.5, %v3007_v55 }
 0xd98   :  { %v3009_v63 = vmul.f32 %v4585_v1, %v3008_v60 }
 0xd9a   :  { %v3013_v0 = vsel %vm3012_vm9, %v4585_v1, %v3009_v63  ;;  %vm8746_vm9 = vnez %v8554_v2 }
 0xd9b   :  { %v3014_v11 = vmul.f32 %v4399_v61, %v3013_v0 }
 0xd9d   :  { %v3017_v29 = vmul.f32 %v3014_v11, %v7990_v27  ;;  %v3020_v16 = vperm.slane %v3014_v11, 0 }
 0xd9f   :  { %v3018_v19 = vsub.f32 %v4400_v26, %v3017_v29  ;;  %v3025_v24 = vmul.f32 %v3020_v16, %v7895_v5  ;;  %v3022_v31 = vmul.f32 %v3020_v16, %v7882_v47  ;;  %v3023_v32 = vmul.f32 %v3020_v16, %v7880_v37 }
 0xda0   :  { %v3024_v13 = vmul.f32 %v3020_v16, %v7884_v34 }
 0xda1   :  { %v3027_v25 = vperm.slane %v3018_v19, 0 }
 0xda3   :  { %v3029_v27 = vadd.f32 %v3027_v25, %v3022_v31  ;;  %v3030_v36 = vadd.f32 %v3027_v25, %v3023_v32  ;;  %v3032_v41 = vadd.f32 %v3027_v25, %v3025_v24  ;;  %v3031_v45 = vadd.f32 %v3027_v25, %v3024_v13 }
 0xda5   :  { %v8102_v5 = vadd.f32 %v3029_v27, %v7480_v30  ;;  %v8105_v47 = vadd.f32 %v3030_v36, %v7483_v57  ;;  %v8108_v37 = vadd.f32 %v3032_v41, %v7486_v33  ;;  %v8114_v34 = vadd.f32 %v3031_v45, %v7492_v21 }
 0xda7   :  { %3111 = vmatmul.f32.vlgmr.msra.gmra.mxu2 %v8102_v5  ;;  %v3045_v12 = vrot.slane %v8102_v5, 1  ;;  %v3046_v30 = vrot.slane %v8105_v47, 1  ;;  %v3037_v50 = vrot.slane %v8102_v5, 7  ;;  %v3040_v57 = vrot.slane %v8108_v37, 7 }
 0xda8   :  { %4531 = vmatpush.msk.msra.mxu2 %vm8742_vm14, %v4594_v38  ;;  %v3038_v54 = vrot.slane %v8105_v47, 7  ;;  %v3047_v18 = vrot.slane %v8114_v34, 1  ;;  %vm8749_vm14 = vnez %v8566_v42  ;;  %v3048_v20 = vrot.slane %v8108_v37, 1 }
 0xda9   :  { %v3051_v33 = vsel %vm8744_vm13, %v3045_v12, %v3046_v30  ;;  %v3044_v21 = vsel %vm8745_vm11, %v3040_v57, %v3037_v50  ;;  %vm8747_vm13 = vmmov %vm8745_vm11  ;;  %vm8748_vm11 = vcmp.lt.s32.totalorder %v4644_v9, 7  ;;  %v3039_v3 = vrot.slane %v8114_v34, 7 }
 0xdaa   :  { %3186 = vmatmul.f32.vlgmr.msrb.gmra.mxu0 %v3051_v33  ;;  %v3053_v40 = vsel %vm8746_vm9, %v3051_v33, %v3044_v21  ;;  %4532 = vmatpush.msk.msra.mxu2 %vm8743_vm12, %v4594_v38  ;;  %v3043_v44 = vsel %vm8747_vm13, %v3037_v50, %v3038_v54  ;;  %v3050_v58 = vsel %vm8748_vm11, %v3046_v30, %v3047_v18 }
 0xdab   :  { %3140 = vmatmul.f32.vlgmr.msra.gmra.mxu3 %v3053_v40  ;;  %vm8750_vm9 = vnez %v8568_v46  ;;  %v3058_v8 = vsel %vm8751_vm10, %v3043_v44, %v3050_v58  ;;  %vm8752_vm13 = vnez %v8570_v49  ;;  %v3049_v48 = vsel %vm8748_vm11, %v3047_v18, %v3048_v20  ;;  %v4481_v46 = vld [vmem:[%s8478_s2 + $0xa] sm:$0x1] }
 0xdac   :  { %4533 = vmatpush.msk.msra.mxu2 %vm8749_vm14, %v4594_v38  ;;  %vm8753_vm10 = vcmp.lt.s32.totalorder %v4644_v9, 1 }
 0xdad   :  { %v3042_v6 = vsel %vm8753_vm10, %v3038_v54, %v3039_v3  ;;  %vm8755_vm11 = vmmov %vm8753_vm10  ;;  %vm8756_vm10 = vcmp.lt.s32.totalorder %v4644_v9, 7 }
 0xdae   :  { %4534 = vmatpush.msk.msra.mxu2 %vm8750_vm9, %v4594_v38  ;;  %v3041_v14 = vsel %vm8755_vm11, %v3039_v3, %v3040_v57  ;;  %v3052_v51 = vsel %vm8756_vm10, %v3048_v20, %v3045_v12  ;;  %vm8758_vm11 = vnez %v8586_v17  ;;  %vm8759_vm10 = vnez %v8562_v35 }
 0xdaf   :  { %3114 = vmatmul.f32.gmra.mxu2 %v8105_v47 }
 0xdb0   :  { %4535 = vmatpush.msk.msra.mxu2 %vm8752_vm13, %v4594_v38  ;;  %vm8754_vm13 = vnez %v8558_v22 }
 0xdb1   :  { %v3055_v1 = vsel %vm8754_vm13, %v3049_v48, %v3042_v6  ;;  %vm8757_vm13 = vnez %v8560_v28 }
 0xdb2   :  { %3189 = vmatmul.f32.gmra.mxu0 %v3058_v8  ;;  %4536 = vmatpush.msk.msra.mxu2 %vm8595_vm5, %v4594_v38  ;;  %v3060_v55 = vsel %vm8757_vm13, %v3041_v14, %v3052_v51 }
 0xdb3   :  { %3143 = vmatmul.f32.gmra.mxu3 %v3043_v44 }
 0xdb4   :  { %4537 = vmatpush.msk.msra.mxu2 %vm4938_vm15, %v4594_v38 }
 0xdb6   :  { %4538 = vmatpush.msk.msra.mxu2 %vm4950_vm3, %v4594_v38 }
 0xdb7   :  { %3117 = vmatmul.f32.gmra.mxu2 %v8114_v34 }
 0xdb8   :  { %4539 = vmatpush.msk.msra.mxu2 %vm4962_vm4, %v4594_v38 }
 0xdba   :  { %3192 = vmatmul.f32.gmra.mxu0 %v3049_v48  ;;  %4540 = vmatpush.msk.msra.mxu2 %vm4974_vm8, %v4594_v38 }
 0xdbb   :  { %3146 = vmatmul.f32.gmra.mxu3 %v3055_v1 }
 0xdbc   :  { %4541 = vmatpush.msk.msra.mxu2 %vm4986_vm7, %v4594_v38 }
 0xdbe   :  { %4542 = vmatpush.msk.msra.mxu2 %vm4997_vm6, %v4594_v38 }
 0xdbf   :  { %3120 = vmatmul.f32.gmra.mxu2 %v8108_v37 }
 0xdc0   :  { %4543 = vmatpush.msk.msra.mxu2 %vm4774_vm2, %v4594_v38 }
 0xdc2   :  { %3195 = vmatmul.f32.gmra.mxu0 %v3060_v55  ;;  %4544 = vmatpush.msk.msra.mxu2 %vm4740_vm1, %v4594_v38 }
 0xdc3   :  { %3149 = vmatmul.f32.gmra.mxu3 %v3041_v14 }
 0xdc4   :  { %4545 = vmatpush.msk.msra.mxu2 %vm4680_vm0, %v4594_v38 }
 0xdc6   :  { %4546 = vmatpush.msk.msra.mxu2 %vm8758_vm11, %v4594_v38 }
 0xe27   :  { %v3187_v60 = vpop.f32.mrf.mxu0 }
 0xe2a   :  { %v3112_v61 = vpop.f32.mrf.mxu2 }
 0xe2e   :  { %v3141_v63 = vpop.f32.mrf.mxu3 }
 0xe2f   :  { %v3190_v11 = vpop.f32.mrf.mxu0  ;;  %v3142_v25 = vadd.f32 %v3141_v63, %v3112_v61 }
 0xe31   :  { %v8205_v13 = vadd.f32 %v3187_v60, %v3142_v25  ;;  %v4511_v25 = vld [vmem:[%s8476_s1 + $0x1160] sm:$0xff] }
 0xe32   :  { %v3115_v0 = vpop.f32.mrf.mxu2 }
 0xe33   :  { %v3212_v12 = vmul.f32 %v8205_v13, %v8205_v13 }
 0xe36   :  { %v3144_v26 = vpop.f32.mrf.mxu3 }
 0xe37   :  { %v3145_v16 = vadd.f32 %v3144_v26, %v3115_v0  ;;  %v3193_v19 = vpop.f32.mrf.mxu0  ;;  %v4513_v26 = vld [vmem:[%s8476_s1 + $0x1170] sm:$0xff] }
 0xe39   :  { %v8203_v32 = vadd.f32 %v3190_v11, %v3145_v16  ;;  %v4514_v11 = vld [vmem:[%s8476_s1 + $0x1178] sm:$0xff]  ;;  %v4512_v16 = vld [vmem:[%s8476_s1 + $0x1168] sm:$0xff] }
 0xe3a   :  { %v3118_v29 = vpop.f32.mrf.mxu2  ;;  %3364 = vmatpush.msrb.mxu3 %v4514_v11 }
 0xe3b   :  { %v3213_v36 = vmul.f32 %v8203_v32, %v8203_v32  ;;  %v3203_v30 = vadd.f32 %v8203_v32, %v8205_v13 }
 0xe3c   :  { %3365 = vmatpush.msrb.mxu3 %v4513_v26  ;;  %v4520_v26 = vld [vmem:[%s8476_s1 + $0x11a8] sm:$0xff] }
 0xe3d   :  { %v3216_v21 = vadd.f32 %v3213_v36, %v3212_v12  ;;  %v4528_v36 = vld [vmem:[%s8476_s1 + $0x11e8] sm:$0xff]  ;;  %v4527_v12 = vld [vmem:[%s8476_s1 + $0x11e0] sm:$0xff] }
 0xe3e   :  { %v3147_v24 = vpop.f32.mrf.mxu3  ;;  %3366 = vmatpush.msrb.mxu3 %v4512_v16 }
 0xe3f   :  { %v3148_v31 = vadd.f32 %v3147_v24, %v3118_v29  ;;  %v3196_v33 = vpop.f32.mrf.mxu0  ;;  %v4530_v29 = vld [vmem:[%s8476_s1 + $0x11f8] sm:$0xff]  ;;  %v4529_v24 = vld [vmem:[%s8476_s1 + $0x11f0] sm:$0xff] }
 0xe40   :  { %3439 = vmatpush.msra.mxu1 %v4530_v29  ;;  %3367 = vmatpush.msrb.mxu3 %v4511_v25  ;;  %v4501_v25 = vld [vmem:[%s8476_s1 + $0x1110] sm:$0xff] }
 0xe41   :  { %v8207_v27 = vadd.f32 %v3193_v19, %v3148_v31  ;;  %v4498_v19 = vld [vmem:[%s8476_s1 + $0x10f8] sm:$0xff]  ;;  %v4497_v31 = vld [vmem:[%s8476_s1 + $0x10f0] sm:$0xff] }
 0xe42   :  { %v3121_v41 = vpop.f32.mrf.mxu2  ;;  %3393 = vmatpush.msra.mxu0 %v4498_v19  ;;  %3440 = vmatpush.msra.mxu1 %v4529_v24  ;;  %v4502_v19 = vld [vmem:[%s8476_s1 + $0x1118] sm:$0xff]  ;;  %v4488_v24 = vld [vmem:[%s8476_s1 + $0x10a8] sm:$0xff] }
 0xe43   :  { %v3214_v50 = vmul.f32 %v8207_v27, %v8207_v27  ;;  %v3204_v40 = vadd.f32 %v3203_v30, %v8207_v27  ;;  %v4509_v30 = vld [vmem:[%s8476_s1 + $0x1150] sm:$0xff] }
 0xe44   :  { %3394 = vmatpush.msra.mxu0 %v4497_v31  ;;  %3441 = vmatpush.msra.mxu1 %v4528_v36  ;;  %v4519_v31 = vld [vmem:[%s8476_s1 + $0x11a0] sm:$0xff] }
 0xe45   :  { %v3217_v18 = vadd.f32 %v3216_v21, %v3214_v50  ;;  %v4495_v50 = vld [vmem:[%s8476_s1 + $0x10e0] sm:$0xff]  ;;  %v4494_v21 = vld [vmem:[%s8476_s1 + $0x10d8] sm:$0xff] }
 0xe46   :  { %v3150_v45 = vpop.f32.mrf.mxu3  ;;  %3442 = vmatpush.msra.mxu1 %v4527_v12  ;;  %v4487_v36 = vld [vmem:[%s8476_s1 + $0x10a0] sm:$0xff]  ;;  %v4518_v12 = vld [vmem:[%s8476_s1 + $0x1198] sm:$0xff] }
 0xe47   :  { %v3151_v57 = vadd.f32 %v3150_v45, %v3121_v41  ;;  %v4510_v41 = vld [vmem:[%s8476_s1 + $0x1158] sm:$0xff]  ;;  %v4496_v45 = vld [vmem:[%s8476_s1 + $0x10e8] sm:$0xff] }
 0xe48   :  { %3368 = vmatpush.msrb.mxu3 %v4510_v41  ;;  %3395 = vmatpush.msra.mxu0 %v4496_v45  ;;  %v4500_v45 = vld [vmem:[%s8476_s1 + $0x1108] sm:$0xff] }
 0xe49   :  { %v8218_v54 = vadd.f32 %v3196_v33, %v3151_v57  ;;  %v4526_v57 = vld [vmem:[%s8476_s1 + $0x11d8] sm:$0xff]  ;;  %v4508_v33 = vld [vmem:[%s8476_s1 + $0x1148] sm:$0xff] }
 0xe4a   :  { %3369 = vmatpush.msrb.mxu3 %v4509_v30  ;;  %3396 = vmatpush.msra.mxu0 %v4495_v50  ;;  %v4486_v30 = vld [vmem:[%s8476_s1 + $0x1098] sm:$0xff]  ;;  %v4517_v50 = vld [vmem:[%s8476_s1 + $0x1190] sm:$0xff] }
 0xe4b   :  { %v3205_v44 = vadd.f32 %v3204_v40, %v8218_v54  ;;  %v3215_v58 = vmul.f32 %v8218_v54, %v8218_v54  ;;  %3443 = vmatpush.msra.mxu1 %v4526_v57  ;;  %v4525_v40 = vld [vmem:[%s8476_s1 + $0x11d0] sm:$0xff] }
 0xe4c   :  { %3370 = vmatpush.msrb.mxu3 %v4508_v33  ;;  %3397 = vmatpush.msra.mxu0 %v4494_v21  ;;  %v4499_v33 = vld [vmem:[%s8476_s1 + $0x1100] sm:$0xff]  ;;  %v4485_v21 = vld [vmem:[%s8476_s1 + $0x1090] sm:$0xff] }
 0xe4d   :  { %v3206_v8 = vrot.slane %v3205_v44, 4  ;;  %v3218_v20 = vadd.f32 %v3217_v18, %v3215_v58  ;;  %v4507_v18 = vld [vmem:[%s8476_s1 + $0x1140] sm:$0xff]  ;;  %3444 = vmatpush.msra.mxu1 %v4525_v40  ;;  %v4524_v58 = vld [vmem:[%s8476_s1 + $0x11c8] sm:$0xff] }
 0xe4e   :  { %3371 = vmatpush.msrb.mxu3 %v4507_v18  ;;  %v4516_v18 = vld [vmem:[%s8476_s1 + $0x1188] sm:$0xff] }
 0xe4f   :  { %v3207_v3 = vadd.f32 %v3206_v8, %v3205_v44  ;;  %v3219_v48 = vrot.slane %v3218_v20, 4  ;;  %v4493_v44 = vld [vmem:[%s8476_s1 + $0x10d0] sm:$0xff]  ;;  %v4506_v8 = vld [vmem:[%s8476_s1 + $0x1138] sm:$0xff]  ;;  %3445 = vmatpush.msra.mxu1 %v4524_v58  ;;  %v4515_v58 = vld [vmem:[%s8476_s1 + $0x1180] sm:$0xff] }
 0xe50   :  { %3398 = vmatpush.msra.mxu0 %v4493_v44  ;;  %3372 = vmatpush.msrb.mxu3 %v4506_v8  ;;  %v4484_v44 = vld [vmem:[%s8476_s1 + $0x1088] sm:$0xff]  ;;  %v4483_v8 = vld [vmem:[%s8476_s1 + $0x1080] sm:$0xff] }
 0xe51   :  { %v3208_v6 = vrot.slane %v3207_v3, 2  ;;  %v3220_v1 = vadd.f32 %v3219_v48, %v3218_v20  ;;  %v4492_v20 = vld [vmem:[%s8476_s1 + $0x10c8] sm:$0xff]  ;;  %v4523_v48 = vld [vmem:[%s8476_s1 + $0x11c0] sm:$0xff] }
 0xe52   :  { %3399 = vmatpush.msra.mxu0 %v4492_v20  ;;  %3446 = vmatpush.msra.mxu1 %v4523_v48 }
 0xe53   :  { %v3209_v14 = vadd.f32 %v3208_v6, %v3207_v3  ;;  %v3221_v51 = vrot.slane %v3220_v1, 2  ;;  %v4505_v6 = vld [vmem:[%s8476_s1 + $0x1130] sm:$0xff] }
 0xe54   :  { %3373 = vmatpush.msrb.mxu3 %v4505_v6 }
 0xe55   :  { %v3210_v55 = vrot.slane %v3209_v14, 1  ;;  %v3222_v60 = vadd.f32 %v3221_v51, %v3220_v1  ;;  %v4491_v1 = vld [vmem:[%s8476_s1 + $0x10c0] sm:$0xff] }
 0xe56   :  { %3400 = vmatpush.msra.mxu0 %v4491_v1 }
 0xe57   :  { %v3211_v61 = vadd.f32 %v3210_v55, %v3209_v14  ;;  %v3223_v63 = vrot.slane %v3222_v60, 1  ;;  %v4522_v14 = vld [vmem:[%s8476_s1 + $0x11b8] sm:$0xff]  ;;  %v4504_v55 = vld [vmem:[%s8476_s1 + $0x1128] sm:$0xff] }
 0xe58   :  { %3447 = vmatpush.msra.mxu1 %v4522_v14  ;;  %3374 = vmatpush.msrb.mxu3 %v4504_v55 }
 0xe59   :  { %3241 = vmatmul.f32.vlgmr.msrb.gmra.mxu1 %v3211_v61  ;;  %v3224_v0 = vadd.f32 %v3223_v63, %v3222_v60  ;;  %v4490_v60 = vld [vmem:[%s8476_s1 + $0x10b8] sm:$0xff]  ;;  %v4521_v61 = vld [vmem:[%s8476_s1 + $0x11b0] sm:$0xff]  ;;  %v4503_v63 = vld [vmem:[%s8476_s1 + $0x1120] sm:$0xff] }
 0xe5a   :  { %3401 = vmatpush.msra.mxu0 %v4490_v60  ;;  %3448 = vmatpush.msra.mxu1 %v4521_v61 }
 0xe5b   :  { %3262 = vmatmul.f32.vlgmr.msrb.gmra.mxu2 %v3224_v0  ;;  %v4489_v0 = vld [vmem:[%s8476_s1 + $0x10b0] sm:$0xff]  ;;  %3375 = vmatpush.msrb.mxu3 %v4503_v63 }
 0xe5c   :  { %3402 = vmatpush.msra.mxu0 %v4489_v0  ;;  %3449 = vmatpush.msra.mxu1 %v4520_v26 }
 0xe5d   :  { %3376 = vmatpush.msrb.mxu3 %v4502_v19 }
 0xe5e   :  { %3403 = vmatpush.msra.mxu0 %v4488_v24  ;;  %3450 = vmatpush.msra.mxu1 %v4519_v31 }
 0xe5f   :  { %3377 = vmatpush.msrb.mxu3 %v4501_v25 }
 0xe60   :  { %3404 = vmatpush.msra.mxu0 %v4487_v36  ;;  %3451 = vmatpush.msra.mxu1 %v4518_v12 }
 0xe61   :  { %3378 = vmatpush.msrb.mxu3 %v4500_v45 }
 0xe62   :  { %3405 = vmatpush.msra.mxu0 %v4486_v30  ;;  %3452 = vmatpush.msra.mxu1 %v4517_v50 }
 0xe63   :  { %3379 = vmatpush.msrb.mxu3 %v4499_v33 }
 0xe64   :  { %3406 = vmatpush.msra.mxu0 %v4485_v21  ;;  %3453 = vmatpush.msra.mxu1 %v4516_v18 }
 0xe65   :  { %4547 = vmatpush.msk.msra.mxu3 %vm8759_vm10, %v4594_v38  ;;  %vm8760_vm10 = vnez %v8570_v49 }
 0xe66   :  { %3407 = vmatpush.msra.mxu0 %v4484_v44  ;;  %3454 = vmatpush.msra.mxu1 %v4515_v58 }
 0xe67   :  { %4548 = vmatpush.msk.msra.mxu3 %vm8743_vm12, %v4594_v38 }
 0xe68   :  { %3408 = vmatpush.msra.mxu0 %v4483_v8 }
 0xe69   :  { %4549 = vmatpush.msk.msra.mxu3 %vm8749_vm14, %v4594_v38 }
 0xe6b   :  { %4550 = vmatpush.msk.msra.mxu3 %vm8750_vm9, %v4594_v38 }
 0xe6d   :  { %4551 = vmatpush.msk.msra.mxu3 %vm8760_vm10, %v4594_v38 }
 0xe6f   :  { %4552 = vmatpush.msk.msra.mxu3 %vm8595_vm5, %v4594_v38 }
 0xe71   :  { %4553 = vmatpush.msk.msra.mxu3 %vm4938_vm15, %v4594_v38  ;;  %vm8769_vm15 = vnez %v8558_v22 }
 0xe73   :  { %4554 = vmatpush.msk.msra.mxu3 %vm4950_vm3, %v4594_v38  ;;  %vm8763_vm3 = vnez %v8554_v2 }
 0xe75   :  { %4555 = vmatpush.msk.msra.mxu3 %vm4962_vm4, %v4594_v38 }
 0xe77   :  { %4556 = vmatpush.msk.msra.mxu3 %vm4974_vm8, %v4594_v38 }
 0xe79   :  { %4557 = vmatpush.msk.msra.mxu3 %vm4986_vm7, %v4594_v38 }
 0xe7b   :  { %4558 = vmatpush.msk.msra.mxu3 %vm4997_vm6, %v4594_v38  ;;  %vm8766_vm6 = vnez %v8556_v15 }
 0xe7d   :  { %4559 = vmatpush.msk.msra.mxu3 %vm4774_vm2, %v4594_v38  ;;  %vm8761_vm2 = vcmp.lt.s32.totalorder %v4644_v9, 7 }
 0xe7e   :  { %vm8765_vm4 = vmmov %vm8761_vm2 }
 0xe7f   :  { %4560 = vmatpush.msk.msra.mxu3 %vm4740_vm1, %v4594_v38  ;;  %vm8762_vm1 = vcmp.lt.s32.totalorder %v4644_v9, 1  ;;  %vm8767_vm7 = vmmov %vm8761_vm2 }
 0xe81   :  { %4561 = vmatpush.msk.msra.mxu3 %vm4680_vm0, %v4594_v38  ;;  %vm8764_vm0 = vmmov %vm8762_vm1 }
 0xe82   :  { %vm8768_vm8 = vmmov %vm8764_vm0 }
 0xe83   :  { %4562 = vmatpush.msk.msra.mxu3 %vm8758_vm11, %v4594_v38  ;;  %vm8770_vm5 = vmmov %vm8764_vm0 }
 0xe84   :  { %vm8771_vm11 = vmmov %vm8761_vm2 }
 0xed6   :  { %v3242_v3 = vpop.f32.mrf.mxu1 }
 0xed7   :  { %v8304_v51 = vmul.f32 0.001953125, %v3242_v3 }
 0xed9   :  { %v3267_v29 = vmul.f32 %v8304_v51, %v8304_v51 }
 0xede   :  { %v3263_v11 = vpop.f32.mrf.mxu2 }
 0xedf   :  { %v3266_v16 = vmul.f32 0.001953125, %v3263_v11 }
 0xee1   :  { %v3268_v41 = vsub.f32 %v3266_v16, %v3267_v29 }
 0xee3   :  { %v3269_v57 = vmax.f32 %v3268_v41, 0.0 }
 0xee5   :  { %v3272_v40 = vadd.f32 1e-05, %v3269_v57 }
 0xee7   :  { %4586 = vrsqrt.f32 %v3272_v40  ;;  %vm3279_vm14 = vweird.f32 %v3272_v40 }
 0xeed   :  { %v4587_v20 = vpop.eup %4586 }
 0xeee   :  { %v3274_v3 = vmul.f32 %v4587_v20, %v3272_v40  ;;  %vm3280_vm12 = vweird.f32 %v4587_v20 }
 0xeef   :  { %vm3281_vm9 = vmor %vm3279_vm14, %vm3280_vm12 }
 0xef0   :  { %v3275_v35 = vmul.f32 %v4587_v20, %v3274_v3 }
 0xef2   :  { %v3276_v39 = vmul.f32 0.5, %v3275_v35 }
 0xef4   :  { %v3277_v42 = vsub.f32 1.5, %v3276_v39 }
 0xef6   :  { %v3278_v49 = vmul.f32 %v4587_v20, %v3277_v42 }
 0xef8   :  { %v3282_v52 = vsel %vm3281_vm9, %v4587_v20, %v3278_v49 }
 0xef9   :  { %v3283_v56 = vmul.f32 %v4481_v46, %v3282_v52 }
 0xefb   :  { %v3286_v48 = vmul.f32 %v3283_v56, %v8304_v51  ;;  %v3289_v6 = vperm.slane %v3283_v56, 0 }
 0xefd   :  { %v3287_v1 = vsub.f32 %v4482_v59, %v3286_v48  ;;  %v3291_v62 = vmul.f32 %v3289_v6, %v8205_v13  ;;  %v3292_v14 = vmul.f32 %v3289_v6, %v8203_v32  ;;  %v3294_v55 = vmul.f32 %v3289_v6, %v8218_v54 }
 0xefe   :  { %v3293_v60 = vmul.f32 %v3289_v6, %v8207_v27 }
 0xeff   :  { %v3296_v4 = vperm.slane %v3287_v1, 0 }
 0xf01   :  { %v3298_v7 = vadd.f32 %v3296_v4, %v3291_v62  ;;  %v3299_v51 = vadd.f32 %v3296_v4, %v3292_v14  ;;  %v3301_v61 = vadd.f32 %v3296_v4, %v3294_v55  ;;  %v3300_v63 = vadd.f32 %v3296_v4, %v3293_v60 }
 0xf03   :  { %v3302_v10 = vmax.f32 %v3298_v7, 0.0  ;;  %v3303_v13 = vmax.f32 %v3299_v51, 0.0  ;;  %v3305_v0 = vmax.f32 %v3301_v61, 0.0  ;;  %v3304_v32 = vmax.f32 %v3300_v63, 0.0 }
 0xf05   :  { %3380 = vmatmul.f32.vlgmr.msrb.gmra.mxu3 %v3302_v10  ;;  %v3314_v27 = vrot.slane %v3302_v10, 1  ;;  %v3315_v53 = vrot.slane %v3303_v13, 1  ;;  %v3306_v54 = vrot.slane %v3302_v10, 7  ;;  %v3309_v11 = vrot.slane %v3305_v0, 7 }
 0xf06   :  { %v3307_v29 = vrot.slane %v3303_v13, 7  ;;  %v3316_v16 = vrot.slane %v3304_v32, 1  ;;  %v3317_v24 = vrot.slane %v3305_v0, 1  ;;  %v3308_v25 = vrot.slane %v3304_v32, 7 }
 0xf07   :  { %v3320_v43 = vsel %vm8761_vm2, %v3314_v27, %v3315_v53  ;;  %v3313_v26 = vsel %vm8762_vm1, %v3309_v11, %v3306_v54 }
 0xf08   :  { %3455 = vmatmul.f32.vlgmr.msra.gmra.mxu1 %v3320_v43  ;;  %v3322_v23 = vsel %vm8763_vm3, %v3320_v43, %v3313_v26  ;;  %v3312_v19 = vsel %vm8764_vm0, %v3306_v54, %v3307_v29  ;;  %v3319_v17 = vsel %vm8765_vm4, %v3315_v53, %v3316_v16  ;;  %v3318_v2 = vsel %vm8767_vm7, %v3316_v16, %v3317_v24 }
 0xf09   :  { %3409 = vmatmul.f32.vlgmr.msra.gmra.mxu0 %v3322_v23  ;;  %v3327_v38 = vsel %vm8766_vm6, %v3312_v19, %v3319_v17  ;;  %v3311_v31 = vsel %vm8768_vm8, %v3307_v29, %v3308_v25  ;;  %v3310_v15 = vsel %vm8770_vm5, %v3308_v25, %v3309_v11  ;;  %v3321_v41 = vsel %vm8771_vm11, %v3317_v24, %v3314_v27 }
 0xf0a   :  { %v3324_v36 = vsel %vm8769_vm15, %v3318_v2, %v3311_v31  ;;  %v3329_v45 = vsel %vm8757_vm13, %v3310_v15, %v3321_v41  ;;  %v4563_v31 = vld [vmem:[%s8478_s2 + $0xb] sm:$0x1] }
 0xf0d   :  { %3383 = vmatmul.f32.gmra.mxu3 %v3303_v13 }
 0xf10   :  { %3458 = vmatmul.f32.gmra.mxu1 %v3327_v38 }
 0xf11   :  { %3412 = vmatmul.f32.gmra.mxu0 %v3312_v19 }
 0xf15   :  { %3386 = vmatmul.f32.gmra.mxu3 %v3304_v32 }
 0xf18   :  { %3461 = vmatmul.f32.gmra.mxu1 %v3318_v2 }
 0xf19   :  { %3415 = vmatmul.f32.gmra.mxu0 %v3324_v36 }
 0xf1d   :  { %3389 = vmatmul.f32.gmra.mxu3 %v3305_v0 }
 0xf20   :  { %3464 = vmatmul.f32.gmra.mxu1 %v3329_v45  ;;  %v4564_v45 = vld [vmem:[%s8479_s3 + $0xb] sm:$0x1] }
 0xf21   :  { %3418 = vmatmul.f32.gmra.mxu0 %v3310_v15 }
 0xf85   :  { %v3456_v12 = vpop.f32.mrf.mxu1 }
 0xf86   :  { %v3410_v30 = vpop.f32.mrf.mxu0 }
 0xf88   :  { %v3381_v50 = vpop.f32.mrf.mxu3 }
 0xf89   :  { %v3411_v58 = vadd.f32 %v3410_v30, %v3381_v50 }
 0xf8b   :  { %v3468_v20 = vadd.f32 %v3456_v12, %v3411_v58 }
 0xf8d   :  { %v3459_v57 = vpop.f32.mrf.mxu1  ;;  %v3481_v42 = vmul.f32 %v3468_v20, %v3468_v20 }
 0xf8e   :  { %v3413_v33 = vpop.f32.mrf.mxu0 }
 0xf90   :  { %v3384_v22 = vpop.f32.mrf.mxu3 }
 0xf91   :  { %v3414_v40 = vadd.f32 %v3413_v33, %v3384_v22 }
 0xf93   :  { %v3469_v9 = vadd.f32 %v3459_v57, %v3414_v40 }
 0xf95   :  { %v3462_v18 = vpop.f32.mrf.mxu1  ;;  %v3482_v35 = vmul.f32 %v3469_v9, %v3469_v9  ;;  %v3472_v46 = vadd.f32 %v3469_v9, %v3468_v20 }
 0xf96   :  { %v3416_v21 = vpop.f32.mrf.mxu0 }
 0xf97   :  { %v3485_v59 = vadd.f32 %v3482_v35, %v3481_v42 }
 0xf98   :  { %v3387_v44 = vpop.f32.mrf.mxu3 }
 0xf99   :  { %v3417_v8 = vadd.f32 %v3416_v21, %v3387_v44 }
 0xf9b   :  { %v3470_v3 = vadd.f32 %v3462_v18, %v3417_v8 }
 0xf9d   :  { %v3483_v49 = vmul.f32 %v3470_v3, %v3470_v3  ;;  %v3465_v56 = vpop.f32.mrf.mxu1  ;;  %v3473_v48 = vadd.f32 %v3472_v46, %v3470_v3 }
 0xf9e   :  { %v3419_v28 = vpop.f32.mrf.mxu0 }
 0xf9f   :  { %v3486_v1 = vadd.f32 %v3485_v59, %v3483_v49 }
 0xfa0   :  { %v3390_v39 = vpop.f32.mrf.mxu3 }
 0xfa1   :  { %v3420_v52 = vadd.f32 %v3419_v28, %v3390_v39 }
 0xfa3   :  { %v3471_v6 = vadd.f32 %v3465_v56, %v3420_v52 }
 0xfa5   :  { %v3474_v62 = vadd.f32 %v3473_v48, %v3471_v6  ;;  %v3484_v4 = vmul.f32 %v3471_v6, %v3471_v6 }
 0xfa7   :  { %v3475_v14 = vrot.slane %v3474_v62, 4  ;;  %v3487_v55 = vadd.f32 %v3486_v1, %v3484_v4 }
 0xfa9   :  { %v3476_v60 = vadd.f32 %v3475_v14, %v3474_v62  ;;  %v3488_v7 = vrot.slane %v3487_v55, 4 }
 0xfab   :  { %v3477_v51 = vrot.slane %v3476_v60, 2  ;;  %v3489_v61 = vadd.f32 %v3488_v7, %v3487_v55 }
 0xfad   :  { %v3478_v63 = vadd.f32 %v3477_v51, %v3476_v60  ;;  %v3490_v10 = vrot.slane %v3489_v61, 2 }
 0xfaf   :  { %v3479_v13 = vrot.slane %v3478_v63, 1  ;;  %v3491_v0 = vadd.f32 %v3490_v10, %v3489_v61 }
 0xfb1   :  { %v3480_v32 = vadd.f32 %v3479_v13, %v3478_v63  ;;  %v3492_v27 = vrot.slane %v3491_v0, 1 }
 0xfb3   :  { %3510 = vmatmul.f32.vlgmr.msra.gmra.mxu2 %v3480_v32  ;;  %v3493_v53 = vadd.f32 %v3492_v27, %v3491_v0 }
 0xfb5   :  { %3531 = vmatmul.f32.vlgmr.msra.gmra.mxu3 %v3493_v53 }
0x1036   :  { %v3511_v54 = vpop.f32.mrf.mxu2 }
0x1037   :  { %v3514_v11 = vmul.f32 0.001953125, %v3511_v54 }
0x1038   :  { %v3532_v43 = vpop.f32.mrf.mxu3 }
0x1039   :  { %v3536_v26 = vmul.f32 %v3514_v11, %v3514_v11  ;;  %v3535_v23 = vmul.f32 0.001953125, %v3532_v43 }
0x103b   :  { %v3537_v29 = vsub.f32 %v3535_v23, %v3536_v26 }
0x103d   :  { %v3538_v16 = vmax.f32 %v3537_v29, 0.0 }
0x103f   :  { %v3541_v19 = vadd.f32 1e-05, %v3538_v16 }
0x1041   :  { %4588 = vrsqrt.f32 %v3541_v19  ;;  %vm3548_vm10 = vweird.f32 %v3541_v19 }
0x1047   :  { %v4589_v17 = vpop.eup %4588 }
0x1048   :  { %v3543_v38 = vmul.f32 %v4589_v17, %v3541_v19  ;;  %vm3549_vm13 = vweird.f32 %v4589_v17 }
0x1049   :  { %vm3550_vm12 = vmor %vm3548_vm10, %vm3549_vm13 }
0x104a   :  { %v3544_v24 = vmul.f32 %v4589_v17, %v3543_v38 }
0x104c   :  { %v3545_v25 = vmul.f32 0.5, %v3544_v24 }
0x104e   :  { %v3546_v2 = vsub.f32 1.5, %v3545_v25 }
0x1050   :  { %v3547_v36 = vmul.f32 %v4589_v17, %v3546_v2 }
0x1052   :  { %v3551_v15 = vsel %vm3550_vm12, %v4589_v17, %v3547_v36 }
0x1053   :  { %v3552_v41 = vmul.f32 %v4563_v31, %v3551_v15 }
0x1055   :  { %v3555_v12 = vmul.f32 %v3552_v41, %v3514_v11  ;;  %v3558_v30 = vperm.slane %v3552_v41, 0 }
0x1057   :  { %v3556_v50 = vsub.f32 %v4564_v45, %v3555_v12  ;;  %v3560_v57 = vmul.f32 %v3558_v30, %v3468_v20  ;;  %v3561_v33 = vmul.f32 %v3558_v30, %v3469_v9  ;;  %v3562_v22 = vmul.f32 %v3558_v30, %v3470_v3 }
0x1058   :  { %v3563_v21 = vmul.f32 %v3558_v30, %v3471_v6 }
0x1059   :  { %v3565_v40 = vperm.slane %v3556_v50, 0 }
0x105b   :  { %v3567_v18 = vadd.f32 %v3565_v40, %v3560_v57  ;;  %v3568_v44 = vadd.f32 %v3565_v40, %v3561_v33  ;;  %v3569_v58 = vadd.f32 %v3565_v40, %v3562_v22  ;;  %v3570_v8 = vadd.f32 %v3565_v40, %v3563_v21 }
0x105d   :  { %v3571_v35 = vadd.f32 %v3567_v18, %v8102_v5  ;;  %v3572_v28 = vadd.f32 %v3568_v44, %v8105_v47  ;;  %v3573_v39 = vadd.f32 %v3569_v58, %v8114_v34  ;;  %v3574_v42 = vadd.f32 %v3570_v8, %v8108_v37 }
0x105f   :  { %3575 = vst [vmem:[%s8480_s4] sm:$0xff] %v3571_v35 }
0x1060   :  { %3576 = vst [vmem:[%s8480_s4 + $0x8] sm:$0xff] %v3572_v28 }
0x1061   :  { %3577 = vst [vmem:[%s8480_s4 + $0x10] sm:$0xff] %v3573_v39 }
0x1062   :  { %3578 = vst [vmem:[%s8480_s4 + $0x18] sm:$0xff] %v3574_v42 }

</bundles_post_ra>
